<compile_context>
chip_gen: v5e
topology: v5e:2x2
jax: 0.10.0
libtpu: 0.0.40
codegen_flags: <defaults>
</compile_context>

<pallas_src>
import functools

import jax
import jax.numpy as jnp
from jax import lax
from jax.experimental import pallas as pl
from jax.experimental.pallas import tpu as pltpu


# ----------------------------- Pallas kernel --------------------------------

def bam_kernel(x_ref,
               cg_w1_ref, cg_b1_ref, cg_w2_ref, cg_b2_ref,
               sg_w0_ref, sg_b0_ref,
               sg_w1_ref, sg_b1_ref,
               sg_w2_ref, sg_b2_ref,
               sg_w3_ref, sg_b3_ref,
               out_ref, pad_ref,
               *, Bt, H, W, C, Cr, d, mm_dtype, vpu_conv):
    HW = H * W
    M = Bt * HW
    Wp = W + 2 * d

    # Re-zero only the halo frame of the padded conv scratch (interior is fully overwritten
    # by each conv).  Done every step (not only at program_id==0) so it stays correct when
    # the batch axis is sharded across TensorCores ("parallel" on v7x).
    pad_ref[:, 0:d, 0:Wp, :] = jnp.zeros((Bt, d, Wp, Cr), jnp.float32)
    pad_ref[:, d + H:H + 2 * d, 0:Wp, :] = jnp.zeros((Bt, d, Wp, Cr), jnp.float32)
    pad_ref[:, d:d + H, 0:d, :] = jnp.zeros((Bt, H, d, Cr), jnp.float32)
    pad_ref[:, d:d + H, d + W:Wp, :] = jnp.zeros((Bt, H, d, Cr), jnp.float32)

    x = x_ref[...].astype(jnp.float32)                 # (Bt, H, W, C)
    xf = x.reshape(M, C)                               # (Bt*H*W, C), C stays on lanes

    # ---- ChannelGate: per-image global avg pool -> FC(+BN folded) -> ReLU -> FC ----------
    avg = jnp.mean(x.reshape(Bt, HW, C), axis=1)                                   # (Bt, C)
    hid = jnp.maximum(
        jnp.dot(avg.astype(mm_dtype), cg_w1_ref[...],
                preferred_element_type=jnp.float32) + cg_b1_ref[...], 0.0)         # (Bt, Cr)
    cg = (jnp.dot(hid.astype(mm_dtype), cg_w2_ref[...],
                  preferred_element_type=jnp.float32) + cg_b2_ref[...])            # (Bt, C)

    # ---- SpatialGate: 1x1 channel reduce on the MXU (M = Bt*H*W rows) --------------------
    t = jnp.maximum(
        jnp.dot(xf.astype(mm_dtype), sg_w0_ref[...],
                preferred_element_type=jnp.float32) + sg_b0_ref[...], 0.0)         # (M, Cr)
    t = t.reshape(Bt, H, W, Cr)

    def dilated_conv3x3(tin, w_ref, b_ref):
        # interior <- current activations; halo stays zero (SAME padding with dilation d)
        pad_ref[:, d:d + H, d:d + W, :] = tin
        w = w_ref[...]                                                   # (3, 3, Cr, Cr) f32
        acc = jnp.zeros((Bt, H, W, Cr), jnp.float32) + b_ref[...]
        for ky in range(3):
            for kx in range(3):
                win = pad_ref[:, ky * d:ky * d + H, kx * d:kx * d + W, :]   # (Bt, H, W, Cr)
                if vpu_conv:
                    # small Cr: 9*Cr shifted VPU FMAs, no lane concatenate, no MXU
                    for i in range(Cr):
                        acc = acc + win[..., i:i + 1] * w[ky, kx, i]
                else:
                    # larger Cr: per-tap MXU dot with f32 accumulation
                    acc = acc + jnp.dot(
                        win.reshape(M, Cr).astype(mm_dtype),
                        w[ky, kx].astype(mm_dtype),
                        preferred_element_type=jnp.float32).reshape(Bt, H, W, Cr)
        return acc

    t = jnp.maximum(dilated_conv3x3(t, sg_w1_ref, sg_b1_ref), 0.0)
    t = jnp.maximum(dilated_conv3x3(t, sg_w2_ref, sg_b2_ref), 0.0)

    # Cr -> 1 projection on the VPU (elementwise mul + small lane reduce); MXU stays free.
    s = jnp.sum(t * sg_w3_ref[...], axis=-1, keepdims=True) + sg_b3_ref[...]   # (Bt, H, W, 1)

    # ---- combine: 1 + sigmoid(cg * s) == 1.5 + 0.5*tanh(0.5*cg*s); math in f32 vregs -----
    z = s * cg.reshape(Bt, 1, 1, C)                                            # (Bt, H, W, C)
    att = 1.5 + 0.5 * jnp.tanh(0.5 * z)
    # Same NHWC layout as the input block -> no epilogue reshape/relayout before the store.
    out_ref[...] = (att * x).astype(out_ref.dtype)


# ----------------------------- wrapper / params ------------------------------

def _rep_spec(a):
    """Full-array block, same block for every grid step (weights/biases)."""
    nd = a.ndim
    return pl.BlockSpec(tuple(a.shape), lambda b: (0,) * nd)


def _choose_bt(B, per_image_bytes, budget_bytes):
    """Largest divisor of B that fits the VMEM budget while keeping >= 2 grid steps."""
    limit = max(1, budget_bytes // max(per_image_bytes, 1))
    bt = 1
    for cand in range(1, B + 1):
        if B % cand != 0 or cand > limit:
            continue
        if B >= 2 and B // cand < 2:     # keep >= 2 grid steps (v7x megacore / pipelining)
            continue
        bt = cand
    return bt


def bam_forward(x_nchw, p, *, matmul_dtype=jnp.bfloat16):
    """x_nchw: (B, C, H, W) (PyTorch convention). Returns (B, C, H, W) in x's dtype."""
    B, C, H, W = x_nchw.shape
    # ChannelGate uses avg_pool2d(kernel=H, stride=H): global pool requires H == W
    assert H == W, "square spatial dims required to match ChannelGate semantics"
    Cr = p["cg_w1"].shape[1]
    d = 4
    io_dtype = x_nchw.dtype

    x = jnp.transpose(x_nchw, (0, 2, 3, 1))                       # NHWC, keep I/O dtype

    # ---- per-generation VMEM budget (v7x 64 MiB/TC, v5e/v6e 128 MiB) ----
    try:
        phys_vmem = int(pltpu.get_tpu_info().vmem_capacity_bytes)
    except Exception:
        phys_vmem = 64 * 2 ** 20                                  # conservative (v7x per-TC)

    lane = lambda n: ((n + 127) // 128) * 128
    sub = lambda n: ((n + 7) // 8) * 8
    itemsize = jnp.dtype(io_dtype).itemsize
    img_bytes = H * sub(W) * lane(C) * itemsize                   # one lane-padded image tile
    pad_img_bytes = (H + 2 * d) * sub(W + 2 * d) * lane(Cr) * 4   # conv pad scratch, per image
    work_img_bytes = H * sub(W) * lane(C) * 4                     # f32 working tile, per image

    per_image = 4 * img_bytes + pad_img_bytes + 6 * work_img_bytes
    budget = min(int(0.25 * phys_vmem), 24 * 2 ** 20)
    Bt = _choose_bt(B, per_image, budget)

    args = (
        x,
        p["cg_w1"].astype(matmul_dtype), p["cg_b1"].reshape(1, Cr).astype(jnp.float32),
        p["cg_w2"].astype(matmul_dtype), p["cg_b2"].reshape(1, C).astype(jnp.float32),
        p["sg_w0"].astype(matmul_dtype), p["sg_b0"].reshape(1, Cr).astype(jnp.float32),
        p["sg_w1"].astype(jnp.float32), p["sg_b1"].reshape(1, Cr).astype(jnp.float32),
        p["sg_w2"].astype(jnp.float32), p["sg_b2"].reshape(1, Cr).astype(jnp.float32),
        p["sg_w3"].reshape(1, Cr).astype(jnp.float32), p["sg_b3"].reshape(1, 1).astype(jnp.float32),
    )

    in_specs = [pl.BlockSpec((Bt, H, W, C), lambda b: (b, 0, 0, 0))]
    # TODO(synk): pipeline_mode=pl.Buffered(1) here would reclaim the second (unused) VMEM
    # buffer of each constant-index-map weight spec.
    in_specs += [_rep_spec(a) for a in args[1:]]
    out_spec = pl.BlockSpec((Bt, H, W, C), lambda b: (b, 0, 0, 0))

    weight_bytes = int(sum(a.size * jnp.dtype(a.dtype).itemsize for a in args[1:]))
    vmem_need = (2 * Bt * img_bytes          # input tile, double-buffered
                 + 2 * Bt * img_bytes        # output tile, double-buffered
                 + Bt * pad_img_bytes        # conv pad scratch
                 + 2 * weight_bytes          # weights (double-buffered specs)
                 + 6 * Bt * work_img_bytes)  # f32 temporaries
    vmem_limit = int(min(max(2 * vmem_need, 16 * 2 ** 20), int(0.75 * phys_vmem)))

    # Advisory cost estimate for XLA's scheduler.
    flops = int(2 * B * H * W * (C * Cr + 2 * 9 * Cr * Cr + Cr)
                + 2 * B * (C * Cr + Cr * C) + 3 * B * H * W * C)
    transcendentals = int(B * H * W * C)                          # tanh
    bytes_accessed = int(2 * B * H * W * C * itemsize + weight_bytes)

    kern = functools.partial(bam_kernel, Bt=Bt, H=H, W=W, C=C, Cr=Cr, d=d,
                             mm_dtype=matmul_dtype, vpu_conv=(Cr <= 16))

    out = pl.pallas_call(
        kern,
        out_shape=jax.ShapeDtypeStruct((B, H, W, C), io_dtype),
        grid_spec=pltpu.PrefetchScalarGridSpec(
            num_scalar_prefetch=0,
            grid=(B // Bt,),
            in_specs=in_specs,
            out_specs=out_spec,
            scratch_shapes=[pltpu.VMEM((Bt, H + 2 * d, W + 2 * d, Cr), jnp.float32)],
        ),
        compiler_params=pltpu.CompilerParams(
            dimension_semantics=("parallel",),        # batch axis -> both TCs on v7x
            vmem_limit_bytes=vmem_limit,
        ),
        cost_estimate=pl.CostEstimate(
            flops=flops, transcendentals=transcendentals,
            bytes_accessed=bytes_accessed),
    )(*args)

    return jnp.transpose(out, (0, 3, 1, 2))                       # -> NCHW


def init_bam_params(key, gate_channel, reduction_ratio=16, eps=1e-5):
    C = gate_channel
    Cr = C // reduction_ratio
    keys = iter(jax.random.split(key, 40))

    def nrm(shape, scale=0.1):
        return scale * jax.random.normal(next(keys), shape, jnp.float32)

    def bn(n):  # (gamma, beta, running_mean, running_var)
        return (1.0 + 0.1 * jax.random.normal(next(keys), (n,), jnp.float32),
                0.1 * jax.random.normal(next(keys), (n,), jnp.float32),
                0.1 * jax.random.normal(next(keys), (n,), jnp.float32),
                1.0 + 0.1 * jnp.abs(jax.random.normal(next(keys), (n,), jnp.float32)))

    def fold(w, b, bn_params):
        gamma, beta, mean, var = bn_params
        s = gamma / jnp.sqrt(var + eps)
        return w * s, b * s + (beta - mean * s)

    # ChannelGate: Linear(C->Cr) + BN1d + ReLU + Linear(Cr->C)
    cg_w1, cg_b1 = fold(nrm((C, Cr)), nrm((Cr,)), bn(Cr))
    cg_w2, cg_b2 = nrm((Cr, C)), nrm((C,))
    # SpatialGate: 1x1(C->Cr)+BN+ReLU, 2x [3x3 dil=4 (Cr->Cr)+BN+ReLU], 1x1(Cr->1)
    sg_w0, sg_b0 = fold(nrm((C, Cr)), nrm((Cr,)), bn(Cr))
    sg_w1, sg_b1 = fold(nrm((3, 3, Cr, Cr)), nrm((Cr,)), bn(Cr))
    sg_w2, sg_b2 = fold(nrm((3, 3, Cr, Cr)), nrm((Cr,)), bn(Cr))
    sg_w3, sg_b3 = nrm((Cr, 1)), nrm((1,))
    return dict(cg_w1=cg_w1, cg_b1=cg_b1, cg_w2=cg_w2, cg_b2=cg_b2,
                sg_w0=sg_w0, sg_b0=sg_b0, sg_w1=sg_w1, sg_b1=sg_b1,
                sg_w2=sg_w2, sg_b2=sg_b2, sg_w3=sg_w3, sg_b3=sg_b3)


# ----------------------------- pure-JAX reference ----------------------------

def bam_reference(x_nchw, p):
    x = jnp.transpose(x_nchw, (0, 2, 3, 1)).astype(jnp.float32)
    B, H, W, C = x.shape
    avg = jnp.mean(x, axis=(1, 2))
    hid = jax.nn.relu(avg @ p["cg_w1"] + p["cg_b1"])
    cg = hid @ p["cg_w2"] + p["cg_b2"]
    t = jax.nn.relu(jnp.einsum("bhwc,co->bhwo", x, p["sg_w0"]) + p["sg_b0"])
    for wk, bk in (("sg_w1", "sg_b1"), ("sg_w2", "sg_b2")):
        t = jax.nn.relu(
            lax.conv_general_dilated(t, p[wk], (1, 1), [(4, 4), (4, 4)],
                                     rhs_dilation=(4, 4),
                                     dimension_numbers=("NHWC", "HWIO", "NHWC"))
            + p[bk])
    s = jnp.einsum("bhwc,co->bhwo", t, p["sg_w3"]) + p["sg_b3"]
    att = 1.0 + jax.nn.sigmoid(cg[:, None, None, :] * s)
    return jnp.transpose(att * x, (0, 3, 1, 2))


# ----------------------------- main ------------------------------------------

if __name__ == "__main__":
    key = jax.random.PRNGKey(0)
    kx, kp = jax.random.split(key)

    B, C, H, W = 4, 32, 8, 8          # gate_channel=32 -> reduced channels Cr = 2
    x = jax.random.normal(kx, (B, C, H, W), jnp.float32)
    params = init_bam_params(kp, C)

    out = jax.block_until_ready(bam_forward(x, params))
    ref = bam_reference(x, params)
    assert out.shape == (B, C, H, W)
    max_err = float(jnp.max(jnp.abs(out - ref)))
    # bf16 MXU operands with f32 accumulation keep the attention error far below this bound.
    if max_err > 5e-3:
        raise AssertionError(f"kernel/reference mismatch, max abs err = {max_err}")
    print("KERNEL_OK")
</pallas_src>

<mosaic_0001>
module attributes {stable_mosaic.version = 11 : i64} {
  func.func @bam_kernel(%arg0: i32, %arg1: memref<2x8x8x32xf32, #tpu.memory_space<vmem>>, %arg2: memref<32x2xbf16, #tpu.memory_space<vmem>>, %arg3: memref<1x2xf32, #tpu.memory_space<vmem>>, %arg4: memref<2x32xbf16, #tpu.memory_space<vmem>>, %arg5: memref<1x32xf32, #tpu.memory_space<vmem>>, %arg6: memref<32x2xbf16, #tpu.memory_space<vmem>>, %arg7: memref<1x2xf32, #tpu.memory_space<vmem>>, %arg8: memref<3x3x2x2xf32, #tpu.memory_space<vmem>>, %arg9: memref<1x2xf32, #tpu.memory_space<vmem>>, %arg10: memref<3x3x2x2xf32, #tpu.memory_space<vmem>>, %arg11: memref<1x2xf32, #tpu.memory_space<vmem>>, %arg12: memref<1x2xf32, #tpu.memory_space<vmem>>, %arg13: memref<1x1xf32, #tpu.memory_space<vmem>>, %arg14: memref<2x8x8x32xf32, #tpu.memory_space<vmem>>, %arg15: memref<2x16x16x2xf32, #tpu.memory_space<vmem>>) attributes {dimension_semantics = [#tpu.dimension_semantics<parallel>], iteration_bounds = array<i64: 2>, scalar_prefetch = 0 : i64, scratch_operands = 1 : i64, tpu.core_type = #tpu.core_type<tc>, window_params = [{transform_indices = @transform_0, window_bounds = array<i64: 2, 8, 8, 32>}, {pipeline_mode = #tpu.pipeline_mode<synchronous>, transform_indices = @transform_1, window_bounds = array<i64: 32, 2>}, {pipeline_mode = #tpu.pipeline_mode<synchronous>, transform_indices = @transform_2, window_bounds = array<i64: 1, 2>}, {pipeline_mode = #tpu.pipeline_mode<synchronous>, transform_indices = @transform_3, window_bounds = array<i64: 2, 32>}, {pipeline_mode = #tpu.pipeline_mode<synchronous>, transform_indices = @transform_4, window_bounds = array<i64: 1, 32>}, {pipeline_mode = #tpu.pipeline_mode<synchronous>, transform_indices = @transform_5, window_bounds = array<i64: 32, 2>}, {pipeline_mode = #tpu.pipeline_mode<synchronous>, transform_indices = @transform_6, window_bounds = array<i64: 1, 2>}, {pipeline_mode = #tpu.pipeline_mode<synchronous>, transform_indices = @transform_7, window_bounds = array<i64: 3, 3, 2, 2>}, {pipeline_mode = #tpu.pipeline_mode<synchronous>, transform_indices = @transform_8, window_bounds = array<i64: 1, 2>}, {pipeline_mode = #tpu.pipeline_mode<synchronous>, transform_indices = @transform_9, window_bounds = array<i64: 3, 3, 2, 2>}, {pipeline_mode = #tpu.pipeline_mode<synchronous>, transform_indices = @transform_10, window_bounds = array<i64: 1, 2>}, {pipeline_mode = #tpu.pipeline_mode<synchronous>, transform_indices = @transform_11, window_bounds = array<i64: 1, 2>}, {pipeline_mode = #tpu.pipeline_mode<synchronous>, transform_indices = @transform_12, window_bounds = array<i64: 1, 1>}, {transform_indices = @transform_13, window_bounds = array<i64: 2, 8, 8, 32>}]} {
    %cst = arith.constant 0.000000e+00 : f32
    %0 = vector.broadcast %cst : f32 to vector<2x4x16x2xf32>
    %c0 = arith.constant 0 : index
    %c0_0 = arith.constant 0 : index
    %c0_1 = arith.constant 0 : index
    %c0_2 = arith.constant 0 : index
    %1 = vector.load %arg15[%c0, %c0_0, %c0_1, %c0_2] : memref<2x16x16x2xf32, #tpu.memory_space<vmem>>, vector<2x4x16x2xf32>
    tpu.vector_store %arg15[%c0, %c0_0, %c0_1, %c0_2], %0 {strides = array<i32>} : memref<2x16x16x2xf32, #tpu.memory_space<vmem>>, vector<2x4x16x2xf32>,
    %cst_3 = arith.constant 0.000000e+00 : f32
    %2 = vector.broadcast %cst_3 : f32 to vector<2x4x16x2xf32>
    %c0_4 = arith.constant 0 : index
    %c12 = arith.constant 12 : index
    %c0_5 = arith.constant 0 : index
    %c0_6 = arith.constant 0 : index
    %3 = vector.load %arg15[%c0_4, %c12, %c0_5, %c0_6] : memref<2x16x16x2xf32, #tpu.memory_space<vmem>>, vector<2x4x16x2xf32>
    tpu.vector_store %arg15[%c0_4, %c12, %c0_5, %c0_6], %2 {strides = array<i32>} : memref<2x16x16x2xf32, #tpu.memory_space<vmem>>, vector<2x4x16x2xf32>,
    %cst_7 = arith.constant 0.000000e+00 : f32
    %4 = vector.broadcast %cst_7 : f32 to vector<2x8x4x2xf32>
    %c0_8 = arith.constant 0 : index
    %c4 = arith.constant 4 : index
    %c0_9 = arith.constant 0 : index
    %c0_10 = arith.constant 0 : index
    %5 = vector.load %arg15[%c0_8, %c4, %c0_9, %c0_10] : memref<2x16x16x2xf32, #tpu.memory_space<vmem>>, vector<2x8x4x2xf32>
    tpu.vector_store %arg15[%c0_8, %c4, %c0_9, %c0_10], %4 {strides = array<i32>} : memref<2x16x16x2xf32, #tpu.memory_space<vmem>>, vector<2x8x4x2xf32>,
    %cst_11 = arith.constant 0.000000e+00 : f32
    %6 = vector.broadcast %cst_11 : f32 to vector<2x8x4x2xf32>
    %c0_12 = arith.constant 0 : index
    %c4_13 = arith.constant 4 : index
    %c12_14 = arith.constant 12 : index
    %c0_15 = arith.constant 0 : index
    %7 = vector.load %arg15[%c0_12, %c4_13, %c12_14, %c0_15] : memref<2x16x16x2xf32, #tpu.memory_space<vmem>>, vector<2x8x4x2xf32>
    tpu.vector_store %arg15[%c0_12, %c4_13, %c12_14, %c0_15], %6 {strides = array<i32>} : memref<2x16x16x2xf32, #tpu.memory_space<vmem>>, vector<2x8x4x2xf32>,
    %c0_16 = arith.constant 0 : index
    %c0_17 = arith.constant 0 : index
    %c0_18 = arith.constant 0 : index
    %c0_19 = arith.constant 0 : index
    %8 = vector.load %arg1[%c0_16, %c0_17, %c0_18, %c0_19] : memref<2x8x8x32xf32, #tpu.memory_space<vmem>>, vector<2x8x8x32xf32>
    %9 = vector.shape_cast %8 : vector<2x8x8x32xf32> to vector<128x32xf32>
    %10 = vector.shape_cast %8 : vector<2x8x8x32xf32> to vector<2x64x32xf32>
    %cst_20 = arith.constant dense<0.000000e+00> : vector<2x32xf32>
    %11 = vector.multi_reduction <add>, %10, %cst_20 [1] : vector<2x64x32xf32> to vector<2x32xf32>
    %cst_21 = arith.constant 6.400000e+01 : f32
    %12 = vector.broadcast %cst_21 : f32 to vector<2x32xf32>
    %13 = arith.divf %11, %12 : vector<2x32xf32>
    %14 = arith.truncf %13 : vector<2x32xf32> to vector<2x32xbf16>
    %c0_22 = arith.constant 0 : index
    %c0_23 = arith.constant 0 : index
    %15 = vector.load %arg2[%c0_22, %c0_23] : memref<32x2xbf16, #tpu.memory_space<vmem>>, vector<32x2xbf16>
    %cst_24 = arith.constant dense<0.000000e+00> : vector<2x2xf32>
    %16 = tpu.matmul %14, %15, %cst_24 {dimension_numbers = #tpu.dot_dimension_numbers<[1], [0], [0], [1], [0, 0, 1, 1], [], []>} : vector<2x32xbf16>, vector<32x2xbf16>, vector<2x2xf32> -> vector<2x2xf32>
    %c0_25 = arith.constant 0 : index
    %c0_26 = arith.constant 0 : index
    %17 = vector.load %arg3[%c0_25, %c0_26] : memref<1x2xf32, #tpu.memory_space<vmem>>, vector<1x2xf32>
    %18 = vector.broadcast %17 : vector<1x2xf32> to vector<2x2xf32>
    %19 = arith.addf %16, %18 : vector<2x2xf32>
    %cst_27 = arith.constant 0.000000e+00 : f32
    %20 = vector.broadcast %cst_27 : f32 to vector<2x2xf32>
    %21 = arith.maximumf %19, %20 : vector<2x2xf32>
    %22 = arith.truncf %21 : vector<2x2xf32> to vector<2x2xbf16>
    %c0_28 = arith.constant 0 : index
    %c0_29 = arith.constant 0 : index
    %23 = vector.load %arg4[%c0_28, %c0_29] : memref<2x32xbf16, #tpu.memory_space<vmem>>, vector<2x32xbf16>
    %cst_30 = arith.constant dense<0.000000e+00> : vector<2x32xf32>
    %24 = tpu.matmul %22, %23, %cst_30 {dimension_numbers = #tpu.dot_dimension_numbers<[1], [0], [0], [1], [0, 0, 1, 1], [], []>} : vector<2x2xbf16>, vector<2x32xbf16>, vector<2x32xf32> -> vector<2x32xf32>
    %c0_31 = arith.constant 0 : index
    %c0_32 = arith.constant 0 : index
    %25 = vector.load %arg5[%c0_31, %c0_32] : memref<1x32xf32, #tpu.memory_space<vmem>>, vector<1x32xf32>
    %26 = vector.broadcast %25 : vector<1x32xf32> to vector<2x32xf32>
    %27 = arith.addf %24, %26 : vector<2x32xf32>
    %28 = arith.truncf %9 : vector<128x32xf32> to vector<128x32xbf16>
    %c0_33 = arith.constant 0 : index
    %c0_34 = arith.constant 0 : index
    %29 = vector.load %arg6[%c0_33, %c0_34] : memref<32x2xbf16, #tpu.memory_space<vmem>>, vector<32x2xbf16>
    %cst_35 = arith.constant dense<0.000000e+00> : vector<128x2xf32>
    %30 = tpu.matmul %28, %29, %cst_35 {dimension_numbers = #tpu.dot_dimension_numbers<[1], [0], [0], [1], [0, 0, 1, 1], [], []>} : vector<128x32xbf16>, vector<32x2xbf16>, vector<128x2xf32> -> vector<128x2xf32>
    %c0_36 = arith.constant 0 : index
    %c0_37 = arith.constant 0 : index
    %31 = vector.load %arg7[%c0_36, %c0_37] : memref<1x2xf32, #tpu.memory_space<vmem>>, vector<1x2xf32>
    %32 = vector.broadcast %31 : vector<1x2xf32> to vector<128x2xf32>
    %33 = arith.addf %30, %32 : vector<128x2xf32>
    %cst_38 = arith.constant 0.000000e+00 : f32
    %34 = vector.broadcast %cst_38 : f32 to vector<128x2xf32>
    %35 = arith.maximumf %33, %34 : vector<128x2xf32>
    %36 = vector.shape_cast %35 : vector<128x2xf32> to vector<2x8x8x2xf32>
    %c0_39 = arith.constant 0 : index
    %c4_40 = arith.constant 4 : index
    %c4_41 = arith.constant 4 : index
    %c0_42 = arith.constant 0 : index
    %37 = vector.load %arg15[%c0_39, %c4_40, %c4_41, %c0_42] : memref<2x16x16x2xf32, #tpu.memory_space<vmem>>, vector<2x8x8x2xf32>
    tpu.vector_store %arg15[%c0_39, %c4_40, %c4_41, %c0_42], %36 {strides = array<i32>} : memref<2x16x16x2xf32, #tpu.memory_space<vmem>>, vector<2x8x8x2xf32>,
    %c0_43 = arith.constant 0 : index
    %c0_44 = arith.constant 0 : index
    %c0_45 = arith.constant 0 : index
    %c0_46 = arith.constant 0 : index
    %38 = vector.load %arg8[%c0_43, %c0_44, %c0_45, %c0_46] : memref<3x3x2x2xf32, #tpu.memory_space<vmem>>, vector<3x3x2x2xf32>
    %cst_47 = arith.constant 0.000000e+00 : f32
    %39 = vector.broadcast %cst_47 : f32 to vector<2x8x8x2xf32>
    %c0_48 = arith.constant 0 : index
    %c0_49 = arith.constant 0 : index
    %40 = vector.load %arg9[%c0_48, %c0_49] : memref<1x2xf32, #tpu.memory_space<vmem>>, vector<1x2xf32>
    %41 = vector.shape_cast %40 : vector<1x2xf32> to vector<1x1x1x2xf32>
    %42 = vector.broadcast %41 : vector<1x1x1x2xf32> to vector<2x8x8x2xf32>
    %43 = arith.addf %39, %42 : vector<2x8x8x2xf32>
    %c0_50 = arith.constant 0 : index
    %c0_51 = arith.constant 0 : index
    %c0_52 = arith.constant 0 : index
    %c0_53 = arith.constant 0 : index
    %44 = vector.load %arg15[%c0_50, %c0_51, %c0_52, %c0_53] : memref<2x16x16x2xf32, #tpu.memory_space<vmem>>, vector<2x8x8x2xf32>
    %45 = vector.extract_strided_slice %44 {offsets = [0, 0, 0, 0], sizes = [2, 8, 8, 1], strides = [1, 1, 1, 1]} : vector<2x8x8x2xf32> to vector<2x8x8x1xf32>
    %46 = vector.extract_strided_slice %38 {offsets = [0, 0, 0, 0], sizes = [1, 1, 1, 2], strides = [1, 1, 1, 1]} : vector<3x3x2x2xf32> to vector<1x1x1x2xf32>
    %47 = vector.shape_cast %46 : vector<1x1x1x2xf32> to vector<2xf32>
    %48 = vector.shape_cast %47 : vector<2xf32> to vector<1x1x1x2xf32>
    %49 = vector.broadcast %45 : vector<2x8x8x1xf32> to vector<2x8x8x2xf32>
    %50 = vector.broadcast %48 : vector<1x1x1x2xf32> to vector<2x8x8x2xf32>
    %51 = arith.mulf %49, %50 : vector<2x8x8x2xf32>
    %52 = arith.addf %43, %51 : vector<2x8x8x2xf32>
    %53 = vector.extract_strided_slice %44 {offsets = [0, 0, 0, 1], sizes = [2, 8, 8, 1], strides = [1, 1, 1, 1]} : vector<2x8x8x2xf32> to vector<2x8x8x1xf32>
    %54 = vector.extract_strided_slice %38 {offsets = [0, 0, 1, 0], sizes = [1, 1, 1, 2], strides = [1, 1, 1, 1]} : vector<3x3x2x2xf32> to vector<1x1x1x2xf32>
    %55 = vector.shape_cast %54 : vector<1x1x1x2xf32> to vector<2xf32>
    %56 = vector.shape_cast %55 : vector<2xf32> to vector<1x1x1x2xf32>
    %57 = vector.broadcast %53 : vector<2x8x8x1xf32> to vector<2x8x8x2xf32>
    %58 = vector.broadcast %56 : vector<1x1x1x2xf32> to vector<2x8x8x2xf32>
    %59 = arith.mulf %57, %58 : vector<2x8x8x2xf32>
    %60 = arith.addf %52, %59 : vector<2x8x8x2xf32>
    %c0_54 = arith.constant 0 : index
    %c0_55 = arith.constant 0 : index
    %c4_56 = arith.constant 4 : index
    %c0_57 = arith.constant 0 : index
    %61 = vector.load %arg15[%c0_54, %c0_55, %c4_56, %c0_57] : memref<2x16x16x2xf32, #tpu.memory_space<vmem>>, vector<2x8x8x2xf32>
    %62 = vector.extract_strided_slice %61 {offsets = [0, 0, 0, 0], sizes = [2, 8, 8, 1], strides = [1, 1, 1, 1]} : vector<2x8x8x2xf32> to vector<2x8x8x1xf32>
    %63 = vector.extract_strided_slice %38 {offsets = [0, 1, 0, 0], sizes = [1, 1, 1, 2], strides = [1, 1, 1, 1]} : vector<3x3x2x2xf32> to vector<1x1x1x2xf32>
    %64 = vector.shape_cast %63 : vector<1x1x1x2xf32> to vector<2xf32>
    %65 = vector.shape_cast %64 : vector<2xf32> to vector<1x1x1x2xf32>
    %66 = vector.broadcast %62 : vector<2x8x8x1xf32> to vector<2x8x8x2xf32>
    %67 = vector.broadcast %65 : vector<1x1x1x2xf32> to vector<2x8x8x2xf32>
    %68 = arith.mulf %66, %67 : vector<2x8x8x2xf32>
    %69 = arith.addf %60, %68 : vector<2x8x8x2xf32>
    %70 = vector.extract_strided_slice %61 {offsets = [0, 0, 0, 1], sizes = [2, 8, 8, 1], strides = [1, 1, 1, 1]} : vector<2x8x8x2xf32> to vector<2x8x8x1xf32>
    %71 = vector.extract_strided_slice %38 {offsets = [0, 1, 1, 0], sizes = [1, 1, 1, 2], strides = [1, 1, 1, 1]} : vector<3x3x2x2xf32> to vector<1x1x1x2xf32>
    %72 = vector.shape_cast %71 : vector<1x1x1x2xf32> to vector<2xf32>
    %73 = vector.shape_cast %72 : vector<2xf32> to vector<1x1x1x2xf32>
    %74 = vector.broadcast %70 : vector<2x8x8x1xf32> to vector<2x8x8x2xf32>
    %75 = vector.broadcast %73 : vector<1x1x1x2xf32> to vector<2x8x8x2xf32>
    %76 = arith.mulf %74, %75 : vector<2x8x8x2xf32>
    %77 = arith.addf %69, %76 : vector<2x8x8x2xf32>
    %c0_58 = arith.constant 0 : index
    %c0_59 = arith.constant 0 : index
    %c8 = arith.constant 8 : index
    %c0_60 = arith.constant 0 : index
    %78 = vector.load %arg15[%c0_58, %c0_59, %c8, %c0_60] : memref<2x16x16x2xf32, #tpu.memory_space<vmem>>, vector<2x8x8x2xf32>
    %79 = vector.extract_strided_slice %78 {offsets = [0, 0, 0, 0], sizes = [2, 8, 8, 1], strides = [1, 1, 1, 1]} : vector<2x8x8x2xf32> to vector<2x8x8x1xf32>
    %80 = vector.extract_strided_slice %38 {offsets = [0, 2, 0, 0], sizes = [1, 1, 1, 2], strides = [1, 1, 1, 1]} : vector<3x3x2x2xf32> to vector<1x1x1x2xf32>
    %81 = vector.shape_cast %80 : vector<1x1x1x2xf32> to vector<2xf32>
    %82 = vector.shape_cast %81 : vector<2xf32> to vector<1x1x1x2xf32>
    %83 = vector.broadcast %79 : vector<2x8x8x1xf32> to vector<2x8x8x2xf32>
    %84 = vector.broadcast %82 : vector<1x1x1x2xf32> to vector<2x8x8x2xf32>
    %85 = arith.mulf %83, %84 : vector<2x8x8x2xf32>
    %86 = arith.addf %77, %85 : vector<2x8x8x2xf32>
    %87 = vector.extract_strided_slice %78 {offsets = [0, 0, 0, 1], sizes = [2, 8, 8, 1], strides = [1, 1, 1, 1]} : vector<2x8x8x2xf32> to vector<2x8x8x1xf32>
    %88 = vector.extract_strided_slice %38 {offsets = [0, 2, 1, 0], sizes = [1, 1, 1, 2], strides = [1, 1, 1, 1]} : vector<3x3x2x2xf32> to vector<1x1x1x2xf32>
    %89 = vector.shape_cast %88 : vector<1x1x1x2xf32> to vector<2xf32>
    %90 = vector.shape_cast %89 : vector<2xf32> to vector<1x1x1x2xf32>
    %91 = vector.broadcast %87 : vector<2x8x8x1xf32> to vector<2x8x8x2xf32>
    %92 = vector.broadcast %90 : vector<1x1x1x2xf32> to vector<2x8x8x2xf32>
    %93 = arith.mulf %91, %92 : vector<2x8x8x2xf32>
    %94 = arith.addf %86, %93 : vector<2x8x8x2xf32>
    %c0_61 = arith.constant 0 : index
    %c4_62 = arith.constant 4 : index
    %c0_63 = arith.constant 0 : index
    %c0_64 = arith.constant 0 : index
    %95 = vector.load %arg15[%c0_61, %c4_62, %c0_63, %c0_64] : memref<2x16x16x2xf32, #tpu.memory_space<vmem>>, vector<2x8x8x2xf32>
    %96 = vector.extract_strided_slice %95 {offsets = [0, 0, 0, 0], sizes = [2, 8, 8, 1], strides = [1, 1, 1, 1]} : vector<2x8x8x2xf32> to vector<2x8x8x1xf32>
    %97 = vector.extract_strided_slice %38 {offsets = [1, 0, 0, 0], sizes = [1, 1, 1, 2], strides = [1, 1, 1, 1]} : vector<3x3x2x2xf32> to vector<1x1x1x2xf32>
    %98 = vector.shape_cast %97 : vector<1x1x1x2xf32> to vector<2xf32>
    %99 = vector.shape_cast %98 : vector<2xf32> to vector<1x1x1x2xf32>
    %100 = vector.broadcast %96 : vector<2x8x8x1xf32> to vector<2x8x8x2xf32>
    %101 = vector.broadcast %99 : vector<1x1x1x2xf32> to vector<2x8x8x2xf32>
    %102 = arith.mulf %100, %101 : vector<2x8x8x2xf32>
    %103 = arith.addf %94, %102 : vector<2x8x8x2xf32>
    %104 = vector.extract_strided_slice %95 {offsets = [0, 0, 0, 1], sizes = [2, 8, 8, 1], strides = [1, 1, 1, 1]} : vector<2x8x8x2xf32> to vector<2x8x8x1xf32>
    %105 = vector.extract_strided_slice %38 {offsets = [1, 0, 1, 0], sizes = [1, 1, 1, 2], strides = [1, 1, 1, 1]} : vector<3x3x2x2xf32> to vector<1x1x1x2xf32>
    %106 = vector.shape_cast %105 : vector<1x1x1x2xf32> to vector<2xf32>
    %107 = vector.shape_cast %106 : vector<2xf32> to vector<1x1x1x2xf32>
    %108 = vector.broadcast %104 : vector<2x8x8x1xf32> to vector<2x8x8x2xf32>
    %109 = vector.broadcast %107 : vector<1x1x1x2xf32> to vector<2x8x8x2xf32>
    %110 = arith.mulf %108, %109 : vector<2x8x8x2xf32>
    %111 = arith.addf %103, %110 : vector<2x8x8x2xf32>
    %c0_65 = arith.constant 0 : index
    %c4_66 = arith.constant 4 : index
    %c4_67 = arith.constant 4 : index
    %c0_68 = arith.constant 0 : index
    %112 = vector.load %arg15[%c0_65, %c4_66, %c4_67, %c0_68] : memref<2x16x16x2xf32, #tpu.memory_space<vmem>>, vector<2x8x8x2xf32>
    %113 = vector.extract_strided_slice %112 {offsets = [0, 0, 0, 0], sizes = [2, 8, 8, 1], strides = [1, 1, 1, 1]} : vector<2x8x8x2xf32> to vector<2x8x8x1xf32>
    %114 = vector.extract_strided_slice %38 {offsets = [1, 1, 0, 0], sizes = [1, 1, 1, 2], strides = [1, 1, 1, 1]} : vector<3x3x2x2xf32> to vector<1x1x1x2xf32>
    %115 = vector.shape_cast %114 : vector<1x1x1x2xf32> to vector<2xf32>
    %116 = vector.shape_cast %115 : vector<2xf32> to vector<1x1x1x2xf32>
    %117 = vector.broadcast %113 : vector<2x8x8x1xf32> to vector<2x8x8x2xf32>
    %118 = vector.broadcast %116 : vector<1x1x1x2xf32> to vector<2x8x8x2xf32>
    %119 = arith.mulf %117, %118 : vector<2x8x8x2xf32>
    %120 = arith.addf %111, %119 : vector<2x8x8x2xf32>
    %121 = vector.extract_strided_slice %112 {offsets = [0, 0, 0, 1], sizes = [2, 8, 8, 1], strides = [1, 1, 1, 1]} : vector<2x8x8x2xf32> to vector<2x8x8x1xf32>
    %122 = vector.extract_strided_slice %38 {offsets = [1, 1, 1, 0], sizes = [1, 1, 1, 2], strides = [1, 1, 1, 1]} : vector<3x3x2x2xf32> to vector<1x1x1x2xf32>
    %123 = vector.shape_cast %122 : vector<1x1x1x2xf32> to vector<2xf32>
    %124 = vector.shape_cast %123 : vector<2xf32> to vector<1x1x1x2xf32>
    %125 = vector.broadcast %121 : vector<2x8x8x1xf32> to vector<2x8x8x2xf32>
    %126 = vector.broadcast %124 : vector<1x1x1x2xf32> to vector<2x8x8x2xf32>
    %127 = arith.mulf %125, %126 : vector<2x8x8x2xf32>
    %128 = arith.addf %120, %127 : vector<2x8x8x2xf32>
    %c0_69 = arith.constant 0 : index
    %c4_70 = arith.constant 4 : index
    %c8_71 = arith.constant 8 : index
    %c0_72 = arith.constant 0 : index
    %129 = vector.load %arg15[%c0_69, %c4_70, %c8_71, %c0_72] : memref<2x16x16x2xf32, #tpu.memory_space<vmem>>, vector<2x8x8x2xf32>
    %130 = vector.extract_strided_slice %129 {offsets = [0, 0, 0, 0], sizes = [2, 8, 8, 1], strides = [1, 1, 1, 1]} : vector<2x8x8x2xf32> to vector<2x8x8x1xf32>
    %131 = vector.extract_strided_slice %38 {offsets = [1, 2, 0, 0], sizes = [1, 1, 1, 2], strides = [1, 1, 1, 1]} : vector<3x3x2x2xf32> to vector<1x1x1x2xf32>
    %132 = vector.shape_cast %131 : vector<1x1x1x2xf32> to vector<2xf32>
    %133 = vector.shape_cast %132 : vector<2xf32> to vector<1x1x1x2xf32>
    %134 = vector.broadcast %130 : vector<2x8x8x1xf32> to vector<2x8x8x2xf32>
    %135 = vector.broadcast %133 : vector<1x1x1x2xf32> to vector<2x8x8x2xf32>
    %136 = arith.mulf %134, %135 : vector<2x8x8x2xf32>
    %137 = arith.addf %128, %136 : vector<2x8x8x2xf32>
    %138 = vector.extract_strided_slice %129 {offsets = [0, 0, 0, 1], sizes = [2, 8, 8, 1], strides = [1, 1, 1, 1]} : vector<2x8x8x2xf32> to vector<2x8x8x1xf32>
    %139 = vector.extract_strided_slice %38 {offsets = [1, 2, 1, 0], sizes = [1, 1, 1, 2], strides = [1, 1, 1, 1]} : vector<3x3x2x2xf32> to vector<1x1x1x2xf32>
    %140 = vector.shape_cast %139 : vector<1x1x1x2xf32> to vector<2xf32>
    %141 = vector.shape_cast %140 : vector<2xf32> to vector<1x1x1x2xf32>
    %142 = vector.broadcast %138 : vector<2x8x8x1xf32> to vector<2x8x8x2xf32>
    %143 = vector.broadcast %141 : vector<1x1x1x2xf32> to vector<2x8x8x2xf32>
    %144 = arith.mulf %142, %143 : vector<2x8x8x2xf32>
    %145 = arith.addf %137, %144 : vector<2x8x8x2xf32>
    %c0_73 = arith.constant 0 : index
    %c8_74 = arith.constant 8 : index
    %c0_75 = arith.constant 0 : index
    %c0_76 = arith.constant 0 : index
    %146 = vector.load %arg15[%c0_73, %c8_74, %c0_75, %c0_76] : memref<2x16x16x2xf32, #tpu.memory_space<vmem>>, vector<2x8x8x2xf32>
    %147 = vector.extract_strided_slice %146 {offsets = [0, 0, 0, 0], sizes = [2, 8, 8, 1], strides = [1, 1, 1, 1]} : vector<2x8x8x2xf32> to vector<2x8x8x1xf32>
    %148 = vector.extract_strided_slice %38 {offsets = [2, 0, 0, 0], sizes = [1, 1, 1, 2], strides = [1, 1, 1, 1]} : vector<3x3x2x2xf32> to vector<1x1x1x2xf32>
    %149 = vector.shape_cast %148 : vector<1x1x1x2xf32> to vector<2xf32>
    %150 = vector.shape_cast %149 : vector<2xf32> to vector<1x1x1x2xf32>
    %151 = vector.broadcast %147 : vector<2x8x8x1xf32> to vector<2x8x8x2xf32>
    %152 = vector.broadcast %150 : vector<1x1x1x2xf32> to vector<2x8x8x2xf32>
    %153 = arith.mulf %151, %152 : vector<2x8x8x2xf32>
    %154 = arith.addf %145, %153 : vector<2x8x8x2xf32>
    %155 = vector.extract_strided_slice %146 {offsets = [0, 0, 0, 1], sizes = [2, 8, 8, 1], strides = [1, 1, 1, 1]} : vector<2x8x8x2xf32> to vector<2x8x8x1xf32>
    %156 = vector.extract_strided_slice %38 {offsets = [2, 0, 1, 0], sizes = [1, 1, 1, 2], strides = [1, 1, 1, 1]} : vector<3x3x2x2xf32> to vector<1x1x1x2xf32>
    %157 = vector.shape_cast %156 : vector<1x1x1x2xf32> to vector<2xf32>
    %158 = vector.shape_cast %157 : vector<2xf32> to vector<1x1x1x2xf32>
    %159 = vector.broadcast %155 : vector<2x8x8x1xf32> to vector<2x8x8x2xf32>
    %160 = vector.broadcast %158 : vector<1x1x1x2xf32> to vector<2x8x8x2xf32>
    %161 = arith.mulf %159, %160 : vector<2x8x8x2xf32>
    %162 = arith.addf %154, %161 : vector<2x8x8x2xf32>
    %c0_77 = arith.constant 0 : index
    %c8_78 = arith.constant 8 : index
    %c4_79 = arith.constant 4 : index
    %c0_80 = arith.constant 0 : index
    %163 = vector.load %arg15[%c0_77, %c8_78, %c4_79, %c0_80] : memref<2x16x16x2xf32, #tpu.memory_space<vmem>>, vector<2x8x8x2xf32>
    %164 = vector.extract_strided_slice %163 {offsets = [0, 0, 0, 0], sizes = [2, 8, 8, 1], strides = [1, 1, 1, 1]} : vector<2x8x8x2xf32> to vector<2x8x8x1xf32>
    %165 = vector.extract_strided_slice %38 {offsets = [2, 1, 0, 0], sizes = [1, 1, 1, 2], strides = [1, 1, 1, 1]} : vector<3x3x2x2xf32> to vector<1x1x1x2xf32>
    %166 = vector.shape_cast %165 : vector<1x1x1x2xf32> to vector<2xf32>
    %167 = vector.shape_cast %166 : vector<2xf32> to vector<1x1x1x2xf32>
    %168 = vector.broadcast %164 : vector<2x8x8x1xf32> to vector<2x8x8x2xf32>
    %169 = vector.broadcast %167 : vector<1x1x1x2xf32> to vector<2x8x8x2xf32>
    %170 = arith.mulf %168, %169 : vector<2x8x8x2xf32>
    %171 = arith.addf %162, %170 : vector<2x8x8x2xf32>
    %172 = vector.extract_strided_slice %163 {offsets = [0, 0, 0, 1], sizes = [2, 8, 8, 1], strides = [1, 1, 1, 1]} : vector<2x8x8x2xf32> to vector<2x8x8x1xf32>
    %173 = vector.extract_strided_slice %38 {offsets = [2, 1, 1, 0], sizes = [1, 1, 1, 2], strides = [1, 1, 1, 1]} : vector<3x3x2x2xf32> to vector<1x1x1x2xf32>
    %174 = vector.shape_cast %173 : vector<1x1x1x2xf32> to vector<2xf32>
    %175 = vector.shape_cast %174 : vector<2xf32> to vector<1x1x1x2xf32>
    %176 = vector.broadcast %172 : vector<2x8x8x1xf32> to vector<2x8x8x2xf32>
    %177 = vector.broadcast %175 : vector<1x1x1x2xf32> to vector<2x8x8x2xf32>
    %178 = arith.mulf %176, %177 : vector<2x8x8x2xf32>
    %179 = arith.addf %171, %178 : vector<2x8x8x2xf32>
    %c0_81 = arith.constant 0 : index
    %c8_82 = arith.constant 8 : index
    %c8_83 = arith.constant 8 : index
    %c0_84 = arith.constant 0 : index
    %180 = vector.load %arg15[%c0_81, %c8_82, %c8_83, %c0_84] : memref<2x16x16x2xf32, #tpu.memory_space<vmem>>, vector<2x8x8x2xf32>
    %181 = vector.extract_strided_slice %180 {offsets = [0, 0, 0, 0], sizes = [2, 8, 8, 1], strides = [1, 1, 1, 1]} : vector<2x8x8x2xf32> to vector<2x8x8x1xf32>
    %182 = vector.extract_strided_slice %38 {offsets = [2, 2, 0, 0], sizes = [1, 1, 1, 2], strides = [1, 1, 1, 1]} : vector<3x3x2x2xf32> to vector<1x1x1x2xf32>
    %183 = vector.shape_cast %182 : vector<1x1x1x2xf32> to vector<2xf32>
    %184 = vector.shape_cast %183 : vector<2xf32> to vector<1x1x1x2xf32>
    %185 = vector.broadcast %181 : vector<2x8x8x1xf32> to vector<2x8x8x2xf32>
    %186 = vector.broadcast %184 : vector<1x1x1x2xf32> to vector<2x8x8x2xf32>
    %187 = arith.mulf %185, %186 : vector<2x8x8x2xf32>
    %188 = arith.addf %179, %187 : vector<2x8x8x2xf32>
    %189 = vector.extract_strided_slice %180 {offsets = [0, 0, 0, 1], sizes = [2, 8, 8, 1], strides = [1, 1, 1, 1]} : vector<2x8x8x2xf32> to vector<2x8x8x1xf32>
    %190 = vector.extract_strided_slice %38 {offsets = [2, 2, 1, 0], sizes = [1, 1, 1, 2], strides = [1, 1, 1, 1]} : vector<3x3x2x2xf32> to vector<1x1x1x2xf32>
    %191 = vector.shape_cast %190 : vector<1x1x1x2xf32> to vector<2xf32>
    %192 = vector.shape_cast %191 : vector<2xf32> to vector<1x1x1x2xf32>
    %193 = vector.broadcast %189 : vector<2x8x8x1xf32> to vector<2x8x8x2xf32>
    %194 = vector.broadcast %192 : vector<1x1x1x2xf32> to vector<2x8x8x2xf32>
    %195 = arith.mulf %193, %194 : vector<2x8x8x2xf32>
    %196 = arith.addf %188, %195 : vector<2x8x8x2xf32>
    %cst_85 = arith.constant 0.000000e+00 : f32
    %197 = vector.broadcast %cst_85 : f32 to vector<2x8x8x2xf32>
    %198 = arith.maximumf %196, %197 : vector<2x8x8x2xf32>
    %c0_86 = arith.constant 0 : index
    %c4_87 = arith.constant 4 : index
    %c4_88 = arith.constant 4 : index
    %c0_89 = arith.constant 0 : index
    %199 = vector.load %arg15[%c0_86, %c4_87, %c4_88, %c0_89] : memref<2x16x16x2xf32, #tpu.memory_space<vmem>>, vector<2x8x8x2xf32>
    tpu.vector_store %arg15[%c0_86, %c4_87, %c4_88, %c0_89], %198 {strides = array<i32>} : memref<2x16x16x2xf32, #tpu.memory_space<vmem>>, vector<2x8x8x2xf32>,
    %c0_90 = arith.constant 0 : index
    %c0_91 = arith.constant 0 : index
    %c0_92 = arith.constant 0 : index
    %c0_93 = arith.constant 0 : index
    %200 = vector.load %arg10[%c0_90, %c0_91, %c0_92, %c0_93] : memref<3x3x2x2xf32, #tpu.memory_space<vmem>>, vector<3x3x2x2xf32>
    %cst_94 = arith.constant 0.000000e+00 : f32
    %201 = vector.broadcast %cst_94 : f32 to vector<2x8x8x2xf32>
    %c0_95 = arith.constant 0 : index
    %c0_96 = arith.constant 0 : index
    %202 = vector.load %arg11[%c0_95, %c0_96] : memref<1x2xf32, #tpu.memory_space<vmem>>, vector<1x2xf32>
    %203 = vector.shape_cast %202 : vector<1x2xf32> to vector<1x1x1x2xf32>
    %204 = vector.broadcast %203 : vector<1x1x1x2xf32> to vector<2x8x8x2xf32>
    %205 = arith.addf %201, %204 : vector<2x8x8x2xf32>
    %c0_97 = arith.constant 0 : index
    %c0_98 = arith.constant 0 : index
    %c0_99 = arith.constant 0 : index
    %c0_100 = arith.constant 0 : index
    %206 = vector.load %arg15[%c0_97, %c0_98, %c0_99, %c0_100] : memref<2x16x16x2xf32, #tpu.memory_space<vmem>>, vector<2x8x8x2xf32>
    %207 = vector.extract_strided_slice %206 {offsets = [0, 0, 0, 0], sizes = [2, 8, 8, 1], strides = [1, 1, 1, 1]} : vector<2x8x8x2xf32> to vector<2x8x8x1xf32>
    %208 = vector.extract_strided_slice %200 {offsets = [0, 0, 0, 0], sizes = [1, 1, 1, 2], strides = [1, 1, 1, 1]} : vector<3x3x2x2xf32> to vector<1x1x1x2xf32>
    %209 = vector.shape_cast %208 : vector<1x1x1x2xf32> to vector<2xf32>
    %210 = vector.shape_cast %209 : vector<2xf32> to vector<1x1x1x2xf32>
    %211 = vector.broadcast %207 : vector<2x8x8x1xf32> to vector<2x8x8x2xf32>
    %212 = vector.broadcast %210 : vector<1x1x1x2xf32> to vector<2x8x8x2xf32>
    %213 = arith.mulf %211, %212 : vector<2x8x8x2xf32>
    %214 = arith.addf %205, %213 : vector<2x8x8x2xf32>
    %215 = vector.extract_strided_slice %206 {offsets = [0, 0, 0, 1], sizes = [2, 8, 8, 1], strides = [1, 1, 1, 1]} : vector<2x8x8x2xf32> to vector<2x8x8x1xf32>
    %216 = vector.extract_strided_slice %200 {offsets = [0, 0, 1, 0], sizes = [1, 1, 1, 2], strides = [1, 1, 1, 1]} : vector<3x3x2x2xf32> to vector<1x1x1x2xf32>
    %217 = vector.shape_cast %216 : vector<1x1x1x2xf32> to vector<2xf32>
    %218 = vector.shape_cast %217 : vector<2xf32> to vector<1x1x1x2xf32>
    %219 = vector.broadcast %215 : vector<2x8x8x1xf32> to vector<2x8x8x2xf32>
    %220 = vector.broadcast %218 : vector<1x1x1x2xf32> to vector<2x8x8x2xf32>
    %221 = arith.mulf %219, %220 : vector<2x8x8x2xf32>
    %222 = arith.addf %214, %221 : vector<2x8x8x2xf32>
    %c0_101 = arith.constant 0 : index
    %c0_102 = arith.constant 0 : index
    %c4_103 = arith.constant 4 : index
    %c0_104 = arith.constant 0 : index
    %223 = vector.load %arg15[%c0_101, %c0_102, %c4_103, %c0_104] : memref<2x16x16x2xf32, #tpu.memory_space<vmem>>, vector<2x8x8x2xf32>
    %224 = vector.extract_strided_slice %223 {offsets = [0, 0, 0, 0], sizes = [2, 8, 8, 1], strides = [1, 1, 1, 1]} : vector<2x8x8x2xf32> to vector<2x8x8x1xf32>
    %225 = vector.extract_strided_slice %200 {offsets = [0, 1, 0, 0], sizes = [1, 1, 1, 2], strides = [1, 1, 1, 1]} : vector<3x3x2x2xf32> to vector<1x1x1x2xf32>
    %226 = vector.shape_cast %225 : vector<1x1x1x2xf32> to vector<2xf32>
    %227 = vector.shape_cast %226 : vector<2xf32> to vector<1x1x1x2xf32>
    %228 = vector.broadcast %224 : vector<2x8x8x1xf32> to vector<2x8x8x2xf32>
    %229 = vector.broadcast %227 : vector<1x1x1x2xf32> to vector<2x8x8x2xf32>
    %230 = arith.mulf %228, %229 : vector<2x8x8x2xf32>
    %231 = arith.addf %222, %230 : vector<2x8x8x2xf32>
    %232 = vector.extract_strided_slice %223 {offsets = [0, 0, 0, 1], sizes = [2, 8, 8, 1], strides = [1, 1, 1, 1]} : vector<2x8x8x2xf32> to vector<2x8x8x1xf32>
    %233 = vector.extract_strided_slice %200 {offsets = [0, 1, 1, 0], sizes = [1, 1, 1, 2], strides = [1, 1, 1, 1]} : vector<3x3x2x2xf32> to vector<1x1x1x2xf32>
    %234 = vector.shape_cast %233 : vector<1x1x1x2xf32> to vector<2xf32>
    %235 = vector.shape_cast %234 : vector<2xf32> to vector<1x1x1x2xf32>
    %236 = vector.broadcast %232 : vector<2x8x8x1xf32> to vector<2x8x8x2xf32>
    %237 = vector.broadcast %235 : vector<1x1x1x2xf32> to vector<2x8x8x2xf32>
    %238 = arith.mulf %236, %237 : vector<2x8x8x2xf32>
    %239 = arith.addf %231, %238 : vector<2x8x8x2xf32>
    %c0_105 = arith.constant 0 : index
    %c0_106 = arith.constant 0 : index
    %c8_107 = arith.constant 8 : index
    %c0_108 = arith.constant 0 : index
    %240 = vector.load %arg15[%c0_105, %c0_106, %c8_107, %c0_108] : memref<2x16x16x2xf32, #tpu.memory_space<vmem>>, vector<2x8x8x2xf32>
    %241 = vector.extract_strided_slice %240 {offsets = [0, 0, 0, 0], sizes = [2, 8, 8, 1], strides = [1, 1, 1, 1]} : vector<2x8x8x2xf32> to vector<2x8x8x1xf32>
    %242 = vector.extract_strided_slice %200 {offsets = [0, 2, 0, 0], sizes = [1, 1, 1, 2], strides = [1, 1, 1, 1]} : vector<3x3x2x2xf32> to vector<1x1x1x2xf32>
    %243 = vector.shape_cast %242 : vector<1x1x1x2xf32> to vector<2xf32>
    %244 = vector.shape_cast %243 : vector<2xf32> to vector<1x1x1x2xf32>
    %245 = vector.broadcast %241 : vector<2x8x8x1xf32> to vector<2x8x8x2xf32>
    %246 = vector.broadcast %244 : vector<1x1x1x2xf32> to vector<2x8x8x2xf32>
    %247 = arith.mulf %245, %246 : vector<2x8x8x2xf32>
    %248 = arith.addf %239, %247 : vector<2x8x8x2xf32>
    %249 = vector.extract_strided_slice %240 {offsets = [0, 0, 0, 1], sizes = [2, 8, 8, 1], strides = [1, 1, 1, 1]} : vector<2x8x8x2xf32> to vector<2x8x8x1xf32>
    %250 = vector.extract_strided_slice %200 {offsets = [0, 2, 1, 0], sizes = [1, 1, 1, 2], strides = [1, 1, 1, 1]} : vector<3x3x2x2xf32> to vector<1x1x1x2xf32>
    %251 = vector.shape_cast %250 : vector<1x1x1x2xf32> to vector<2xf32>
    %252 = vector.shape_cast %251 : vector<2xf32> to vector<1x1x1x2xf32>
    %253 = vector.broadcast %249 : vector<2x8x8x1xf32> to vector<2x8x8x2xf32>
    %254 = vector.broadcast %252 : vector<1x1x1x2xf32> to vector<2x8x8x2xf32>
    %255 = arith.mulf %253, %254 : vector<2x8x8x2xf32>
    %256 = arith.addf %248, %255 : vector<2x8x8x2xf32>
    %c0_109 = arith.constant 0 : index
    %c4_110 = arith.constant 4 : index
    %c0_111 = arith.constant 0 : index
    %c0_112 = arith.constant 0 : index
    %257 = vector.load %arg15[%c0_109, %c4_110, %c0_111, %c0_112] : memref<2x16x16x2xf32, #tpu.memory_space<vmem>>, vector<2x8x8x2xf32>
    %258 = vector.extract_strided_slice %257 {offsets = [0, 0, 0, 0], sizes = [2, 8, 8, 1], strides = [1, 1, 1, 1]} : vector<2x8x8x2xf32> to vector<2x8x8x1xf32>
    %259 = vector.extract_strided_slice %200 {offsets = [1, 0, 0, 0], sizes = [1, 1, 1, 2], strides = [1, 1, 1, 1]} : vector<3x3x2x2xf32> to vector<1x1x1x2xf32>
    %260 = vector.shape_cast %259 : vector<1x1x1x2xf32> to vector<2xf32>
    %261 = vector.shape_cast %260 : vector<2xf32> to vector<1x1x1x2xf32>
    %262 = vector.broadcast %258 : vector<2x8x8x1xf32> to vector<2x8x8x2xf32>
    %263 = vector.broadcast %261 : vector<1x1x1x2xf32> to vector<2x8x8x2xf32>
    %264 = arith.mulf %262, %263 : vector<2x8x8x2xf32>
    %265 = arith.addf %256, %264 : vector<2x8x8x2xf32>
    %266 = vector.extract_strided_slice %257 {offsets = [0, 0, 0, 1], sizes = [2, 8, 8, 1], strides = [1, 1, 1, 1]} : vector<2x8x8x2xf32> to vector<2x8x8x1xf32>
    %267 = vector.extract_strided_slice %200 {offsets = [1, 0, 1, 0], sizes = [1, 1, 1, 2], strides = [1, 1, 1, 1]} : vector<3x3x2x2xf32> to vector<1x1x1x2xf32>
    %268 = vector.shape_cast %267 : vector<1x1x1x2xf32> to vector<2xf32>
    %269 = vector.shape_cast %268 : vector<2xf32> to vector<1x1x1x2xf32>
    %270 = vector.broadcast %266 : vector<2x8x8x1xf32> to vector<2x8x8x2xf32>
    %271 = vector.broadcast %269 : vector<1x1x1x2xf32> to vector<2x8x8x2xf32>
    %272 = arith.mulf %270, %271 : vector<2x8x8x2xf32>
    %273 = arith.addf %265, %272 : vector<2x8x8x2xf32>
    %c0_113 = arith.constant 0 : index
    %c4_114 = arith.constant 4 : index
    %c4_115 = arith.constant 4 : index
    %c0_116 = arith.constant 0 : index
    %274 = vector.load %arg15[%c0_113, %c4_114, %c4_115, %c0_116] : memref<2x16x16x2xf32, #tpu.memory_space<vmem>>, vector<2x8x8x2xf32>
    %275 = vector.extract_strided_slice %274 {offsets = [0, 0, 0, 0], sizes = [2, 8, 8, 1], strides = [1, 1, 1, 1]} : vector<2x8x8x2xf32> to vector<2x8x8x1xf32>
    %276 = vector.extract_strided_slice %200 {offsets = [1, 1, 0, 0], sizes = [1, 1, 1, 2], strides = [1, 1, 1, 1]} : vector<3x3x2x2xf32> to vector<1x1x1x2xf32>
    %277 = vector.shape_cast %276 : vector<1x1x1x2xf32> to vector<2xf32>
    %278 = vector.shape_cast %277 : vector<2xf32> to vector<1x1x1x2xf32>
    %279 = vector.broadcast %275 : vector<2x8x8x1xf32> to vector<2x8x8x2xf32>
    %280 = vector.broadcast %278 : vector<1x1x1x2xf32> to vector<2x8x8x2xf32>
    %281 = arith.mulf %279, %280 : vector<2x8x8x2xf32>
    %282 = arith.addf %273, %281 : vector<2x8x8x2xf32>
    %283 = vector.extract_strided_slice %274 {offsets = [0, 0, 0, 1], sizes = [2, 8, 8, 1], strides = [1, 1, 1, 1]} : vector<2x8x8x2xf32> to vector<2x8x8x1xf32>
    %284 = vector.extract_strided_slice %200 {offsets = [1, 1, 1, 0], sizes = [1, 1, 1, 2], strides = [1, 1, 1, 1]} : vector<3x3x2x2xf32> to vector<1x1x1x2xf32>
    %285 = vector.shape_cast %284 : vector<1x1x1x2xf32> to vector<2xf32>
    %286 = vector.shape_cast %285 : vector<2xf32> to vector<1x1x1x2xf32>
    %287 = vector.broadcast %283 : vector<2x8x8x1xf32> to vector<2x8x8x2xf32>
    %288 = vector.broadcast %286 : vector<1x1x1x2xf32> to vector<2x8x8x2xf32>
    %289 = arith.mulf %287, %288 : vector<2x8x8x2xf32>
    %290 = arith.addf %282, %289 : vector<2x8x8x2xf32>
    %c0_117 = arith.constant 0 : index
    %c4_118 = arith.constant 4 : index
    %c8_119 = arith.constant 8 : index
    %c0_120 = arith.constant 0 : index
    %291 = vector.load %arg15[%c0_117, %c4_118, %c8_119, %c0_120] : memref<2x16x16x2xf32, #tpu.memory_space<vmem>>, vector<2x8x8x2xf32>
    %292 = vector.extract_strided_slice %291 {offsets = [0, 0, 0, 0], sizes = [2, 8, 8, 1], strides = [1, 1, 1, 1]} : vector<2x8x8x2xf32> to vector<2x8x8x1xf32>
    %293 = vector.extract_strided_slice %200 {offsets = [1, 2, 0, 0], sizes = [1, 1, 1, 2], strides = [1, 1, 1, 1]} : vector<3x3x2x2xf32> to vector<1x1x1x2xf32>
    %294 = vector.shape_cast %293 : vector<1x1x1x2xf32> to vector<2xf32>
    %295 = vector.shape_cast %294 : vector<2xf32> to vector<1x1x1x2xf32>
    %296 = vector.broadcast %292 : vector<2x8x8x1xf32> to vector<2x8x8x2xf32>
    %297 = vector.broadcast %295 : vector<1x1x1x2xf32> to vector<2x8x8x2xf32>
    %298 = arith.mulf %296, %297 : vector<2x8x8x2xf32>
    %299 = arith.addf %290, %298 : vector<2x8x8x2xf32>
    %300 = vector.extract_strided_slice %291 {offsets = [0, 0, 0, 1], sizes = [2, 8, 8, 1], strides = [1, 1, 1, 1]} : vector<2x8x8x2xf32> to vector<2x8x8x1xf32>
    %301 = vector.extract_strided_slice %200 {offsets = [1, 2, 1, 0], sizes = [1, 1, 1, 2], strides = [1, 1, 1, 1]} : vector<3x3x2x2xf32> to vector<1x1x1x2xf32>
    %302 = vector.shape_cast %301 : vector<1x1x1x2xf32> to vector<2xf32>
    %303 = vector.shape_cast %302 : vector<2xf32> to vector<1x1x1x2xf32>
    %304 = vector.broadcast %300 : vector<2x8x8x1xf32> to vector<2x8x8x2xf32>
    %305 = vector.broadcast %303 : vector<1x1x1x2xf32> to vector<2x8x8x2xf32>
    %306 = arith.mulf %304, %305 : vector<2x8x8x2xf32>
    %307 = arith.addf %299, %306 : vector<2x8x8x2xf32>
    %c0_121 = arith.constant 0 : index
    %c8_122 = arith.constant 8 : index
    %c0_123 = arith.constant 0 : index
    %c0_124 = arith.constant 0 : index
    %308 = vector.load %arg15[%c0_121, %c8_122, %c0_123, %c0_124] : memref<2x16x16x2xf32, #tpu.memory_space<vmem>>, vector<2x8x8x2xf32>
    %309 = vector.extract_strided_slice %308 {offsets = [0, 0, 0, 0], sizes = [2, 8, 8, 1], strides = [1, 1, 1, 1]} : vector<2x8x8x2xf32> to vector<2x8x8x1xf32>
    %310 = vector.extract_strided_slice %200 {offsets = [2, 0, 0, 0], sizes = [1, 1, 1, 2], strides = [1, 1, 1, 1]} : vector<3x3x2x2xf32> to vector<1x1x1x2xf32>
    %311 = vector.shape_cast %310 : vector<1x1x1x2xf32> to vector<2xf32>
    %312 = vector.shape_cast %311 : vector<2xf32> to vector<1x1x1x2xf32>
    %313 = vector.broadcast %309 : vector<2x8x8x1xf32> to vector<2x8x8x2xf32>
    %314 = vector.broadcast %312 : vector<1x1x1x2xf32> to vector<2x8x8x2xf32>
    %315 = arith.mulf %313, %314 : vector<2x8x8x2xf32>
    %316 = arith.addf %307, %315 : vector<2x8x8x2xf32>
    %317 = vector.extract_strided_slice %308 {offsets = [0, 0, 0, 1], sizes = [2, 8, 8, 1], strides = [1, 1, 1, 1]} : vector<2x8x8x2xf32> to vector<2x8x8x1xf32>
    %318 = vector.extract_strided_slice %200 {offsets = [2, 0, 1, 0], sizes = [1, 1, 1, 2], strides = [1, 1, 1, 1]} : vector<3x3x2x2xf32> to vector<1x1x1x2xf32>
    %319 = vector.shape_cast %318 : vector<1x1x1x2xf32> to vector<2xf32>
    %320 = vector.shape_cast %319 : vector<2xf32> to vector<1x1x1x2xf32>
    %321 = vector.broadcast %317 : vector<2x8x8x1xf32> to vector<2x8x8x2xf32>
    %322 = vector.broadcast %320 : vector<1x1x1x2xf32> to vector<2x8x8x2xf32>
    %323 = arith.mulf %321, %322 : vector<2x8x8x2xf32>
    %324 = arith.addf %316, %323 : vector<2x8x8x2xf32>
    %c0_125 = arith.constant 0 : index
    %c8_126 = arith.constant 8 : index
    %c4_127 = arith.constant 4 : index
    %c0_128 = arith.constant 0 : index
    %325 = vector.load %arg15[%c0_125, %c8_126, %c4_127, %c0_128] : memref<2x16x16x2xf32, #tpu.memory_space<vmem>>, vector<2x8x8x2xf32>
    %326 = vector.extract_strided_slice %325 {offsets = [0, 0, 0, 0], sizes = [2, 8, 8, 1], strides = [1, 1, 1, 1]} : vector<2x8x8x2xf32> to vector<2x8x8x1xf32>
    %327 = vector.extract_strided_slice %200 {offsets = [2, 1, 0, 0], sizes = [1, 1, 1, 2], strides = [1, 1, 1, 1]} : vector<3x3x2x2xf32> to vector<1x1x1x2xf32>
    %328 = vector.shape_cast %327 : vector<1x1x1x2xf32> to vector<2xf32>
    %329 = vector.shape_cast %328 : vector<2xf32> to vector<1x1x1x2xf32>
    %330 = vector.broadcast %326 : vector<2x8x8x1xf32> to vector<2x8x8x2xf32>
    %331 = vector.broadcast %329 : vector<1x1x1x2xf32> to vector<2x8x8x2xf32>
    %332 = arith.mulf %330, %331 : vector<2x8x8x2xf32>
    %333 = arith.addf %324, %332 : vector<2x8x8x2xf32>
    %334 = vector.extract_strided_slice %325 {offsets = [0, 0, 0, 1], sizes = [2, 8, 8, 1], strides = [1, 1, 1, 1]} : vector<2x8x8x2xf32> to vector<2x8x8x1xf32>
    %335 = vector.extract_strided_slice %200 {offsets = [2, 1, 1, 0], sizes = [1, 1, 1, 2], strides = [1, 1, 1, 1]} : vector<3x3x2x2xf32> to vector<1x1x1x2xf32>
    %336 = vector.shape_cast %335 : vector<1x1x1x2xf32> to vector<2xf32>
    %337 = vector.shape_cast %336 : vector<2xf32> to vector<1x1x1x2xf32>
    %338 = vector.broadcast %334 : vector<2x8x8x1xf32> to vector<2x8x8x2xf32>
    %339 = vector.broadcast %337 : vector<1x1x1x2xf32> to vector<2x8x8x2xf32>
    %340 = arith.mulf %338, %339 : vector<2x8x8x2xf32>
    %341 = arith.addf %333, %340 : vector<2x8x8x2xf32>
    %c0_129 = arith.constant 0 : index
    %c8_130 = arith.constant 8 : index
    %c8_131 = arith.constant 8 : index
    %c0_132 = arith.constant 0 : index
    %342 = vector.load %arg15[%c0_129, %c8_130, %c8_131, %c0_132] : memref<2x16x16x2xf32, #tpu.memory_space<vmem>>, vector<2x8x8x2xf32>
    %343 = vector.extract_strided_slice %342 {offsets = [0, 0, 0, 0], sizes = [2, 8, 8, 1], strides = [1, 1, 1, 1]} : vector<2x8x8x2xf32> to vector<2x8x8x1xf32>
    %344 = vector.extract_strided_slice %200 {offsets = [2, 2, 0, 0], sizes = [1, 1, 1, 2], strides = [1, 1, 1, 1]} : vector<3x3x2x2xf32> to vector<1x1x1x2xf32>
    %345 = vector.shape_cast %344 : vector<1x1x1x2xf32> to vector<2xf32>
    %346 = vector.shape_cast %345 : vector<2xf32> to vector<1x1x1x2xf32>
    %347 = vector.broadcast %343 : vector<2x8x8x1xf32> to vector<2x8x8x2xf32>
    %348 = vector.broadcast %346 : vector<1x1x1x2xf32> to vector<2x8x8x2xf32>
    %349 = arith.mulf %347, %348 : vector<2x8x8x2xf32>
    %350 = arith.addf %341, %349 : vector<2x8x8x2xf32>
    %351 = vector.extract_strided_slice %342 {offsets = [0, 0, 0, 1], sizes = [2, 8, 8, 1], strides = [1, 1, 1, 1]} : vector<2x8x8x2xf32> to vector<2x8x8x1xf32>
    %352 = vector.extract_strided_slice %200 {offsets = [2, 2, 1, 0], sizes = [1, 1, 1, 2], strides = [1, 1, 1, 1]} : vector<3x3x2x2xf32> to vector<1x1x1x2xf32>
    %353 = vector.shape_cast %352 : vector<1x1x1x2xf32> to vector<2xf32>
    %354 = vector.shape_cast %353 : vector<2xf32> to vector<1x1x1x2xf32>
    %355 = vector.broadcast %351 : vector<2x8x8x1xf32> to vector<2x8x8x2xf32>
    %356 = vector.broadcast %354 : vector<1x1x1x2xf32> to vector<2x8x8x2xf32>
    %357 = arith.mulf %355, %356 : vector<2x8x8x2xf32>
    %358 = arith.addf %350, %357 : vector<2x8x8x2xf32>
    %cst_133 = arith.constant 0.000000e+00 : f32
    %359 = vector.broadcast %cst_133 : f32 to vector<2x8x8x2xf32>
    %360 = arith.maximumf %358, %359 : vector<2x8x8x2xf32>
    %c0_134 = arith.constant 0 : index
    %c0_135 = arith.constant 0 : index
    %361 = vector.load %arg12[%c0_134, %c0_135] : memref<1x2xf32, #tpu.memory_space<vmem>>, vector<1x2xf32>
    %362 = vector.shape_cast %361 : vector<1x2xf32> to vector<1x1x1x2xf32>
    %363 = vector.broadcast %362 : vector<1x1x1x2xf32> to vector<2x8x8x2xf32>
    %364 = arith.mulf %360, %363 : vector<2x8x8x2xf32>
    %cst_136 = arith.constant dense<0.000000e+00> : vector<2x8x8xf32>
    %365 = vector.multi_reduction <add>, %364, %cst_136 [3] : vector<2x8x8x2xf32> to vector<2x8x8xf32>
    %366 = vector.shape_cast %365 : vector<2x8x8xf32> to vector<2x8x8x1xf32>
    %c0_137 = arith.constant 0 : index
    %c0_138 = arith.constant 0 : index
    %367 = vector.load %arg13[%c0_137, %c0_138] : memref<1x1xf32, #tpu.memory_space<vmem>>, vector<1x1xf32>
    %368 = vector.shape_cast %367 : vector<1x1xf32> to vector<1x1x1x1xf32>
    %369 = vector.broadcast %368 : vector<1x1x1x1xf32> to vector<2x8x8x1xf32>
    %370 = arith.addf %366, %369 : vector<2x8x8x1xf32>
    %371 = vector.shape_cast %27 : vector<2x32xf32> to vector<2x1x1x32xf32>
    %372 = vector.broadcast %370 : vector<2x8x8x1xf32> to vector<2x8x8x32xf32>
    %373 = vector.broadcast %371 : vector<2x1x1x32xf32> to vector<2x8x8x32xf32>
    %374 = arith.mulf %372, %373 : vector<2x8x8x32xf32>
    %cst_139 = arith.constant 5.000000e-01 : f32
    %375 = vector.broadcast %cst_139 : f32 to vector<2x8x8x32xf32>
    %376 = arith.mulf %375, %374 : vector<2x8x8x32xf32>
    %377 = math.tanh %376 : vector<2x8x8x32xf32>
    %cst_140 = arith.constant 5.000000e-01 : f32
    %378 = vector.broadcast %cst_140 : f32 to vector<2x8x8x32xf32>
    %379 = arith.mulf %378, %377 : vector<2x8x8x32xf32>
    %cst_141 = arith.constant 1.500000e+00 : f32
    %380 = vector.broadcast %cst_141 : f32 to vector<2x8x8x32xf32>
    %381 = arith.addf %380, %379 : vector<2x8x8x32xf32>
    %382 = arith.mulf %381, %8 : vector<2x8x8x32xf32>
    %c0_142 = arith.constant 0 : index
    %c0_143 = arith.constant 0 : index
    %c0_144 = arith.constant 0 : index
    %c0_145 = arith.constant 0 : index
    %383 = vector.load %arg14[%c0_142, %c0_143, %c0_144, %c0_145] : memref<2x8x8x32xf32, #tpu.memory_space<vmem>>, vector<2x8x8x32xf32>
    tpu.vector_store %arg14[%c0_142, %c0_143, %c0_144, %c0_145], %382 {strides = array<i32>} : memref<2x8x8x32xf32, #tpu.memory_space<vmem>>, vector<2x8x8x32xf32>,
    return
  }
  func.func @transform_0(%arg0: i32) -> (i32, i32, i32, i32) {
    %c0_i32 = arith.constant 0 : i32
    %c0_i32_0 = arith.constant 0 : i32
    %c0_i32_1 = arith.constant 0 : i32
    %c0_i32_2 = arith.constant 0 : i32
    return %arg0, %c0_i32, %c0_i32_0, %c0_i32_1 : i32, i32, i32, i32
  }
  func.func @transform_1(%arg0: i32) -> (i32, i32) {
    %c0_i32 = arith.constant 0 : i32
    %c0_i32_0 = arith.constant 0 : i32
    %c0_i32_1 = arith.constant 0 : i32
    return %c0_i32, %c0_i32_0 : i32, i32
  }
  func.func @transform_2(%arg0: i32) -> (i32, i32) {
    %c0_i32 = arith.constant 0 : i32
    %c0_i32_0 = arith.constant 0 : i32
    %c0_i32_1 = arith.constant 0 : i32
    return %c0_i32, %c0_i32_0 : i32, i32
  }
  func.func @transform_3(%arg0: i32) -> (i32, i32) {
    %c0_i32 = arith.constant 0 : i32
    %c0_i32_0 = arith.constant 0 : i32
    %c0_i32_1 = arith.constant 0 : i32
    return %c0_i32, %c0_i32_0 : i32, i32
  }
  func.func @transform_4(%arg0: i32) -> (i32, i32) {
    %c0_i32 = arith.constant 0 : i32
    %c0_i32_0 = arith.constant 0 : i32
    %c0_i32_1 = arith.constant 0 : i32
    return %c0_i32, %c0_i32_0 : i32, i32
  }
  func.func @transform_5(%arg0: i32) -> (i32, i32) {
    %c0_i32 = arith.constant 0 : i32
    %c0_i32_0 = arith.constant 0 : i32
    %c0_i32_1 = arith.constant 0 : i32
    return %c0_i32, %c0_i32_0 : i32, i32
  }
  func.func @transform_6(%arg0: i32) -> (i32, i32) {
    %c0_i32 = arith.constant 0 : i32
    %c0_i32_0 = arith.constant 0 : i32
    %c0_i32_1 = arith.constant 0 : i32
    return %c0_i32, %c0_i32_0 : i32, i32
  }
  func.func @transform_7(%arg0: i32) -> (i32, i32, i32, i32) {
    %c0_i32 = arith.constant 0 : i32
    %c0_i32_0 = arith.constant 0 : i32
    %c0_i32_1 = arith.constant 0 : i32
    %c0_i32_2 = arith.constant 0 : i32
    %c0_i32_3 = arith.constant 0 : i32
    return %c0_i32, %c0_i32_0, %c0_i32_1, %c0_i32_2 : i32, i32, i32, i32
  }
  func.func @transform_8(%arg0: i32) -> (i32, i32) {
    %c0_i32 = arith.constant 0 : i32
    %c0_i32_0 = arith.constant 0 : i32
    %c0_i32_1 = arith.constant 0 : i32
    return %c0_i32, %c0_i32_0 : i32, i32
  }
  func.func @transform_9(%arg0: i32) -> (i32, i32, i32, i32) {
    %c0_i32 = arith.constant 0 : i32
    %c0_i32_0 = arith.constant 0 : i32
    %c0_i32_1 = arith.constant 0 : i32
    %c0_i32_2 = arith.constant 0 : i32
    %c0_i32_3 = arith.constant 0 : i32
    return %c0_i32, %c0_i32_0, %c0_i32_1, %c0_i32_2 : i32, i32, i32, i32
  }
  func.func @transform_10(%arg0: i32) -> (i32, i32) {
    %c0_i32 = arith.constant 0 : i32
    %c0_i32_0 = arith.constant 0 : i32
    %c0_i32_1 = arith.constant 0 : i32
    return %c0_i32, %c0_i32_0 : i32, i32
  }
  func.func @transform_11(%arg0: i32) -> (i32, i32) {
    %c0_i32 = arith.constant 0 : i32
    %c0_i32_0 = arith.constant 0 : i32
    %c0_i32_1 = arith.constant 0 : i32
    return %c0_i32, %c0_i32_0 : i32, i32
  }
  func.func @transform_12(%arg0: i32) -> (i32, i32) {
    %c0_i32 = arith.constant 0 : i32
    %c0_i32_0 = arith.constant 0 : i32
    %c0_i32_1 = arith.constant 0 : i32
    return %c0_i32, %c0_i32_0 : i32, i32
  }
  func.func @transform_13(%arg0: i32) -> (i32, i32, i32, i32) {
    %c0_i32 = arith.constant 0 : i32
    %c0_i32_0 = arith.constant 0 : i32
    %c0_i32_1 = arith.constant 0 : i32
    %c0_i32_2 = arith.constant 0 : i32
    return %arg0, %c0_i32, %c0_i32_0, %c0_i32_1 : i32, i32, i32, i32
  }
}

</mosaic_0001>

<bundles_post_ra>
// kernel: tpu_custom_call.1
= control target key start
LH: loop header
LB: loop body
LE: loop exit
PB: predicated region body
PF: predicated region fallthrough
CT: control target
= control target key end

     0   :  { %s10020_s0 = inlined_call_operand.hbm [shape: f32[4,8,8,32], index: 0, kind: input, shape index: {}]   ;;  %s10021_s1 = inlined_call_operand.vmem [shape: bf16[32,2], index: 1, kind: input, shape index: {}]   ;;  %s10022_s2 = inlined_call_operand.vmem [shape: f32[1,2], index: 2, kind: input, shape index: {}]   ;;  %s10023_s3 = inlined_call_operand.vmem [shape: bf16[2,32], index: 3, kind: input, shape index: {}]   ;;  %s10024_s4 = inlined_call_operand.vmem [shape: f32[1,32], index: 4, kind: input, shape index: {}]   ;;  %s10025_s5 = inlined_call_operand.vmem [shape: bf16[32,2], index: 5, kind: input, shape index: {}]   ;;  %s10026_s6 = inlined_call_operand.vmem [shape: f32[1,2], index: 6, kind: input, shape index: {}]   ;;  %s10027_s7 = inlined_call_operand.vmem [shape: f32[3,3,2,2], index: 7, kind: input, shape index: {}]   ;;  %s10028_s8 = inlined_call_operand.vmem [shape: f32[1,2], index: 8, kind: input, shape index: {}]   ;;  %s10029_s9 = inlined_call_operand.vmem [shape: f32[3,3,2,2], index: 9, kind: input, shape index: {}]   ;;  %s10030_s10 = inlined_call_operand.vmem [shape: f32[1,2], index: 10, kind: input, shape index: {}]   ;;  %s10031_s11 = inlined_call_operand.vmem [shape: f32[1,2], index: 11, kind: input, shape index: {}]   ;;  %s10032_s12 = inlined_call_operand.<no memory space> [shape: f32[1,1], index: 12, kind: input, shape index: {}]   ;;  %s10033_s13 = inlined_call_operand.hbm [shape: f32[4,8,8,32], index: 13, kind: output, shape index: {}]  }
   0x1   :  { %v18_v0 = vstv %s10032_s12 }
   0x2   :  { %19 = vst [vmem:[#allocation3] sm:$0x1] %v18_v0 }
   0x3   :  { %20 = vsyncpa [#allocation5], 0 }
   0x4   :  { %22 = vsyncpa [#allocation5 + $0x1], 0 }
   0x5   :  { %23 = vsyncpa [#allocation6], 0 }
   0x6   :  { %25 = vsyncpa [#allocation6 + $0x1], 0  ;;  %s5801_s27 = smov 0   ;;  %s5803_s28 = smov 0  }
   0x7   :  { %s5805_s29 = smov 0   ;;  %s5807_s30 = smov 0  }
   0x8 LB: > { %10064 = sst [smem:[#allocation10_spill]] %s5706_s27  ;;  %s5822_s12 = sadd.s32 4294967295, %s5718_s30   ;;  %s5718_s30 = sphi %s5807_s30, %s11015_s30   ;;  %s5714_s29 = sphi %s5805_s29, %s11017_s29   ;;  %s5710_s28 = sphi %s5803_s28, %s11019_s28   ;;  %s5706_s27 = sphi %s5801_s27, %s11018_s27  }
   0x9   : > { %10065 = sst [smem:[#allocation11_spill]] %s5714_s29  ;;  %s5329_s14 = sadd.s32 4294967294, %s5718_s30  }
   0xa   : > { %s5826_s15 = sadd.s32 1, %s5718_s30   ;;  %s38_s16 = sadd.s32 1, %s5714_s29 }
   0xb   : > { %10066 = sst [smem:[#allocation12_spill]] %s5826_s15  ;;  %s35_s17 = ssub.s32 %s5718_s30, %s5826_s15 }
   0xc   : > { %p45_p0 = scmp.ne.s32.totalorder %s5714_s29, %s5710_s28  ;;  %p36_p1 = scmp.eq.s32.totalorder %s35_s17, 0 }
   0xd   : > { %p46_p2 = scmp.eq.s32.totalorder %s5718_s30, 0  ;;  %p51_p3 = scmp.ne.s32.totalorder %s5710_s28, %s5706_s27 }
   0xe   : > { %p52_p4 = scmp.eq.s32.totalorder %s5822_s12, 0  ;;  %p327_p7 = scmp.eq.s32.totalorder %s5822_s12, 1 }
   0xf   : > { %s5838_s18 = scalar_select %p36_p1, %s5714_s29, %s38_s16  }
  0x10   : > { %p5840_p5 = por %p46_p2, %p45_p0  ;;  %p5844_p6 = por %p52_p4, %p51_p3 }
  0x11   : > { %10067 = sst [smem:[#allocation13_spill]] %s5838_s18  ;;  %p333_p8 = scmp.eq.s32.totalorder %s5329_s14, 1 }
  0x12   : > { %p5395_p10 = scmp.lt.s32.totalorder %s5718_s30, 2  ;;  %p5851_p11 = por %p327_p7, %p45_p0 }
  0x13   : > { %p5855_p12 = por %p333_p8, %p51_p3  ;;  %s389_s23 = sand.u32 1, %s5714_s29  }
  0x14   : > { %s10070_s21 = scalar_select %p5851_p11, 1, 0 }
  0x15   : > { %s10072_s22 = scalar_select %p5855_p12, 1, 0 }
  0x16   : > { %10071 = sst [smem:[#allocation14_spill]] %s10070_s21  ;;  %s5372_s24 = sshll.u32 %s5718_s30, 7 }
  0x17   : > { %10073 = sst [smem:[#allocation15_spill]] %s10072_s22  ;;  %s5332_s25 = sshll.u32 %s389_s23, 7 }
  0x18   : > { %s399_s17 = scalar_lea.hbm %s10020_s0, %s5372_s24  ;;  %s393_s14 = scalar_lea.vmem [#allocation4], %s5332_s25 }
  0x19   : > { %s400_s18 = sshll.u32 %s399_s17, 4  ;;  %s402_s15 = sshll.u32 %s393_s14, 4  ;;  %s401_s18 = int_to_ptr.hbm [resolvable:$true] %s400_s18  ;;  %s403_s15 = int_to_ptr.vmem [resolvable:$true] %s402_s15 }
  0x1a   : > { %p5866_p13 = pnand %p5395_p10, %p5840_p5  ;;  %p5336_p0 = scmp.ge.s32.totalorder %s5718_s30, 1 }
  0x1b   : > { %p410_p1 = scmp.lt.s32.totalorder %s5718_s30, 3  ;;  %s390_s29 = scalar_lea.sflag [#allocation5], %s389_s23 }
  0x1c   : > { %s5622_s22 = sshra.s32 %s401_s18, 4  ;;  %p5626_p3 = pneg %p5866_p13  ;;  %s5623_s22 = int_to_ptr.hbm [resolvable:$true] %s5622_s22 }
  0x1d   : > { %s5624_s21 = scalar_lea.hbm %s5623_s22, 128  ;;  %s5629_s19 = scalar_lea.hbm %s10020_s0, 256 }
  0x1e   : > { %p5625_p2 = scmp.ne.s32.totalorder %s5623_s22, %s5624_s21  ;;  %p5630_p5 = scmp.lt.s32.totalorder %s5623_s22, %s10020_s0 }
  0x1f   : > { %p5631_p8 = scmp.lt.s32.totalorder %s5629_s19, %s5624_s21 }
  0x20   : > { %p5627_p4 = pnand %p5626_p3, %p5625_p2 }
  0x21   : > { %p5632_p10 = por %p5631_p8, %p5630_p5 }
  0x22   : > { %p5628_p7 = pneg %p5627_p4 }
  0x24   : > { %p5633_p9 = pnand %p5632_p10, %p5628_p7 }
  0x26   : > { %5636 = shalt.err (!%p5633_p9)
}
  0x27   : > { %s5720_s23 = smov 128   ;;  %s5721_s17 = smov 8  }
  0x28   : > { %5390 = dma.hbm_to_vmem [thread:$0]  (!%p5866_p13), %s401_s18, 2048, %s403_s15, %s390_s29, %s5720_s23, %s5720_s23, %s5721_s17  }
  0x29   : > { %p411_p2 = pnand %p5336_p0, %p410_p1 }
  0x2b   : > { %414 = sbr.rel (%p411_p2) target bundleno = 2261 (0x8d5), region = 72 }
  0x30   : > { %s5887_s14 = sand.u32 1, %s5710_s28  }
  0x31   : > { %s5337_s21 = sshll.u32 %s5887_s14, 7  ;;  %s417_s22 = scalar_lea.sflag [#allocation5], %s5887_s14 }
  0x32   : > { %s5893_s24 = scalar_lea.vmem [#allocation4], %s5337_s21 }
  0x33   : > { %5697 = dma.done.wait (%p5844_p6), %s417_s22, 2048  }
  0x34   : > { %5699 = vsyncadd (%p5844_p6), %s417_s22, 4294965248  ;;  %vm467_vm0 = vcmask 15360   ;;  %v10043_v1 = vmov 0   ;;  %v5723_v2 = vmov 0.0   ;;  %vm551_vm1 = vcmask 261120   ;;  %v5919_v3 = vld [vmem:[%s10025_s5 + $0x8] sm:$0xff] }
  0x35   : > { %5438 = vset.pattern.permute.xlu1 %v10043_v1  ;;  %472 = vst.msk [vmem:[#allocation2 + $0x20] sm:$0xff] %vm467_vm0, %v5723_v2  ;;  %5439 = vset.pattern.permute.xlu2 %v10043_v1  ;;  %v5924_v4 = vld [vmem:[%s10025_s5] sm:$0xff]  ;;  %v5932_v7 = vld [vmem:[%s5893_s24 + $0x8] sm:$0xff]  ;;  %v5935_v8 = vld [vmem:[%s5893_s24 + $0x10] sm:$0xff]  ;;  %v5724_v10 = vmov 64.0   ;;  %vm617_vm3 = vcmask 1041409  }
  0x36   : > { %468 = vst.msk [vmem:[#allocation2] sm:$0xff] %vm467_vm0, %v5723_v2  ;;  %5437 = vset.pattern.permute.xlu0 %v10043_v1  ;;  %v5927_v5 = vld [vmem:[%s5893_s24] sm:$0xff]  ;;  %5543 = vrcp.f32 %v5724_v10  ;;  %5379 = vmatpush.bf16.msra.mxu2 %v5919_v3  ;;  %v5943_v11 = vld [vmem:[%s5893_s24 + $0x18] sm:$0xff]  ;;  %v540_v13 = vld [vmem:[%s5893_s24 + $0x28] sm:$0xff]  ;;  %v553_v14 = vsel %vm551_vm1, %v5932_v7, 0.0  ;;  %v555_v15 = vsel %vm551_vm1, %v5935_v8, 0.0 }
  0x37   : > { %469 = vst.msk [vmem:[#allocation2 + $0x8] sm:$0xff] %vm467_vm0, %v5723_v2  ;;  %v552_v9 = vsel %vm551_vm1, %v5927_v5, 0.0  ;;  %v539_v12 = vld [vmem:[%s5893_s24 + $0x20] sm:$0xff]  ;;  %5380 = vmatpush.bf16.msra.mxu3 %v5919_v3  ;;  %v5958_v18 = vld [vmem:[%s5893_s24 + $0x48] sm:$0xff]  ;;  %v557_v19 = vsel %vm551_vm1, %v5943_v11, 0.0  ;;  %v545_v20 = vld [vmem:[%s5893_s24 + $0x50] sm:$0xff] }
  0x38   : > { %470 = vst.msk [vmem:[#allocation2 + $0x10] sm:$0xff] %vm467_vm0, %v5723_v2  ;;  %v554_v16 = vadd.f32 %v553_v14, %v552_v9  ;;  %v5955_v17 = vld [vmem:[%s5893_s24 + $0x40] sm:$0xff]  ;;  %v546_v21 = vld [vmem:[%s5893_s24 + $0x58] sm:$0xff]  ;;  %v574_v23 = vsel %vm551_vm1, %v5958_v18, 0.0  ;;  %v677_v25 = vpack.c.bf16 %v540_v13, %v539_v12  ;;  %v5976_v27 = vld [vmem:[%s5893_s24 + $0x68] sm:$0xff]  ;;  %v576_v30 = vsel %vm551_vm1, %v545_v20, 0.0 }
  0x39   : > { %471 = vst.msk [vmem:[#allocation2 + $0x18] sm:$0xff] %vm467_vm0, %v5723_v2  ;;  %v573_v22 = vsel %vm551_vm1, %v5955_v17, 0.0  ;;  %v5973_v26 = vld [vmem:[%s5893_s24 + $0x60] sm:$0xff]  ;;  %v5979_v28 = vld [vmem:[%s5893_s24 + $0x70] sm:$0xff]  ;;  %v559_v31 = vsel %vm551_vm1, %v539_v12, 0.0  ;;  %v578_v32 = vsel %vm551_vm1, %v546_v21, 0.0  ;;  %v680_v37 = vpack.c.bf16 %v546_v21, %v545_v20 }
  0x3a   : > { %473 = vst.msk [vmem:[#allocation2 + $0x28] sm:$0xff] %vm467_vm0, %v5723_v2  ;;  %v556_v24 = vadd.f32 %v555_v15, %v554_v16  ;;  %v575_v29 = vadd.f32 %v574_v23, %v573_v22  ;;  %5381 = vmatpush.bf16.msra.mxu2 %v5924_v4  ;;  %v5988_v33 = vld [vmem:[%s5893_s24 + $0x30] sm:$0xff]  ;;  %v561_v40 = vsel %vm551_vm1, %v540_v13, 0.0  ;;  %v580_v41 = vsel %vm551_vm1, %v5973_v26, 0.0  ;;  %v5374_v44 = vld [vmem:[%s10021_s1 + $0x8] sm:$0xff]  ;;  %v6016_v46 = vld [vmem:[%s5893_s24 + $0x78] sm:$0xff] }
  0x3b   : > { %474 = vst.msk [vmem:[#allocation2 + $0x30] sm:$0xff] %vm467_vm0, %v5723_v2  ;;  %5382 = vmatpush.bf16.msra.mxu3 %v5924_v4  ;;  %v582_v42 = vsel %vm551_vm1, %v5976_v27, 0.0  ;;  %v584_v43 = vsel %vm551_vm1, %v5979_v28, 0.0  ;;  %v542_v49 = vld [vmem:[%s5893_s24 + $0x38] sm:$0xff]  ;;  %v563_v50 = vsel %vm551_vm1, %v5988_v33, 0.0  ;;  %641 = vmatpush.bf16.msra.mxu0 %v5374_v44  ;;  %v586_v59 = vsel %vm551_vm1, %v6016_v46, 0.0 }
  0x3c   : > { %v824_v6 = vld [vmem:[#allocation2 + $0x20] sm:$0xff]  ;;  %475 = vst.msk [vmem:[#allocation2 + $0x38] sm:$0xff] %vm467_vm0, %v5723_v2  ;;  %v5990_v34 = vpop.eup %5543  ;;  %v558_v35 = vadd.f32 %v557_v19, %v556_v24  ;;  %v577_v36 = vadd.f32 %v576_v30, %v575_v29  ;;  %v565_v55 = vsel %vm551_vm1, %v542_v49, 0.0  ;;  %v678_v15 = vpack.c.bf16 %v542_v49, %v5988_v33  ;;  %s9920_s27 = scalar_lea.vmem [#allocation7], %s5337_s21  ;;  %s5378_s21 = sshll.u32 %s5822_s12, 7 }
  0x3d   : > { %850 = vperm.xlu1 %5438, %v824_v6   ;;  %476 = vst.msk [vmem:[#allocation2 + $0x100] sm:$0xff] %vm467_vm0, %v5723_v2  ;;  %v5997_v39 = vld [vmem:[#allocation2] sm:$0xff]  ;;  %5359 = vmatmul.msk.bf16.vlgmr.msra.gmra.mxu2 %vm551_vm1, %v677_v25  ;;  %v595_v51 = vmul.f32 64.0, %v5990_v34  ;;  %v681_v21 = vpack.c.bf16 %v5976_v27, %v5973_v26  ;;  %vm599_vm2 = vweird.f32 %v5990_v34  ;;  %v10041_v29 = vmov 1   ;;  %s5252_s18 = scalar_lea.hbm %s10033_s13, %s5378_s21  ;;  %s5253_s25 = sshll.u32 %s9920_s27, 4  ;;  %s5254_s25 = int_to_ptr.vmem [resolvable:$true] %s5253_s25 }
  0x3e   : > { %477 = vst.msk [vmem:[#allocation2 + $0x108] sm:$0xff] %vm467_vm0, %v5723_v2  ;;  %840 = vperm.xlu0 %5437, %v5997_v39   ;;  %v560_v45 = vadd.f32 %v559_v31, %v558_v35  ;;  %v579_v47 = vadd.f32 %v578_v32, %v577_v36  ;;  %5362 = vmatmul.msk.bf16.vlgmr.msra.gmra.mxu3 %vm551_vm1, %v680_v37  ;;  %v5373_v54 = vld [vmem:[%s10021_s1] sm:$0xff]  ;;  %vm502_vm4 = vcmask 11264   ;;  %vm658_vm5 = vcmask 1040384   ;;  %s5255_s19 = sshll.u32 %s5252_s18, 4  ;;  %s5240_s12 = scalar_lea.sflag [#allocation6], %s5887_s14  ;;  %s5256_s19 = int_to_ptr.hbm [resolvable:$true] %s5255_s19 }
  0x3f   : > { %478 = vst.msk [vmem:[#allocation2 + $0x110] sm:$0xff] %vm467_vm0, %v5723_v2  ;;  %v823_v58 = vld [vmem:[#allocation2 + $0x10] sm:$0xff]  ;;  %v596_v60 = vsub.f32 1.0, %v595_v51  ;;  %642 = vmatpush.bf16.msra.mxu0 %v5373_v54  ;;  %v1048_v33 = vld [vmem:[#allocation2 + $0x4] sm:$0xff]  ;;  %v682_v44 = vpack.c.bf16 %v6016_v46, %v5979_v28  ;;  %s5666_s26 = sshra.s32 %s5256_s19, 4  ;;  %s5672_s22 = scalar_lea.hbm %s10033_s13, 256  ;;  %s5667_s26 = int_to_ptr.hbm [resolvable:$true] %s5666_s26 }
  0x40   : > { %479 = vst.msk [vmem:[#allocation2 + $0x118] sm:$0xff] %vm467_vm0, %v5723_v2  ;;  %v562_v52 = vadd.f32 %v561_v40, %v560_v45  ;;  %v581_v53 = vadd.f32 %v580_v41, %v579_v47  ;;  %v1275_v47 = vld [vmem:[#allocation2 + $0x18] sm:$0xff]  ;;  %s5668_s16 = scalar_lea.hbm %s5667_s26, 128  ;;  %p5673_p0 = scmp.lt.s32.totalorder %s5667_s26, %s10033_s13 }
  0x41   : > { %480 = vst.msk [vmem:[#allocation2 + $0x120] sm:$0xff] %vm467_vm0, %v5723_v2  ;;  %v597_v10 = vmul.f32 %v5990_v34, %v596_v60  ;;  %v1050_v45 = vld [vmem:[#allocation2 + $0x24] sm:$0xff]  ;;  %v650_v60 = vld [vmem:[%s10023_s3] sm:$0x1]  ;;  %p5669_p6 = scmp.ne.s32.totalorder %s5667_s26, %s5668_s16  ;;  %p5674_p1 = scmp.lt.s32.totalorder %s5672_s22, %s5668_s16 }
  0x42   : > { %481 = vst.msk [vmem:[#allocation2 + $0x128] sm:$0xff] %vm467_vm0, %v5723_v2  ;;  %v5995_v38 = vld [vmem:[#allocation2 + $0x30] sm:$0xff]  ;;  %v583_v56 = vadd.f32 %v582_v42, %v581_v53  ;;  %v564_v57 = vadd.f32 %v563_v50, %v562_v52  ;;  %v1276_v50 = vld [vmem:[#allocation2 + $0x28] sm:$0xff] }
  0x43   : > { %482 = vst.msk [vmem:[#allocation2 + $0x130] sm:$0xff] %vm467_vm0, %v5723_v2  ;;  %v598_v20 = vadd.f32 %v5990_v34, %v597_v10  ;;  %v1051_v28 = vld [vmem:[#allocation2 + $0x34] sm:$0xff]  ;;  %p5670_p9 = pnand %p5669_p6, %p5851_p11  ;;  %p5675_p3 = por %p5674_p1, %p5673_p0 }
  0x44   : > { %483 = vst.msk [vmem:[#allocation2 + $0x138] sm:$0xff] %vm467_vm0, %v5723_v2  ;;  %v6018_v48 = vld [vmem:[#allocation2 + $0x100] sm:$0xff]  ;;  %v585_v61 = vadd.f32 %v584_v43, %v583_v56  ;;  %v566_v63 = vadd.f32 %v565_v55, %v564_v57  ;;  %v1277_v51 = vld [vmem:[#allocation2 + $0x38] sm:$0xff] }
  0x45   : > { %485 = vst.msk [vmem:[#allocation2 + $0xc0] sm:$0xff] %vm467_vm0, %v5723_v2  ;;  %855 = vperm.xlu1 %5438, %v5995_v38   ;;  %880 = vperm.xlu2 %5439, %v6018_v48   ;;  %v600_v26 = vsel %vm599_vm2, %v5990_v34, %v598_v20  ;;  %v1056_v42 = vld [vmem:[#allocation2 + $0x104] sm:$0xff]  ;;  %p5671_p13 = pneg %p5670_p9 }
  0x46   : > { %486 = vst.msk [vmem:[#allocation2 + $0xc8] sm:$0xff] %vm467_vm0, %v5723_v2  ;;  %845 = vperm.xlu0 %5437, %v823_v58   ;;  %v587_v6 = vadd.f32 %v586_v59, %v585_v61  ;;  %v567_v9 = vrot.slane %v566_v63, 4  ;;  %v831_v19 = vld [vmem:[#allocation2 + $0x110] sm:$0xff]  ;;  %v1282_v53 = vld [vmem:[#allocation2 + $0x108] sm:$0xff] }
  0x47   : > { %487 = vst.msk [vmem:[#allocation2 + $0xd0] sm:$0xff] %vm467_vm0, %v5723_v2  ;;  %v1057_v46 = vld [vmem:[#allocation2 + $0x114] sm:$0xff]  ;;  %p5676_p4 = pnand %p5675_p3, %p5671_p13 }
  0x48   : > { %488 = vst.msk [vmem:[#allocation2 + $0xd8] sm:$0xff] %vm467_vm0, %v5723_v2  ;;  %v832_v62 = vld [vmem:[#allocation2 + $0x120] sm:$0xff]  ;;  %v568_v12 = vadd.f32 %v567_v9, %v566_v63  ;;  %v588_v13 = vrot.slane %v587_v6, 4  ;;  %v6095_v49 = vld [vmem:[#allocation2 + $0x118] sm:$0xff] }
  0x49   : > { %489 = vst.msk [vmem:[#allocation2 + $0xe0] sm:$0xff] %vm467_vm0, %v5723_v2  ;;  %v1284_v52 = vld [vmem:[#allocation2 + $0x128] sm:$0xff]  ;;  %v6164_v63 = vld [vmem:[%s10026_s6] ss:$0 sm:$0xff] }
  0x4a   : > { %490 = vst.msk [vmem:[#allocation2 + $0xe8] sm:$0xff] %vm467_vm0, %v5723_v2  ;;  %v6047_v0 = vld [vmem:[#allocation2 + $0x130] sm:$0xff]  ;;  %v569_v14 = vrot.slane %v568_v12, 2  ;;  %v589_v16 = vadd.f32 %v588_v13, %v587_v6 }
  0x4b   : > { %491 = vst.msk [vmem:[#allocation2 + $0xf0] sm:$0xff] %vm467_vm0, %v5723_v2  ;;  %v1285_v56 = vld [vmem:[#allocation2 + $0x138] sm:$0xff] }
  0x4c   : > { %492 = vst.msk [vmem:[#allocation2 + $0xf8] sm:$0xff] %vm467_vm0, %v5723_v2  ;;  %v570_v22 = vadd.f32 %v569_v14, %v568_v12  ;;  %v590_v23 = vrot.slane %v589_v16, 2 }
  0x4d   : > { %493 = vst.msk [vmem:[#allocation2 + $0x1c0] sm:$0xff] %vm467_vm0, %v5723_v2  ;;  %890 = vperm.xlu1 %5438, %v832_v62   ;;  %895 = vperm.xlu2 %5439, %v6047_v0   ;;  %v660_v62 = vsel %vm658_vm5, %v650_v60, 0 }
  0x4e   : > { %494 = vst.msk [vmem:[#allocation2 + $0x1c8] sm:$0xff] %vm467_vm0, %v5723_v2  ;;  %885 = vperm.xlu0 %5437, %v831_v19   ;;  %5360 = vmatmul.msk.bf16.gmra.mxu2 %vm551_vm1, %v678_v15  ;;  %v571_v24 = vrot.slane %v570_v22, 1  ;;  %v591_v25 = vadd.f32 %v590_v23, %v589_v16 }
  0x4f   : > { %495 = vst.msk [vmem:[#allocation2 + $0x1d0] sm:$0xff] %vm467_vm0, %v5723_v2  ;;  %5363 = vmatmul.msk.bf16.gmra.mxu3 %vm551_vm1, %v681_v21  ;;  %669 = vmatpush.bf16.msra.mxu1 %v660_v62 }
  0x50   : > { %496 = vst.msk [vmem:[#allocation2 + $0x1d8] sm:$0xff] %vm467_vm0, %v5723_v2  ;;  %v572_v27 = vadd.f32 %v571_v24, %v570_v22  ;;  %v592_v30 = vrot.slane %v591_v25, 1 }
  0x51   : > { %497 = vst.msk [vmem:[#allocation2 + $0x1e0] sm:$0xff] %vm467_vm0, %v5723_v2 }
  0x52   : > { %498 = vst.msk [vmem:[#allocation2 + $0x1e8] sm:$0xff] %vm467_vm0, %v5723_v2  ;;  %v593_v31 = vadd.f32 %v592_v30, %v591_v25  ;;  %v601_v32 = vmul.f32 %v600_v26, %v572_v27 }
  0x53   : > { %499 = vst.msk [vmem:[#allocation2 + $0x1f0] sm:$0xff] %vm467_vm0, %v5723_v2  ;;  %733 = vmatpush.bf16.msrb.mxu1 %v5919_v3 }
  0x54   : > { %500 = vst.msk [vmem:[#allocation2 + $0x1f8] sm:$0xff] %vm467_vm0, %v5723_v2  ;;  %v602_v35 = vmul.f32 %v600_v26, %v593_v31  ;;  %v603_v36 = vpack.c.bf16 %v601_v32, %v601_v32 }
  0x55   : > { %5440 = vset.pattern.permute.xlu1 %v10041_v29  ;;  %5441 = vset.pattern.permute.xlu2 %v10041_v29  ;;  %513 = vst.msk [vmem:[#allocation2 + $0x160] sm:$0xf] %vm502_vm4, %v5723_v2 }
  0x56   : > { %952 = vperm.xlu1 %5440, %v5997_v39   ;;  %956 = vperm.xlu2 %5441, %v823_v58   ;;  %v604_v37 = vpack.c.bf16 %v602_v35, %v602_v35  ;;  %v615_v40 = vunpack.c.l.b16 %v603_v36  ;;  %v679_v39 = vpack.c.bf16 %v5958_v18, %v5955_v17  ;;  %v1058_v17 = vld [vmem:[#allocation2 + $0x124] sm:$0xff]  ;;  %v1049_v18 = vld [vmem:[#allocation2 + $0x14] sm:$0xff]  ;;  %503 = vst.msk [vmem:[#allocation2 + $0x40] sm:$0xf] %vm502_vm4, %v5723_v2  ;;  %v5538_v36 = vld [vmem:[%s10022_s2] ss:$0 sm:$0xff] }
  0x57   : > { %1066 = vperm.xlu0 %5437, %v1048_v33   ;;  %504 = vst.msk [vmem:[#allocation2 + $0x50] sm:$0xf] %vm502_vm4, %v5723_v2  ;;  %734 = vmatpush.bf16.msrb.mxu1 %v5924_v4 }
  0x58   : > { %v616_v34 = vunpack.c.l.b16 %v604_v37  ;;  %505 = vst.msk [vmem:[#allocation2 + $0x60] sm:$0xf] %vm502_vm4, %v5723_v2 }
  0x59   : > { %506 = vst.msk [vmem:[#allocation2 + $0x70] sm:$0xf] %vm502_vm4, %v5723_v2 }
  0x5a   : > { %v618_v41 = vsel %vm617_vm3, %v616_v34, %v615_v40  ;;  %507 = vst.msk [vmem:[#allocation2 + $0x80] sm:$0xf] %vm502_vm4, %v5723_v2 }
  0x5b   : > { %v619_v43 = vpack.c.b16 %v618_v41, %v618_v41  ;;  %508 = vst.msk [vmem:[#allocation2 + $0x90] sm:$0xf] %vm502_vm4, %v5723_v2 }
  0x5c   : > { %509 = vst.msk [vmem:[#allocation2 + $0xa0] sm:$0xf] %vm502_vm4, %v5723_v2 }
  0x5d   : > { %5347 = vmatmul.msk.bf16.vlgmr.msra.gmra.mxu0 %vm551_vm1, %v619_v43  ;;  %510 = vst.msk [vmem:[#allocation2 + $0xb0] sm:$0xf] %vm502_vm4, %v5723_v2 }
  0x5e   : > { %964 = vperm.xlu1 %5440, %v5995_v38   ;;  %988 = vperm.xlu2 %5441, %v831_v19   ;;  %v1059_v38 = vld [vmem:[#allocation2 + $0x134] sm:$0xff]  ;;  %511 = vst.msk [vmem:[#allocation2 + $0x140] sm:$0xf] %vm502_vm4, %v5723_v2 }
  0x5f   : > { %1106 = vperm.xlu0 %5437, %v1056_v42   ;;  %5361 = vmatmul.msk.bf16.gmra.mxu2 %vm551_vm1, %v679_v39  ;;  %512 = vst.msk [vmem:[#allocation2 + $0x150] sm:$0xf] %vm502_vm4, %v5723_v2 }
  0x60   : > { %5364 = vmatmul.msk.bf16.gmra.mxu3 %vm551_vm1, %v682_v44  ;;  %514 = vst.msk [vmem:[#allocation2 + $0x170] sm:$0xf] %vm502_vm4, %v5723_v2 }
  0x61   : > { %515 = vst.msk [vmem:[#allocation2 + $0x180] sm:$0xf] %vm502_vm4, %v5723_v2 }
  0x62   : > { %516 = vst.msk [vmem:[#allocation2 + $0x190] sm:$0xf] %vm502_vm4, %v5723_v2 }
  0x63   : > { %517 = vst.msk [vmem:[#allocation2 + $0x1a0] sm:$0xf] %vm502_vm4, %v5723_v2 }
  0x64   : > { %518 = vst.msk [vmem:[#allocation2 + $0x1b0] sm:$0xf] %vm502_vm4, %v5723_v2 }
  0x65   : > { %519 = vst.msk [vmem:[#allocation2 + $0x4c] sm:$0xf] %vm502_vm4, %v5723_v2 }
  0x66   : > { %984 = vperm.xlu1 %5440, %v6018_v48   ;;  %5443 = vset.pattern.permute.xlu2 %v10043_v1  ;;  %v1274_v48 = vld [vmem:[#allocation2 + $0x8] sm:$0xff]  ;;  %520 = vst.msk [vmem:[#allocation2 + $0x5c] sm:$0xf] %vm502_vm4, %v5723_v2 }
  0x67   : > { %1076 = vperm.xlu2 %5443, %v1050_v45   ;;  %1121 = vperm.xlu0 %5437, %v1059_v38   ;;  %521 = vst.msk [vmem:[#allocation2 + $0x6c] sm:$0xf] %vm502_vm4, %v5723_v2 }
  0x68   : > { %522 = vst.msk [vmem:[#allocation2 + $0x7c] sm:$0xf] %vm502_vm4, %v5723_v2 }
  0x69   : > { %523 = vst.msk [vmem:[#allocation2 + $0x8c] sm:$0xf] %vm502_vm4, %v5723_v2 }
  0x6a   : > { %524 = vst.msk [vmem:[#allocation2 + $0x9c] sm:$0xf] %vm502_vm4, %v5723_v2 }
  0x6b   : > { %525 = vst.msk [vmem:[#allocation2 + $0xac] sm:$0xf] %vm502_vm4, %v5723_v2 }
  0x6c   : > { %526 = vst.msk [vmem:[#allocation2 + $0xbc] sm:$0xf] %vm502_vm4, %v5723_v2 }
  0x6d   : > { %527 = vst.msk [vmem:[#allocation2 + $0x14c] sm:$0xf] %vm502_vm4, %v5723_v2 }
  0x6e   : > { %996 = vperm.xlu1 %5440, %v6047_v0   ;;  %528 = vst.msk [vmem:[#allocation2 + $0x15c] sm:$0xf] %vm502_vm4, %v5723_v2 }
  0x6f   : > { %1116 = vperm.xlu2 %5443, %v1058_v17   ;;  %1302 = vperm.xlu0 %5437, %v1276_v50   ;;  %529 = vst.msk [vmem:[#allocation2 + $0x16c] sm:$0xf] %vm502_vm4, %v5723_v2 }
  0x70   : > { %530 = vst.msk [vmem:[#allocation2 + $0x17c] sm:$0xf] %vm502_vm4, %v5723_v2 }
  0x71   : > { %531 = vst.msk [vmem:[#allocation2 + $0x18c] sm:$0xf] %vm502_vm4, %v5723_v2 }
  0x72   : > { %532 = vst.msk [vmem:[#allocation2 + $0x19c] sm:$0xf] %vm502_vm4, %v5723_v2 }
  0x73   : > { %533 = vst.msk [vmem:[#allocation2 + $0x1ac] sm:$0xf] %vm502_vm4, %v5723_v2 }
  0x74   : > { %534 = vst.msk [vmem:[#allocation2 + $0x1bc] sm:$0xf] %vm502_vm4, %v5723_v2 }
  0x76   : > { %5442 = vset.pattern.permute.xlu1 %v10043_v1 }
  0x77   : > { %1071 = vperm.xlu1 %5442, %v1049_v18   ;;  %5444 = vset.pattern.permute.xlu2 %v10041_v29 }
  0x78   : > { %1178 = vperm.xlu2 %5444, %v1048_v33   ;;  %1342 = vperm.xlu0 %5437, %v1284_v52  }
  0x7f   : > { %1081 = vperm.xlu1 %5442, %v1051_v28  }
  0x80   : > { %1190 = vperm.xlu2 %5444, %v1051_v28  }
  0x87   : > { %1111 = vperm.xlu1 %5442, %v1057_v46  }
  0x88   : > { %1210 = vperm.xlu2 %5444, %v1056_v42  }
  0x8f   : > { %5445 = vset.pattern.permute.xlu1 %v10041_v29 }
  0x90   : > { %1186 = vperm.xlu1 %5445, %v1050_v45   ;;  %1222 = vperm.xlu2 %5444, %v1059_v38  }
  0x98   : > { %1218 = vperm.xlu1 %5445, %v1058_v17   ;;  %5447 = vset.pattern.permute.xlu2 %v10043_v1 }
  0x99   : > { %1297 = vperm.xlu2 %5447, %v1275_v47  }
  0x9f   : > { %v6100_v54 = vpop.permute.xlu2 %880 }
  0xa0   : > { %5446 = vset.pattern.permute.xlu1 %v10043_v1 }
  0xa1   : > { %1292 = vperm.xlu1 %5446, %v1274_v48   ;;  %1337 = vperm.xlu2 %5447, %v6095_v49  }
  0xa7   : > { %v6126_v58 = vpop.permute.xlu2 %895 }
  0xa9   : > { %1307 = vperm.xlu1 %5446, %v1277_v51   ;;  %5449 = vset.pattern.permute.xlu2 %v10041_v29 }
  0xaa   : > { %1412 = vperm.xlu2 %5449, %v1276_v50  }
  0xaf   : > { %v6102_v55 = vpop.permute.xlu1 %850 }
  0xb0   : > { %v6155_v61 = vpop.permute.xlu2 %956 }
  0xb1   : > { %1332 = vperm.xlu1 %5446, %v1282_v53  }
  0xb2   : > { %1444 = vperm.xlu2 %5449, %v1284_v52  }
  0xb7   : > { %v6120_v57 = vpop.permute.xlu1 %855 }
  0xb8   : > { %v6187_v14 = vpop.permute.xlu2 %988 }
  0xb9   : > { %1347 = vperm.xlu1 %5446, %v1285_v56  }
  0xba   : > { %5450 = vset.pattern.permute.xlu2 %v10043_v1 }
  0xbf   : > { %v6141_v59 = vpop.permute.xlu1 %890 }
  0xc0   : > { %v746_v0 = vpop.f32.mrf.mxu2 }
  0xc1   : > { %5448 = vset.pattern.permute.xlu1 %v10041_v29  ;;  %v747_v6 = vadd.f32 %v6164_v63, %v746_v0  ;;  %v761_v9 = vpop.f32.mrf.mxu3  ;;  %v6209_v2 = vpop.permute.xlu2 %1076 }
  0xc2   : > { %1408 = vperm.xlu1 %5448, %v1275_v47   ;;  %v762_v12 = vadd.f32 %v6164_v63, %v761_v9  ;;  %10075 = vst [vmem:[#allocation16_spill] sm:$0xff] %v6209_v2 }
  0xc3   : > { %v780_v3 = vmax.f32 %v747_v6, 0.0 }
  0xc4   : > { %v786_v13 = vmax.f32 %v762_v12, 0.0 }
  0xc5   : > { %796 = vst.msk [vmem:[#allocation2 + $0x84] sm:$0xff] %vm467_vm0, %v780_v3 }
  0xc6   : > { %802 = vst.msk [vmem:[#allocation2 + $0x164] sm:$0xff] %vm467_vm0, %v786_v13 }
  0xc8   : > { %v6174_v10 = vpop.permute.xlu1 %952  ;;  %v748_v15 = vpop.f32.mrf.mxu2 }
  0xc9   : > { %v749_v4 = vadd.f32 %v6164_v63, %v748_v15  ;;  %v763_v19 = vpop.f32.mrf.mxu3  ;;  %v6231_v42 = vpop.permute.xlu2 %1116  ;;  %v675_v15 = vpack.c.bf16 %v5932_v7, %v5927_v5 }
  0xca   : > { %1416 = vperm.xlu1 %5448, %v1277_v51   ;;  %v764_v20 = vadd.f32 %v6164_v63, %v763_v19  ;;  %10076 = vst [vmem:[#allocation17_spill] sm:$0xff] %v6231_v42 }
  0xcb   : > { %v781_v21 = vmax.f32 %v749_v4, 0.0 }
  0xcc   : > { %v787_v22 = vmax.f32 %v764_v20, 0.0 }
  0xcd   : > { %797 = vst.msk [vmem:[#allocation2 + $0x94] sm:$0xff] %vm467_vm0, %v781_v21  ;;  %v6202_v23 = vld [vmem:[#allocation2 + $0x160] sm:$0xff]  ;;  %v6229_v39 = vld [vmem:[#allocation2 + $0x168] sm:$0xff] }
  0xce   : > { %v6204_v24 = vld [vmem:[#allocation2 + $0x164] sm:$0xff]  ;;  %910 = vperm.xlu2 %5450, %v6202_v23   ;;  %803 = vst.msk [vmem:[#allocation2 + $0x174] sm:$0xff] %vm467_vm0, %v787_v22 }
  0xcf   : > { %1136 = vperm.xlu0 %5437, %v6204_v24  }
  0xd0   : > { %v6195_v16 = vpop.permute.xlu1 %964 }
  0xd1   : > { %v751_v25 = vpop.f32.mrf.mxu2 }
  0xd2   : > { %1440 = vperm.xlu1 %5448, %v6095_v49   ;;  %v752_v26 = vadd.f32 %v6164_v63, %v751_v25  ;;  %v766_v30 = vpop.f32.mrf.mxu3  ;;  %v6246_v56 = vpop.permute.xlu2 %1178 }
  0xd3   : > { %v767_v31 = vadd.f32 %v6164_v63, %v766_v30  ;;  %10078 = vst [vmem:[#allocation19_spill] sm:$0xff] %v6246_v56 }
  0xd4   : > { %v782_v32 = vmax.f32 %v752_v26, 0.0 }
  0xd5   : > { %v788_v33 = vmax.f32 %v767_v31, 0.0  ;;  %v6217_v35 = vld [vmem:[#allocation2 + $0x170] sm:$0xff]  ;;  %v6250_v60 = vld [vmem:[#allocation2 + $0x178] sm:$0xff]  ;;  %v676_v31 = vpack.c.bf16 %v5943_v11, %v5935_v8 }
  0xd6   : > { %798 = vst.msk [vmem:[#allocation2 + $0xa4] sm:$0xff] %vm467_vm0, %v782_v32  ;;  %5451 = vset.pattern.permute.xlu2 %v10041_v29  ;;  %v6241_v49 = vld [vmem:[#allocation2 + $0x174] sm:$0xff] }
  0xd7   : > { %915 = vperm.xlu0 %5437, %v6217_v35   ;;  %804 = vst.msk [vmem:[#allocation2 + $0x184] sm:$0xff] %vm467_vm0, %v788_v33  ;;  %1234 = vperm.xlu2 %5451, %v6204_v24   ;;  %v6305_v8 = vld [vmem:[#allocation2 + $0x90] sm:$0xff] }
  0xd8   : > { %v6212_v27 = vpop.permute.xlu1 %984 }
  0xd9   : > { %v753_v37 = vpop.f32.mrf.mxu2 }
  0xda   : > { %1008 = vperm.xlu1 %5448, %v6202_v23   ;;  %v644_v40 = vpop.f32.mrf.mxu0  ;;  %v754_v34 = vadd.f32 %v6164_v63, %v753_v37  ;;  %v768_v44 = vpop.f32.mrf.mxu3 }
  0xdb   : > { %v645_v43 = vadd.f32 %v5538_v36, %v644_v40  ;;  %v769_v38 = vadd.f32 %v6164_v63, %v768_v44  ;;  %v6268_v21 = vpop.permute.xlu2 %1190 }
  0xdc   : > { %v783_v45 = vmax.f32 %v754_v34, 0.0  ;;  %10079 = vst [vmem:[#allocation20_spill] sm:$0xff] %v6268_v21 }
  0xdd   : > { %v648_v17 = vmax.f32 %v645_v43, 0.0  ;;  %v789_v18 = vmax.f32 %v769_v38, 0.0  ;;  %v1506_v7 = vld [vmem:[#allocation2 + $0xa0] sm:$0xff] }
  0xde   : > { %799 = vst.msk [vmem:[#allocation2 + $0xb4] sm:$0xff] %vm467_vm0, %v783_v45  ;;  %v1512_v26 = vld [vmem:[#allocation2 + $0x180] sm:$0xff] }
  0xdf   : > { %v649_v28 = vpack.c.bf16 %v648_v17, %v648_v17  ;;  %1012 = vperm.xlu2 %5451, %v6217_v35   ;;  %805 = vst.msk [vmem:[#allocation2 + $0x194] sm:$0xff] %vm467_vm0, %v789_v18  ;;  %v1504_v38 = vld [vmem:[#allocation2 + $0x80] sm:$0xff] }
  0xe0   : > { %v6227_v41 = vpop.permute.xlu1 %996 }
  0xe1   : > { %5348 = vmatmul.msk.bf16.vlgmr.msra.gmra.mxu1 %vm467_vm0, %v649_v28 }
  0xe2   : > { %5452 = vset.pattern.permute.xlu1 %v10043_v1  ;;  %v756_v46 = vpop.f32.mrf.mxu2  ;;  %v646_v47 = vpop.f32.mrf.mxu0 }
  0xe3   : > { %1362 = vperm.xlu1 %5452, %v6229_v39   ;;  %v757_v48 = vadd.f32 %v6164_v63, %v756_v46  ;;  %v771_v51 = vpop.f32.mrf.mxu3  ;;  %v6280_v25 = vpop.permute.xlu2 %1210 }
  0xe4   : > { %v772_v53 = vadd.f32 %v6164_v63, %v771_v51  ;;  %10081 = vst [vmem:[#allocation22_spill] sm:$0xff] %v6280_v25 }
  0xe5   : > { %v784_v52 = vmax.f32 %v757_v48, 0.0  ;;  %v6323_v18 = vld [vmem:[#allocation2 + $0xb0] sm:$0xff] }
  0xe6   : > { %v790_v62 = vmax.f32 %v772_v53, 0.0  ;;  %v6336_v51 = vld [vmem:[#allocation2 + $0x190] sm:$0xff] }
  0xe7   : > { %800 = vst.msk [vmem:[#allocation2 + $0x144] sm:$0xff] %vm467_vm0, %v784_v52  ;;  %5453 = vset.pattern.permute.xlu2 %v10043_v1 }
  0xe8   : > { %806 = vst.msk [vmem:[#allocation2 + $0x1a4] sm:$0xff] %vm467_vm0, %v790_v62  ;;  %1367 = vperm.xlu2 %5453, %v6250_v60  }
  0xe9   : > { %v6243_v50 = vpop.permute.xlu1 %1071 }
  0xea   : > { %10077 = vst [vmem:[#allocation18_spill] sm:$0xff] %v6243_v50  ;;  %v758_v0 = vpop.f32.mrf.mxu2  ;;  %v6600_v50 = vld [vmem:[#allocation2 + $0xd4] sm:$0xff] }
  0xeb   : > { %1141 = vperm.xlu1 %5452, %v6241_v49   ;;  %v759_v6 = vadd.f32 %v6164_v63, %v758_v0  ;;  %v773_v12 = vpop.f32.mrf.mxu3  ;;  %v6295_v36 = vpop.permute.xlu2 %1222 }
  0xec   : > { %v774_v13 = vadd.f32 %v6164_v63, %v773_v12  ;;  %10083 = vst [vmem:[#allocation24_spill] sm:$0xff] %v6295_v36 }
  0xed   : > { %v785_v3 = vmax.f32 %v759_v6, 0.0 }
  0xee   : > { %v6261_v4 = vld [vmem:[#allocation2 + $0x144] sm:$0xff]  ;;  %v791_v20 = vmax.f32 %v774_v13, 0.0 }
  0xef   : > { %v6263_v19 = vld [vmem:[#allocation2 + $0x140] sm:$0xff]  ;;  %801 = vst.msk [vmem:[#allocation2 + $0x154] sm:$0xff] %vm467_vm0, %v785_v3  ;;  %v6276_v22 = vld [vmem:[#allocation2 + $0x148] sm:$0xff] }
  0xf0   : > { %900 = vperm.xlu0 %5437, %v6263_v19   ;;  %807 = vst.msk [vmem:[#allocation2 + $0x1b4] sm:$0xff] %vm467_vm0, %v791_v20  ;;  %5454 = vset.pattern.permute.xlu2 %v10041_v29  ;;  %v1514_v47 = vld [vmem:[#allocation2 + $0x1a0] sm:$0xff] }
  0xf1   : > { %v6256_v9 = vpop.permute.xlu1 %1081  ;;  %5357 = vmatmul.msk.bf16.vlgmr.msrb.gmra.mxu1 %vm551_vm1, %v675_v15  ;;  %1000 = vperm.xlu2 %5454, %v6263_v19   ;;  %v6361_v15 = vpop.permute.xlu0 %840 }
  0xf3   : > { %1126 = vperm.xlu1 %5452, %v6261_v4   ;;  %v6308_v11 = vpop.permute.xlu2 %1297 }
  0xf4   : > { %10085 = vst [vmem:[#allocation26_spill] sm:$0xff] %v6308_v11 }
  0xf6   : > { %v6288_v32 = vld [vmem:[#allocation2 + $0x150] sm:$0xff]  ;;  %v6298_v37 = vld [vmem:[#allocation2 + $0x158] sm:$0xff] }
  0xf7   : > { %v6292_v33 = vld [vmem:[#allocation2 + $0x154] sm:$0xff] }
  0xf8   : > { %1548 = vperm.xlu0 %5437, %v1506_v7   ;;  %v1515_v43 = vld [vmem:[#allocation2 + $0x1b0] sm:$0xff] }
  0xf9   : > { %v6274_v5 = vpop.permute.xlu1 %1111  ;;  %5455 = vset.pattern.permute.xlu2 %v10043_v1 }
  0xfa   : > { %10080 = vst [vmem:[#allocation21_spill] sm:$0xff] %v6274_v5  ;;  %1352 = vperm.xlu2 %5455, %v6276_v22   ;;  %v6561_v5 = vld [vmem:[#allocation2 + $0x1b4] sm:$0xff] }
  0xfb   : > { %5456 = vset.pattern.permute.xlu1 %v10041_v29  ;;  %v6315_v44 = vpop.permute.xlu2 %1337 }
  0xfc   : > { %1452 = vperm.xlu1 %5456, %v6276_v22   ;;  %10087 = vst [vmem:[#allocation28_spill] sm:$0xff] %v6315_v44 }
 0x100   : > { %1578 = vperm.xlu0 %5437, %v1512_v26  }
 0x101   : > { %5358 = vmatmul.msk.bf16.gmra.mxu1 %vm551_vm1, %v676_v31 }
 0x102   : > { %v6284_v30 = vpop.permute.xlu1 %1186  ;;  %1131 = vperm.xlu2 %5455, %v6292_v33  }
 0x103   : > { %10082 = vst [vmem:[#allocation23_spill] sm:$0xff] %v6284_v30 }
 0x104   : > { %5457 = vset.pattern.permute.xlu1 %v10043_v1  ;;  %v6321_v17 = vpop.permute.xlu2 %1412 }
 0x105   : > { %905 = vperm.xlu1 %5457, %v6288_v32   ;;  %10089 = vst [vmem:[#allocation30_spill] sm:$0xff] %v6321_v17 }
 0x108   : > { %1357 = vperm.xlu0 %5437, %v6298_v37  }
 0x10a   : > { %v6300_v40 = vpop.permute.xlu1 %1218  ;;  %1543 = vperm.xlu2 %5455, %v6305_v8  }
 0x10b   : > { %10084 = vst [vmem:[#allocation25_spill] sm:$0xff] %v6300_v40 }
 0x10c   : > { %v6330_v46 = vpop.permute.xlu2 %1444 }
 0x10d   : > { %5458 = vset.pattern.permute.xlu1 %v10041_v29  ;;  %10091 = vst [vmem:[#allocation32_spill] sm:$0xff] %v6330_v46 }
 0x10e   : > { %1230 = vperm.xlu1 %5458, %v6292_v33  }
 0x110   : > { %1563 = vperm.xlu0 %5437, %v6288_v32  }
 0x112   : > { %1558 = vperm.xlu2 %5455, %v6263_v19  }
 0x113   : > { %v6311_v34 = vpop.permute.xlu1 %1292 }
 0x114   : > { %10086 = vst [vmem:[#allocation27_spill] sm:$0xff] %v6311_v34 }
 0x116   : > { %1464 = vperm.xlu1 %5458, %v6250_v60  }
 0x118   : > { %1593 = vperm.xlu0 %5437, %v1515_v43  }
 0x11a   : > { %1573 = vperm.xlu2 %5455, %v6217_v35  }
 0x11b   : > { %v6317_v45 = vpop.permute.xlu1 %1307 }
 0x11c   : > { %10088 = vst [vmem:[#allocation29_spill] sm:$0xff] %v6317_v45 }
 0x11e   : > { %5459 = vset.pattern.permute.xlu1 %v10043_v1 }
 0x11f   : > { %1538 = vperm.xlu1 %5459, %v1504_v38  }
 0x122   : > { %5460 = vset.pattern.permute.xlu2 %v10041_v29 }
 0x123   : > { %v6326_v28 = vpop.permute.xlu1 %1332  ;;  %1456 = vperm.xlu2 %5460, %v6298_v37  }
 0x124   : > { %10090 = vst [vmem:[#allocation31_spill] sm:$0xff] %v6326_v28 }
 0x127   : > { %1553 = vperm.xlu1 %5459, %v6323_v18  }
 0x128   : > { %v6339_v52 = vpop.permute.xlu2 %910 }
 0x129   : > { %10093 = vst [vmem:[#allocation34_spill] sm:$0xff] %v6339_v52  ;;  %v6665_v52 = vld [vmem:[#allocation2 + $0x1a8] sm:$0xff] }
 0x12b   : > { %5461 = vset.pattern.permute.xlu2 %v10043_v1  ;;  %v6334_v48 = vpop.permute.xlu1 %1347 }
 0x12c   : > { %10092 = vst [vmem:[#allocation33_spill] sm:$0xff] %v6334_v48  ;;  %1588 = vperm.xlu2 %5461, %v1514_v47  }
 0x12f   : > { %1568 = vperm.xlu1 %5459, %v6202_v23  }
 0x131   : > { %v6346_v62 = vpop.permute.xlu2 %1234 }
 0x132   : > { %10095 = vst [vmem:[#allocation36_spill] sm:$0xff] %v6346_v62 }
 0x134   : > { %5462 = vset.pattern.permute.xlu2 %v10041_v29  ;;  %v6342_v53 = vpop.permute.xlu1 %1408 }
 0x135   : > { %1646 = vperm.xlu2 %5462, %v1504_v38   ;;  %10094 = vst [vmem:[#allocation35_spill] sm:$0xff] %v6342_v53 }
 0x137   : > { %1583 = vperm.xlu1 %5459, %v6336_v51  }
 0x139   : > { %v6352_v6 = vpop.permute.xlu2 %1012 }
 0x13a   : > { %10097 = vst [vmem:[#allocation38_spill] sm:$0xff] %v6352_v6 }
 0x13c   : > { %v6348_v0 = vpop.permute.xlu1 %1416 }
 0x13d   : > { %1654 = vperm.xlu2 %5462, %v1506_v7   ;;  %10096 = vst [vmem:[#allocation37_spill] sm:$0xff] %v6348_v0  ;;  %v6367_v7 = vpop.permute.xlu0 %845 }
 0x13f   : > { %5463 = vset.pattern.permute.xlu1 %v10041_v29 }
 0x140   : > { %1650 = vperm.xlu1 %5463, %v6305_v8  }
 0x142   : > { %v6357_v3 = vpop.permute.xlu2 %1367 }
 0x143   : > { %10099 = vst [vmem:[#allocation40_spill] sm:$0xff] %v6357_v3 }
 0x144   : > { %v6354_v12 = vpop.permute.xlu1 %1440 }
 0x145   : > { %1666 = vperm.xlu2 %5462, %v6288_v32   ;;  %10098 = vst [vmem:[#allocation39_spill] sm:$0xff] %v6354_v12  ;;  %v6376_v29 = vpop.permute.xlu0 %885 }
 0x148   : > { %1662 = vperm.xlu1 %5463, %v6263_v19  }
 0x14b   : > { %v6363_v20 = vpop.permute.xlu2 %1000 }
 0x14c   : > { %v6359_v13 = vpop.permute.xlu1 %1008  ;;  %10101 = vst [vmem:[#allocation42_spill] sm:$0xff] %v6363_v20 }
 0x14d   : > { %1678 = vperm.xlu2 %5462, %v1512_v26   ;;  %10100 = vst [vmem:[#allocation41_spill] sm:$0xff] %v6359_v13 }
 0x150   : > { %1674 = vperm.xlu1 %5463, %v6217_v35  }
 0x154   : > { %v6372_v35 = vpop.permute.xlu2 %1352 }
 0x155   : > { %1690 = vperm.xlu2 %5462, %v1515_v43   ;;  %v6365_v19 = vpop.permute.xlu1 %1362  ;;  %10104 = vst [vmem:[#allocation45_spill] sm:$0xff] %v6372_v35 }
 0x156   : > { %10102 = vst [vmem:[#allocation43_spill] sm:$0xff] %v6365_v19  ;;  %v6383_v19 = vpop.permute.xlu0 %1066 }
 0x158   : > { %1686 = vperm.xlu1 %5463, %v1514_v47  }
 0x15c   : > { %v6378_v3 = vpop.permute.xlu2 %1131 }
 0x15d   : > { %5464 = vset.pattern.permute.xlu2 %v10043_v1  ;;  %v6374_v38 = vpop.permute.xlu1 %1141  ;;  %10106 = vst [vmem:[#allocation47_spill] sm:$0xff] %v6378_v3 }
 0x15e   : > { %v6369_v31 = vpop.f32.mrf.mxu1  ;;  %10105 = vst [vmem:[#allocation46_spill] sm:$0xff] %v6374_v38 }
 0x15f   : > { %10103 = vst [vmem:[#allocation44_spill] sm:$0xff] %v6369_v31 }
 0x165   : > { %v6380_v43 = vpop.permute.xlu1 %1126 }
 0x166   : > { %v673_v26 = vpop.f32.mrf.mxu1  ;;  %10107 = vst [vmem:[#allocation48_spill] sm:$0xff] %v6380_v43 }
 0x167   : > { %v6387_v26 = vpop.permute.xlu2 %1543 }
 0x168   : > { %10108 = vst [vmem:[#allocation49_spill] sm:$0xff] %v6387_v26 }
 0x16e   : > { %v736_v47 = vpop.f32.mrf.mxu1  ;;  %v6389_v35 = vpop.permute.xlu1 %1452 }
 0x16f   : > { %v737_v12 = vadd.f32 %v6164_v63, %v736_v47  ;;  %10109 = vst [vmem:[#allocation50_spill] sm:$0xff] %v6389_v35  ;;  %v6401_v35 = vpop.permute.xlu2 %1558 }
 0x170   : > { %10110 = vst [vmem:[#allocation51_spill] sm:$0xff] %v6401_v35  ;;  %v10113_v35 = vmov 0  }
 0x171   : > { %v776_v53 = vmax.f32 %v737_v12, 0.0  ;;  %v6395_v12 = vpop.permute.xlu0 %1106 }
 0x173   : > { %792 = vst.msk [vmem:[#allocation2 + $0x44] sm:$0xff] %vm467_vm0, %v776_v53 }
 0x176   : > { %v738_v1 = vpop.f32.mrf.mxu1 }
 0x177   : > { %v739_v31 = vadd.f32 %v6164_v63, %v738_v1 }
 0x179   : > { %v777_v38 = vmax.f32 %v739_v31, 0.0  ;;  %v6403_v31 = vpop.permute.xlu1 %905  ;;  %v6408_v3 = vpop.permute.xlu0 %1121 }
 0x17a   : > { %v826_v0 = vld [vmem:[#allocation2 + $0x40] sm:$0xff]  ;;  %10111 = vst [vmem:[#allocation52_spill] sm:$0xff] %v6403_v31 }
 0x17b   : > { %v6391_v48 = vld [vmem:[#allocation2 + $0x44] sm:$0xff]  ;;  %793 = vst.msk [vmem:[#allocation2 + $0x54] sm:$0xff] %vm467_vm0, %v777_v38  ;;  %860 = vperm.xlu2 %5464, %v826_v0   ;;  %v10112_v38 = vmov 1  }
 0x17c   : > { %1194 = vperm.xlu1 %5463, %v6391_v48   ;;  %1744 = vperm.xlu0 %5437, %v6391_v48  }
 0x17e   : > { %v741_v53 = vpop.f32.mrf.mxu1 }
 0x17f   : > { %v742_v1 = vadd.f32 %v6164_v63, %v741_v53 }
 0x181   : > { %v778_v47 = vmax.f32 %v742_v1, 0.0  ;;  %v6415_v31 = vpop.permute.xlu1 %1230  ;;  %v6418_v6 = vpop.permute.xlu0 %1302 }
 0x182   : > { %v6399_v26 = vld [vmem:[#allocation2 + $0x54] sm:$0xff]  ;;  %10115 = vst [vmem:[#allocation54_spill] sm:$0xff] %v6415_v31 }
 0x183   : > { %794 = vst.msk [vmem:[#allocation2 + $0x64] sm:$0xff] %vm467_vm0, %v778_v47  ;;  %5465 = vset.pattern.permute.xlu2 %v10112_v38  ;;  %v827_v20 = vld [vmem:[#allocation2 + $0x50] sm:$0xff]  ;;  %v6413_v47 = vpop.permute.xlu2 %1573 }
 0x184   : > { %1630 = vperm.xlu1 %5463, %v826_v0   ;;  %1091 = vperm.xlu0 %5437, %v6399_v26   ;;  %10114 = vst [vmem:[#allocation53_spill] sm:$0xff] %v6413_v47 }
 0x185   : > { %968 = vperm.xlu2 %5465, %v826_v0   ;;  %10116 = vst [vmem:[#allocation55_spill] sm:$0xff] %v6418_v6 }
 0x186   : > { %v743_v43 = vpop.f32.mrf.mxu1 }
 0x187   : > { %v744_v53 = vadd.f32 %v6164_v63, %v743_v43  ;;  %v6423_v63 = vld [vmem:[#allocation2 + $0x58] sm:$0xff]  ;;  %v6427_v43 = vld [vmem:[#allocation2 + $0x48] sm:$0xff] }
 0x189   : > { %v779_v1 = vmax.f32 %v744_v53, 0.0  ;;  %v6434_v31 = vpop.permute.xlu0 %1342 }
 0x18a   : > { %v6420_v62 = vld [vmem:[#allocation2 + $0x60] sm:$0xff]  ;;  %10119 = vst [vmem:[#allocation58_spill] sm:$0xff] %v6434_v31  ;;  %v6454_v31 = vld [vmem:[#allocation2 + $0x68] sm:$0xff] }
 0x18b   : > { %795 = vst.msk [vmem:[#allocation2 + $0x74] sm:$0xff] %vm467_vm0, %v779_v1  ;;  %v6430_v53 = vpop.permute.xlu2 %1456  ;;  %v6432_v1 = vpop.permute.xlu1 %1464  ;;  %v6438_v6 = vld [vmem:[#allocation2 + $0x64] sm:$0xff] }
 0x18c   : > { %972 = vperm.xlu1 %5463, %v827_v20   ;;  %1523 = vperm.xlu0 %5437, %v827_v20   ;;  %10117 = vst [vmem:[#allocation56_spill] sm:$0xff] %v6430_v53 }
 0x18d   : > { %5466 = vset.pattern.permute.xlu2 %v10113_v35  ;;  %10118 = vst [vmem:[#allocation57_spill] sm:$0xff] %v6432_v1  ;;  %v6450_v1 = vld [vmem:[#allocation2 + $0x94] sm:$0xff] }
 0x18e   : > { %1086 = vperm.xlu2 %5466, %v6391_v48  }
 0x191   : > { %v6448_v53 = vpop.permute.xlu0 %1136 }
 0x192   : > { %v6436_v47 = vld [vmem:[#allocation2 + $0x78] sm:$0xff]  ;;  %10122 = vst [vmem:[#allocation61_spill] sm:$0xff] %v6448_v53 }
 0x193   : > { %v6444_v46 = vpop.permute.xlu2 %1588  ;;  %v6446_v28 = vpop.permute.xlu1 %1538 }
 0x194   : > { %5470 = vset.pattern.permute.xlu1 %v10113_v35  ;;  %870 = vperm.xlu0 %5437, %v6420_v62   ;;  %10120 = vst [vmem:[#allocation59_spill] sm:$0xff] %v6444_v46 }
 0x195   : > { %1317 = vperm.xlu1 %5470, %v6423_v63   ;;  %10121 = vst [vmem:[#allocation60_spill] sm:$0xff] %v6446_v28 }
 0x196   : > { %1312 = vperm.xlu2 %5466, %v6427_v43  }
 0x199   : > { %v6462_v28 = vpop.permute.xlu0 %915 }
 0x19a   : > { %10125 = vst [vmem:[#allocation64_spill] sm:$0xff] %v6462_v28 }
 0x19b   : > { %v6458_v17 = vpop.permute.xlu2 %1646  ;;  %v6460_v46 = vpop.permute.xlu1 %1553 }
 0x19c   : > { %1327 = vperm.xlu0 %5437, %v6436_v47   ;;  %10123 = vst [vmem:[#allocation62_spill] sm:$0xff] %v6458_v17  ;;  %v6474_v17 = vld [vmem:[#allocation2 + $0x70] sm:$0xff] }
 0x19d   : > { %1096 = vperm.xlu1 %5470, %v6438_v6   ;;  %10124 = vst [vmem:[#allocation63_spill] sm:$0xff] %v6460_v46  ;;  %v6479_v46 = vld [vmem:[#allocation2 + $0x1a4] sm:$0xff] }
 0x19e   : > { %5467 = vset.pattern.permute.xlu2 %v10112_v38 }
 0x19f   : > { %1420 = vperm.xlu2 %5467, %v6427_v43  }
 0x1a1   : > { %v6469_v40 = vpop.permute.xlu0 %900 }
 0x1a2   : > { %10127 = vst [vmem:[#allocation66_spill] sm:$0xff] %v6469_v40  ;;  %v6487_v40 = vld [vmem:[#allocation2 + $0x74] sm:$0xff] }
 0x1a3   : > { %v6467_v45 = vpop.permute.xlu2 %1654 }
 0x1a4   : > { %1769 = vperm.xlu0 %5437, %v6450_v1   ;;  %10126 = vst [vmem:[#allocation65_spill] sm:$0xff] %v6467_v45 }
 0x1a5   : > { %5472 = vset.pattern.permute.xlu1 %v10112_v38 }
 0x1a6   : > { %1428 = vperm.xlu1 %5472, %v6454_v31  }
 0x1a7   : > { %5468 = vset.pattern.permute.xlu2 %v10113_v35 }
 0x1a8   : > { %1518 = vperm.xlu2 %5468, %v826_v0   ;;  %v6472_v0 = vpop.permute.xlu1 %1568 }
 0x1a9   : > { %10128 = vst [vmem:[#allocation67_spill] sm:$0xff] %v6472_v0  ;;  %v6484_v45 = vpop.permute.xlu0 %1548 }
 0x1aa   : > { %10130 = vst [vmem:[#allocation69_spill] sm:$0xff] %v6484_v45  ;;  %v6501_v45 = vld [vmem:[#allocation2 + $0xb8] sm:$0xff] }
 0x1ab   : > { %v6482_v30 = vpop.permute.xlu2 %1666 }
 0x1ac   : > { %1784 = vperm.xlu0 %5437, %v6261_v4   ;;  %10129 = vst [vmem:[#allocation68_spill] sm:$0xff] %v6482_v30 }
 0x1ae   : > { %5473 = vset.pattern.permute.xlu1 %v10113_v35 }
 0x1af   : > { %1528 = vperm.xlu1 %5473, %v6420_v62  }
 0x1b0   : > { %865 = vperm.xlu2 %5468, %v827_v20   ;;  %v6489_v0 = vpop.permute.xlu1 %1583 }
 0x1b1   : > { %10131 = vst [vmem:[#allocation70_spill] sm:$0xff] %v6489_v0  ;;  %v6496_v28 = vpop.permute.xlu0 %1578 }
 0x1b2   : > { %10133 = vst [vmem:[#allocation72_spill] sm:$0xff] %v6496_v28 }
 0x1b3   : > { %v6493_v44 = vpop.permute.xlu2 %1678 }
 0x1b4   : > { %1799 = vperm.xlu0 %5437, %v6241_v49   ;;  %10132 = vst [vmem:[#allocation71_spill] sm:$0xff] %v6493_v44 }
 0x1b7   : > { %875 = vperm.xlu1 %5473, %v6474_v17  }
 0x1b8   : > { %5469 = vset.pattern.permute.xlu2 %v10112_v38  ;;  %v6499_v30 = vpop.permute.xlu1 %1650 }
 0x1b9   : > { %1198 = vperm.xlu2 %5469, %v6399_v26   ;;  %10134 = vst [vmem:[#allocation73_spill] sm:$0xff] %v6499_v30 }
 0x1bb   : > { %v6504_v0 = vpop.permute.xlu2 %1690 }
 0x1bc   : > { %1814 = vperm.xlu0 %5437, %v6479_v46   ;;  %10135 = vst [vmem:[#allocation74_spill] sm:$0xff] %v6504_v0  ;;  %v6519_v0 = vld [vmem:[#allocation2 + $0x198] sm:$0xff] }
 0x1bf   : > { %5474 = vset.pattern.permute.xlu1 %v10112_v38 }
 0x1c0   : > { %1206 = vperm.xlu1 %5474, %v6487_v40   ;;  %v6512_v44 = vpop.permute.xlu1 %1662 }
 0x1c1   : > { %1634 = vperm.xlu2 %5469, %v827_v20   ;;  %v6510_v20 = vpop.permute.xlu0 %1357  ;;  %10137 = vst [vmem:[#allocation76_spill] sm:$0xff] %v6512_v44 }
 0x1c2   : > { %10136 = vst [vmem:[#allocation75_spill] sm:$0xff] %v6510_v20  ;;  %v6528_v20 = vld [vmem:[#allocation2 + $0xa4] sm:$0xff] }
 0x1c4   : > { %1980 = vperm.xlu0 %5437, %v6454_v31  }
 0x1c8   : > { %1642 = vperm.xlu1 %5474, %v6474_v17   ;;  %v6524_v53 = vpop.permute.xlu1 %1674 }
 0x1c9   : > { %976 = vperm.xlu2 %5469, %v6420_v62   ;;  %v6521_v28 = vpop.permute.xlu0 %1563  ;;  %10140 = vst [vmem:[#allocation79_spill] sm:$0xff] %v6524_v53  ;;  %v6541_v53 = vld [vmem:[#allocation2 + $0xe0] sm:$0xff] }
 0x1ca   : > { %10139 = vst [vmem:[#allocation78_spill] sm:$0xff] %v6521_v28 }
 0x1cc   : > { %2005 = vperm.xlu0 %5437, %v6501_v45  }
 0x1d0   : > { %5477 = vset.pattern.permute.xlu1 %v10113_v35  ;;  %v6534_v44 = vpop.permute.xlu1 %1686 }
 0x1d1   : > { %5471 = vset.pattern.permute.xlu2 %v10113_v35  ;;  %1749 = vperm.xlu1 %5477, %v6399_v26   ;;  %10142 = vst [vmem:[#allocation81_spill] sm:$0xff] %v6534_v44  ;;  %v6552_v44 = vld [vmem:[#allocation2 + $0x184] sm:$0xff] }
 0x1d2   : > { %1322 = vperm.xlu2 %5471, %v6454_v31  }
 0x1d4   : > { %2020 = vperm.xlu0 %5437, %v6229_v39  }
 0x1d5   : > { %v6515_v30 = vpop.permute.xlu2 %860 }
 0x1d6   : > { %10138 = vst [vmem:[#allocation77_spill] sm:$0xff] %v6515_v30  ;;  %v6536_v30 = vpop.permute.xlu0 %1593 }
 0x1d7   : > { %10143 = vst [vmem:[#allocation82_spill] sm:$0xff] %v6536_v30 }
 0x1d9   : > { %1759 = vperm.xlu1 %5477, %v6487_v40  }
 0x1da   : > { %1101 = vperm.xlu2 %5471, %v6487_v40  }
 0x1dc   : > { %2035 = vperm.xlu0 %5437, %v6519_v0  }
 0x1df   : > { %v6526_v34 = vpop.permute.xlu2 %968 }
 0x1e0   : > { %10141 = vst [vmem:[#allocation80_spill] sm:$0xff] %v6526_v34 }
 0x1e1   : > { %1774 = vperm.xlu1 %5477, %v6528_v20  }
 0x1e2   : > { %5475 = vset.pattern.permute.xlu2 %v10112_v38 }
 0x1e3   : > { %1432 = vperm.xlu2 %5475, %v6436_v47  }
 0x1e4   : > { %2202 = vperm.xlu0 %5437, %v6305_v8  }
 0x1e8   : > { %v6538_v28 = vpop.permute.xlu2 %1086 }
 0x1e9   : > { %10144 = vst [vmem:[#allocation83_spill] sm:$0xff] %v6538_v28  ;;  %1789 = vperm.xlu1 %5477, %v6292_v33  }
 0x1eb   : > { %5476 = vset.pattern.permute.xlu2 %v10113_v35 }
 0x1ec   : > { %1533 = vperm.xlu2 %5476, %v6474_v17   ;;  %2227 = vperm.xlu0 %5437, %v6541_v53  }
 0x1ee   : > { %v6546_v34 = vpop.permute.xlu1 %1194  ;;  %v6548_v11 = vpop.permute.xlu0 %1744 }
 0x1ef   : > { %10145 = vst [vmem:[#allocation84_spill] sm:$0xff] %v6546_v34 }
 0x1f0   : > { %10146 = vst [vmem:[#allocation85_spill] sm:$0xff] %v6548_v11  ;;  %v6550_v42 = vpop.permute.xlu2 %1312  ;;  %v6566_v11 = vld [vmem:[#allocation2 + $0x1c0] sm:$0xff] }
 0x1f1   : > { %10147 = vst [vmem:[#allocation86_spill] sm:$0xff] %v6550_v42  ;;  %1804 = vperm.xlu1 %5477, %v6552_v44   ;;  %v6568_v42 = vld [vmem:[#allocation2 + $0x84] sm:$0xff] }
 0x1f4   : > { %1754 = vperm.xlu2 %5476, %v6438_v6   ;;  %2242 = vperm.xlu0 %5437, %v6336_v51  }
 0x1f6   : > { %v6557_v30 = vpop.permute.xlu1 %1630  ;;  %v6559_v28 = vpop.permute.xlu0 %1091 }
 0x1f7   : > { %10148 = vst [vmem:[#allocation87_spill] sm:$0xff] %v6557_v30 }
 0x1f8   : > { %10149 = vst [vmem:[#allocation88_spill] sm:$0xff] %v6559_v28  ;;  %v6580_v28 = vld [vmem:[#allocation2 + $0x1f0] sm:$0xff] }
 0x1f9   : > { %v6563_v2 = vpop.permute.xlu2 %1420  ;;  %1819 = vperm.xlu1 %5477, %v6561_v5  }
 0x1fa   : > { %10150 = vst [vmem:[#allocation89_spill] sm:$0xff] %v6563_v2  ;;  %v6582_v2 = vld [vmem:[#allocation2 + $0xb4] sm:$0xff] }
 0x1fc   : > { %1764 = vperm.xlu2 %5476, %v6568_v42   ;;  %2257 = vperm.xlu0 %5437, %v6566_v11  }
 0x1fe   : > { %v6572_v34 = vpop.permute.xlu1 %972  ;;  %v6574_v13 = vpop.permute.xlu0 %1523 }
 0x1ff   : > { %10151 = vst [vmem:[#allocation90_spill] sm:$0xff] %v6572_v34 }
 0x200   : > { %10152 = vst [vmem:[#allocation91_spill] sm:$0xff] %v6574_v13 }
 0x201   : > { %5479 = vset.pattern.permute.xlu1 %v10112_v38 }
 0x202   : > { %v6577_v30 = vpop.permute.xlu2 %1518  ;;  %1864 = vperm.xlu1 %5479, %v6438_v6  }
 0x203   : > { %10153 = vst [vmem:[#allocation92_spill] sm:$0xff] %v6577_v30 }
 0x204   : > { %1779 = vperm.xlu2 %5476, %v6582_v2   ;;  %2272 = vperm.xlu0 %5437, %v6580_v28  }
 0x206   : > { %v6586_v36 = vpop.permute.xlu0 %870 }
 0x207   : > { %10154 = vst [vmem:[#allocation93_spill] sm:$0xff] %v6586_v36  ;;  %v6588_v25 = vpop.permute.xlu1 %1317  ;;  %v6604_v36 = vld [vmem:[#allocation2 + $0x194] sm:$0xff] }
 0x208   : > { %10155 = vst [vmem:[#allocation94_spill] sm:$0xff] %v6588_v25 }
 0x20a   : > { %v6590_v34 = vpop.permute.xlu2 %865  ;;  %1872 = vperm.xlu1 %5479, %v6568_v42  }
 0x20b   : > { %10156 = vst [vmem:[#allocation95_spill] sm:$0xff] %v6590_v34 }
 0x20c   : > { %1794 = vperm.xlu2 %5476, %v6204_v24   ;;  %2423 = vperm.xlu0 %5437, %v6568_v42  }
 0x20e   : > { %v6595_v30 = vpop.permute.xlu0 %1327 }
 0x20f   : > { %10157 = vst [vmem:[#allocation96_spill] sm:$0xff] %v6595_v30  ;;  %v6597_v13 = vpop.permute.xlu1 %1096 }
 0x210   : > { %10158 = vst [vmem:[#allocation97_spill] sm:$0xff] %v6597_v13 }
 0x212   : > { %1884 = vperm.xlu1 %5479, %v6582_v2  }
 0x213   : > { %v6602_v21 = vpop.permute.xlu2 %1198 }
 0x214   : > { %10159 = vst [vmem:[#allocation98_spill] sm:$0xff] %v6602_v21  ;;  %1809 = vperm.xlu2 %5476, %v6604_v36   ;;  %2448 = vperm.xlu0 %5437, %v6600_v50  }
 0x216   : > { %v6608_v25 = vpop.permute.xlu0 %1769 }
 0x217   : > { %10160 = vst [vmem:[#allocation99_spill] sm:$0xff] %v6608_v25 }
 0x218   : > { %v6610_v34 = vpop.permute.xlu1 %1428 }
 0x219   : > { %10161 = vst [vmem:[#allocation100_spill] sm:$0xff] %v6610_v34  ;;  %v6632_v34 = vld [vmem:[#allocation2 + $0x1e4] sm:$0xff] }
 0x21a   : > { %1896 = vperm.xlu1 %5479, %v6204_v24  }
 0x21b   : > { %v6613_v30 = vpop.permute.xlu2 %1634 }
 0x21c   : > { %10162 = vst [vmem:[#allocation101_spill] sm:$0xff] %v6613_v30  ;;  %5478 = vset.pattern.permute.xlu2 %v10112_v38  ;;  %2463 = vperm.xlu0 %5437, %v6552_v44  }
 0x21d   : > { %1856 = vperm.xlu2 %5478, %v6391_v48  }
 0x21e   : > { %v6618_v13 = vpop.permute.xlu0 %1784 }
 0x21f   : > { %10163 = vst [vmem:[#allocation102_spill] sm:$0xff] %v6618_v13 }
 0x221   : > { %v6620_v21 = vpop.permute.xlu1 %1528 }
 0x222   : > { %10164 = vst [vmem:[#allocation103_spill] sm:$0xff] %v6620_v21  ;;  %1908 = vperm.xlu1 %5479, %v6604_v36  }
 0x223   : > { %v6623_v56 = vpop.permute.xlu2 %976 }
 0x224   : > { %10165 = vst [vmem:[#allocation104_spill] sm:$0xff] %v6623_v56  ;;  %2478 = vperm.xlu0 %5437, %v6561_v5   ;;  %v2638_v56 = vld [vmem:[#allocation2 + $0xf8] sm:$0xff] }
 0x225   : > { %1868 = vperm.xlu2 %5478, %v6487_v40  }
 0x226   : > { %v6627_v24 = vpop.permute.xlu0 %1799 }
 0x227   : > { %10166 = vst [vmem:[#allocation105_spill] sm:$0xff] %v6627_v24  ;;  %v6646_v24 = vld [vmem:[#allocation2 + $0xa8] sm:$0xff] }
 0x229   : > { %v6629_v30 = vpop.permute.xlu1 %875 }
 0x22a   : > { %10167 = vst [vmem:[#allocation106_spill] sm:$0xff] %v6629_v30  ;;  %5480 = vset.pattern.permute.xlu1 %v10113_v35  ;;  %v6654_v30 = vld [vmem:[#allocation2 + $0x98] sm:$0xff] }
 0x22b   : > { %1970 = vperm.xlu1 %5480, %v6427_v43  }
 0x22c   : > { %v6635_v48 = vpop.permute.xlu2 %1322  ;;  %2493 = vperm.xlu0 %5437, %v6632_v34  }
 0x22d   : > { %10168 = vst [vmem:[#allocation107_spill] sm:$0xff] %v6635_v48  ;;  %1876 = vperm.xlu2 %5478, %v6450_v1  }
 0x22e   : > { %v6639_v21 = vpop.permute.xlu0 %1814 }
 0x22f   : > { %10169 = vst [vmem:[#allocation108_spill] sm:$0xff] %v6639_v21 }
 0x232   : > { %v6641_v13 = vpop.permute.xlu1 %1206 }
 0x233   : > { %10170 = vst [vmem:[#allocation109_spill] sm:$0xff] %v6641_v13  ;;  %1985 = vperm.xlu1 %5480, %v6436_v47  }
 0x234   : > { %v6644_v40 = vpop.permute.xlu2 %1101  ;;  %2659 = vperm.xlu0 %5437, %v6646_v24  }
 0x235   : > { %10171 = vst [vmem:[#allocation110_spill] sm:$0xff] %v6644_v40  ;;  %1888 = vperm.xlu2 %5478, %v6261_v4  }
 0x236   : > { %v6650_v25 = vpop.permute.xlu0 %1980 }
 0x237   : > { %10172 = vst [vmem:[#allocation111_spill] sm:$0xff] %v6650_v25 }
 0x23a   : > { %v6652_v48 = vpop.permute.xlu1 %1642 }
 0x23b   : > { %10173 = vst [vmem:[#allocation112_spill] sm:$0xff] %v6652_v48  ;;  %1995 = vperm.xlu1 %5480, %v6654_v30  }
 0x23c   : > { %2684 = vperm.xlu0 %5437, %v2638_v56   ;;  %v2644_v56 = vld [vmem:[#allocation2 + $0x1d8] sm:$0xff] }
 0x23d   : > { %1900 = vperm.xlu2 %5478, %v6241_v49   ;;  %v6658_v13 = vpop.permute.xlu2 %1432 }
 0x23e   : > { %10174 = vst [vmem:[#allocation113_spill] sm:$0xff] %v6658_v13  ;;  %v6660_v40 = vpop.permute.xlu0 %2005 }
 0x23f   : > { %10175 = vst [vmem:[#allocation114_spill] sm:$0xff] %v6660_v40 }
 0x243   : > { %2010 = vperm.xlu1 %5480, %v6276_v22   ;;  %v6663_v21 = vpop.permute.xlu1 %1749 }
 0x244   : > { %10176 = vst [vmem:[#allocation115_spill] sm:$0xff] %v6663_v21  ;;  %2699 = vperm.xlu0 %5437, %v6665_v52  }
 0x245   : > { %1912 = vperm.xlu2 %5478, %v6479_v46  }
 0x246   : > { %v6669_v25 = vpop.permute.xlu2 %1533  ;;  %v6671_v48 = vpop.permute.xlu0 %2020 }
 0x247   : > { %10177 = vst [vmem:[#allocation116_spill] sm:$0xff] %v6669_v25 }
 0x248   : > { %10178 = vst [vmem:[#allocation117_spill] sm:$0xff] %v6671_v48  ;;  %v6686_v48 = vld [vmem:[#allocation2 + $0x88] sm:$0xff] }
 0x24b   : > { %2025 = vperm.xlu1 %5480, %v6250_v60   ;;  %v6674_v13 = vpop.permute.xlu1 %1759  ;;  %v5577_v60 = vld [vmem:[#allocation2 + $0x20] sm:$0xff] }
 0x24c   : > { %10179 = vst [vmem:[#allocation118_spill] sm:$0xff] %v6674_v13  ;;  %2714 = vperm.xlu0 %5437, %v2644_v56  }
 0x24d   : > { %5481 = vset.pattern.permute.xlu2 %v10113_v35 }
 0x24e   : > { %1975 = vperm.xlu2 %5481, %v6423_v63   ;;  %v6678_v21 = vpop.permute.xlu2 %1754  ;;  %v6680_v40 = vpop.permute.xlu0 %2035 }
 0x24f   : > { %10180 = vst [vmem:[#allocation119_spill] sm:$0xff] %v6678_v21 }
 0x250   : > { %10181 = vst [vmem:[#allocation120_spill] sm:$0xff] %v6680_v40 }
 0x253   : > { %2040 = vperm.xlu1 %5480, %v6665_v52   ;;  %v6683_v46 = vpop.permute.xlu1 %1774 }
 0x254   : > { %10182 = vst [vmem:[#allocation121_spill] sm:$0xff] %v6683_v46  ;;  %5494 = vset.pattern.permute.xlu0 %v10112_v38 }
 0x255   : > { %960 = vperm.xlu0 %5494, %v5577_v60  }
 0x256   : > { %1990 = vperm.xlu2 %5481, %v6686_v48   ;;  %v6689_v56 = vpop.permute.xlu2 %1764  ;;  %v6691_v13 = vpop.permute.xlu0 %2202 }
 0x257   : > { %10183 = vst [vmem:[#allocation122_spill] sm:$0xff] %v6689_v56  ;;  %v5578_v56 = vld [vmem:[#allocation2 + $0x120] sm:$0xff] }
 0x258   : > { %10184 = vst [vmem:[#allocation123_spill] sm:$0xff] %v6691_v13 }
 0x25b   : > { %5482 = vset.pattern.permute.xlu1 %v10112_v38  ;;  %v6694_v21 = vpop.permute.xlu1 %1789 }
 0x25c   : > { %10185 = vst [vmem:[#allocation124_spill] sm:$0xff] %v6694_v21  ;;  %2086 = vperm.xlu1 %5482, %v6423_v63  }
 0x25d   : > { %980 = vperm.xlu0 %5494, %v6474_v17   ;;  %v6714_v17 = vld [vmem:[#allocation2 + $0x188] sm:$0xff] }
 0x25e   : > { %2000 = vperm.xlu2 %5481, %v6646_v24   ;;  %v6699_v46 = vpop.permute.xlu2 %1779  ;;  %v6701_v40 = vpop.permute.xlu0 %2227 }
 0x25f   : > { %10186 = vst [vmem:[#allocation125_spill] sm:$0xff] %v6699_v46 }
 0x260   : > { %10187 = vst [vmem:[#allocation126_spill] sm:$0xff] %v6701_v40 }
 0x263   : > { %v6703_v60 = vpop.permute.xlu1 %1804 }
 0x264   : > { %10188 = vst [vmem:[#allocation127_spill] sm:$0xff] %v6703_v60  ;;  %2094 = vperm.xlu1 %5482, %v6436_v47  }
 0x265   : > { %992 = vperm.xlu0 %5494, %v5578_v56  }
 0x266   : > { %2015 = vperm.xlu2 %5481, %v6298_v37   ;;  %v6707_v13 = vpop.permute.xlu2 %1794  ;;  %v6709_v21 = vpop.permute.xlu0 %2242 }
 0x267   : > { %10189 = vst [vmem:[#allocation128_spill] sm:$0xff] %v6707_v13  ;;  %v6725_v13 = vld [vmem:[#allocation2 + $0x1b8] sm:$0xff] }
 0x268   : > { %10190 = vst [vmem:[#allocation129_spill] sm:$0xff] %v6709_v21  ;;  %v5579_v21 = vld [vmem:[#allocation2 + $0x14] sm:$0xff] }
 0x26b   : > { %v6711_v25 = vpop.permute.xlu1 %1819 }
 0x26c   : > { %10191 = vst [vmem:[#allocation130_spill] sm:$0xff] %v6711_v25  ;;  %2106 = vperm.xlu1 %5482, %v6646_v24  }
 0x26d   : > { %1004 = vperm.xlu0 %5494, %v6288_v32  }
 0x26e   : > { %2030 = vperm.xlu2 %5481, %v6714_v17   ;;  %v6718_v60 = vpop.permute.xlu2 %1809  ;;  %v6720_v47 = vpop.permute.xlu0 %2257 }
 0x26f   : > { %10192 = vst [vmem:[#allocation131_spill] sm:$0xff] %v6718_v60 }
 0x270   : > { %10193 = vst [vmem:[#allocation132_spill] sm:$0xff] %v6720_v47 }
 0x274   : > { %2118 = vperm.xlu1 %5482, %v6298_v37   ;;  %v6723_v56 = vpop.permute.xlu1 %1864 }
 0x275   : > { %10194 = vst [vmem:[#allocation133_spill] sm:$0xff] %v6723_v56  ;;  %1182 = vperm.xlu0 %5494, %v5579_v21  }
 0x276   : > { %2045 = vperm.xlu2 %5481, %v6725_v13   ;;  %v6728_v25 = vpop.permute.xlu0 %2272 }
 0x277   : > { %10195 = vst [vmem:[#allocation134_spill] sm:$0xff] %v6728_v25  ;;  %v6730_v40 = vpop.permute.xlu2 %1856  ;;  %v5580_v25 = vld [vmem:[#allocation2 + $0x114] sm:$0xff] }
 0x278   : > { %10196 = vst [vmem:[#allocation135_spill] sm:$0xff] %v6730_v40 }
 0x27c   : > { %2130 = vperm.xlu1 %5482, %v6714_v17   ;;  %v6733_v32 = vpop.permute.xlu1 %1872 }
 0x27d   : > { %10197 = vst [vmem:[#allocation136_spill] sm:$0xff] %v6733_v32  ;;  %1202 = vperm.xlu0 %5494, %v6438_v6  }
 0x27e   : > { %5483 = vset.pattern.permute.xlu2 %v10112_v38  ;;  %v6737_v37 = vpop.permute.xlu0 %2423 }
 0x27f   : > { %10198 = vst [vmem:[#allocation137_spill] sm:$0xff] %v6737_v37  ;;  %2090 = vperm.xlu2 %5483, %v6454_v31   ;;  %v6740_v56 = vpop.permute.xlu2 %1868  ;;  %v6753_v37 = vld [vmem:[#allocation2 + $0xa0] sm:$0xff] }
 0x280   : > { %10199 = vst [vmem:[#allocation138_spill] sm:$0xff] %v6740_v56  ;;  %v2184_v56 = vld [vmem:[#allocation2 + $0xd0] sm:$0xff] }
 0x284   : > { %2142 = vperm.xlu1 %5482, %v6725_v13   ;;  %v6743_v21 = vpop.permute.xlu1 %1884 }
 0x285   : > { %10200 = vst [vmem:[#allocation139_spill] sm:$0xff] %v6743_v21  ;;  %1214 = vperm.xlu0 %5494, %v5580_v25  }
 0x286   : > { %v6745_v40 = vpop.permute.xlu0 %2448 }
 0x287   : > { %10201 = vst [vmem:[#allocation140_spill] sm:$0xff] %v6745_v40  ;;  %2098 = vperm.xlu2 %5483, %v6686_v48   ;;  %v6748_v47 = vpop.permute.xlu2 %1876  ;;  %v6762_v40 = vld [vmem:[#allocation2 + $0xc0] sm:$0xff] }
 0x288   : > { %10202 = vst [vmem:[#allocation141_spill] sm:$0xff] %v6748_v47 }
 0x28c   : > { %5485 = vset.pattern.permute.xlu1 %v10113_v35  ;;  %v6751_v6 = vpop.permute.xlu1 %1896 }
 0x28d   : > { %10203 = vst [vmem:[#allocation142_spill] sm:$0xff] %v6751_v6  ;;  %2207 = vperm.xlu1 %5485, %v6753_v37   ;;  %1226 = vperm.xlu0 %5494, %v6261_v4   ;;  %v6773_v4 = vld [vmem:[#allocation2 + $0xf0] sm:$0xff] }
 0x28e   : > { %v6757_v31 = vpop.permute.xlu0 %2463 }
 0x28f   : > { %10204 = vst [vmem:[#allocation143_spill] sm:$0xff] %v6757_v31  ;;  %2110 = vperm.xlu2 %5483, %v6501_v45   ;;  %v6760_v25 = vpop.permute.xlu2 %1888 }
 0x290   : > { %10205 = vst [vmem:[#allocation144_spill] sm:$0xff] %v6760_v25  ;;  %v5581_v25 = vld [vmem:[#allocation2 + $0x8] sm:$0xff] }
 0x294   : > { %v6764_v21 = vpop.permute.xlu1 %1908 }
 0x295   : > { %10206 = vst [vmem:[#allocation145_spill] sm:$0xff] %v6764_v21  ;;  %2217 = vperm.xlu1 %5485, %v6762_v40   ;;  %1238 = vperm.xlu0 %5494, %v6241_v49   ;;  %v6783_v49 = vld [vmem:[#allocation2 + $0x1a0] sm:$0xff] }
 0x296   : > { %v6768_v6 = vpop.permute.xlu0 %2478 }
 0x297   : > { %10207 = vst [vmem:[#allocation146_spill] sm:$0xff] %v6768_v6  ;;  %2122 = vperm.xlu2 %5483, %v6229_v39   ;;  %v6771_v47 = vpop.permute.xlu2 %1900 }
 0x298   : > { %10208 = vst [vmem:[#allocation147_spill] sm:$0xff] %v6771_v47 }
 0x29d   : > { %2232 = vperm.xlu1 %5485, %v6773_v4   ;;  %v6776_v45 = vpop.permute.xlu1 %1970  ;;  %1404 = vperm.xlu0 %5494, %v5581_v25  }
 0x29e   : > { %10209 = vst [vmem:[#allocation148_spill] sm:$0xff] %v6776_v45  ;;  %v6778_v31 = vpop.permute.xlu0 %2493  ;;  %v2179_v45 = vld [vmem:[#allocation2 + $0x80] sm:$0xff] }
 0x29f   : > { %10210 = vst [vmem:[#allocation149_spill] sm:$0xff] %v6778_v31  ;;  %2134 = vperm.xlu2 %5483, %v6519_v0   ;;  %v6781_v21 = vpop.permute.xlu2 %1912  ;;  %v6794_v31 = vld [vmem:[#allocation2 + $0x1d0] sm:$0xff] }
 0x2a0   : > { %10211 = vst [vmem:[#allocation150_spill] sm:$0xff] %v6781_v21  ;;  %v5582_v21 = vld [vmem:[#allocation2 + $0x108] sm:$0xff] }
 0x2a5   : > { %2247 = vperm.xlu1 %5485, %v6783_v49   ;;  %v6786_v6 = vpop.permute.xlu1 %1985  ;;  %1424 = vperm.xlu0 %5494, %v6423_v63  }
 0x2a6   : > { %10212 = vst [vmem:[#allocation151_spill] sm:$0xff] %v6786_v6  ;;  %v6789_v47 = vpop.permute.xlu0 %2659  ;;  %v2182_v6 = vld [vmem:[#allocation2 + $0xb0] sm:$0xff] }
 0x2a7   : > { %10213 = vst [vmem:[#allocation152_spill] sm:$0xff] %v6789_v47  ;;  %5484 = vset.pattern.permute.xlu2 %v10113_v35 }
 0x2a8   : > { %2197 = vperm.xlu2 %5484, %v2179_v45   ;;  %v6792_v25 = vpop.permute.xlu2 %1975 }
 0x2a9   : > { %10214 = vst [vmem:[#allocation153_spill] sm:$0xff] %v6792_v25  ;;  %v5583_v25 = vld [vmem:[#allocation2 + $0x138] sm:$0xff] }
 0x2ad   : > { %2262 = vperm.xlu1 %5485, %v6794_v31   ;;  %v6797_v0 = vpop.permute.xlu1 %1995  ;;  %1436 = vperm.xlu0 %5494, %v5582_v21  }
 0x2ae   : > { %10215 = vst [vmem:[#allocation154_spill] sm:$0xff] %v6797_v0  ;;  %v6799_v60 = vpop.permute.xlu0 %2684 }
 0x2af   : > { %10216 = vst [vmem:[#allocation155_spill] sm:$0xff] %v6799_v60 }
 0x2b0   : > { %2212 = vperm.xlu2 %5484, %v2182_v6   ;;  %v6801_v63 = vpop.permute.xlu2 %1990 }
 0x2b1   : > { %10217 = vst [vmem:[#allocation156_spill] sm:$0xff] %v6801_v63  ;;  %v2187_v63 = vld [vmem:[#allocation2 + $0x180] sm:$0xff] }
 0x2b5   : > { %5486 = vset.pattern.permute.xlu1 %v10112_v38  ;;  %v6804_v47 = vpop.permute.xlu1 %2010  ;;  %1448 = vperm.xlu0 %5494, %v5583_v25  }
 0x2b6   : > { %10218 = vst [vmem:[#allocation157_spill] sm:$0xff] %v6804_v47  ;;  %2309 = vperm.xlu1 %5486, %v2179_v45   ;;  %v6806_v32 = vpop.permute.xlu0 %2699  ;;  %v2190_v45 = vld [vmem:[#allocation2 + $0x1b0] sm:$0xff] }
 0x2b7   : > { %10219 = vst [vmem:[#allocation158_spill] sm:$0xff] %v6806_v32 }
 0x2b8   : > { %2222 = vperm.xlu2 %5484, %v2184_v56   ;;  %v6808_v0 = vpop.permute.xlu2 %2000 }
 0x2bd   : > { %v6810_v21 = vpop.permute.xlu1 %2025  ;;  %1460 = vperm.xlu0 %5494, %v6229_v39  }
 0x2be   : > { %10220 = vst [vmem:[#allocation159_spill] sm:$0xff] %v6810_v21  ;;  %2321 = vperm.xlu1 %5486, %v2182_v6   ;;  %v6813_v60 = vpop.permute.xlu0 %2714  ;;  %v2193_v21 = vld [vmem:[#allocation2 + $0x1e0] sm:$0xff] }
 0x2bf   : > { %10221 = vst [vmem:[#allocation160_spill] sm:$0xff] %v6813_v60 }
 0x2c0   : > { %2237 = vperm.xlu2 %5484, %v2187_v63   ;;  %v6815_v46 = vpop.permute.xlu2 %2015 }
 0x2c5   : > { %v6817_v47 = vpop.permute.xlu1 %2040  ;;  %1638 = vperm.xlu0 %5494, %v6420_v62  }
 0x2c6   : > { %10222 = vst [vmem:[#allocation161_spill] sm:$0xff] %v6817_v47  ;;  %2329 = vperm.xlu1 %5486, %v2184_v56   ;;  %v2418_v47 = vld [vmem:[#allocation2 + $0x1d4] sm:$0xff] }
 0x2c7   : > { %v6820_v25 = vpop.permute.xlu0 %960 }
 0x2c8   : > { %2252 = vperm.xlu2 %5484, %v2190_v45   ;;  %v6822_v32 = vpop.permute.xlu2 %2030 }
 0x2c9   : > { %10223 = vst [vmem:[#allocation162_spill] sm:$0xff] %v6822_v32 }
 0x2cd   : > { %1658 = vperm.xlu0 %5494, %v6323_v18  }
 0x2ce   : > { %2341 = vperm.xlu1 %5486, %v2187_v63   ;;  %v6825_v39 = vpop.permute.xlu1 %2086 }
 0x2cf   : > { %10224 = vst [vmem:[#allocation163_spill] sm:$0xff] %v6825_v39  ;;  %v6827_v6 = vpop.permute.xlu0 %980 }
 0x2d0   : > { %2267 = vperm.xlu2 %5484, %v2193_v21   ;;  %v6829_v60 = vpop.permute.xlu2 %2045 }
 0x2d1   : > { %10225 = vst [vmem:[#allocation164_spill] sm:$0xff] %v6829_v60 }
 0x2d5   : > { %1670 = vperm.xlu0 %5494, %v6202_v23  }
 0x2d6   : > { %2353 = vperm.xlu1 %5486, %v2190_v45   ;;  %v6832_v62 = vpop.permute.xlu1 %2094 }
 0x2d7   : > { %10226 = vst [vmem:[#allocation165_spill] sm:$0xff] %v6832_v62  ;;  %v6834_v56 = vpop.permute.xlu0 %992 }
 0x2d8   : > { %5487 = vset.pattern.permute.xlu2 %v10112_v38 }
 0x2d9   : > { %2313 = vperm.xlu2 %5487, %v6305_v8   ;;  %v6838_v18 = vpop.permute.xlu2 %2090 }
 0x2da   : > { %10227 = vst [vmem:[#allocation166_spill] sm:$0xff] %v6838_v18 }
 0x2dd   : > { %1682 = vperm.xlu0 %5494, %v6336_v51  }
 0x2de   : > { %2365 = vperm.xlu1 %5486, %v2193_v21   ;;  %v6841_v63 = vpop.permute.xlu1 %2106 }
 0x2df   : > { %10228 = vst [vmem:[#allocation167_spill] sm:$0xff] %v6841_v63  ;;  %v6843_v39 = vpop.permute.xlu0 %1004 }
 0x2e1   : > { %2325 = vperm.xlu2 %5487, %v6762_v40   ;;  %v6846_v23 = vpop.permute.xlu2 %2098 }
 0x2e2   : > { %10229 = vst [vmem:[#allocation168_spill] sm:$0xff] %v6846_v23 }
 0x2e5   : > { %1860 = vperm.xlu0 %5494, %v6399_v26  }
 0x2e6   : > { %5488 = vset.pattern.permute.xlu1 %v10113_v35  ;;  %v6850_v45 = vpop.permute.xlu1 %2118 }
 0x2e7   : > { %10230 = vst [vmem:[#allocation169_spill] sm:$0xff] %v6850_v45  ;;  %2428 = vperm.xlu1 %5488, %v6450_v1   ;;  %v6853_v8 = vpop.permute.xlu0 %1182  ;;  %v6867_v45 = vld [vmem:[#allocation2 + $0xe4] sm:$0xff] }
 0x2e9   : > { %2333 = vperm.xlu2 %5487, %v6541_v53   ;;  %v6856_v21 = vpop.permute.xlu2 %2110 }
 0x2ea   : > { %10231 = vst [vmem:[#allocation170_spill] sm:$0xff] %v6856_v21  ;;  %v6899_v21 = vld [vmem:[#allocation2 + $0x1f4] sm:$0xff] }
 0x2ed   : > { %1880 = vperm.xlu0 %5494, %v6528_v20  }
 0x2ee   : > { %v6859_v63 = vpop.permute.xlu1 %2130 }
 0x2ef   : > { %10232 = vst [vmem:[#allocation171_spill] sm:$0xff] %v6859_v63  ;;  %2438 = vperm.xlu1 %5488, %v6582_v2   ;;  %v6862_v40 = vpop.permute.xlu0 %1202 }
 0x2f1   : > { %2345 = vperm.xlu2 %5487, %v6336_v51   ;;  %v6865_v26 = vpop.permute.xlu2 %2122 }
 0x2f2   : > { %10233 = vst [vmem:[#allocation172_spill] sm:$0xff] %v6865_v26 }
 0x2f5   : > { %1892 = vperm.xlu0 %5494, %v6292_v33  }
 0x2f6   : > { %v6870_v18 = vpop.permute.xlu1 %2142 }
 0x2f7   : > { %10234 = vst [vmem:[#allocation173_spill] sm:$0xff] %v6870_v18  ;;  %2453 = vperm.xlu1 %5488, %v6867_v45   ;;  %v6873_v53 = vpop.permute.xlu0 %1214  ;;  %v6887_v18 = vld [vmem:[#allocation2 + $0x1c4] sm:$0xff] }
 0x2f9   : > { %2357 = vperm.xlu2 %5487, %v6566_v11   ;;  %v6876_v63 = vpop.permute.xlu2 %2134 }
 0x2fa   : > { %10235 = vst [vmem:[#allocation174_spill] sm:$0xff] %v6876_v63 }
 0x2fd   : > { %1904 = vperm.xlu0 %5494, %v6552_v44  }
 0x2ff   : > { %2468 = vperm.xlu1 %5488, %v6604_v36   ;;  %v6880_v51 = vpop.permute.xlu1 %2207  ;;  %v6882_v26 = vpop.permute.xlu0 %1226 }
 0x300   : > { %10236 = vst [vmem:[#allocation175_spill] sm:$0xff] %v6880_v51 }
 0x301   : > { %2369 = vperm.xlu2 %5487, %v6580_v28  }
 0x302   : > { %v6885_v33 = vpop.permute.xlu2 %2197 }
 0x303   : > { %10237 = vst [vmem:[#allocation176_spill] sm:$0xff] %v6885_v33  ;;  %v2409_v33 = vld [vmem:[#allocation2 + $0xc4] sm:$0xff] }
 0x305   : > { %1916 = vperm.xlu0 %5494, %v6561_v5  }
 0x307   : > { %2483 = vperm.xlu1 %5488, %v6887_v18   ;;  %v6891_v11 = vpop.permute.xlu1 %2217  ;;  %v6893_v63 = vpop.permute.xlu0 %1238 }
 0x308   : > { %10238 = vst [vmem:[#allocation177_spill] sm:$0xff] %v6891_v11 }
 0x309   : > { %10239 = vst [vmem:[#allocation178_spill] sm:$0xff] %v6893_v63  ;;  %5489 = vset.pattern.permute.xlu2 %v10113_v35 }
 0x30a   : > { %2433 = vperm.xlu2 %5489, %v6528_v20   ;;  %v6897_v51 = vpop.permute.xlu2 %2212 }
 0x30b   : > { %10240 = vst [vmem:[#allocation179_spill] sm:$0xff] %v6897_v51  ;;  %v2412_v51 = vld [vmem:[#allocation2 + $0xf4] sm:$0xff] }
 0x30d   : > { %2082 = vperm.xlu0 %5494, %v6427_v43  }
 0x30f   : > { %2498 = vperm.xlu1 %5488, %v6899_v21   ;;  %v6903_v28 = vpop.permute.xlu1 %2232  ;;  %v6905_v23 = vpop.permute.xlu0 %1404 }
 0x310   : > { %10241 = vst [vmem:[#allocation180_spill] sm:$0xff] %v6903_v28 }
 0x311   : > { %10242 = vst [vmem:[#allocation181_spill] sm:$0xff] %v6905_v23 }
 0x312   : > { %2443 = vperm.xlu2 %5489, %v2409_v33   ;;  %v6907_v11 = vpop.permute.xlu2 %2222 }
 0x313   : > { %10243 = vst [vmem:[#allocation182_spill] sm:$0xff] %v6907_v11  ;;  %v2415_v11 = vld [vmem:[#allocation2 + $0x1a4] sm:$0xff] }
 0x315   : > { %2102 = vperm.xlu0 %5494, %v6654_v30  }
 0x317   : > { %5491 = vset.pattern.permute.xlu1 %v10112_v38  ;;  %v6911_v60 = vpop.permute.xlu1 %2247  ;;  %v6913_v32 = vpop.permute.xlu0 %1424 }
 0x318   : > { %10244 = vst [vmem:[#allocation183_spill] sm:$0xff] %v6911_v60  ;;  %2543 = vperm.xlu1 %5491, %v6528_v20   ;;  %v5584_v60 = vld [vmem:[#allocation2 + $0x178] sm:$0xff] }
 0x319   : > { %10245 = vst [vmem:[#allocation184_spill] sm:$0xff] %v6913_v32 }
 0x31a   : > { %2458 = vperm.xlu2 %5489, %v2412_v51   ;;  %v6916_v43 = vpop.permute.xlu2 %2237 }
 0x31b   : > { %10246 = vst [vmem:[#allocation185_spill] sm:$0xff] %v6916_v43 }
 0x31d   : > { %2114 = vperm.xlu0 %5494, %v6276_v22  }
 0x31f   : > { %v6919_v28 = vpop.permute.xlu1 %2262  ;;  %v6921_v23 = vpop.permute.xlu0 %1436 }
 0x320   : > { %10247 = vst [vmem:[#allocation186_spill] sm:$0xff] %v6919_v28  ;;  %2551 = vperm.xlu1 %5491, %v2409_v33   ;;  %v10287_v28 = vld [vmem:[#allocation22_spill] sm:$0xff] }
 0x321   : > { %10248 = vst [vmem:[#allocation187_spill] sm:$0xff] %v6921_v23  ;;  %v10318_v23 = vld [vmem:[#allocation83_spill] sm:$0xff] }
 0x322   : > { %2473 = vperm.xlu2 %5489, %v2415_v11   ;;  %v6923_v62 = vpop.permute.xlu2 %2252 }
 0x323   : > { %10249 = vst [vmem:[#allocation188_spill] sm:$0xff] %v6923_v62 }
 0x325   : > { %2126 = vperm.xlu0 %5494, %v5584_v60  }
 0x327   : > { %v6925_v32 = vpop.permute.xlu0 %1448 }
 0x328   : > { %10250 = vst [vmem:[#allocation189_spill] sm:$0xff] %v6925_v32  ;;  %2563 = vperm.xlu1 %5491, %v2412_v51   ;;  %v6927_v20 = vpop.permute.xlu1 %2309 }
 0x329   : > { %10251 = vst [vmem:[#allocation190_spill] sm:$0xff] %v6927_v20 }
 0x32a   : > { %2488 = vperm.xlu2 %5489, %v2418_v47   ;;  %v6929_v43 = vpop.permute.xlu2 %2267 }
 0x32b   : > { %10252 = vst [vmem:[#allocation191_spill] sm:$0xff] %v6929_v43 }
 0x32d   : > { %2138 = vperm.xlu0 %5494, %v6665_v52  }
 0x32f   : > { %v6932_v22 = vpop.permute.xlu0 %1460 }
 0x330   : > { %10253 = vst [vmem:[#allocation192_spill] sm:$0xff] %v6932_v22  ;;  %2575 = vperm.xlu1 %5491, %v2415_v11   ;;  %v6934_v33 = vpop.permute.xlu1 %2321  ;;  %v7199_v22 = vld [vmem:[#allocation2 + $0x1f8] sm:$0xff] }
 0x331   : > { %10254 = vst [vmem:[#allocation193_spill] sm:$0xff] %v6934_v33 }
 0x332   : > { %5490 = vset.pattern.permute.xlu2 %v10112_v38 }
 0x333   : > { %2535 = vperm.xlu2 %5490, %v6568_v42   ;;  %v6938_v60 = vpop.permute.xlu2 %2313 }
 0x334   : > { %10255 = vst [vmem:[#allocation194_spill] sm:$0xff] %v6938_v60 }
 0x335   : > { %2317 = vperm.xlu0 %5494, %v6753_v37  }
 0x337   : > { %v6941_v51 = vpop.permute.xlu0 %1638 }
 0x338   : > { %10256 = vst [vmem:[#allocation195_spill] sm:$0xff] %v6941_v51  ;;  %2587 = vperm.xlu1 %5491, %v2418_v47   ;;  %v6943_v20 = vpop.permute.xlu1 %2329  ;;  %v10316_v51 = vld [vmem:[#allocation38_spill] sm:$0xff] }
 0x339   : > { %10257 = vst [vmem:[#allocation196_spill] sm:$0xff] %v6943_v20  ;;  %v6963_v20 = vld [vmem:[#allocation2 + $0xb8] sm:$0xff] }
 0x33b   : > { %2547 = vperm.xlu2 %5490, %v6582_v2   ;;  %v6946_v52 = vpop.permute.xlu2 %2325 }
 0x33c   : > { %10258 = vst [vmem:[#allocation197_spill] sm:$0xff] %v6946_v52 }
 0x33d   : > { %2337 = vperm.xlu0 %5494, %v6773_v4  }
 0x33f   : > { %v6949_v11 = vpop.permute.xlu0 %1658 }
 0x340   : > { %10259 = vst [vmem:[#allocation198_spill] sm:$0xff] %v6949_v11  ;;  %5492 = vset.pattern.permute.xlu1 %v10113_v35  ;;  %v6952_v42 = vpop.permute.xlu1 %2341 }
 0x341   : > { %10260 = vst [vmem:[#allocation199_spill] sm:$0xff] %v6952_v42  ;;  %2649 = vperm.xlu1 %5492, %v6686_v48   ;;  %v6970_v42 = vld [vmem:[#allocation2 + $0xd8] sm:$0xff] }
 0x343   : > { %2555 = vperm.xlu2 %5490, %v6600_v50   ;;  %v6956_v37 = vpop.permute.xlu2 %2333 }
 0x344   : > { %10261 = vst [vmem:[#allocation200_spill] sm:$0xff] %v6956_v37 }
 0x345   : > { %2349 = vperm.xlu0 %5494, %v6783_v49  }
 0x347   : > { %v6959_v47 = vpop.permute.xlu0 %1670 }
 0x348   : > { %10262 = vst [vmem:[#allocation201_spill] sm:$0xff] %v6959_v47  ;;  %v6961_v2 = vpop.permute.xlu1 %2353 }
 0x349   : > { %10263 = vst [vmem:[#allocation202_spill] sm:$0xff] %v6961_v2  ;;  %2664 = vperm.xlu1 %5492, %v6963_v20  }
 0x34b   : > { %2567 = vperm.xlu2 %5490, %v6552_v44   ;;  %v6967_v4 = vpop.permute.xlu2 %2345 }
 0x34c   : > { %10264 = vst [vmem:[#allocation203_spill] sm:$0xff] %v6967_v4 }
 0x34d   : > { %2361 = vperm.xlu0 %5494, %v6794_v31  }
 0x34f   : > { %v6972_v50 = vpop.permute.xlu0 %1682 }
 0x350   : > { %10265 = vst [vmem:[#allocation204_spill] sm:$0xff] %v6972_v50  ;;  %v6974_v37 = vpop.permute.xlu1 %2365 }
 0x351   : > { %10266 = vst [vmem:[#allocation205_spill] sm:$0xff] %v6974_v37  ;;  %2674 = vperm.xlu1 %5492, %v6970_v42  }
 0x353   : > { %2579 = vperm.xlu2 %5490, %v6561_v5   ;;  %v6978_v49 = vpop.permute.xlu2 %2357 }
 0x354   : > { %10267 = vst [vmem:[#allocation206_spill] sm:$0xff] %v6978_v49  ;;  %v7000_v49 = vld [vmem:[#allocation2 + $0x1e8] sm:$0xff] }
 0x355   : > { %2539 = vperm.xlu0 %5494, %v6450_v1  }
 0x357   : > { %v6981_v2 = vpop.permute.xlu0 %1860 }
 0x358   : > { %10268 = vst [vmem:[#allocation207_spill] sm:$0xff] %v6981_v2  ;;  %v10315_v2 = vld [vmem:[#allocation36_spill] sm:$0xff] }
 0x359   : > { %2689 = vperm.xlu1 %5492, %v6714_v17   ;;  %v6984_v44 = vpop.permute.xlu1 %2428 }
 0x35a   : > { %10269 = vst [vmem:[#allocation208_spill] sm:$0xff] %v6984_v44 }
 0x35b   : > { %2591 = vperm.xlu2 %5490, %v6632_v34   ;;  %v6987_v31 = vpop.permute.xlu2 %2369 }
 0x35c   : > { %10270 = vst [vmem:[#allocation209_spill] sm:$0xff] %v6987_v31  ;;  %v7007_v31 = vld [vmem:[#allocation2 + $0xc8] sm:$0xff] }
 0x35d   : > { %2559 = vperm.xlu0 %5494, %v6867_v45  }
 0x35f   : > { %v6990_v37 = vpop.permute.xlu0 %1880 }
 0x360   : > { %10271 = vst [vmem:[#allocation210_spill] sm:$0xff] %v6990_v37 }
 0x361   : > { %2704 = vperm.xlu1 %5492, %v6725_v13   ;;  %v6993_v5 = vpop.permute.xlu1 %2438 }
 0x362   : > { %10272 = vst [vmem:[#allocation211_spill] sm:$0xff] %v6993_v5 }
 0x363   : > { %5493 = vset.pattern.permute.xlu2 %v10113_v35 }
 0x364   : > { %2654 = vperm.xlu2 %5493, %v6654_v30   ;;  %v6997_v1 = vpop.permute.xlu2 %2433 }
 0x365   : > { %10273 = vst [vmem:[#allocation212_spill] sm:$0xff] %v6997_v1  ;;  %2571 = vperm.xlu0 %5494, %v6604_v36   ;;  %v808_v1 = vld [vmem:[%s10027_s7] sm:$0x3] }
 0x366   : > { %v7016_v36 = vperm.slane %v808_v1, 0  ;;  %v7037_v52 = vperm.slane %v808_v1, 1 }
 0x367   : > { %v7002_v34 = vpop.permute.xlu0 %1892 }
 0x368   : > { %10274 = vst [vmem:[#allocation213_spill] sm:$0xff] %v7002_v34  ;;  %v919_v60 = vmul.f32 %v7016_v36, %v6361_v15  ;;  %v1016_v15 = vmul.f32 %v7037_v52, %v6174_v10  ;;  %v1027_v33 = vmul.f32 %v7037_v52, %v6227_v41 }
 0x369   : > { %2719 = vperm.xlu1 %5492, %v7000_v49   ;;  %v7005_v45 = vpop.permute.xlu1 %2453 }
 0x36a   : > { %10275 = vst [vmem:[#allocation214_spill] sm:$0xff] %v7005_v45  ;;  %v7023_v45 = vld [vmem:[#allocation2 + $0xe8] sm:$0xff] }
 0x36c   : > { %2669 = vperm.xlu2 %5493, %v7007_v31   ;;  %v7010_v5 = vpop.permute.xlu2 %2443 }
 0x36d   : > { %10276 = vst [vmem:[#allocation215_spill] sm:$0xff] %v7010_v5  ;;  %2583 = vperm.xlu0 %5494, %v6887_v18   ;;  %v927_v5 = vmul.f32 %v7016_v36, %v6100_v54  ;;  %v7033_v18 = vld [vmem:[%s10028_s8] ss:$0 sm:$0xff]  ;;  %v809_v54 = vld [vmem:[%s10027_s7 + $0x2] sm:$0x3] }
 0x36e   : > { %v935_v43 = vadd.f32 %v7033_v18, %v919_v60  ;;  %v7057_v34 = vperm.slane %v809_v54, 0 }
 0x36f   : > { %v7018_v4 = vpop.permute.xlu0 %1904  ;;  %v943_v1 = vadd.f32 %v7033_v18, %v927_v5 }
 0x370   : > { %10277 = vst [vmem:[#allocation216_spill] sm:$0xff] %v7018_v4  ;;  %v930_v4 = vmul.f32 %v7016_v36, %v6126_v58  ;;  %v920_v58 = vmul.f32 %v7016_v36, %v6367_v7  ;;  %v1017_v7 = vmul.f32 %v7037_v52, %v6155_v61  ;;  %v1032_v62 = vadd.f32 %v1016_v15, %v935_v43  ;;  %v10284_v15 = vld [vmem:[#allocation19_spill] sm:$0xff] }
 0x371   : > { %5495 = vset.pattern.permute.xlu1 %v10112_v38  ;;  %v7021_v44 = vpop.permute.xlu1 %2468  ;;  %v1145_v41 = vmul.f32 %v7057_v34, %v6383_v19  ;;  %v1153_v61 = vmul.f32 %v7057_v34, %v6395_v12  ;;  %v1148_v43 = vmul.f32 %v7057_v34, %v6256_v9  ;;  %v1156_v19 = vmul.f32 %v7057_v34, %v6408_v3  ;;  %v10283_v9 = vld [vmem:[#allocation34_spill] sm:$0xff] }
 0x372   : > { %10278 = vst [vmem:[#allocation217_spill] sm:$0xff] %v7021_v44  ;;  %2765 = vperm.xlu1 %5495, %v6654_v30   ;;  %v922_v30 = vmul.f32 %v7016_v36, %v6120_v57  ;;  %v946_v57 = vadd.f32 %v7033_v18, %v930_v4  ;;  %v936_v4 = vadd.f32 %v7033_v18, %v920_v58 }
 0x373   : > { %v1025_v12 = vmul.f32 %v7037_v52, %v6187_v14 }
 0x374   : > { %2679 = vperm.xlu2 %5493, %v7023_v45   ;;  %v7040_v44 = vpop.permute.xlu2 %2458  ;;  %v938_v60 = vadd.f32 %v7033_v18, %v922_v30 }
 0x375   : > { %10279 = vst [vmem:[#allocation218_spill] sm:$0xff] %v7040_v44  ;;  %2595 = vperm.xlu0 %5494, %v6899_v21   ;;  %v1024_v44 = vmul.f32 %v7037_v52, %v6212_v27  ;;  %v928_v21 = vmul.f32 %v7016_v36, %v6376_v29  ;;  %v1019_v27 = vmul.f32 %v7037_v52, %v6195_v16  ;;  %v7080_v29 = vld [vmem:[#allocation2 + $0x198] sm:$0xff] }
 0x376   : > { %v1043_v16 = vadd.f32 %v1027_v33, %v946_v57  ;;  %v933_v33 = vmul.f32 %v7016_v36, %v10283_v9  ;;  %v1033_v57 = vadd.f32 %v1017_v7, %v936_v4  ;;  %v10290_v4 = vld [vmem:[#allocation41_spill] sm:$0xff] }
 0x377   : > { %v7061_v10 = vpop.permute.xlu0 %1916  ;;  %v1040_v30 = vadd.f32 %v1024_v44, %v943_v1  ;;  %v929_v44 = vmul.f32 %v7016_v36, %v6141_v59  ;;  %v1035_v3 = vadd.f32 %v1019_v27, %v938_v60  ;;  %v1161_v1 = vadd.f32 %v1145_v41, %v1032_v62  ;;  %v10285_v59 = vld [vmem:[#allocation20_spill] sm:$0xff] }
 0x378   : > { %10280 = vst [vmem:[#allocation219_spill] sm:$0xff] %v7061_v10  ;;  %v7076_v10 = vperm.slane %v809_v54, 1  ;;  %v944_v54 = vadd.f32 %v7033_v18, %v928_v21  ;;  %v1172_v9 = vadd.f32 %v1156_v19, %v1043_v16  ;;  %v10288_v60 = vld [vmem:[#allocation24_spill] sm:$0xff]  ;;  %v949_v7 = vadd.f32 %v7033_v18, %v933_v33  ;;  %v10294_v33 = vld [vmem:[#allocation17_spill] sm:$0xff] }
 0x379   : > { %v7068_v5 = vpop.permute.xlu1 %2483  ;;  %v1169_v37 = vadd.f32 %v1153_v61, %v1040_v30  ;;  %v1164_v47 = vadd.f32 %v1148_v43, %v1035_v3  ;;  %v1030_v41 = vmul.f32 %v7037_v52, %v10290_v4  ;;  %v7127_v61 = vadd.f32 %v7033_v18, %v929_v44  ;;  %v10292_v16 = vld [vmem:[#allocation16_spill] sm:$0xff] }
 0x37a   : > { %10281 = vst [vmem:[#allocation220_spill] sm:$0xff] %v7068_v5  ;;  %2773 = vperm.xlu1 %5495, %v6963_v20   ;;  %v921_v5 = vmul.f32 %v7016_v36, %v6102_v55  ;;  %v810_v55 = vld [vmem:[%s10027_s7 + $0x4] sm:$0x3]  ;;  %v1242_v58 = vmul.f32 %v7076_v10, %v10284_v15  ;;  %v1245_v14 = vmul.f32 %v7076_v10, %v10285_v59 }
 0x37b   : > { %v1250_v50 = vmul.f32 %v7076_v10, %v10287_v28  ;;  %v1253_v27 = vmul.f32 %v7076_v10, %v10288_v60  ;;  %v7112_v15 = vperm.slane %v810_v55, 0  ;;  %v7124_v28 = vld [vmem:[#allocation2 + $0x1c8] sm:$0xff]  ;;  %v7131_v43 = vmul.f32 %v7057_v34, %v10292_v16  ;;  %v10296_v16 = vld [vmem:[#allocation27_spill] sm:$0xff] }
 0x37c   : > { %2694 = vperm.xlu2 %5493, %v7080_v29   ;;  %v7089_v20 = vpop.permute.xlu2 %2473  ;;  %v1041_v19 = vadd.f32 %v1025_v12, %v944_v54  ;;  %v7138_v3 = vmul.f32 %v7057_v34, %v10294_v33  ;;  %v1258_v4 = vadd.f32 %v1242_v58, %v1161_v1  ;;  %v1261_v54 = vadd.f32 %v1245_v14, %v1164_v47  ;;  %v10302_v47 = vld [vmem:[#allocation66_spill] sm:$0xff] }
 0x37d   : > { %10282 = vst [vmem:[#allocation221_spill] sm:$0xff] %v7089_v20  ;;  %2761 = vperm.xlu0 %5494, %v6686_v48   ;;  %v10286_v20 = vld [vmem:[#allocation18_spill] sm:$0xff]  ;;  %v7117_v48 = vadd.f32 %v7033_v18, %v921_v5  ;;  %v1266_v60 = vadd.f32 %v1250_v50, %v1169_v37  ;;  %v1269_v44 = vadd.f32 %v1253_v27, %v1172_v9  ;;  %v10299_v50 = vld [vmem:[#allocation64_spill] sm:$0xff]  ;;  %v10303_v27 = vld [vmem:[#allocation77_spill] sm:$0xff] }
 0x37e   : > { %v1146_v21 = vmul.f32 %v7057_v34, %v10286_v20  ;;  %v10293_v20 = vld [vmem:[#allocation21_spill] sm:$0xff]  ;;  %v1371_v12 = vmul.f32 %v7112_v15, %v10296_v16  ;;  %v1046_v33 = vadd.f32 %v1030_v41, %v949_v7  ;;  %v934_v58 = vmul.f32 %v7016_v36, %v10299_v50  ;;  %v10304_v7 = vld [vmem:[#allocation23_spill] sm:$0xff] }
 0x37f   : > { %v7114_v62 = vpop.permute.xlu0 %2082  ;;  %v1154_v5 = vmul.f32 %v7057_v34, %v10293_v20  ;;  %v7151_v20 = vperm.slane %v810_v55, 1  ;;  %v931_v14 = vmul.f32 %v7016_v36, %v10302_v47  ;;  %v923_v55 = vmul.f32 %v7016_v36, %v10303_v27  ;;  %v10310_v47 = vld [vmem:[#allocation31_spill] sm:$0xff]  ;;  %v10311_v27 = vld [vmem:[#allocation32_spill] sm:$0xff] }
 0x380   : > { %10289 = vst [vmem:[#allocation34_spill] sm:$0xff] %v7114_v62  ;;  %v7140_v59 = vadd.f32 %v1146_v21, %v1033_v57  ;;  %v10298_v57 = vld [vmem:[#allocation61_spill] sm:$0xff]  ;;  %v10300_v21 = vld [vmem:[#allocation28_spill] sm:$0xff]  ;;  %v7170_v41 = vmul.f32 %v7076_v10, %v10304_v7 }
 0x381   : > { %v7122_v30 = vpop.permute.xlu1 %2498  ;;  %v1159_v37 = vmul.f32 %v7057_v34, %v10298_v57  ;;  %v7157_v1 = vadd.f32 %v1154_v5, %v1041_v19  ;;  %v7161_v9 = vmul.f32 %v7112_v15, %v10300_v21  ;;  %v10306_v5 = vld [vmem:[#allocation29_spill] sm:$0xff]  ;;  %v10307_v57 = vld [vmem:[#allocation30_spill] sm:$0xff]  ;;  %v7182_v21 = vadd.f32 %v1371_v12, %v1258_v4 }
 0x382   : > { %10291 = vst [vmem:[#allocation19_spill] sm:$0xff] %v7122_v30  ;;  %2785 = vperm.xlu1 %5495, %v7023_v45   ;;  %v10295_v30 = vld [vmem:[#allocation26_spill] sm:$0xff]  ;;  %v1374_v16 = vmul.f32 %v7112_v15, %v10306_v5  ;;  %v7180_v50 = vmul.f32 %v7151_v20, %v10307_v57  ;;  %v7188_v7 = vmul.f32 %v7151_v20, %v10311_v27 }
 0x383   : > { %v7144_v62 = vmul.f32 %v7112_v15, %v10295_v30  ;;  %10301 = vst [vmem:[#allocation18_spill] sm:$0xff] %v7161_v9  ;;  %v10305_v30 = vld [vmem:[#allocation25_spill] sm:$0xff]  ;;  %v1256_v5 = vmul.f32 %v7076_v10, %v10315_v2  ;;  %v1031_v57 = vmul.f32 %v7037_v52, %v10316_v51  ;;  %v1175_v4 = vadd.f32 %v1159_v37, %v1046_v33 }
 0x384   : > { %2709 = vperm.xlu2 %5493, %v7124_v28   ;;  %v7149_v45 = vpop.permute.xlu2 %2488  ;;  %v7174_v19 = vmul.f32 %v7076_v10, %v10305_v30  ;;  %10308 = vst [vmem:[#allocation22_spill] sm:$0xff] %v7180_v50  ;;  %v950_v12 = vadd.f32 %v7033_v18, %v934_v58  ;;  %v947_v32 = vadd.f32 %v7033_v18, %v931_v14  ;;  %v10320_v33 = vld [vmem:[#allocation33_spill] sm:$0xff]  ;;  %v811_v14 = vld [vmem:[%s10027_s7 + $0x6] sm:$0x3]  ;;  %v10327_v50 = vld [vmem:[#allocation46_spill] sm:$0xff] }
 0x385   : > { %10297 = vst [vmem:[#allocation20_spill] sm:$0xff] %v7149_v45  ;;  %2781 = vperm.xlu0 %5494, %v6970_v42   ;;  %v1379_v42 = vmul.f32 %v7112_v15, %v10310_v47  ;;  %v10313_v45 = vld [vmem:[#allocation80_spill] sm:$0xff]  ;;  %v10317_v47 = vld [vmem:[#allocation42_spill] sm:$0xff]  ;;  %v1390_v51 = vadd.f32 %v1374_v16, %v1261_v54  ;;  %v1382_v37 = vmul.f32 %v7112_v15, %v10320_v33  ;;  %v10321_v58 = vld [vmem:[#allocation37_spill] sm:$0xff] }
 0x386   : > { %10309 = vst [vmem:[#allocation24_spill] sm:$0xff] %v7182_v21  ;;  %v1020_v30 = vmul.f32 %v7037_v52, %v10313_v45  ;;  %v1028_v27 = vmul.f32 %v7037_v52, %v10317_v47  ;;  %v939_v45 = vadd.f32 %v7033_v18, %v923_v55  ;;  %v1471_v21 = vmul.f32 %v7151_v20, %v10321_v58  ;;  %v10325_v16 = vld [vmem:[#allocation84_spill] sm:$0xff] }
 0x387   : > { %10312 = vst [vmem:[#allocation41_spill] sm:$0xff] %v7188_v7  ;;  %v7192_v11 = vpop.permute.xlu0 %2102  ;;  %v10322_v7 = vld [vmem:[#allocation55_spill] sm:$0xff]  ;;  %v1246_v33 = vmul.f32 %v7076_v10, %v10325_v16  ;;  %v1272_v58 = vadd.f32 %v1256_v5, %v1175_v4  ;;  %v1047_v9 = vadd.f32 %v1031_v57, %v950_v12  ;;  %v1160_v63 = vmul.f32 %v7057_v34, %v10327_v50 }
 0x388   : > { %10314 = vst [vmem:[#allocation16_spill] sm:$0xff] %v7192_v11  ;;  %v1149_v11 = vmul.f32 %v7057_v34, %v10318_v23  ;;  %v7216_v47 = vmul.f32 %v7112_v15, %v10322_v7  ;;  %v7221_v23 = vadd.f32 %v1379_v42, %v1266_v60  ;;  %v1036_v54 = vadd.f32 %v1020_v30, %v939_v45  ;;  %v10331_v5 = vld [vmem:[#allocation35_spill] sm:$0xff] }
 0x389   : > { %v1044_v42 = vadd.f32 %v1028_v27, %v947_v32  ;;  %v7238_v30 = vperm.slane %v811_v14, 0  ;;  %v7241_v16 = vadd.f32 %v1382_v37, %v1269_v44  ;;  %v7245_v4 = vmul.f32 %v7151_v20, %v10331_v5  ;;  %v10332_v50 = vld [vmem:[#allocation95_spill] sm:$0xff]  ;;  %v10341_v5 = vld [vmem:[#allocation45_spill] sm:$0xff] }
 0x38a   : > { %2797 = vperm.xlu1 %5495, %v7080_v29   ;;  %v7208_v2 = vpop.permute.xlu1 %2543  ;;  %10323 = vst [vmem:[#allocation17_spill] sm:$0xff] %v7221_v23  ;;  %v10324_v29 = vld [vmem:[#allocation58_spill] sm:$0xff]  ;;  %v10329_v23 = vld [vmem:[#allocation48_spill] sm:$0xff]  ;;  %v1165_v45 = vadd.f32 %v1149_v11, %v1036_v54  ;;  %v7247_v57 = vadd.f32 %v1471_v21, %v1390_v51  ;;  %v924_v12 = vmul.f32 %v7016_v36, %v10332_v50  ;;  %v10333_v32 = vld [vmem:[#allocation39_spill] sm:$0xff] }
 0x38b   : > { %10319 = vst [vmem:[#allocation21_spill] sm:$0xff] %v7208_v2  ;;  %v7225_v55 = vmul.f32 %v7112_v15, %v10324_v29  ;;  %v10326_v2 = vld [vmem:[#allocation43_spill] sm:$0xff]  ;;  %v1157_v29 = vmul.f32 %v7057_v34, %v10329_v23  ;;  %v7253_v27 = vmul.f32 %v7151_v20, %v10333_v32  ;;  %v10338_v54 = vld [vmem:[#allocation40_spill] sm:$0xff]  ;;  %v7269_v50 = vmul.f32 %v7112_v15, %v10341_v5  ;;  %v10349_v5 = vld [vmem:[#allocation69_spill] sm:$0xff] }
 0x38c   : > { %2724 = vperm.xlu2 %5493, %v7199_v22   ;;  %v1385_v7 = vmul.f32 %v7112_v15, %v10326_v2  ;;  %10330 = vst [vmem:[#allocation27_spill] sm:$0xff] %v7241_v16  ;;  %v10335_v2 = vld [vmem:[#allocation52_spill] sm:$0xff]  ;;  %v1262_v23 = vadd.f32 %v1246_v33, %v1165_v45  ;;  %v7263_v21 = vmul.f32 %v7112_v15, %v10338_v54  ;;  %v10347_v54 = vld [vmem:[#allocation89_spill] sm:$0xff] }
 0x38d   : > { %v7234_v60 = vpop.permute.xlu2 %2535  ;;  %2793 = vperm.xlu0 %5494, %v6714_v17   ;;  %10334 = vst [vmem:[#allocation61_spill] sm:$0xff] %v7253_v27  ;;  %v932_v11 = vmul.f32 %v7016_v36, %v10335_v2  ;;  %v10336_v17 = vld [vmem:[#allocation86_spill] sm:$0xff]  ;;  %v7271_v32 = vadd.f32 %v1160_v63, %v1047_v9  ;;  %v7277_v45 = vadd.f32 %v1157_v29, %v1044_v42  ;;  %v10345_v2 = vld [vmem:[#allocation49_spill] sm:$0xff]  ;;  %v7296_v42 = vperm.slane %v811_v14, 1 }
 0x38e   : > { %10328 = vst [vmem:[#allocation26_spill] sm:$0xff] %v7234_v60  ;;  %v1375_v44 = vmul.f32 %v7112_v15, %v10336_v17  ;;  %v7265_v51 = vadd.f32 %v1385_v7, %v1272_v58  ;;  %v10344_v60 = vld [vmem:[#allocation47_spill] sm:$0xff]  ;;  %v7281_v17 = vmul.f32 %v7238_v30, %v10345_v2  ;;  %v1472_v58 = vmul.f32 %v7151_v20, %v10347_v54  ;;  %v10351_v9 = vld [vmem:[#allocation50_spill] sm:$0xff]  ;;  %v10356_v54 = vld [vmem:[#allocation72_spill] sm:$0xff] }
 0x38f   : > { %v7259_v37 = vpop.permute.xlu0 %2114  ;;  %10339 = vst [vmem:[#allocation28_spill] sm:$0xff] %v7263_v21  ;;  %v7275_v33 = vmul.f32 %v7057_v34, %v10344_v60  ;;  %v7290_v63 = vmul.f32 %v7238_v30, %v10349_v5  ;;  %v7294_v60 = vmul.f32 %v7151_v20, %v10351_v9  ;;  %v940_v29 = vadd.f32 %v7033_v18, %v924_v12  ;;  %v10354_v2 = vld [vmem:[#allocation51_spill] sm:$0xff]  ;;  %v10358_v9 = vld [vmem:[#allocation53_spill] sm:$0xff] }
 0x390   : > { %10337 = vst [vmem:[#allocation64_spill] sm:$0xff] %v7259_v37  ;;  %v7301_v37 = vmul.f32 %v7238_v30, %v10354_v2  ;;  %v1391_v5 = vadd.f32 %v1375_v44, %v1262_v23  ;;  %v7313_v14 = vmul.f32 %v7238_v30, %v10358_v9  ;;  %v10361_v2 = vld [vmem:[#allocation54_spill] sm:$0xff]  ;;  %v10364_v23 = vld [vmem:[#allocation56_spill] sm:$0xff] }
 0x391   : > { %10340 = vst [vmem:[#allocation66_spill] sm:$0xff] %v7265_v51  ;;  %v10360_v51 = vld [vmem:[#allocation75_spill] sm:$0xff]  ;;  %v7330_v44 = vmul.f32 %v7151_v20, %v10364_v23  ;;  %v10366_v9 = vld [vmem:[#allocation78_spill] sm:$0xff] }
 0x392   : > { %10342 = vst [vmem:[#allocation77_spill] sm:$0xff] %v7269_v50  ;;  %2809 = vperm.xlu1 %5495, %v7124_v28   ;;  %v7286_v7 = vpop.permute.xlu1 %2551  ;;  %v7305_v28 = vmul.f32 %v7238_v30, %v10356_v54  ;;  %v7317_v12 = vmul.f32 %v7112_v15, %v10360_v51  ;;  %v10362_v54 = vld [vmem:[#allocation90_spill] sm:$0xff]  ;;  %v10368_v51 = vld [vmem:[#allocation57_spill] sm:$0xff] }
 0x393   : > { %10343 = vst [vmem:[#allocation23_spill] sm:$0xff] %v7271_v32 }
 0x394   : > { %10346 = vst [vmem:[#allocation25_spill] sm:$0xff] %v7281_v17  ;;  %5496 = vset.pattern.permute.xlu2 %v10112_v38  ;;  %v7334_v38 = vmul.f32 %v7238_v30, %v10366_v9  ;;  %v10374_v17 = vld [vmem:[#allocation60_spill] sm:$0xff] }
 0x395   : > { %10348 = vst [vmem:[#allocation29_spill] sm:$0xff] %v7286_v7  ;;  %v7308_v7 = vadd.f32 %v7033_v18, %v932_v11  ;;  %2769 = vperm.xlu2 %5496, %v6646_v24   ;;  %v7326_v11 = vpop.permute.xlu2 %2547  ;;  %v1488_v24 = vadd.f32 %v1472_v58, %v1391_v5  ;;  %2805 = vperm.xlu0 %5494, %v6725_v13   ;;  %v10378_v13 = vld [vmem:[#allocation65_spill] sm:$0xff] }
 0x396   : > { %10350 = vst [vmem:[#allocation30_spill] sm:$0xff] %v7290_v63  ;;  %v7364_v5 = vmul.f32 %v7296_v42, %v10378_v13  ;;  %v10386_v13 = vld [vmem:[#allocation68_spill] sm:$0xff] }
 0x397   : > { %10352 = vst [vmem:[#allocation31_spill] sm:$0xff] %v7294_v60  ;;  %v10376_v60 = vld [vmem:[#allocation63_spill] sm:$0xff]  ;;  %v10396_v63 = vld [vmem:[#allocation104_spill] sm:$0xff] }
 0x398   : > { %10353 = vst [vmem:[#allocation32_spill] sm:$0xff] %v7296_v42  ;;  %v7360_v58 = vmul.f32 %v7238_v30, %v10376_v60 }
 0x399   : > { %10355 = vst [vmem:[#allocation80_spill] sm:$0xff] %v7301_v37  ;;  %v7321_v37 = vmul.f32 %v7076_v10, %v10361_v2  ;;  %v7343_v2 = vld [vmem:[%s10027_s7 + $0x8] sm:$0x3] }
 0x39a   : > { %10357 = vst [vmem:[#allocation36_spill] sm:$0xff] %v7305_v28  ;;  %v1021_v28 = vmul.f32 %v7037_v52, %v10362_v54  ;;  %v10370_v54 = vld [vmem:[#allocation59_spill] sm:$0xff]  ;;  %2821 = vperm.xlu1 %5495, %v7199_v22  }
 0x39b   : > { %10359 = vst [vmem:[#allocation38_spill] sm:$0xff] %v7313_v14  ;;  %v7338_v14 = vmul.f32 %v7151_v20, %v10368_v51  ;;  %v7348_v23 = vmul.f32 %v7238_v30, %v10370_v54  ;;  %v1601_v51 = vmul.f32 %v7238_v30, %v10374_v17  ;;  %v10380_v54 = vld [vmem:[#allocation67_spill] sm:$0xff]  ;;  %v7373_v17 = vperm.slane %v7343_v2, 0 }
 0x39c   : > { %10363 = vst [vmem:[#allocation42_spill] sm:$0xff] %v7326_v11  ;;  %v10372_v11 = vld [vmem:[#allocation82_spill] sm:$0xff]  ;;  %v1037_v16 = vadd.f32 %v1021_v28, %v940_v29  ;;  %v10383_v29 = vld [vmem:[#allocation88_spill] sm:$0xff] }
 0x39d   : > { %10365 = vst [vmem:[#allocation83_spill] sm:$0xff] %v7330_v44  ;;  %v7352_v9 = vmul.f32 %v7238_v30, %v10372_v11  ;;  %v7370_v11 = vpop.permute.xlu0 %2126  ;;  %v1150_v28 = vmul.f32 %v7057_v34, %v10383_v29  ;;  %v7392_v29 = vpop.permute.xlu1 %2563  ;;  %2777 = vperm.xlu2 %5496, %v7007_v31   ;;  %2817 = vperm.xlu0 %5494, %v7000_v49   ;;  %v10420_v49 = vld [vmem:[#allocation112_spill] sm:$0xff] }
 0x39e   : > { %10367 = vst [vmem:[#allocation33_spill] sm:$0xff] %v7334_v38 }
 0x39f   : > { %10369 = vst [vmem:[#allocation37_spill] sm:$0xff] %v7338_v14  ;;  %v10375_v14 = vld [vmem:[#allocation62_spill] sm:$0xff] }
 0x3a0   : > { %10371 = vst [vmem:[#allocation55_spill] sm:$0xff] %v7348_v23  ;;  %v1698_v38 = vmul.f32 %v7296_v42, %v10375_v14  ;;  %v7368_v23 = vmul.f32 %v7238_v30, %v10380_v54  ;;  %v10384_v14 = vld [vmem:[#allocation93_spill] sm:$0xff]  ;;  %v10388_v54 = vld [vmem:[#allocation70_spill] sm:$0xff] }
 0x3a1   : > { %10373 = vst [vmem:[#allocation58_spill] sm:$0xff] %v7352_v9  ;;  %v925_v60 = vmul.f32 %v7016_v36, %v10384_v14  ;;  %v10385_v9 = vld [vmem:[#allocation98_spill] sm:$0xff]  ;;  %v10392_v14 = vld [vmem:[#allocation71_spill] sm:$0xff] }
 0x3a2   : > { %10377 = vst [vmem:[#allocation84_spill] sm:$0xff] %v7360_v58  ;;  %v1247_v21 = vmul.f32 %v7076_v10, %v10385_v9  ;;  %v10390_v58 = vld [vmem:[#allocation116_spill] sm:$0xff]  ;;  %v7396_v27 = vmul.f32 %v7296_v42, %v10392_v14  ;;  %v10394_v9 = vld [vmem:[#allocation73_spill] sm:$0xff]  ;;  %5498 = vset.pattern.permute.xlu1 %v10113_v35 }
 0x3a3   : > { %10379 = vst [vmem:[#allocation43_spill] sm:$0xff] %v7364_v5  ;;  %v7383_v5 = vmul.f32 %v7296_v42, %v10386_v13  ;;  %v1600_v50 = vmul.f32 %v7238_v30, %v10390_v58  ;;  %v7400_v13 = vmul.f32 %v7296_v42, %v10394_v9  ;;  %v10399_v58 = vld [vmem:[#allocation79_spill] sm:$0xff] }
 0x3a4   : > { %10381 = vst [vmem:[#allocation46_spill] sm:$0xff] %v7368_v23  ;;  %v7387_v23 = vmul.f32 %v7238_v30, %v10388_v54  ;;  %v1022_v54 = vmul.f32 %v7037_v52, %v10396_v63  ;;  %v7410_v22 = vmul.f32 %v7296_v42, %v10399_v58  ;;  %v10407_v63 = vld [vmem:[#allocation87_spill] sm:$0xff] }
 0x3a5   : > { %10382 = vst [vmem:[#allocation48_spill] sm:$0xff] %v7370_v11  ;;  %v1617_v11 = vadd.f32 %v1601_v51, %v1488_v24  ;;  %v10397_v24 = vld [vmem:[#allocation76_spill] sm:$0xff] }
 0x3a6   : > { %10387 = vst [vmem:[#allocation35_spill] sm:$0xff] %v7383_v5  ;;  %v1166_v5 = vadd.f32 %v1150_v28, %v1037_v16  ;;  %v7406_v51 = vmul.f32 %v7296_v42, %v10397_v24  ;;  %v10405_v16 = vld [vmem:[#allocation85_spill] sm:$0xff]  ;;  %v7426_v24 = vmul.f32 %v7296_v42, %v10407_v63 }
 0x3a7   : > { %10389 = vst [vmem:[#allocation95_spill] sm:$0xff] %v7387_v23  ;;  %v7422_v28 = vmul.f32 %v7373_v17, %v10405_v16  ;;  %v10418_v23 = vld [vmem:[#allocation99_spill] sm:$0xff] }
 0x3a8   : > { %10391 = vst [vmem:[#allocation39_spill] sm:$0xff] %v7392_v29  ;;  %v10401_v29 = vld [vmem:[#allocation74_spill] sm:$0xff]  ;;  %v1263_v58 = vadd.f32 %v1247_v21, %v1166_v5  ;;  %v1714_v21 = vadd.f32 %v1698_v38, %v1617_v11  ;;  %v7469_v11 = vld [vmem:[%s10027_s7 + $0xc] sm:$0x3] }
 0x3a9   : > { %10393 = vst [vmem:[#allocation52_spill] sm:$0xff] %v7396_v27  ;;  %v7414_v14 = vmul.f32 %v7296_v42, %v10401_v29  ;;  %v10403_v27 = vld [vmem:[#allocation81_spill] sm:$0xff]  ;;  %v10414_v5 = vld [vmem:[#allocation94_spill] sm:$0xff] }
 0x3aa   : > { %10395 = vst [vmem:[#allocation86_spill] sm:$0xff] %v7400_v13  ;;  %v7418_v9 = vmul.f32 %v7296_v42, %v10403_v27  ;;  %v7432_v29 = vld [vmem:[%s10027_s7 + $0xa] sm:$0x3]  ;;  %v7435_v27 = vpop.permute.xlu2 %2555  ;;  %v10416_v13 = vld [vmem:[#allocation106_spill] sm:$0xff] }
 0x3ab   : > { %10398 = vst [vmem:[#allocation40_spill] sm:$0xff] %v7406_v51  ;;  %v941_v51 = vadd.f32 %v7033_v18, %v925_v60  ;;  %v1616_v60 = vadd.f32 %v1600_v50, %v7247_v57  ;;  %v7459_v57 = vmul.f32 %v7373_v17, %v10418_v23  ;;  %v7462_v38 = vperm.slane %v7432_v29, 0  ;;  %v10424_v23 = vld [vmem:[#allocation101_spill] sm:$0xff] }
 0x3ac   : > { %10400 = vst [vmem:[#allocation45_spill] sm:$0xff] %v7410_v22  ;;  %v1376_v22 = vmul.f32 %v7112_v15, %v10414_v5  ;;  %v1697_v50 = vmul.f32 %v7296_v42, %v10420_v49 }
 0x3ad   : > { %10402 = vst [vmem:[#allocation47_spill] sm:$0xff] %v7414_v14  ;;  %v10412_v14 = vld [vmem:[#allocation92_spill] sm:$0xff] }
 0x3ae   : > { %10404 = vst [vmem:[#allocation49_spill] sm:$0xff] %v7418_v9  ;;  %v10410_v9 = vld [vmem:[#allocation91_spill] sm:$0xff]  ;;  %v7443_v63 = vmul.f32 %v7238_v30, %v10412_v14  ;;  %v7485_v49 = vadd.f32 %v1376_v22, %v1263_v58 }
 0x3af   : > { %10406 = vst [vmem:[#allocation89_spill] sm:$0xff] %v7422_v28  ;;  %v7439_v16 = vmul.f32 %v7238_v30, %v10410_v9  ;;  %v10415_v28 = vld [vmem:[#allocation96_spill] sm:$0xff]  ;;  %v926_v9 = vmul.f32 %v7016_v36, %v10416_v13  ;;  %v10432_v22 = vld [vmem:[#allocation107_spill] sm:$0xff] }
 0x3b0   : > { %10408 = vst [vmem:[#allocation69_spill] sm:$0xff] %v7426_v24  ;;  %v7451_v31 = vmul.f32 %v7112_v15, %v10415_v28  ;;  %v10417_v24 = vld [vmem:[#allocation97_spill] sm:$0xff]  ;;  %v2905_v36 = vld [vmem:[#allocation2 + $0x20] sm:$0xff]  ;;  %v7479_v28 = vmul.f32 %v7296_v42, %v10424_v23  ;;  %v7498_v23 = vpop.permute.xlu1 %2575  ;;  %v7503_v58 = vmul.f32 %v7112_v15, %v10432_v22 }
 0x3b1   : > { %10409 = vst [vmem:[#allocation50_spill] sm:$0xff] %v7435_v27  ;;  %v1038_v27 = vadd.f32 %v1022_v54, %v941_v51  ;;  %v1151_v14 = vmul.f32 %v7057_v34, %v10417_v24  ;;  %v7471_v54 = vpop.permute.xlu0 %2138  ;;  %v10423_v13 = vld [vmem:[#allocation100_spill] sm:$0xff]  ;;  %v10425_v24 = vld [vmem:[#allocation102_spill] sm:$0xff]  ;;  %2931 = vperm.xlu1 %5498, %v2905_v36   ;;  %v10438_v22 = vld [vmem:[#allocation111_spill] sm:$0xff]  ;;  %3041 = vperm.xlu0 %5494, %v2905_v36  }
 0x3b2   : > { %10411 = vst [vmem:[#allocation51_spill] sm:$0xff] %v7439_v16  ;;  %v7475_v51 = vmul.f32 %v7151_v20, %v10423_v13  ;;  %v7483_v5 = vmul.f32 %v7373_v17, %v10425_v24  ;;  %v1713_v13 = vadd.f32 %v1697_v50, %v1616_v60  ;;  %v10430_v16 = vld [vmem:[#allocation118_spill] sm:$0xff]  ;;  %v942_v24 = vadd.f32 %v7033_v18, %v926_v9  ;;  %v10433_v60 = vld [vmem:[#allocation108_spill] sm:$0xff] }
 0x3b3   : > { %10413 = vst [vmem:[#allocation72_spill] sm:$0xff] %v7443_v63  ;;  %v1826_v32 = vmul.f32 %v7373_v17, %v10430_v16  ;;  %v7512_v50 = vmul.f32 %v7373_v17, %v10433_v60  ;;  %v10435_v16 = vld [vmem:[#allocation109_spill] sm:$0xff]  ;;  %v10437_v9 = vld [vmem:[#allocation122_spill] sm:$0xff]  ;;  %v10451_v42 = vld [vmem:[#allocation120_spill] sm:$0xff] }
 0x3b4   : > { %10419 = vst [vmem:[#allocation53_spill] sm:$0xff] %v7459_v57  ;;  %v10427_v57 = vld [vmem:[#allocation103_spill] sm:$0xff]  ;;  %v1827_v15 = vmul.f32 %v7373_v17, %v10437_v9  ;;  %v10441_v60 = vld [vmem:[#allocation114_spill] sm:$0xff]  ;;  %v7541_v9 = vpop.permute.xlu2 %2567 }
 0x3b5   : > { %10421 = vst [vmem:[#allocation75_spill] sm:$0xff] %v7469_v11  ;;  %v7489_v63 = vmul.f32 %v7238_v30, %v10427_v57  ;;  %v7506_v30 = vperm.slane %v7469_v11, 0  ;;  %v7508_v57 = vadd.f32 %v1151_v14, %v1038_v27  ;;  %v10440_v27 = vld [vmem:[#allocation113_spill] sm:$0xff] }
 0x3b6   : > { %10422 = vst [vmem:[#allocation54_spill] sm:$0xff] %v7471_v54  ;;  %v10428_v54 = vld [vmem:[#allocation105_spill] sm:$0xff]  ;;  %v7528_v14 = vmul.f32 %v7151_v20, %v10440_v27 }
 0x3b7   : > { %10426 = vst [vmem:[#allocation90_spill] sm:$0xff] %v7483_v5  ;;  %v7493_v44 = vmul.f32 %v7373_v17, %v10428_v54  ;;  %v7516_v54 = vmul.f32 %v7076_v10, %v10435_v16  ;;  %v7537_v16 = vld [vmem:[%s10027_s7 + $0xe] sm:$0x3]  ;;  %v10449_v5 = vld [vmem:[#allocation119_spill] sm:$0xff] }
 0x3b8   : > { %10431 = vst [vmem:[#allocation78_spill] sm:$0xff] %v7498_v23  ;;  %v10436_v23 = vld [vmem:[#allocation110_spill] sm:$0xff]  ;;  %v7553_v11 = vmul.f32 %v7373_v17, %v10449_v5  ;;  %v7575_v36 = vperm.slane %v7537_v16, 0 }
 0x3b9   : > { %10429 = vst [vmem:[#allocation56_spill] sm:$0xff] %v7493_v44  ;;  %v1152_v18 = vmul.f32 %v7057_v34, %v10436_v23  ;;  %v7524_v44 = vmul.f32 %v7462_v38, %v10438_v22  ;;  %v1018_v34 = vmul.f32 %v7037_v52, %v6820_v25  ;;  %v5585_v23 = vld [vmem:[#allocation2 + $0xf8] sm:$0xff]  ;;  %v7557_v25 = vmul.f32 %v7462_v38, %v10451_v42 }
 0x3ba   : > { %10434 = vst [vmem:[#allocation57_spill] sm:$0xff] %v7512_v50  ;;  %v7532_v50 = vmul.f32 %v7462_v38, %v10441_v60  ;;  %2789 = vperm.xlu2 %5496, %v5585_v23   ;;  %v10445_v22 = vld [vmem:[#allocation115_spill] sm:$0xff]  ;;  %v10453_v23 = vld [vmem:[#allocation121_spill] sm:$0xff]  ;;  %v1023_v42 = vmul.f32 %v7037_v52, %v6827_v6  ;;  %v10465_v6 = vld [vmem:[#allocation128_spill] sm:$0xff] }
 0x3bb   : > { %10439 = vst [vmem:[#allocation59_spill] sm:$0xff] %v7524_v44  ;;  %v7545_v27 = vmul.f32 %v7373_v17, %v10445_v22  ;;  %v10447_v44 = vld [vmem:[#allocation117_spill] sm:$0xff]  ;;  %v10454_v22 = vld [vmem:[#allocation123_spill] sm:$0xff] }
 0x3bc   : > { %10442 = vst [vmem:[#allocation82_spill] sm:$0xff] %v7532_v50  ;;  %v7549_v60 = vmul.f32 %v7462_v38, %v10447_v44  ;;  %v1842_v50 = vadd.f32 %v1826_v32, %v1713_v13  ;;  %v7568_v44 = vperm.slane %v7343_v2, 1  ;;  %v1843_v32 = vadd.f32 %v1827_v15, %v1714_v21  ;;  %v10456_v13 = vld [vmem:[#allocation124_spill] sm:$0xff] }
 0x3bd   : > { %10443 = vst [vmem:[#allocation60_spill] sm:$0xff] %v7537_v16  ;;  %v7572_v5 = vmul.f32 %v7373_v17, %v10456_v13  ;;  %v10462_v21 = vld [vmem:[#allocation136_spill] sm:$0xff]  ;;  %v1034_v13 = vadd.f32 %v1018_v34, %v7117_v48  ;;  %v10463_v16 = vld [vmem:[#allocation127_spill] sm:$0xff]  ;;  %v10471_v48 = vld [vmem:[#allocation130_spill] sm:$0xff] }
 0x3be   : > { %10444 = vst [vmem:[#allocation62_spill] sm:$0xff] %v7541_v9  ;;  %v7561_v9 = vmul.f32 %v7373_v17, %v10453_v23  ;;  %v7579_v23 = vpop.permute.xlu0 %2317  ;;  %v1924_v15 = vmul.f32 %v7568_v44, %v10462_v21  ;;  %v10473_v34 = vld [vmem:[#allocation131_spill] sm:$0xff] }
 0x3bf   : > { %10446 = vst [vmem:[#allocation63_spill] sm:$0xff] %v7545_v27  ;;  %v7565_v27 = vmul.f32 %v7506_v30, %v10454_v22 }
 0x3c0   : > { %10448 = vst [vmem:[#allocation65_spill] sm:$0xff] %v7549_v60  ;;  %v10460_v60 = vld [vmem:[#allocation126_spill] sm:$0xff] }
 0x3c1   : > { %10450 = vst [vmem:[#allocation67_spill] sm:$0xff] %v7553_v11  ;;  %v7587_v2 = vmul.f32 %v7506_v30, %v10460_v60  ;;  %v10467_v11 = vld [vmem:[#allocation138_spill] sm:$0xff]  ;;  %v1026_v60 = vmul.f32 %v7037_v52, %v6834_v56 }
 0x3c2   : > { %10452 = vst [vmem:[#allocation88_spill] sm:$0xff] %v7557_v25  ;;  %v10458_v25 = vld [vmem:[#allocation125_spill] sm:$0xff] }
 0x3c3   : > { %10455 = vst [vmem:[#allocation93_spill] sm:$0xff] %v7565_v27  ;;  %v7583_v22 = vmul.f32 %v7373_v17, %v10458_v25  ;;  %v7594_v27 = vmul.f32 %v7373_v17, %v10463_v16  ;;  %v1923_v25 = vmul.f32 %v7568_v44, %v10467_v11  ;;  %v7612_v16 = vmul.f32 %v7373_v17, %v10471_v48 }
 0x3c4   : > { %10457 = vst [vmem:[#allocation98_spill] sm:$0xff] %v7579_v23  ;;  %v7598_v23 = vmul.f32 %v7373_v17, %v10465_v6  ;;  %v7616_v6 = vmul.f32 %v7373_v17, %v10473_v34  ;;  %v1029_v11 = vmul.f32 %v7037_v52, %v6843_v39  ;;  %v7635_v17 = vld [vmem:[%s10027_s7 + $0x10] sm:$0x3]  ;;  %v1039_v48 = vadd.f32 %v1023_v42, %v942_v24  ;;  %v10482_v34 = vld [vmem:[#allocation135_spill] sm:$0xff]  ;;  %v10487_v42 = vld [vmem:[#allocation140_spill] sm:$0xff] }
 0x3c5   : > { %10459 = vst [vmem:[#allocation68_spill] sm:$0xff] %v7583_v22  ;;  %v10469_v22 = vld [vmem:[#allocation129_spill] sm:$0xff]  ;;  %v7639_v39 = vmul.f32 %v7568_v44, %v10482_v34  ;;  %v1940_v52 = vadd.f32 %v1924_v15, %v1843_v32  ;;  %v1042_v24 = vadd.f32 %v1026_v60, %v7127_v61  ;;  %v1243_v32 = vmul.f32 %v7076_v10, %v6853_v8  ;;  %v10491_v61 = vld [vmem:[#allocation142_spill] sm:$0xff]  ;;  %v10492_v8 = vld [vmem:[#allocation151_spill] sm:$0xff] }
 0x3c6   : > { %10461 = vst [vmem:[#allocation70_spill] sm:$0xff] %v7587_v2  ;;  %v7604_v2 = vpop.permute.xlu1 %2587  ;;  %v7608_v21 = vmul.f32 %v7506_v30, %v10469_v22  ;;  %v10479_v22 = vld [vmem:[#allocation134_spill] sm:$0xff]  ;;  %v7657_v15 = vmul.f32 %v7575_v36, %v10487_v42  ;;  %v7671_v60 = vmul.f32 %v7568_v44, %v10491_v61  ;;  %v1168_v34 = vadd.f32 %v1152_v18, %v1039_v48  ;;  %v10494_v42 = vld [vmem:[#allocation143_spill] sm:$0xff] }
 0x3c7   : > { %10464 = vst [vmem:[#allocation116_spill] sm:$0xff] %v7594_v27  ;;  %v10500_v18 = vld [vmem:[#allocation147_spill] sm:$0xff] }
 0x3c8   : > { %10466 = vst [vmem:[#allocation71_spill] sm:$0xff] %v7598_v23  ;;  %v10475_v23 = vld [vmem:[#allocation132_spill] sm:$0xff]  ;;  %v7696_v48 = vmul.f32 %v7568_v44, %v10500_v18 }
 0x3c9   : > { %10468 = vst [vmem:[#allocation73_spill] sm:$0xff] %v7604_v2  ;;  %v7622_v56 = vmul.f32 %v7506_v30, %v10475_v23  ;;  %v10477_v2 = vld [vmem:[#allocation133_spill] sm:$0xff] }
 0x3ca   : > { %10470 = vst [vmem:[#allocation104_spill] sm:$0xff] %v7608_v21  ;;  %v7626_v27 = vmul.f32 %v7568_v44, %v10477_v2  ;;  %v7630_v21 = vmul.f32 %v7506_v30, %v10479_v22  ;;  %v10483_v23 = vld [vmem:[#allocation137_spill] sm:$0xff]  ;;  %v1163_v2 = vadd.f32 %v7131_v43, %v1034_v13  ;;  %v7646_v22 = vpop.permute.xlu2 %2579  ;;  %v7660_v43 = vperm.slane %v7635_v17, 0 }
 0x3cb   : > { %10472 = vst [vmem:[#allocation76_spill] sm:$0xff] %v7612_v16  ;;  %v1045_v13 = vadd.f32 %v1029_v11, %v7308_v7  ;;  %v7679_v7 = vmul.f32 %v7575_v36, %v10494_v42  ;;  %v10496_v11 = vld [vmem:[#allocation144_spill] sm:$0xff]  ;;  %v1171_v42 = vadd.f32 %v7138_v3, %v1042_v24  ;;  %v1251_v24 = vmul.f32 %v7076_v10, %v6873_v53 }
 0x3cc   : > { %10474 = vst [vmem:[#allocation79_spill] sm:$0xff] %v7616_v6  ;;  %v5586_v6 = vld [vmem:[#allocation2 + $0x1a8] sm:$0xff]  ;;  %v1260_v61 = vadd.f32 %v7170_v41, %v1163_v2 }
 0x3cd   : > { %10476 = vst [vmem:[#allocation74_spill] sm:$0xff] %v7622_v56  ;;  %v7643_v56 = vmul.f32 %v7575_v36, %v10483_v23  ;;  %2801 = vperm.xlu2 %5496, %v5586_v6   ;;  %v2052_v6 = vmul.f32 %v7462_v38, %v10492_v8  ;;  %v7675_v23 = vpop.permute.xlu0 %2337  ;;  %v1174_v41 = vadd.f32 %v7275_v33, %v1045_v13 }
 0x3ce   : > { %10478 = vst [vmem:[#allocation81_spill] sm:$0xff] %v7626_v27  ;;  %v10486_v27 = vld [vmem:[#allocation139_spill] sm:$0xff] }
 0x3cf   : > { %10480 = vst [vmem:[#allocation85_spill] sm:$0xff] %v7630_v21  ;;  %v1939_v21 = vadd.f32 %v1923_v25, %v1842_v50  ;;  %v7650_v16 = vmul.f32 %v7568_v44, %v10486_v27  ;;  %v1248_v50 = vmul.f32 %v7076_v10, %v6862_v40  ;;  %v10490_v25 = vld [vmem:[#allocation141_spill] sm:$0xff]  ;;  %v7683_v40 = vmul.f32 %v7568_v44, %v10496_v11  ;;  %v10501_v11 = vld [vmem:[#allocation148_spill] sm:$0xff] }
 0x3d0   : > { %10481 = vst [vmem:[#allocation87_spill] sm:$0xff] %v7635_v17  ;;  %v7667_v27 = vmul.f32 %v7568_v44, %v10490_v25  ;;  %v10497_v25 = vld [vmem:[#allocation145_spill] sm:$0xff] }
 0x3d1   : > { %10484 = vst [vmem:[#allocation91_spill] sm:$0xff] %v7643_v56  ;;  %v1264_v2 = vadd.f32 %v1248_v50, %v7508_v57  ;;  %v2068_v3 = vadd.f32 %v2052_v6, %v1939_v21  ;;  %v10508_v57 = vld [vmem:[#allocation154_spill] sm:$0xff]  ;;  %v1389_v50 = vadd.f32 %v7216_v47, %v1260_v61  ;;  %v10510_v6 = vld [vmem:[#allocation155_spill] sm:$0xff]  ;;  %v1271_v47 = vadd.f32 %v7321_v37, %v1174_v41  ;;  %v10517_v41 = vld [vmem:[#allocation161_spill] sm:$0xff] }
 0x3d2   : > { %10485 = vst [vmem:[#allocation92_spill] sm:$0xff] %v7646_v22  ;;  %v7687_v22 = vmul.f32 %v7568_v44, %v10497_v25  ;;  %v10502_v25 = vld [vmem:[#allocation156_spill] sm:$0xff]  ;;  %v7727_v13 = vmul.f32 %v7462_v38, %v10508_v57  ;;  %v5587_v21 = vld [vmem:[#allocation2 + $0x1d8] sm:$0xff]  ;;  %v7734_v53 = vmul.f32 %v7660_v43, %v10510_v6  ;;  %v10512_v57 = vld [vmem:[#allocation157_spill] sm:$0xff]  ;;  %v7763_v37 = vmul.f32 %v7462_v38, %v6815_v46 }
 0x3d3   : > { %10488 = vst [vmem:[#allocation94_spill] sm:$0xff] %v7657_v15  ;;  %v10498_v15 = vld [vmem:[#allocation146_spill] sm:$0xff]  ;;  %v2053_v56 = vmul.f32 %v7462_v38, %v10502_v25  ;;  %v10507_v25 = vld [vmem:[#allocation153_spill] sm:$0xff]  ;;  %v1393_v61 = vadd.f32 %v7503_v58, %v1264_v2 }
 0x3d4   : > { %10489 = vst [vmem:[#allocation96_spill] sm:$0xff] %v7660_v43  ;;  %v7692_v8 = vmul.f32 %v7575_v36, %v10498_v15  ;;  %v7708_v15 = vpop.permute.xlu1 %2649  ;;  %v7723_v33 = vmul.f32 %v7462_v38, %v10507_v25  ;;  %v10515_v58 = vld [vmem:[#allocation178_spill] sm:$0xff]  ;;  %v10589_v17 = vld [vmem:[#allocation201_spill] sm:$0xff] }
 0x3d5   : > { %10493 = vst [vmem:[#allocation106_spill] sm:$0xff] %v7675_v23  ;;  %v7702_v23 = vmul.f32 %v7462_v38, %v10501_v11  ;;  %2813 = vperm.xlu2 %5496, %v5587_v21   ;;  %v2069_v25 = vadd.f32 %v2053_v56, %v1940_v52  ;;  %v7749_v21 = vmul.f32 %v7462_v38, %v6808_v0  ;;  %v7755_v56 = vpop.permute.xlu0 %2349  ;;  %v10514_v52 = vld [vmem:[#allocation159_spill] sm:$0xff]  ;;  %v10519_v6 = vld [vmem:[#allocation162_spill] sm:$0xff] }
 0x3d6   : > { %10495 = vst [vmem:[#allocation97_spill] sm:$0xff] %v7679_v7  ;;  %v1259_v7 = vadd.f32 %v1243_v32, %v7140_v59  ;;  %v1265_v59 = vadd.f32 %v7516_v54, %v1168_v34  ;;  %v10505_v32 = vld [vmem:[#allocation152_spill] sm:$0xff]  ;;  %v7730_v54 = vpop.permute.xlu2 %2591  ;;  %v7737_v34 = vperm.slane %v7432_v29, 1  ;;  %v1267_v29 = vadd.f32 %v1251_v24, %v7157_v1 }
 0x3d7   : > { %10499 = vst [vmem:[#allocation99_spill] sm:$0xff] %v7692_v8  ;;  %v10504_v8 = vld [vmem:[#allocation150_spill] sm:$0xff]  ;;  %v7719_v11 = vmul.f32 %v7660_v43, %v10505_v32  ;;  %v1257_v0 = vmul.f32 %v7076_v10, %v10515_v58  ;;  %v7778_v46 = vmul.f32 %v7462_v38, %v10519_v6 }
 0x3d8   : > { %10503 = vst [vmem:[#allocation112_spill] sm:$0xff] %v7708_v15  ;;  %v7712_v18 = vmul.f32 %v7568_v44, %v10504_v8  ;;  %v1268_v8 = vadd.f32 %v7174_v19, %v1171_v42  ;;  %v1388_v32 = vadd.f32 %v7144_v62, %v1259_v7  ;;  %v1254_v19 = vmul.f32 %v7076_v10, %v6882_v26  ;;  %v10516_v42 = vld [vmem:[#allocation22_spill] sm:$0xff]  ;;  %v10521_v10 = vld [vmem:[#allocation181_spill] sm:$0xff] }
 0x3d9   : > { %10506 = vst [vmem:[#allocation100_spill] sm:$0xff] %v7719_v11  ;;  %v7743_v11 = vmul.f32 %v7462_v38, %v10512_v57  ;;  %v1394_v62 = vadd.f32 %v7451_v31, %v1265_v59  ;;  %v7759_v7 = vmul.f32 %v7462_v38, %v10514_v52  ;;  %v1486_v1 = vadd.f32 %v10516_v42, %v1389_v50  ;;  %v10518_v31 = vld [vmem:[#allocation165_spill] sm:$0xff]  ;;  %v10523_v42 = vld [vmem:[#allocation163_spill] sm:$0xff]  ;;  %v10577_v43 = vld [vmem:[#allocation66_spill] sm:$0xff] }
 0x3da   : > { %10509 = vst [vmem:[#allocation101_spill] sm:$0xff] %v7730_v54  ;;  %v7770_v26 = vmul.f32 %v7462_v38, %v10517_v41  ;;  %v2149_v2 = vmul.f32 %v7737_v34, %v10518_v31  ;;  %v1485_v59 = vadd.f32 %v7245_v4, %v1388_v32  ;;  %v1397_v24 = vadd.f32 %v7225_v55, %v1268_v8  ;;  %v10524_v4 = vld [vmem:[#allocation18_spill] sm:$0xff]  ;;  %v10525_v31 = vld [vmem:[#allocation164_spill] sm:$0xff] }
 0x3db   : > { %10511 = vst [vmem:[#allocation102_spill] sm:$0xff] %v7734_v53  ;;  %v1490_v57 = vadd.f32 %v7475_v51, %v1393_v61  ;;  %v1468_v50 = vmul.f32 %v7151_v20, %v10521_v10  ;;  %v1400_v52 = vadd.f32 %v7317_v12, %v1271_v47  ;;  %v7788_v41 = vmul.f32 %v7737_v34, %v10523_v42  ;;  %v10527_v61 = vld [vmem:[#allocation168_spill] sm:$0xff]  ;;  %v10528_v12 = vld [vmem:[#allocation23_spill] sm:$0xff]  ;;  %v10538_v53 = vld [vmem:[#allocation77_spill] sm:$0xff] }
 0x3dc   : > { %10513 = vst [vmem:[#allocation103_spill] sm:$0xff] %v7755_v56  ;;  %v7784_v58 = vpop.permute.xlu1 %2664  ;;  %v1396_v32 = vadd.f32 %v10524_v4, %v1267_v29  ;;  %v1270_v55 = vadd.f32 %v1254_v19, %v7277_v45  ;;  %v1491_v8 = vadd.f32 %v7528_v14, %v1394_v62  ;;  %v7795_v51 = vmul.f32 %v7462_v38, %v10525_v31  ;;  %v10529_v29 = vld [vmem:[#allocation184_spill] sm:$0xff]  ;;  %v10530_v19 = vld [vmem:[#allocation41_spill] sm:$0xff]  ;;  %v10531_v62 = vld [vmem:[#allocation51_spill] sm:$0xff] }
 0x3dd   : > { %10520 = vst [vmem:[#allocation105_spill] sm:$0xff] %v7778_v46  ;;  %v2150_v6 = vmul.f32 %v7737_v34, %v10527_v61  ;;  %v1273_v47 = vadd.f32 %v1257_v0, %v10528_v12  ;;  %v1615_v10 = vadd.f32 %v7489_v63, %v1486_v1  ;;  %5497 = vset.pattern.permute.xlu2 %v10113_v35  ;;  %v10533_v31 = vld [vmem:[#allocation166_spill] sm:$0xff]  ;;  %v10534_v0 = vld [vmem:[#allocation24_spill] sm:$0xff]  ;;  %v10535_v63 = vld [vmem:[#allocation83_spill] sm:$0xff] }
 0x3de   : > { %10522 = vst [vmem:[#allocation118_spill] sm:$0xff] %v7784_v58  ;;  %v7802_v42 = vadd.f32 %v2149_v2, %v2068_v3  ;;  %v1473_v45 = vmul.f32 %v7151_v20, %v10529_v29  ;;  %v1494_v14 = vadd.f32 %v10530_v19, %v1397_v24  ;;  %v1614_v4 = vadd.f32 %v10531_v62, %v1485_v59  ;;  %v7808_v38 = vpop.permute.xlu2 %2654  ;;  %v10536_v35 = vld [vmem:[#allocation30_spill] sm:$0xff]  ;;  %v10537_v2 = vld [vmem:[#allocation61_spill] sm:$0xff]  ;;  %v10539_v56 = vld [vmem:[#allocation187_spill] sm:$0xff]  ;;  %v7824_v62 = vpop.permute.xlu0 %2361 }
 0x3df   : > { %10526 = vst [vmem:[#allocation107_spill] sm:$0xff] %v7795_v51  ;;  %v7812_v61 = vmul.f32 %v7737_v34, %v10533_v31  ;;  %v1484_v12 = vadd.f32 %v1468_v50, %v10534_v0  ;;  %v1497_v1 = vadd.f32 %v10535_v63, %v1400_v52  ;;  %v1619_v3 = vadd.f32 %v10536_v35, %v1490_v57  ;;  %v10540_v59 = vld [vmem:[#allocation84_spill] sm:$0xff]  ;;  %v10542_v31 = vld [vmem:[#allocation167_spill] sm:$0xff]  ;;  %v10545_v35 = vld [vmem:[#allocation189_spill] sm:$0xff] }
 0x3e0   : > { %10532 = vst [vmem:[#allocation108_spill] sm:$0xff] %v7808_v38  ;;  %v1493_v54 = vadd.f32 %v10537_v2, %v1396_v32  ;;  %v1399_v29 = vadd.f32 %v10538_v53, %v1270_v55  ;;  %v1476_v24 = vmul.f32 %v7151_v20, %v10539_v56  ;;  %v7822_v19 = vadd.f32 %v10540_v59, %v1491_v8  ;;  %v10544_v52 = vld [vmem:[#allocation28_spill] sm:$0xff]  ;;  %v10546_v32 = vld [vmem:[#allocation169_spill] sm:$0xff]  ;;  %v10548_v55 = vld [vmem:[#allocation46_spill] sm:$0xff] }
 0x3e1   : > { %10541 = vst [vmem:[#allocation109_spill] sm:$0xff] %v7824_v62  ;;  %v7828_v15 = vmul.f32 %v7737_v34, %v10542_v31  ;;  %v2166_v50 = vadd.f32 %v2150_v6, %v2069_v25  ;;  %v1402_v0 = vadd.f32 %v10544_v52, %v1273_v47  ;;  %v1479_v57 = vmul.f32 %v7151_v20, %v10545_v35  ;;  %v10549_v2 = vld [vmem:[#allocation170_spill] sm:$0xff]  ;;  %v10550_v25 = vld [vmem:[#allocation72_spill] sm:$0xff]  ;;  %v10551_v47 = vld [vmem:[#allocation95_spill] sm:$0xff] }
 0x3e2   : > { %v7835_v53 = vmul.f32 %v7737_v34, %v10546_v32  ;;  %v1489_v56 = vadd.f32 %v1473_v45, %v7485_v49  ;;  %v1623_v8 = vadd.f32 %v10548_v55, %v1494_v14  ;;  %v1711_v63 = vadd.f32 %v7479_v28, %v1614_v4  ;;  %v10552_v52 = vld [vmem:[#allocation43_spill] sm:$0xff]  ;;  %v10556_v14 = vld [vmem:[#allocation17_spill] sm:$0xff]  ;;  %v10557_v28 = vld [vmem:[#allocation192_spill] sm:$0xff] }
 0x3e3   : > { %10543 = vst [vmem:[#allocation110_spill] sm:$0xff] %v7828_v15  ;;  %v7842_v59 = vmul.f32 %v7737_v34, %v10549_v2  ;;  %v1613_v6 = vadd.f32 %v10550_v25, %v1484_v12  ;;  %v7846_v31 = vadd.f32 %v10551_v47, %v1497_v1  ;;  %v1716_v35 = vadd.f32 %v10552_v52, %v1619_v3  ;;  %v7851_v32 = vld [vmem:[#allocation2] sm:$0xff]  ;;  %v10558_v2 = vld [vmem:[#allocation33_spill] sm:$0xff]  ;;  %v10584_v46 = vld [vmem:[#allocation58_spill] sm:$0xff] }
 0x3e4   : > { %10547 = vst [vmem:[#allocation122_spill] sm:$0xff] %v7835_v53  ;;  %v7849_v62 = vpop.permute.xlu1 %2674  ;;  %v10555_v49 = vld [vmem:[#allocation31_spill] sm:$0xff]  ;;  %v1492_v55 = vadd.f32 %v1476_v24, %v10556_v14  ;;  %v1482_v4 = vmul.f32 %v7151_v20, %v10557_v28  ;;  %v1622_v51 = vadd.f32 %v10558_v2, %v1493_v54  ;;  %2921 = vperm.xlu2 %5497, %v7851_v32   ;;  %v10561_v3 = vld [vmem:[#allocation172_spill] sm:$0xff]  ;;  %v10563_v47 = vld [vmem:[#allocation37_spill] sm:$0xff] }
 0x3e5   : > { %10553 = vst [vmem:[#allocation111_spill] sm:$0xff] %v7849_v62  ;;  %v1496_v45 = vadd.f32 %v10555_v49, %v1399_v29  ;;  %v10559_v12 = vld [vmem:[#allocation171_spill] sm:$0xff]  ;;  %v7865_v25 = vmul.f32 %v7737_v34, %v10561_v3  ;;  %v1499_v52 = vadd.f32 %v10563_v47, %v1402_v0  ;;  %v10565_v24 = vld [vmem:[#allocation173_spill] sm:$0xff]  ;;  %v10567_v20 = vld [vmem:[#allocation174_spill] sm:$0xff] }
 0x3e6   : > { %10554 = vst [vmem:[#allocation113_spill] sm:$0xff] %v7851_v32  ;;  %v7861_v1 = vmul.f32 %v7737_v34, %v10559_v12  ;;  %v10564_v29 = vld [vmem:[#allocation27_spill] sm:$0xff]  ;;  %v7871_v14 = vmul.f32 %v7737_v34, %v10565_v24  ;;  %v7875_v54 = vmul.f32 %v7737_v34, %v10567_v20  ;;  %v10569_v28 = vld [vmem:[#allocation25_spill] sm:$0xff]  ;;  %v7879_v62 = vpop.permute.xlu2 %2669  ;;  %v10574_v0 = vld [vmem:[#allocation32_spill] sm:$0xff]  ;;  %v7887_v24 = vadd.f32 %v7561_v9, %v1716_v35 }
 0x3e7   : > { %10562 = vst [vmem:[#allocation115_spill] sm:$0xff] %v7865_v25  ;;  %v1495_v49 = vadd.f32 %v1479_v57, %v10564_v29  ;;  %v1618_v2 = vadd.f32 %v10569_v28, %v1489_v56  ;;  %v10570_v12 = vld [vmem:[#allocation63_spill] sm:$0xff]  ;;  %v10572_v3 = vld [vmem:[#allocation69_spill] sm:$0xff]  ;;  %v1498_v38 = vadd.f32 %v1482_v4, %v10577_v43  ;;  %v10583_v9 = vld [vmem:[#allocation38_spill] sm:$0xff] }
 0x3e8   : > { %10560 = vst [vmem:[#allocation114_spill] sm:$0xff] %v7861_v1  ;;  %v1840_v32 = vadd.f32 %v10570_v12, %v1711_v63  ;;  %v1710_v58 = vadd.f32 %v10572_v3, %v1613_v6  ;;  %v10573_v1 = vld [vmem:[#allocation195_spill] sm:$0xff]  ;;  %v10579_v63 = vld [vmem:[#allocation36_spill] sm:$0xff]  ;;  %v10587_v4 = vld [vmem:[#allocation86_spill] sm:$0xff] }
 0x3e9   : > { %10566 = vst [vmem:[#allocation117_spill] sm:$0xff] %v7871_v14  ;;  %v1696_v47 = vmul.f32 %v10574_v0, %v10573_v1  ;;  %v10575_v57 = vld [vmem:[#allocation207_spill] sm:$0xff]  ;;  %v10576_v14 = vld [vmem:[#allocation80_spill] sm:$0xff]  ;;  %v1625_v12 = vadd.f32 %v10579_v63, %v1496_v45  ;;  %v1624_v35 = vadd.f32 %v10583_v9, %v1495_v49  ;;  %v10588_v63 = vld [vmem:[#allocation198_spill] sm:$0xff] }
 0x3ea   : > { %10568 = vst [vmem:[#allocation119_spill] sm:$0xff] %v7875_v54  ;;  %v1921_v29 = vmul.f32 %v7568_v44, %v10575_v57  ;;  %v1621_v20 = vadd.f32 %v10576_v14, %v1492_v55  ;;  %v10578_v56 = vld [vmem:[#allocation35_spill] sm:$0xff]  ;;  %v10581_v1 = vld [vmem:[#allocation176_spill] sm:$0xff]  ;;  %v1628_v55 = vadd.f32 %v10584_v46, %v1499_v52  ;;  %v10585_v14 = vld [vmem:[#allocation177_spill] sm:$0xff] }
 0x3eb   : > { %10571 = vst [vmem:[#allocation120_spill] sm:$0xff] %v7879_v62  ;;  %v1719_v28 = vadd.f32 %v10578_v56, %v1622_v51  ;;  %v7893_v62 = vpop.permute.xlu0 %2539  ;;  %v10580_v6 = vld [vmem:[#allocation175_spill] sm:$0xff]  ;;  %v7901_v57 = vmul.f32 %v7506_v30, %v10581_v1  ;;  %v2280_v43 = vmul.f32 %v7506_v30, %v10585_v14  ;;  %v1715_v56 = vadd.f32 %v10587_v4, %v1618_v2  ;;  %v10590_v54 = vld [vmem:[#allocation89_spill] sm:$0xff]  ;;  %v10593_v52 = vld [vmem:[#allocation40_spill] sm:$0xff] }
 0x3ec   : > { %v7897_v3 = vmul.f32 %v7506_v30, %v10580_v6  ;;  %v10586_v51 = vld [vmem:[#allocation179_spill] sm:$0xff]  ;;  %v1701_v6 = vmul.f32 %v10574_v0, %v10588_v63  ;;  %v1712_v53 = vadd.f32 %v1696_v47, %v1615_v10  ;;  %v1704_v1 = vmul.f32 %v10574_v0, %v10589_v17  ;;  %v7915_v9 = vpop.permute.xlu1 %2689  ;;  %v7917_v46 = vld [vmem:[#allocation2 + $0x30] sm:$0xff]  ;;  %v10595_v4 = vld [vmem:[#allocation52_spill] sm:$0xff] }
 0x3ed   : > { %10582 = vst [vmem:[#allocation121_spill] sm:$0xff] %v7901_v57  ;;  %v2279_v45 = vmul.f32 %v7506_v30, %v10586_v51  ;;  %v1937_v57 = vadd.f32 %v1921_v29, %v1840_v32  ;;  %v1839_v49 = vadd.f32 %v10590_v54, %v1710_v58  ;;  %v1718_v14 = vadd.f32 %v10593_v52, %v1621_v20  ;;  %v10594_v15 = vld [vmem:[#allocation55_spill] sm:$0xff]  ;;  %v10596_v10 = vld [vmem:[#allocation45_spill] sm:$0xff]  ;;  %v10598_v58 = vld [vmem:[#allocation204_spill] sm:$0xff] }
 0x3ee   : > { %10591 = vst [vmem:[#allocation123_spill] sm:$0xff] %v7915_v9  ;;  %v1627_v51 = vadd.f32 %v10594_v15, %v1498_v38  ;;  %v1848_v2 = vadd.f32 %v7572_v5, %v1719_v28  ;;  %v1722_v25 = vadd.f32 %v10595_v4, %v1625_v12  ;;  %2936 = vperm.xlu2 %5497, %v7917_v46   ;;  %v10597_v17 = vld [vmem:[#allocation75_spill] sm:$0xff]  ;;  %v10600_v5 = vld [vmem:[#allocation53_spill] sm:$0xff]  ;;  %v7934_v28 = vpop.permute.xlu2 %2679 }
 0x3ef   : > { %10592 = vst [vmem:[#allocation124_spill] sm:$0xff] %v7917_v46  ;;  %v1721_v47 = vadd.f32 %v10596_v10, %v1624_v35  ;;  %v7926_v32 = vperm.slane %v10597_v17, 1  ;;  %v1707_v54 = vmul.f32 %v10574_v0, %v10598_v58  ;;  %v10599_v29 = vld [vmem:[#allocation47_spill] sm:$0xff]  ;;  %v2296_v9 = vadd.f32 %v2280_v43, %v2166_v50  ;;  %v10602_v17 = vld [vmem:[#allocation180_spill] sm:$0xff]  ;;  %v10603_v50 = vld [vmem:[#allocation49_spill] sm:$0xff] }
 0x3f0   : > { %v1725_v63 = vadd.f32 %v10599_v29, %v1628_v55  ;;  %v2295_v20 = vadd.f32 %v2279_v45, %v7802_v42  ;;  %v1717_v15 = vadd.f32 %v1701_v6, %v7822_v19  ;;  %v1844_v38 = vadd.f32 %v10600_v5, %v1715_v56  ;;  %v10601_v12 = vld [vmem:[#allocation67_spill] sm:$0xff]  ;;  %v10604_v42 = vld [vmem:[#allocation116_spill] sm:$0xff]  ;;  %v10605_v19 = vld [vmem:[#allocation90_spill] sm:$0xff] }
 0x3f1   : > { %v1841_v52 = vadd.f32 %v10601_v12, %v1712_v53  ;;  %v1720_v35 = vadd.f32 %v1704_v1, %v1623_v8  ;;  %v2066_v4 = vadd.f32 %v7723_v33, %v1937_v57  ;;  %v1936_v10 = vadd.f32 %v7639_v39, %v1839_v49  ;;  %v10606_v6 = vld [vmem:[#allocation182_spill] sm:$0xff]  ;;  %v10607_v8 = vld [vmem:[#allocation76_spill] sm:$0xff]  ;;  %v10609_v49 = vld [vmem:[#allocation183_spill] sm:$0xff] }
 0x3f2   : > { %v7941_v0 = vmul.f32 %v7506_v30, %v10602_v17  ;;  %v1724_v55 = vadd.f32 %v10603_v50, %v1627_v51  ;;  %v1851_v43 = vadd.f32 %v10604_v42, %v1722_v25  ;;  %v1847_v45 = vadd.f32 %v10605_v19, %v1718_v14  ;;  %v10608_v57 = vld [vmem:[#allocation56_spill] sm:$0xff]  ;;  %v10610_v25 = vld [vmem:[#allocation185_spill] sm:$0xff]  ;;  %v10614_v42 = vld [vmem:[#allocation186_spill] sm:$0xff] }
 0x3f3   : > { %v7946_v56 = vpop.permute.xlu0 %2559  ;;  %v7950_v53 = vmul.f32 %v7506_v30, %v10606_v6  ;;  %v1723_v33 = vadd.f32 %v1707_v54, %v7846_v31  ;;  %v7954_v39 = vadd.f32 %v10607_v8, %v1725_v63  ;;  %v1850_v1 = vadd.f32 %v10608_v57, %v1721_v47  ;;  %v10611_v58 = vld [vmem:[#allocation68_spill] sm:$0xff]  ;;  %v10612_v12 = vld [vmem:[#allocation81_spill] sm:$0xff]  ;;  %v10613_v31 = vld [vmem:[#allocation71_spill] sm:$0xff] }
 0x3f4   : > { %v7959_v51 = vmul.f32 %v7506_v30, %v10609_v49  ;;  %v7963_v14 = vmul.f32 %v7506_v30, %v10610_v25  ;;  %v1846_v29 = vadd.f32 %v10611_v58, %v1717_v15  ;;  %v1941_v5 = vadd.f32 %v7667_v27, %v1844_v38  ;;  %v7971_v50 = vpop.permute.xlu1 %2704  ;;  %v10615_v6 = vld [vmem:[#allocation210_spill] sm:$0xff]  ;;  %v10616_v27 = vld [vmem:[#allocation57_spill] sm:$0xff] }
 0x3f5   : > { %v1938_v17 = vadd.f32 %v10612_v12, %v1841_v52  ;;  %v1849_v54 = vadd.f32 %v10613_v31, %v1720_v35  ;;  %v2163_v63 = vadd.f32 %v7788_v41, %v2066_v4  ;;  %v2065_v47 = vadd.f32 %v7702_v23, %v1936_v10  ;;  %v10617_v52 = vld [vmem:[#allocation188_spill] sm:$0xff]  ;;  %v10618_v41 = vld [vmem:[#allocation193_spill] sm:$0xff]  ;;  %v10619_v4 = vld [vmem:[#allocation79_spill] sm:$0xff] }
 0x3f6   : > { %v7975_v19 = vmul.f32 %v7506_v30, %v10614_v42  ;;  %v1926_v8 = vmul.f32 %v7568_v44, %v10615_v6  ;;  %v1944_v15 = vadd.f32 %v7683_v40, %v1847_v45  ;;  %v1853_v38 = vadd.f32 %v10616_v27, %v1724_v55  ;;  %v10620_v49 = vld [vmem:[#allocation190_spill] sm:$0xff]  ;;  %v10621_v40 = vld [vmem:[#allocation213_spill] sm:$0xff]  ;;  %v7999_v12 = vpop.permute.xlu2 %2694  ;;  %v10622_v31 = vld [vmem:[#allocation191_spill] sm:$0xff] }
 0x3f7   : > { %v7983_v35 = vmul.f32 %v7506_v30, %v10617_v52  ;;  %v2376_v23 = vmul.f32 %v7926_v32, %v10618_v41  ;;  %v1852_v10 = vadd.f32 %v10619_v4, %v1723_v33  ;;  %v1947_v57 = vadd.f32 %v7696_v48, %v1850_v1  ;;  %v10623_v33 = vld [vmem:[#allocation93_spill] sm:$0xff]  ;;  %v10624_v6 = vld [vmem:[#allocation59_spill] sm:$0xff]  ;;  %v10626_v4 = vld [vmem:[#allocation194_spill] sm:$0xff] }
 0x3f8   : > { %v7991_v25 = vmul.f32 %v7926_v32, %v10620_v49  ;;  %v1943_v58 = vadd.f32 %v7650_v16, %v1846_v29  ;;  %v1929_v55 = vmul.f32 %v7568_v44, %v10621_v40  ;;  %v7997_v45 = vadd.f32 %v7727_v13, %v1941_v5  ;;  %v10625_v52 = vld [vmem:[#allocation197_spill] sm:$0xff] }
 0x3f9   : > { %v8003_v42 = vmul.f32 %v7506_v30, %v10622_v31  ;;  %v1946_v48 = vadd.f32 %v7671_v60, %v1849_v54  ;;  %v2293_v1 = vadd.f32 %v10623_v33, %v2163_v63  ;;  %v2067_v27 = vadd.f32 %v10624_v6, %v1938_v17  ;;  %v10627_v63 = vld [vmem:[#allocation196_spill] sm:$0xff] }
 0x3fa   : > { %v2377_v16 = vmul.f32 %v7926_v32, %v10625_v52  ;;  %v1942_v29 = vadd.f32 %v1926_v8, %v7887_v24  ;;  %v8012_v13 = vadd.f32 %v7743_v11, %v1944_v15  ;;  %v1950_v5 = vadd.f32 %v7712_v18, %v1853_v38  ;;  %v10628_v11 = vld [vmem:[#allocation216_spill] sm:$0xff]  ;;  %v10629_v18 = vld [vmem:[#allocation82_spill] sm:$0xff] }
 0x3fb   : > { %v8015_v41 = vpop.permute.xlu0 %2571  ;;  %v2392_v30 = vadd.f32 %v2376_v23, %v2295_v20  ;;  %v2374_v60 = vmul.f32 %v7926_v32, %v10626_v4  ;;  %v1949_v54 = vadd.f32 %v7687_v22, %v1852_v10  ;;  %v8021_v17 = vadd.f32 %v7759_v7, %v1947_v57  ;;  %v10630_v20 = vld [vmem:[#allocation60_spill] sm:$0xff]  ;;  %v10631_v22 = vld [vmem:[#allocation65_spill] sm:$0xff]  ;;  %v10637_v4 = vld [vmem:[#allocation202_spill] sm:$0xff] }
 0x3fc   : > { %v8025_v49 = vmul.f32 %v7926_v32, %v10627_v63  ;;  %v1945_v24 = vadd.f32 %v1929_v55, %v1848_v2  ;;  %v1932_v8 = vmul.f32 %v7568_v44, %v10628_v11  ;;  %v2072_v15 = vadd.f32 %v10629_v18, %v1943_v58  ;;  %v8035_v7 = vpop.permute.xlu1 %2719  ;;  %v10632_v2 = vld [vmem:[#allocation34_spill] sm:$0xff]  ;;  %v10633_v58 = vld [vmem:[#allocation199_spill] sm:$0xff]  ;;  %v10634_v6 = vld [vmem:[#allocation208_spill] sm:$0xff] }
 0x3fd   : > { %v2390_v38 = vadd.f32 %v2374_v60, %v2293_v1  ;;  %v8031_v23 = vperm.slane %v10630_v20, 1  ;;  %v2164_v40 = vadd.f32 %v7812_v61, %v2067_v27  ;;  %v2075_v10 = vadd.f32 %v10631_v22, %v1946_v48  ;;  %v10635_v48 = vld [vmem:[#allocation88_spill] sm:$0xff]  ;;  %v10638_v11 = vld [vmem:[#allocation115_spill] sm:$0xff]  ;;  %v10640_v22 = vld [vmem:[#allocation110_spill] sm:$0xff] }
 0x3fe   : > { %v8037_v57 = vadd.f32 %v2377_v16, %v2296_v9  ;;  %v2071_v31 = vadd.f32 %v7749_v21, %v1942_v29  ;;  %v2146_v55 = vmul.f32 %v7737_v34, %v10632_v2  ;;  %v8043_v33 = vadd.f32 %v7770_v26, %v1950_v5  ;;  %v10636_v52 = vld [vmem:[#allocation200_spill] sm:$0xff]  ;;  %v8058_v5 = vpop.permute.xlu2 %2709 }
 0x3ff   : > { %v8047_v1 = vmul.f32 %v7926_v32, %v10633_v58  ;;  %v2503_v61 = vmul.f32 %v7575_v36, %v10634_v6  ;;  %v2078_v27 = vadd.f32 %v10635_v48, %v1949_v54  ;;  %v2600_v9 = vmul.f32 %v8031_v23, %v7893_v62  ;;  %v10639_v62 = vld [vmem:[#allocation203_spill] sm:$0xff]  ;;  %v10646_v48 = vld [vmem:[#allocation105_spill] sm:$0xff] }
 0x400   : > { %v2379_v21 = vmul.f32 %v7926_v32, %v10636_v52  ;;  %v2074_v16 = vadd.f32 %v7763_v37, %v1945_v24  ;;  %v1948_v29 = vadd.f32 %v1932_v8, %v1851_v43  ;;  %v2169_v26 = vadd.f32 %v7842_v59, %v2072_v15  ;;  %v10641_v43 = vld [vmem:[#allocation98_spill] sm:$0xff]  ;;  %v10642_v8 = vld [vmem:[#allocation211_spill] sm:$0xff] }
 0x401   : > { %v8062_v60 = vmul.f32 %v7926_v32, %v10637_v4  ;;  %v2519_v63 = vadd.f32 %v2503_v61, %v2390_v38  ;;  %v2294_v54 = vadd.f32 %v7897_v3, %v2164_v40  ;;  %v2172_v18 = vadd.f32 %v10638_v11, %v2075_v10  ;;  %v10643_v58 = vld [vmem:[#allocation119_spill] sm:$0xff]  ;;  %v10645_v10 = vld [vmem:[#allocation122_spill] sm:$0xff] }
 0x402   : > { %v2382_v20 = vmul.f32 %v7926_v32, %v10639_v62  ;;  %v2168_v2 = vadd.f32 %v10640_v22, %v2071_v31  ;;  %v2162_v37 = vadd.f32 %v2146_v55, %v2065_v47  ;;  %v2375_v59 = vmul.f32 %v7926_v32, %v10641_v43  ;;  %v10644_v3 = vld [vmem:[#allocation87_spill] sm:$0xff]  ;;  %v10647_v31 = vld [vmem:[#allocation16_spill] sm:$0xff]  ;;  %v10648_v4 = vld [vmem:[#allocation206_spill] sm:$0xff] }
 0x403   : > { %v8071_v24 = vpop.permute.xlu0 %2583  ;;  %v2505_v15 = vmul.f32 %v7575_v36, %v10642_v8  ;;  %v2175_v38 = vadd.f32 %v10643_v58, %v2078_v27  ;;  %v2616_v6 = vadd.f32 %v2600_v9, %v2519_v63  ;;  %v8077_v40 = vperm.slane %v10644_v3, 1  ;;  %v10649_v62 = vld [vmem:[#allocation219_spill] sm:$0xff]  ;;  %v10650_v63 = vld [vmem:[#allocation108_spill] sm:$0xff]  ;;  %v10652_v43 = vld [vmem:[#allocation209_spill] sm:$0xff] }
 0x404   : > { %v2171_v61 = vadd.f32 %v10645_v10, %v2074_v16  ;;  %v2077_v52 = vadd.f32 %v10646_v48, %v1948_v29  ;;  %v2151_v47 = vmul.f32 %v7737_v34, %v10647_v31  ;;  %v8084_v55 = vadd.f32 %v7941_v0, %v2169_v26  ;;  %v10651_v22 = vld [vmem:[#allocation96_spill] sm:$0xff]  ;;  %v10653_v8 = vld [vmem:[#allocation70_spill] sm:$0xff]  ;;  %v10654_v0 = vld [vmem:[#allocation121_spill] sm:$0xff]  ;;  %v2766_v10 = vpop.permute.xlu1 %2765 }
 0x405   : > { %v2385_v11 = vmul.f32 %v7926_v32, %v10648_v4  ;;  %v1935_v27 = vmul.f32 %v7568_v44, %v10649_v62  ;;  %v8091_v9 = vadd.f32 %v7959_v51, %v2172_v18  ;;  %v2729_v16 = vmul.f32 %v10651_v22, %v10650_v63  ;;  %v10655_v18 = vld [vmem:[#allocation212_spill] sm:$0xff]  ;;  %v10656_v62 = vld [vmem:[#allocation114_spill] sm:$0xff] }
 0x406   : > { %v8097_v29 = vmul.f32 %v7926_v32, %v10652_v43  ;;  %v2298_v58 = vadd.f32 %v10653_v8, %v2168_v2  ;;  %v2292_v26 = vadd.f32 %v10654_v0, %v2162_v37  ;;  %v2391_v3 = vadd.f32 %v2375_v59, %v2294_v54  ;;  %v10657_v43 = vld [vmem:[#allocation104_spill] sm:$0xff]  ;;  %v8110_v8 = vpop.permute.xlu2 %2724  ;;  %v10659_v37 = vld [vmem:[#allocation42_spill] sm:$0xff] }
 0x407   : > { %v2521_v48 = vadd.f32 %v2505_v15, %v2392_v30  ;;  %v8102_v31 = vadd.f32 %v7975_v19, %v2175_v38  ;;  %v2745_v44 = vadd.f32 %v2729_v16, %v2616_v6  ;;  %v2826_v51 = vmul.f32 %v8077_v40, %v2766_v10  ;;  %v10658_v30 = vld [vmem:[#allocation64_spill] sm:$0xff]  ;;  %v10660_v6 = vld [vmem:[#allocation214_spill] sm:$0xff] }
 0x408   : > { %v2504_v4 = vmul.f32 %v7575_v36, %v10655_v18  ;;  %v2174_v63 = vadd.f32 %v10656_v62, %v2077_v52  ;;  %v2301_v46 = vadd.f32 %v10657_v43, %v2171_v61  ;;  %v2167_v2 = vadd.f32 %v2151_v47, %v7997_v45  ;;  %v10661_v45 = vld [vmem:[#allocation215_spill] sm:$0xff]  ;;  %v10663_v10 = vld [vmem:[#allocation118_spill] sm:$0xff] }
 0x409   : > { %v1951_v54 = vadd.f32 %v1935_v27, %v7954_v39  ;;  %v2154_v19 = vmul.f32 %v7737_v34, %v10658_v30  ;;  %v2602_v59 = vmul.f32 %v8031_v23, %v10659_v37  ;;  %v2842_v15 = vadd.f32 %v2826_v51, %v2745_v44  ;;  %v10662_v39 = vld [vmem:[#allocation217_spill] sm:$0xff]  ;;  %v10667_v43 = vld [vmem:[#allocation74_spill] sm:$0xff] }
 0x40a   : > { %v2395_v38 = vadd.f32 %v2379_v21, %v2298_v58  ;;  %v2508_v16 = vmul.f32 %v7575_v36, %v10660_v6  ;;  %v2389_v52 = vadd.f32 %v7991_v25, %v2292_v26  ;;  %v2520_v61 = vadd.f32 %v2504_v4, %v2391_v3  ;;  %v10664_v58 = vld [vmem:[#allocation21_spill] sm:$0xff]  ;;  %v10665_v25 = vld [vmem:[#allocation26_spill] sm:$0xff]  ;;  %v10666_v3 = vld [vmem:[#allocation107_spill] sm:$0xff] }
 0x40b   : > { %v8120_v0 = vpop.permute.xlu0 %2595  ;;  %v2506_v47 = vmul.f32 %v7575_v36, %v10661_v45  ;;  %v2511_v27 = vmul.f32 %v7575_v36, %v10662_v39  ;;  %v2731_v18 = vmul.f32 %v10651_v22, %v10663_v10  ;;  %v2858_v62 = vmax.f32 %v2842_v15, 0.0  ;;  %v10668_v15 = vld [vmem:[#allocation91_spill] sm:$0xff] }
 0x40c   : > { %v2398_v44 = vadd.f32 %v2382_v20, %v2301_v46  ;;  %v2297_v21 = vadd.f32 %v7950_v53, %v2167_v2  ;;  %v2601_v51 = vmul.f32 %v8031_v23, %v10664_v58  ;;  %v2599_v26 = vmul.f32 %v8031_v23, %v10665_v25  ;;  %v10669_v20 = vld [vmem:[#allocation112_spill] sm:$0xff]  ;;  %v2774_v2 = vpop.permute.xlu1 %2773 }
 0x40d   : > { %v2080_v4 = vadd.f32 %v10666_v3, %v1951_v54  ;;  %v2304_v30 = vadd.f32 %v10667_v43, %v2174_v63  ;;  %v2170_v37 = vadd.f32 %v2154_v19, %v8012_v13  ;;  %v2618_v6 = vadd.f32 %v2602_v59, %v2521_v48  ;;  %2874 = vst.msk [vmem:[#allocation2 + $0x54] sm:$0xff] %vm467_vm0, %v2858_v62  ;;  %v10670_v48 = vld [vmem:[#allocation220_spill] sm:$0xff] }
 0x40e   : > { %v2524_v45 = vadd.f32 %v2508_v16, %v2395_v38  ;;  %v2518_v46 = vadd.f32 %v10668_v15, %v2389_v52  ;;  %v2728_v53 = vmul.f32 %v10651_v22, %v10669_v20  ;;  %v2617_v39 = vadd.f32 %v2601_v51, %v2520_v61  ;;  %v10671_v16 = vld [vmem:[#allocation117_spill] sm:$0xff]  ;;  %v10673_v25 = vld [vmem:[#allocation100_spill] sm:$0xff]  ;;  %v10677_v20 = vld [vmem:[#allocation50_spill] sm:$0xff] }
 0x40f   : > { %v2522_v10 = vadd.f32 %v2506_v47, %v8037_v57  ;;  %v2747_v58 = vadd.f32 %v2731_v18, %v2618_v6  ;;  %v2605_v54 = vmul.f32 %v8031_v23, %v7946_v56  ;;  %v2828_v63 = vmul.f32 %v8077_v40, %v2774_v2  ;;  %v2770_v57 = vpop.permute.xlu2 %2769  ;;  %v10672_v47 = vld [vmem:[#allocation106_spill] sm:$0xff]  ;;  %v10675_v43 = vld [vmem:[#allocation48_spill] sm:$0xff] }
 0x410   : > { %v2527_v13 = vadd.f32 %v2511_v27, %v2398_v44  ;;  %v2514_v19 = vmul.f32 %v7575_v36, %v10670_v48  ;;  %v2615_v59 = vadd.f32 %v2599_v26, %v2518_v46  ;;  %v2394_v38 = vadd.f32 %v8025_v49, %v2297_v21 }
 0x411   : > { %v2177_v52 = vadd.f32 %v10671_v16, %v2080_v4  ;;  %v2401_v62 = vadd.f32 %v2385_v11, %v2304_v30  ;;  %v2300_v61 = vadd.f32 %v7963_v14, %v2170_v37  ;;  %v2844_v51 = vadd.f32 %v2828_v63, %v2747_v58  ;;  %v10674_v4 = vld [vmem:[#allocation29_spill] sm:$0xff]  ;;  %v10676_v37 = vld [vmem:[#allocation94_spill] sm:$0xff] }
 0x412   : > { %v2380_v18 = vmul.f32 %v7926_v32, %v10672_v47  ;;  %v2744_v56 = vadd.f32 %v2728_v53, %v2615_v59  ;;  %v2746_v3 = vadd.f32 %v10673_v25, %v2617_v39  ;;  %v2827_v27 = vmul.f32 %v8077_v40, %v2770_v57  ;;  %v10678_v39 = vld [vmem:[#allocation111_spill] sm:$0xff] }
 0x413   : > { %v2762_v44 = vpop.permute.xlu0 %2761  ;;  %v2734_v26 = vmul.f32 %v10651_v22, %v7934_v28  ;;  %v2621_v49 = vadd.f32 %v2605_v54, %v2524_v45  ;;  %v2860_v21 = vmax.f32 %v2844_v51, 0.0  ;;  %v2603_v14 = vmul.f32 %v8031_v23, %v10674_v4  ;;  %v10679_v54 = vld [vmem:[#allocation120_spill] sm:$0xff]  ;;  %v10680_v51 = vld [vmem:[#allocation218_spill] sm:$0xff] }
 0x414   : > { %v2825_v11 = vmul.f32 %v8077_v40, %v2762_v44  ;;  %v2157_v30 = vmul.f32 %v7737_v34, %v10675_v43  ;;  %v2523_v6 = vadd.f32 %v10676_v37, %v2394_v38  ;;  %v2843_v15 = vadd.f32 %v2827_v27, %v2746_v3  ;;  %v8161_v46 = vld [vmem:[#allocation2 + $0x50] sm:$0xff]  ;;  %v2786_v59 = vpop.permute.xlu1 %2785  ;;  %v10684_v37 = vld [vmem:[#allocation39_spill] sm:$0xff] }
 0x415   : > { %v2604_v53 = vmul.f32 %v8031_v23, %v10677_v20  ;;  %v2397_v28 = vadd.f32 %v8047_v1, %v2300_v61  ;;  %2876 = vst.msk [vmem:[#allocation2 + $0x74] sm:$0xff] %vm467_vm0, %v2860_v21  ;;  %2946 = vperm.xlu2 %5497, %v8161_v46   ;;  %v2396_v2 = vadd.f32 %v2380_v18, %v8084_v55  ;;  %v10682_v27 = vld [vmem:[#allocation97_spill] sm:$0xff]  ;;  %v10683_v21 = vld [vmem:[#allocation103_spill] sm:$0xff] }
 0x416   : > { %v2841_v45 = vadd.f32 %v2825_v11, %v2744_v56  ;;  %v2733_v58 = vmul.f32 %v10651_v22, %v10678_v39  ;;  %v2732_v63 = vmul.f32 %v10651_v22, %v10679_v54  ;;  %v2859_v48 = vmax.f32 %v2843_v15, 0.0  ;;  %v10681_v56 = vld [vmem:[#allocation85_spill] sm:$0xff]  ;;  %v10685_v15 = vld [vmem:[#allocation54_spill] sm:$0xff] }
 0x417   : > { %v2608_v38 = vmul.f32 %v8031_v23, %v8015_v41  ;;  %v2750_v1 = vadd.f32 %v2734_v26, %v2621_v49  ;;  %v2831_v61 = vmul.f32 %v8077_v40, %v2786_v59  ;;  %v2509_v57 = vmul.f32 %v7575_v36, %v10680_v51  ;;  %v2778_v26 = vpop.permute.xlu2 %2777  ;;  %v10689_v51 = vld [vmem:[#allocation19_spill] sm:$0xff] }
 0x418   : > { %v2857_v16 = vmax.f32 %v2841_v45, 0.0  ;;  %v2530_v47 = vadd.f32 %v2514_v19, %v2401_v62  ;;  %v2619_v55 = vadd.f32 %v2603_v14, %v2522_v10  ;;  %v2173_v18 = vadd.f32 %v2157_v30, %v8021_v17  ;;  %2875 = vst.msk [vmem:[#allocation2 + $0x64] sm:$0xff] %vm467_vm0, %v2859_v48  ;;  %v8186_v17 = vld [vmem:[#allocation2 + $0x100] sm:$0xff]  ;;  %v10686_v45 = vld [vmem:[#allocation62_spill] sm:$0xff] }
 0x419   : > { %v2307_v25 = vadd.f32 %v10681_v56, %v2177_v52  ;;  %v2620_v3 = vadd.f32 %v2604_v53, %v2523_v6  ;;  %v2526_v44 = vadd.f32 %v10682_v27, %v2397_v28  ;;  %v2847_v41 = vadd.f32 %v2831_v61, %v2750_v1  ;;  %v10688_v1 = vld [vmem:[#allocation221_spill] sm:$0xff] }
 0x41a   : > { %2873 = vst.msk [vmem:[#allocation2 + $0x44] sm:$0xff] %vm467_vm0, %v2857_v16  ;;  %v2525_v49 = vadd.f32 %v2509_v57, %v2396_v2  ;;  %v2383_v11 = vmul.f32 %v7926_v32, %v10683_v21  ;;  %v2748_v4 = vadd.f32 %v2732_v63, %v2619_v55  ;;  %v2829_v10 = vmul.f32 %v8077_v40, %v2778_v26  ;;  %v10690_v26 = vld [vmem:[#allocation109_spill] sm:$0xff] }
 0x41b   : > { %v2782_v19 = vpop.permute.xlu0 %2781  ;;  %v2749_v62 = vadd.f32 %v2733_v58, %v2620_v3  ;;  %v2624_v14 = vadd.f32 %v2608_v38, %v2527_v13  ;;  %v2863_v52 = vmax.f32 %v2847_v41, 0.0  ;;  %v2303_v30 = vadd.f32 %v7983_v35, %v2173_v18  ;;  %v10687_v58 = vld [vmem:[#allocation123_spill] sm:$0xff] }
 0x41c   : > { %v2830_v43 = vmul.f32 %v8077_v40, %v2782_v19  ;;  %v2606_v6 = vmul.f32 %v8031_v23, %v10684_v37  ;;  %v2160_v20 = vmul.f32 %v7737_v34, %v10685_v15  ;;  %v2845_v53 = vadd.f32 %v2829_v10, %v2748_v4  ;;  %v8194_v28 = vld [vmem:[#allocation2 + $0x70] sm:$0xff]  ;;  %v2798_v63 = vpop.permute.xlu1 %2797  ;;  %v8225_v4 = vld [vmem:[#allocation2 + $0x120] sm:$0xff] }
 0x41d   : > { %v2607_v2 = vmul.f32 %v8031_v23, %v10686_v45  ;;  %v2737_v13 = vmul.f32 %v10651_v22, %v7999_v12  ;;  %2879 = vst.msk [vmem:[#allocation2 + $0xa4] sm:$0xff] %vm467_vm0, %v2863_v52  ;;  %3061 = vperm.xlu0 %5494, %v8194_v28   ;;  %2961 = vperm.xlu2 %5497, %v8186_v17   ;;  %v8227_v10 = vld [vmem:[#allocation2 + $0x130] sm:$0xff] }
 0x41e   : > { %v2846_v39 = vadd.f32 %v2830_v43, %v2749_v62  ;;  %v2399_v35 = vadd.f32 %v2383_v11, %v8091_v9  ;;  %v2736_v34 = vmul.f32 %v10651_v22, %v10687_v58  ;;  %v2861_v54 = vmax.f32 %v2845_v53, 0.0  ;;  %v10693_v43 = vld [vmem:[#allocation99_spill] sm:$0xff] }
 0x41f   : > { %v2622_v48 = vadd.f32 %v2606_v6, %v2525_v49  ;;  %v2611_v59 = vmul.f32 %v8031_v23, %v8071_v24  ;;  %v2753_v12 = vadd.f32 %v2737_v13, %v2624_v14  ;;  %v2834_v16 = vmul.f32 %v8077_v40, %v2798_v63  ;;  %v2790_v27 = vpop.permute.xlu2 %2789  ;;  %v10692_v14 = vld [vmem:[#allocation78_spill] sm:$0xff]  ;;  %v10694_v6 = vld [vmem:[#allocation92_spill] sm:$0xff]  ;;  %v10696_v63 = vld [vmem:[#allocation205_spill] sm:$0xff] }
 0x420   : > { %v2862_v38 = vmax.f32 %v2846_v39, 0.0  ;;  %v2512_v61 = vmul.f32 %v7575_v36, %v10688_v1  ;;  %v2517_v57 = vmul.f32 %v7575_v36, %v10689_v51  ;;  %v2176_v9 = vadd.f32 %v2160_v20, %v8043_v33  ;;  %2877 = vst.msk [vmem:[#allocation2 + $0x84] sm:$0xff] %vm467_vm0, %v2861_v54  ;;  %v10691_v33 = vld [vmem:[#allocation102_spill] sm:$0xff] }
 0x421   : > { %v2400_v55 = vadd.f32 %v8062_v60, %v2303_v30  ;;  %v8216_v18 = vld [vmem:[#allocation2 + $0x40] sm:$0xff]  ;;  %v2404_v24 = vadd.f32 %v8097_v29, %v2307_v25  ;;  %v2623_v56 = vadd.f32 %v2607_v2, %v2526_v44  ;;  %v2850_v3 = vadd.f32 %v2834_v16, %v2753_v12 }
 0x422   : > { %2878 = vst.msk [vmem:[#allocation2 + $0x94] sm:$0xff] %vm467_vm0, %v2862_v38  ;;  %2941 = vperm.xlu1 %5498, %v8216_v18   ;;  %v2528_v41 = vadd.f32 %v2512_v61, %v2399_v35  ;;  %v2386_v49 = vmul.f32 %v7926_v32, %v10690_v26  ;;  %v2751_v21 = vadd.f32 %v10691_v33, %v2622_v48  ;;  %v10700_v33 = vld [vmem:[#allocation101_spill] sm:$0xff] }
 0x423   : > { %v2832_v60 = vmul.f32 %v8077_v40, %v2790_v27  ;;  %v2794_v11 = vpop.permute.xlu0 %2793  ;;  %v2752_v29 = vadd.f32 %v2736_v34, %v2623_v56  ;;  %v2627_v25 = vadd.f32 %v2611_v59, %v2530_v47  ;;  %v2866_v44 = vmax.f32 %v2850_v3, 0.0  ;;  %v10695_v34 = vld [vmem:[#allocation158_spill] sm:$0xff]  ;;  %v10698_v27 = vld [vmem:[#allocation149_spill] sm:$0xff] }
 0x424   : > { %v2833_v19 = vmul.f32 %v8077_v40, %v2794_v11  ;;  %v2306_v62 = vadd.f32 %v8003_v42, %v2176_v9  ;;  %v2609_v52 = vmul.f32 %v8031_v23, %v10692_v14  ;;  %v2529_v30 = vadd.f32 %v10693_v43, %v2400_v55  ;;  %v2810_v2 = vpop.permute.xlu1 %2809 }
 0x425   : > { %v2848_v37 = vadd.f32 %v2832_v60, %v2751_v21  ;;  %v2610_v15 = vmul.f32 %v8031_v23, %v10694_v6  ;;  %v2740_v20 = vmul.f32 %v10651_v22, %v8058_v5  ;;  %2882 = vst.msk [vmem:[#allocation2 + $0x154] sm:$0xff] %vm467_vm0, %v2866_v44  ;;  %3073 = vperm.xlu0 %5494, %v8225_v4  }
 0x426   : > { %v2849_v47 = vadd.f32 %v2833_v19, %v2752_v29  ;;  %2976 = vperm.xlu2 %5497, %v8227_v10   ;;  %v2402_v42 = vadd.f32 %v2386_v49, %v8102_v31  ;;  %v2739_v53 = vmul.f32 %v10651_v22, %v7971_v50  ;;  %v2625_v13 = vadd.f32 %v2609_v52, %v2528_v41  ;;  %v10697_v31 = vld [vmem:[#allocation20_spill] sm:$0xff] }
 0x427   : > { %v2864_v45 = vmax.f32 %v2848_v37, 0.0  ;;  %v2614_v39 = vmul.f32 %v8031_v23, %v8120_v0  ;;  %v2756_v5 = vadd.f32 %v2740_v20, %v2627_v25  ;;  %v2837_v58 = vmul.f32 %v8077_v40, %v2810_v2  ;;  %v2802_v12 = vpop.permute.xlu2 %2801  ;;  %v3130_v20 = vld [vmem:[#allocation2 + $0x14] sm:$0xff] }
 0x428   : > { %v2865_v35 = vmax.f32 %v2849_v47, 0.0  ;;  %v2738_v54 = vmul.f32 %v10651_v22, %v10695_v34  ;;  %v2387_v48 = vmul.f32 %v7926_v32, %v10696_v63  ;;  %v2515_v59 = vmul.f32 %v7575_v36, %v10697_v31  ;;  %v10704_v34 = vld [vmem:[#allocation124_spill] sm:$0xff]  ;;  %v8302_v31 = vld [vmem:[#allocation2 + $0x110] sm:$0xff] }
 0x429   : > { %2880 = vst.msk [vmem:[#allocation2 + $0xb4] sm:$0xff] %vm467_vm0, %v2864_v45  ;;  %v2533_v50 = vadd.f32 %v2517_v57, %v2404_v24  ;;  %v2626_v38 = vadd.f32 %v2610_v15, %v2529_v30  ;;  %v2853_v0 = vadd.f32 %v2837_v58, %v2756_v5  ;;  %v2835_v51 = vmul.f32 %v8077_v40, %v2802_v12  ;;  %v10699_v24 = vld [vmem:[#allocation73_spill] sm:$0xff]  ;;  %v3138_v58 = vld [vmem:[#allocation2 + $0x114] sm:$0xff]  ;;  %v8298_v63 = vld [vmem:[#allocation2 + $0x60] sm:$0xff] }
 0x42a   : > { %2881 = vst.msk [vmem:[#allocation2 + $0x144] sm:$0xff] %vm467_vm0, %v2865_v35  ;;  %2956 = vperm.xlu1 %5498, %v8194_v28   ;;  %v2403_v16 = vadd.f32 %v2387_v48, %v2306_v62  ;;  %v2531_v1 = vadd.f32 %v2515_v59, %v2402_v42  ;;  %v2754_v61 = vadd.f32 %v2738_v54, %v2625_v13  ;;  %v10702_v35 = vmov 1   ;;  %v10703_v5 = vld [vmem:[#allocation113_spill] sm:$0xff] }
 0x42b   : > { %v2806_v9 = vpop.permute.xlu0 %2805  ;;  %v2755_v32 = vadd.f32 %v2739_v53, %v2626_v38  ;;  %v2630_v55 = vadd.f32 %v2614_v39, %v2533_v50  ;;  %v2869_v56 = vmax.f32 %v2853_v0, 0.0  ;;  %v2516_v57 = vmul.f32 %v7575_v36, %v10698_v27  ;;  %v8306_v59 = vld [vmem:[#allocation2 + $0x8] sm:$0xff]  ;;  %v8315_v0 = vld [vmem:[#allocation2 + $0x58] sm:$0xff] }
 0x42c   : > { %v2836_v3 = vmul.f32 %v8077_v40, %v2806_v9  ;;  %v2612_v41 = vmul.f32 %v8031_v23, %v10699_v24  ;;  %v2851_v26 = vadd.f32 %v2835_v51, %v2754_v61  ;;  %v8262_v49 = vld [vmem:[#allocation2 + $0x150] sm:$0xff]  ;;  %v2613_v21 = vmul.f32 %v8031_v23, %v10700_v33  ;;  %v2822_v36 = vpop.permute.xlu1 %2821  ;;  %v10701_v23 = vld [vmem:[#allocation160_spill] sm:$0xff] }
 0x42d   : > { %v2743_v60 = vmul.f32 %v10651_v22, %v8110_v8  ;;  %2885 = vst.msk [vmem:[#allocation2 + $0x184] sm:$0xff] %vm467_vm0, %v2869_v56  ;;  %3085 = vperm.xlu0 %5494, %v8262_v49   ;;  %v2532_v29 = vadd.f32 %v2516_v57, %v2403_v16  ;;  %v2742_v19 = vmul.f32 %v10651_v22, %v8035_v7  ;;  %v10706_v61 = vmov 0   ;;  %v3132_v9 = vld [vmem:[#allocation2 + $0x34] sm:$0xff]  ;;  %v3139_v57 = vld [vmem:[#allocation2 + $0x124] sm:$0xff] }
 0x42e   : > { %v2852_v11 = vadd.f32 %v2836_v3, %v2755_v32  ;;  %v2867_v25 = vmax.f32 %v2851_v26, 0.0  ;;  %v2628_v44 = vadd.f32 %v2612_v41, %v2531_v1  ;;  %v2840_v52 = vmul.f32 %v8077_v40, %v2822_v36  ;;  %v3131_v1 = vld [vmem:[#allocation2 + $0x24] sm:$0xff]  ;;  %v8342_v3 = vld [vmem:[#allocation2 + $0x74] sm:$0xff] }
 0x42f   : > { %v2759_v14 = vadd.f32 %v2743_v60, %v2630_v55  ;;  %v2741_v43 = vmul.f32 %v10651_v22, %v10701_v23  ;;  %v2629_v8 = vadd.f32 %v2613_v21, %v2532_v29  ;;  %v2814_v37 = vpop.permute.xlu2 %2813  ;;  %v8334_v32 = vld [vmem:[#allocation2 + $0x44] sm:$0xff]  ;;  %v8358_v21 = vld [vmem:[#allocation2 + $0x154] sm:$0xff] }
 0x430   : > { %v2868_v62 = vmax.f32 %v2852_v11, 0.0  ;;  %2883 = vst.msk [vmem:[#allocation2 + $0x164] sm:$0xff] %vm467_vm0, %v2867_v25  ;;  %v2838_v15 = vmul.f32 %v8077_v40, %v2814_v37  ;;  %v8353_v26 = vld [vmem:[#allocation2 + $0xb0] sm:$0xff]  ;;  %v8368_v25 = vld [vmem:[#allocation2 + $0x4] sm:$0xff] }
 0x431   : > { %v2856_v30 = vadd.f32 %v2840_v52, %v2759_v14  ;;  %v2757_v6 = vadd.f32 %v2741_v43, %v2628_v44  ;;  %v2758_v47 = vadd.f32 %v2742_v19, %v2629_v8  ;;  %v3141_v54 = vld [vmem:[#allocation2 + $0x144] sm:$0xff]  ;;  %v8386_v23 = vld [vmem:[#allocation2 + $0x54] sm:$0xff] }
 0x432   : > { %2884 = vst.msk [vmem:[#allocation2 + $0x174] sm:$0xff] %vm467_vm0, %v2868_v62  ;;  %2971 = vperm.xlu1 %5498, %v8225_v4   ;;  %v8287_v4 = vld [vmem:[#allocation2 + $0x64] sm:$0xff] }
 0x433   : > { %v2818_v7 = vpop.permute.xlu0 %2817  ;;  %v2872_v42 = vmax.f32 %v2856_v30, 0.0  ;;  %v2854_v45 = vadd.f32 %v2838_v15, %v2757_v6  ;;  %v8309_v50 = vld [vmem:[#allocation2 + $0x140] sm:$0xff] }
 0x434   : > { %v2839_v53 = vmul.f32 %v8077_v40, %v2818_v7  ;;  %v8290_v40 = vld [vmem:[#allocation2 + $0x10] sm:$0xff]  ;;  %v8351_v41 = vpop.permute.xlu1 %2931  ;;  %v8397_v37 = vld [vmem:[#allocation2 + $0xa4] sm:$0xff] }
 0x435   : > { %2888 = vst.msk [vmem:[#allocation2 + $0x1b4] sm:$0xff] %vm467_vm0, %v2872_v42  ;;  %3263 = vperm.xlu0 %5494, %v3130_v20   ;;  %v2870_v2 = vmax.f32 %v2854_v45, 0.0  ;;  %v8402_v15 = vld [vmem:[#allocation2 + $0x104] sm:$0xff]  ;;  %v8413_v42 = vld [vmem:[#allocation2 + $0x134] sm:$0xff] }
 0x436   : > { %v2855_v22 = vadd.f32 %v2839_v53, %v2758_v47  ;;  %10710 = vst [vmem:[#allocation128_spill] sm:$0xff] %v8351_v41  ;;  %v4491_v41 = vld [vmem:[#allocation2 + $0xe4] sm:$0xff] }
 0x437   : > { %v8281_v39 = vld [vmem:[#allocation2 + $0x160] sm:$0xff]  ;;  %2886 = vst.msk [vmem:[#allocation2 + $0x194] sm:$0xff] %vm467_vm0, %v2870_v2  ;;  %v8337_v55 = vld [vmem:[#allocation2 + $0x168] sm:$0xff] }
 0x438   : > { %v2871_v13 = vmax.f32 %v2855_v22, 0.0  ;;  %2991 = vperm.xlu2 %5497, %v8281_v39   ;;  %v8420_v22 = vld [vmem:[#allocation2 + $0x184] sm:$0xff] }
 0x439   : > { %v3144_v48 = vld [vmem:[#allocation2 + $0x174] sm:$0xff] }
 0x43a   : > { %2887 = vst.msk [vmem:[#allocation2 + $0x1a4] sm:$0xff] %vm467_vm0, %v2871_v13  ;;  %2986 = vperm.xlu1 %5498, %v8262_v49   ;;  %v8318_v12 = vld [vmem:[#allocation2 + $0x170] sm:$0xff]  ;;  %v8425_v13 = vld [vmem:[#allocation2 + $0x164] sm:$0xff] }
 0x43b   : > { %v8347_v27 = vpop.permute.xlu0 %3041 }
 0x43c   : > { %10708 = vst [vmem:[#allocation136_spill] sm:$0xff] %v8347_v27  ;;  %v8529_v27 = vld [vmem:[#allocation2 + $0x1d0] sm:$0xff] }
 0x43d   : > { %3283 = vperm.xlu0 %5494, %v8287_v4   ;;  %10748 = vst [vmem:[#allocation168_spill] sm:$0xff] %v8529_v27 }
 0x43e   : > { %v8312_v38 = vpop.permute.xlu2 %2921  ;;  %v8376_v19 = vld [vmem:[#allocation2 + $0x190] sm:$0xff] }
 0x440   : > { %5500 = vset.pattern.permute.xlu2 %v10702_v35 }
 0x441   : > { %3037 = vperm.xlu2 %5500, %v8290_v40  }
 0x442   : > { %5499 = vset.pattern.permute.xlu1 %v10702_v35 }
 0x443   : > { %3033 = vperm.xlu1 %5499, %v10703_v5  }
 0x445   : > { %3295 = vperm.xlu0 %5494, %v3138_v58  }
 0x448   : > { %v8324_v16 = vpop.permute.xlu2 %2936 }
 0x449   : > { %3049 = vperm.xlu2 %5500, %v8216_v18   ;;  %10705 = vst [vmem:[#allocation125_spill] sm:$0xff] %v8324_v16  ;;  %v3358_v16 = vld [vmem:[#allocation2 + $0x38] sm:$0xff] }
 0x44b   : > { %3045 = vperm.xlu1 %5499, %v10704_v34   ;;  %v8433_v34 = vld [vmem:[#allocation2 + $0x1b4] sm:$0xff] }
 0x44d   : > { %3307 = vperm.xlu0 %5494, %v3141_v54  }
 0x451   : > { %3057 = vperm.xlu2 %5500, %v8298_v63  }
 0x453   : > { %3053 = vperm.xlu1 %5499, %v8161_v46  }
 0x455   : > { %3319 = vperm.xlu0 %5494, %v3144_v48  }
 0x459   : > { %3069 = vperm.xlu2 %5500, %v8302_v31  }
 0x45b   : > { %3065 = vperm.xlu1 %5499, %v8186_v17   ;;  %v8322_v17 = vld [vmem:[#allocation2 + $0x108] sm:$0xff] }
 0x45d   : > { %3485 = vperm.xlu0 %5494, %v8306_v59  }
 0x461   : > { %3081 = vperm.xlu2 %5500, %v8309_v50  }
 0x463   : > { %3077 = vperm.xlu1 %5499, %v8227_v10   ;;  %v8329_v10 = vld [vmem:[#allocation2 + $0x138] sm:$0xff] }
 0x465   : > { %3505 = vperm.xlu0 %5494, %v8315_v0  }
 0x469   : > { %3093 = vperm.xlu2 %5500, %v8318_v12  }
 0x46b   : > { %3089 = vperm.xlu1 %5499, %v8281_v39  }
 0x46d   : > { %3517 = vperm.xlu0 %5494, %v8322_v17  }
 0x46f   : > { %v8332_v51 = vpop.permute.xlu2 %2946 }
 0x471   : > { %5502 = vset.pattern.permute.xlu2 %v10706_v61 }
 0x472   : > { %3157 = vperm.xlu2 %5502, %v3131_v1  }
 0x473   : > { %5501 = vset.pattern.permute.xlu1 %v10706_v61 }
 0x474   : > { %3152 = vperm.xlu1 %5501, %v3130_v20  }
 0x475   : > { %3529 = vperm.xlu0 %5494, %v8329_v10  }
 0x477   : > { %v8340_v56 = vpop.permute.xlu2 %2961 }
 0x478   : > { %10707 = vst [vmem:[#allocation126_spill] sm:$0xff] %v8340_v56 }
 0x47a   : > { %3167 = vperm.xlu2 %5502, %v8334_v32  }
 0x47c   : > { %3162 = vperm.xlu1 %5501, %v3132_v9  }
 0x47d   : > { %3541 = vperm.xlu0 %5494, %v8337_v55  }
 0x480   : > { %v8349_v24 = vpop.permute.xlu2 %2976 }
 0x481   : > { %10709 = vst [vmem:[#allocation127_spill] sm:$0xff] %v8349_v24 }
 0x482   : > { %3182 = vperm.xlu2 %5502, %v8342_v3  }
 0x484   : > { %3177 = vperm.xlu1 %5501, %v8287_v4  }
 0x485   : > { %3719 = vperm.xlu0 %5494, %v8298_v63  }
 0x48a   : > { %3197 = vperm.xlu2 %5502, %v3139_v57  }
 0x48c   : > { %3192 = vperm.xlu1 %5501, %v3138_v58  }
 0x48d   : > { %3739 = vperm.xlu0 %5494, %v8353_v26  }
 0x48f   : > { %v8356_v33 = vpop.permute.xlu0 %3061 }
 0x490   : > { %10711 = vst [vmem:[#allocation138_spill] sm:$0xff] %v8356_v33 }
 0x492   : > { %v8360_v60 = vpop.permute.xlu2 %2991  ;;  %3212 = vperm.xlu2 %5502, %v8358_v21  }
 0x493   : > { %10712 = vst [vmem:[#allocation129_spill] sm:$0xff] %v8360_v60 }
 0x494   : > { %v8363_v11 = vpop.permute.xlu1 %2941  ;;  %3207 = vperm.xlu1 %5501, %v3141_v54  }
 0x495   : > { %10713 = vst [vmem:[#allocation130_spill] sm:$0xff] %v8363_v11  ;;  %3751 = vperm.xlu0 %5494, %v8281_v39  }
 0x497   : > { %v8366_v29 = vpop.permute.xlu0 %3073 }
 0x498   : > { %10714 = vst [vmem:[#allocation131_spill] sm:$0xff] %v8366_v29 }
 0x49a   : > { %5503 = vset.pattern.permute.xlu2 %v10702_v35 }
 0x49b   : > { %v8373_v44 = vpop.permute.xlu2 %3037  ;;  %3259 = vperm.xlu2 %5503, %v8368_v25  }
 0x49c   : > { %v8371_v36 = vpop.permute.xlu1 %2956  ;;  %3222 = vperm.xlu1 %5501, %v3144_v48   ;;  %10716 = vst [vmem:[#allocation133_spill] sm:$0xff] %v8373_v44  ;;  %v3356_v48 = vld [vmem:[#allocation2 + $0x18] sm:$0xff] }
 0x49d   : > { %10715 = vst [vmem:[#allocation132_spill] sm:$0xff] %v8371_v36  ;;  %3763 = vperm.xlu0 %5494, %v8376_v19   ;;  %v3364_v44 = vld [vmem:[#allocation2 + $0x118] sm:$0xff] }
 0x49f   : > { %v8379_v62 = vpop.permute.xlu0 %3085 }
 0x4a0   : > { %10717 = vst [vmem:[#allocation134_spill] sm:$0xff] %v8379_v62 }
 0x4a3   : > { %v8384_v52 = vpop.permute.xlu2 %3049  ;;  %3271 = vperm.xlu2 %5503, %v3132_v9  }
 0x4a4   : > { %v8381_v14 = vpop.permute.xlu1 %2971  ;;  %5504 = vset.pattern.permute.xlu1 %v10702_v35  ;;  %10719 = vst [vmem:[#allocation137_spill] sm:$0xff] %v8384_v52 }
 0x4a5   : > { %10718 = vst [vmem:[#allocation135_spill] sm:$0xff] %v8381_v14  ;;  %3267 = vperm.xlu1 %5504, %v3131_v1   ;;  %3941 = vperm.xlu0 %5494, %v8386_v23   ;;  %v8475_v14 = vld [vmem:[#allocation2 + $0x178] sm:$0xff] }
 0x4a7   : > { %v8389_v43 = vpop.permute.xlu0 %3263 }
 0x4a8   : > { %10720 = vst [vmem:[#allocation139_spill] sm:$0xff] %v8389_v43  ;;  %v8455_v43 = vld [vmem:[#allocation2 + $0x98] sm:$0xff] }
 0x4ab   : > { %v8393_v30 = vpop.permute.xlu2 %3057  ;;  %3279 = vperm.xlu2 %5503, %v8386_v23  }
 0x4ac   : > { %v8391_v8 = vpop.permute.xlu1 %2986  ;;  %10722 = vst [vmem:[#allocation141_spill] sm:$0xff] %v8393_v30  ;;  %v8524_v30 = vld [vmem:[#allocation2 + $0x1a0] sm:$0xff] }
 0x4ad   : > { %10721 = vst [vmem:[#allocation140_spill] sm:$0xff] %v8391_v8  ;;  %3275 = vperm.xlu1 %5504, %v8334_v32   ;;  %3961 = vperm.xlu0 %5494, %v8397_v37   ;;  %v8467_v8 = vld [vmem:[#allocation2 + $0x148] sm:$0xff] }
 0x4af   : > { %v8400_v6 = vpop.permute.xlu0 %3283 }
 0x4b0   : > { %10723 = vst [vmem:[#allocation142_spill] sm:$0xff] %v8400_v6 }
 0x4b3   : > { %v8404_v7 = vpop.permute.xlu2 %3069  ;;  %3291 = vperm.xlu2 %5503, %v8402_v15  }
 0x4b5   : > { %v8407_v20 = vpop.permute.xlu1 %3033  ;;  %3287 = vperm.xlu1 %5504, %v8342_v3   ;;  %3973 = vperm.xlu0 %5494, %v8358_v21  }
 0x4b7   : > { %v8411_v47 = vpop.permute.xlu0 %3295 }
 0x4bb   : > { %v8415_v53 = vpop.permute.xlu2 %3081  ;;  %3303 = vperm.xlu2 %5503, %v8413_v42  }
 0x4bd   : > { %v8418_v45 = vpop.permute.xlu1 %3045  ;;  %3299 = vperm.xlu1 %5504, %v3139_v57   ;;  %3985 = vperm.xlu0 %5494, %v8420_v22   ;;  %v8444_v57 = vld [vmem:[#allocation2 + $0x48] sm:$0xff] }
 0x4be   : > { %10724 = vst [vmem:[#allocation151_spill] sm:$0xff] %v8418_v45 }
 0x4bf   : > { %v8423_v2 = vpop.permute.xlu0 %3307 }
 0x4c3   : > { %3315 = vperm.xlu2 %5503, %v8425_v13   ;;  %v8428_v5 = vpop.permute.xlu2 %3093 }
 0x4c5   : > { %v8430_v58 = vpop.permute.xlu1 %3053  ;;  %3311 = vperm.xlu1 %5504, %v8358_v21   ;;  %3997 = vperm.xlu0 %5494, %v8433_v34  }
 0x4c6   : > { %10725 = vst [vmem:[#allocation143_spill] sm:$0xff] %v8430_v58  ;;  %v8616_v58 = vld [vmem:[#allocation2 + $0x188] sm:$0xff] }
 0x4c7   : > { %v8436_v54 = vpop.permute.xlu0 %3319 }
 0x4c8   : > { %10726 = vst [vmem:[#allocation144_spill] sm:$0xff] %v8436_v54 }
 0x4cb   : > { %5506 = vset.pattern.permute.xlu2 %v10706_v61 }
 0x4cc   : > { %3378 = vperm.xlu2 %5506, %v3356_v48   ;;  %v8442_v9 = vpop.permute.xlu2 %3157 }
 0x4cd   : > { %v8439_v1 = vpop.permute.xlu1 %3065  ;;  %5505 = vset.pattern.permute.xlu1 %v10706_v61  ;;  %10728 = vst [vmem:[#allocation146_spill] sm:$0xff] %v8442_v9  ;;  %4163 = vperm.xlu0 %5494, %v8444_v57   ;;  %v8460_v9 = vld [vmem:[#allocation2 + $0x68] sm:$0xff] }
 0x4ce   : > { %10727 = vst [vmem:[#allocation145_spill] sm:$0xff] %v8439_v1  ;;  %3373 = vperm.xlu1 %5505, %v8306_v59  }
 0x4cf   : > { %v8448_v45 = vpop.permute.xlu0 %3485 }
 0x4d0   : > { %10729 = vst [vmem:[#allocation147_spill] sm:$0xff] %v8448_v45  ;;  %v4500_v45 = vld [vmem:[#allocation2 + $0x1f4] sm:$0xff] }
 0x4d4   : > { %3393 = vperm.xlu2 %5506, %v8444_v57   ;;  %v8453_v11 = vpop.permute.xlu2 %3167 }
 0x4d5   : > { %v8450_v52 = vpop.permute.xlu1 %3077  ;;  %10731 = vst [vmem:[#allocation156_spill] sm:$0xff] %v8453_v11  ;;  %4183 = vperm.xlu0 %5494, %v8455_v43  }
 0x4d6   : > { %10730 = vst [vmem:[#allocation148_spill] sm:$0xff] %v8450_v52  ;;  %3388 = vperm.xlu1 %5505, %v3358_v16   ;;  %v8547_v52 = vld [vmem:[#allocation2 + $0x94] sm:$0xff] }
 0x4d7   : > { %v8458_v62 = vpop.permute.xlu0 %3505 }
 0x4d8   : > { %10732 = vst [vmem:[#allocation150_spill] sm:$0xff] %v8458_v62 }
 0x4dc   : > { %3403 = vperm.xlu2 %5506, %v8460_v9   ;;  %v8465_v6 = vpop.permute.xlu2 %3182 }
 0x4dd   : > { %v8462_v59 = vpop.permute.xlu1 %3089  ;;  %10734 = vst [vmem:[#allocation153_spill] sm:$0xff] %v8465_v6  ;;  %4195 = vperm.xlu0 %5494, %v8467_v8  }
 0x4de   : > { %10733 = vst [vmem:[#allocation152_spill] sm:$0xff] %v8462_v59  ;;  %3398 = vperm.xlu1 %5505, %v8315_v0   ;;  %v8486_v59 = vld [vmem:[#allocation2 + $0x1a8] sm:$0xff] }
 0x4df   : > { %v8471_v11 = vpop.permute.xlu0 %3517 }
 0x4e0   : > { %10735 = vst [vmem:[#allocation154_spill] sm:$0xff] %v8471_v11 }
 0x4e4   : > { %3418 = vperm.xlu2 %5506, %v3364_v44   ;;  %v8473_v29 = vpop.permute.xlu2 %3197 }
 0x4e5   : > { %10736 = vst [vmem:[#allocation155_spill] sm:$0xff] %v8473_v29  ;;  %4207 = vperm.xlu0 %5494, %v8475_v14  }
 0x4e6   : > { %v8477_v36 = vpop.permute.xlu1 %3152  ;;  %3413 = vperm.xlu1 %5505, %v8322_v17   ;;  %v8495_v17 = vld [vmem:[#allocation2 + $0xa0] sm:$0xff] }
 0x4e7   : > { %10737 = vst [vmem:[#allocation157_spill] sm:$0xff] %v8477_v36  ;;  %v8481_v6 = vpop.permute.xlu0 %3529 }
 0x4e8   : > { %10738 = vst [vmem:[#allocation159_spill] sm:$0xff] %v8481_v6 }
 0x4ec   : > { %3433 = vperm.xlu2 %5506, %v8467_v8   ;;  %v8484_v0 = vpop.permute.xlu2 %3212 }
 0x4ed   : > { %10739 = vst [vmem:[#allocation178_spill] sm:$0xff] %v8484_v0  ;;  %4219 = vperm.xlu0 %5494, %v8486_v59  }
 0x4ee   : > { %v8488_v11 = vpop.permute.xlu1 %3162  ;;  %3428 = vperm.xlu1 %5505, %v8329_v10   ;;  %v8507_v10 = vld [vmem:[#allocation2 + $0xf0] sm:$0xff] }
 0x4ef   : > { %10740 = vst [vmem:[#allocation22_spill] sm:$0xff] %v8488_v11  ;;  %v8492_v29 = vpop.permute.xlu0 %3541  ;;  %v8505_v11 = vld [vmem:[#allocation2 + $0x28] sm:$0xff] }
 0x4f0   : > { %10741 = vst [vmem:[#allocation161_spill] sm:$0xff] %v8492_v29 }
 0x4f4   : > { %3448 = vperm.xlu2 %5506, %v8475_v14  }
 0x4f5   : > { %v8500_v6 = vpop.permute.xlu2 %3259  ;;  %4397 = vperm.xlu0 %5494, %v8495_v17  }
 0x4f6   : > { %v8497_v36 = vpop.permute.xlu1 %3177  ;;  %3443 = vperm.xlu1 %5505, %v8337_v55  }
 0x4f7   : > { %10742 = vst [vmem:[#allocation165_spill] sm:$0xff] %v8497_v36  ;;  %v8503_v0 = vpop.permute.xlu0 %3719 }
 0x4f8   : > { %10743 = vst [vmem:[#allocation162_spill] sm:$0xff] %v8503_v0 }
 0x4fc   : > { %5508 = vset.pattern.permute.xlu2 %v10702_v35 }
 0x4fd   : > { %3493 = vperm.xlu2 %5508, %v8505_v11   ;;  %v8514_v36 = vpop.permute.xlu2 %3271  ;;  %4417 = vperm.xlu0 %5494, %v8507_v10  }
 0x4fe   : > { %v8510_v29 = vpop.permute.xlu1 %3192  ;;  %5507 = vset.pattern.permute.xlu1 %v10702_v35  ;;  %10744 = vst [vmem:[#allocation181_spill] sm:$0xff] %v8514_v36 }
 0x4ff   : > { %3489 = vperm.xlu1 %5507, %v3356_v48   ;;  %v8517_v55 = vpop.permute.xlu0 %3739  ;;  %v8531_v48 = vld [vmem:[#allocation2 + $0x78] sm:$0xff] }
 0x500   : > { %10745 = vst [vmem:[#allocation163_spill] sm:$0xff] %v8517_v55 }
 0x505   : > { %3501 = vperm.xlu2 %5508, %v8444_v57   ;;  %v8522_v33 = vpop.permute.xlu2 %3279  ;;  %4429 = vperm.xlu0 %5494, %v8524_v30  }
 0x506   : > { %v8519_v0 = vpop.permute.xlu1 %3207  ;;  %10746 = vst [vmem:[#allocation18_spill] sm:$0xff] %v8522_v33  ;;  %v8554_v33 = vld [vmem:[#allocation2 + $0x158] sm:$0xff] }
 0x507   : > { %3497 = vperm.xlu1 %5507, %v3358_v16   ;;  %v8527_v60 = vpop.permute.xlu0 %3751  ;;  %v8542_v16 = vld [vmem:[#allocation2 + $0x128] sm:$0xff] }
 0x508   : > { %10747 = vst [vmem:[#allocation164_spill] sm:$0xff] %v8527_v60 }
 0x50d   : > { %3513 = vperm.xlu2 %5508, %v8531_v48   ;;  %v8536_v55 = vpop.permute.xlu2 %3291  ;;  %4441 = vperm.xlu0 %5494, %v8529_v27   ;;  %v8587_v27 = vld [vmem:[#allocation2 + $0x80] sm:$0xff] }
 0x50e   : > { %v8533_v36 = vpop.permute.xlu1 %3222  ;;  %10749 = vst [vmem:[#allocation23_spill] sm:$0xff] %v8536_v55 }
 0x50f   : > { %3509 = vperm.xlu1 %5507, %v8460_v9   ;;  %v8540_v62 = vpop.permute.xlu0 %3763 }
 0x510   : > { %10750 = vst [vmem:[#allocation184_spill] sm:$0xff] %v8540_v62 }
 0x515   : > { %3525 = vperm.xlu2 %5508, %v8542_v16   ;;  %v8545_v60 = vpop.permute.xlu2 %3303  ;;  %4619 = vperm.xlu0 %5494, %v8547_v52  }
 0x516   : > { %10751 = vst [vmem:[#allocation41_spill] sm:$0xff] %v8545_v60 }
 0x517   : > { %3521 = vperm.xlu1 %5507, %v3364_v44   ;;  %v8549_v24 = vpop.permute.xlu1 %3267  ;;  %v8552_v55 = vpop.permute.xlu0 %3941  ;;  %v8565_v44 = vld [vmem:[#allocation2 + $0x194] sm:$0xff] }
 0x518   : > { %10752 = vst [vmem:[#allocation51_spill] sm:$0xff] %v8549_v24 }
 0x519   : > { %10753 = vst [vmem:[#allocation166_spill] sm:$0xff] %v8552_v55 }
 0x51d   : > { %3537 = vperm.xlu2 %5508, %v8554_v33   ;;  %v8557_v62 = vpop.permute.xlu2 %3315  ;;  %4639 = vperm.xlu0 %5494, %v4491_v41  }
 0x51e   : > { %10754 = vst [vmem:[#allocation24_spill] sm:$0xff] %v8557_v62 }
 0x51f   : > { %3533 = vperm.xlu1 %5507, %v8467_v8   ;;  %v8560_v1 = vpop.permute.xlu1 %3275  ;;  %v8562_v60 = vpop.permute.xlu0 %3961 }
 0x520   : > { %10755 = vst [vmem:[#allocation83_spill] sm:$0xff] %v8560_v1  ;;  %v4497_v1 = vld [vmem:[#allocation2 + $0x1c4] sm:$0xff] }
 0x521   : > { %10756 = vst [vmem:[#allocation30_spill] sm:$0xff] %v8562_v60 }
 0x525   : > { %5509 = vset.pattern.permute.xlu2 %v10706_v61  ;;  %4651 = vperm.xlu0 %5494, %v8565_v44  }
 0x526   : > { %v8571_v24 = vpop.permute.xlu2 %3378  ;;  %3599 = vperm.xlu2 %5509, %v8216_v18  }
 0x527   : > { %3545 = vperm.xlu1 %5507, %v8475_v14   ;;  %v8568_v55 = vpop.permute.xlu1 %3287  ;;  %10758 = vst [vmem:[#allocation77_spill] sm:$0xff] %v8571_v24  ;;  %v8574_v62 = vpop.permute.xlu0 %3973 }
 0x528   : > { %10757 = vst [vmem:[#allocation61_spill] sm:$0xff] %v8568_v55 }
 0x529   : > { %10759 = vst [vmem:[#allocation187_spill] sm:$0xff] %v8574_v62  ;;  %v8589_v62 = vld [vmem:[#allocation2 + $0x90] sm:$0xff] }
 0x52d   : > { %4663 = vperm.xlu0 %5494, %v4497_v1  }
 0x52e   : > { %v8579_v60 = vpop.permute.xlu2 %3393  ;;  %3614 = vperm.xlu2 %5509, %v8194_v28  }
 0x52f   : > { %5510 = vset.pattern.permute.xlu1 %v10706_v61  ;;  %v8577_v41 = vpop.permute.xlu1 %3299  ;;  %10761 = vst [vmem:[#allocation167_spill] sm:$0xff] %v8579_v60  ;;  %v8583_v55 = vpop.permute.xlu0 %3985  ;;  %v8597_v60 = vld [vmem:[#allocation2 + $0x88] sm:$0xff] }
 0x530   : > { %10760 = vst [vmem:[#allocation84_spill] sm:$0xff] %v8577_v41  ;;  %3609 = vperm.xlu1 %5510, %v8298_v63   ;;  %v4716_v41 = vld [vmem:[#allocation2 + $0xd8] sm:$0xff] }
 0x531   : > { %10762 = vst [vmem:[#allocation28_spill] sm:$0xff] %v8583_v55 }
 0x535   : > { %4675 = vperm.xlu0 %5494, %v4500_v45  }
 0x536   : > { %v8591_v56 = vpop.permute.xlu2 %3403  ;;  %3624 = vperm.xlu2 %5509, %v8589_v62  }
 0x537   : > { %v8585_v24 = vpop.permute.xlu1 %3311  ;;  %10764 = vst [vmem:[#allocation169_spill] sm:$0xff] %v8591_v56  ;;  %v8595_v1 = vpop.permute.xlu0 %3997 }
 0x538   : > { %10763 = vst [vmem:[#allocation189_spill] sm:$0xff] %v8585_v24  ;;  %3619 = vperm.xlu1 %5510, %v8587_v27  }
 0x539   : > { %10765 = vst [vmem:[#allocation46_spill] sm:$0xff] %v8595_v1 }
 0x53d   : > { %4841 = vperm.xlu0 %5494, %v8597_v60  }
 0x53e   : > { %v8600_v55 = vpop.permute.xlu2 %3418  ;;  %3639 = vperm.xlu2 %5509, %v8309_v50  }
 0x53f   : > { %v8606_v24 = vpop.permute.xlu0 %4163 }
 0x540   : > { %3634 = vperm.xlu1 %5510, %v8353_v26   ;;  %v8603_v45 = vpop.permute.xlu1 %3373  ;;  %10766 = vst [vmem:[#allocation170_spill] sm:$0xff] %v8606_v24 }
 0x545   : > { %4861 = vperm.xlu0 %5494, %v4716_v41  }
 0x546   : > { %v8608_v56 = vpop.permute.xlu2 %3433  ;;  %3654 = vperm.xlu2 %5509, %v8318_v12  }
 0x547   : > { %v8614_v54 = vpop.permute.xlu0 %4183 }
 0x548   : > { %3649 = vperm.xlu1 %5510, %v8281_v39   ;;  %v8611_v1 = vpop.permute.xlu1 %3388  ;;  %10768 = vst [vmem:[#allocation95_spill] sm:$0xff] %v8614_v54  ;;  %v8627_v39 = vld [vmem:[#allocation2 + $0x1b8] sm:$0xff] }
 0x549   : > { %10767 = vst [vmem:[#allocation72_spill] sm:$0xff] %v8611_v1 }
 0x54d   : > { %4873 = vperm.xlu0 %5494, %v8616_v58  }
 0x54e   : > { %v8619_v26 = vpop.permute.xlu2 %3448  ;;  %3669 = vperm.xlu2 %5509, %v8524_v30  }
 0x54f   : > { %10769 = vst [vmem:[#allocation43_spill] sm:$0xff] %v8619_v26  ;;  %v8625_v41 = vpop.permute.xlu0 %4195 }
 0x550   : > { %3664 = vperm.xlu1 %5510, %v8376_v19   ;;  %v8622_v24 = vpop.permute.xlu1 %3398  ;;  %10771 = vst [vmem:[#allocation17_spill] sm:$0xff] %v8625_v41 }
 0x551   : > { %10770 = vst [vmem:[#allocation31_spill] sm:$0xff] %v8622_v24  ;;  %v4725_v24 = vld [vmem:[#allocation2 + $0x1e8] sm:$0xff] }
 0x555   : > { %4885 = vperm.xlu0 %5494, %v8627_v39  }
 0x556   : > { %5512 = vset.pattern.permute.xlu2 %v10702_v35 }
 0x557   : > { %v8634_v54 = vpop.permute.xlu2 %3493  ;;  %3715 = vperm.xlu2 %5512, %v8161_v46   ;;  %v8638_v19 = vpop.permute.xlu0 %4207 }
 0x558   : > { %5511 = vset.pattern.permute.xlu1 %v10702_v35  ;;  %v8631_v1 = vpop.permute.xlu1 %3413  ;;  %10773 = vst [vmem:[#allocation33_spill] sm:$0xff] %v8634_v54 }
 0x559   : > { %10772 = vst [vmem:[#allocation192_spill] sm:$0xff] %v8631_v1  ;;  %3711 = vperm.xlu1 %5511, %v8216_v18  }
 0x55a   : > { %10774 = vst [vmem:[#allocation171_spill] sm:$0xff] %v8638_v19  ;;  %v8679_v19 = vld [vmem:[#allocation2 + $0x1b0] sm:$0xff] }
 0x55d   : > { %4897 = vperm.xlu0 %5494, %v4725_v24  }
 0x55f   : > { %v8642_v26 = vpop.permute.xlu2 %3501  ;;  %3727 = vperm.xlu2 %5512, %v8587_v27   ;;  %v8646_v1 = vpop.permute.xlu0 %4219 }
 0x560   : > { %v8640_v41 = vpop.permute.xlu1 %3428  ;;  %10775 = vst [vmem:[#allocation172_spill] sm:$0xff] %v8642_v26 }
 0x561   : > { %3723 = vperm.xlu1 %5511, %v8194_v28   ;;  %10776 = vst [vmem:[#allocation37_spill] sm:$0xff] %v8646_v1  ;;  %v8670_v1 = vld [vmem:[#allocation2 + $0x180] sm:$0xff] }
 0x565   : > { %5533 = vset.pattern.permute.xlu0 %v10706_v61 }
 0x566   : > { %2926 = vperm.xlu0 %5533, %v8290_v40  }
 0x567   : > { %v8652_v46 = vpop.permute.xlu2 %3513  ;;  %3735 = vperm.xlu2 %5512, %v8495_v17   ;;  %v8656_v18 = vpop.permute.xlu0 %4397 }
 0x568   : > { %v8649_v54 = vpop.permute.xlu1 %3443  ;;  %10778 = vst [vmem:[#allocation173_spill] sm:$0xff] %v8652_v46  ;;  %v3814_v46 = vld [vmem:[#allocation2 + $0xb4] sm:$0xff] }
 0x569   : > { %10777 = vst [vmem:[#allocation27_spill] sm:$0xff] %v8649_v54  ;;  %3731 = vperm.xlu1 %5511, %v8589_v62  }
 0x56a   : > { %10779 = vst [vmem:[#allocation174_spill] sm:$0xff] %v8656_v18 }
 0x56e   : > { %2951 = vperm.xlu0 %5533, %v8298_v63  }
 0x56f   : > { %v8659_v28 = vpop.permute.xlu2 %3525  ;;  %3747 = vperm.xlu2 %5512, %v8262_v49   ;;  %v8665_v26 = vpop.permute.xlu0 %4417 }
 0x570   : > { %10780 = vst [vmem:[#allocation25_spill] sm:$0xff] %v8659_v28 }
 0x571   : > { %3743 = vperm.xlu1 %5511, %v8309_v50   ;;  %v8662_v24 = vpop.permute.xlu1 %3489  ;;  %10782 = vst [vmem:[#allocation69_spill] sm:$0xff] %v8665_v26 }
 0x572   : > { %10781 = vst [vmem:[#allocation63_spill] sm:$0xff] %v8662_v24 }
 0x576   : > { %2966 = vperm.xlu0 %5533, %v8302_v31  }
 0x577   : > { %v8668_v40 = vpop.permute.xlu2 %3537  ;;  %3759 = vperm.xlu2 %5512, %v8670_v1   ;;  %v8676_v63 = vpop.permute.xlu0 %4429 }
 0x578   : > { %10783 = vst [vmem:[#allocation195_spill] sm:$0xff] %v8668_v40 }
 0x579   : > { %3755 = vperm.xlu1 %5511, %v8318_v12   ;;  %v8673_v18 = vpop.permute.xlu1 %3497  ;;  %10785 = vst [vmem:[#allocation207_spill] sm:$0xff] %v8676_v63 }
 0x57a   : > { %10784 = vst [vmem:[#allocation32_spill] sm:$0xff] %v8673_v18 }
 0x57e   : > { %2981 = vperm.xlu0 %5533, %v8309_v50  }
 0x57f   : > { %3771 = vperm.xlu2 %5512, %v8679_v19   ;;  %v8685_v31 = vpop.permute.xlu0 %4441 }
 0x580   : > { %10787 = vst [vmem:[#allocation66_spill] sm:$0xff] %v8685_v31  ;;  %v8687_v26 = vpop.permute.xlu2 %3599 }
 0x581   : > { %v8681_v24 = vpop.permute.xlu1 %3509  ;;  %3767 = vperm.xlu1 %5511, %v8524_v30  }
 0x582   : > { %10786 = vst [vmem:[#allocation80_spill] sm:$0xff] %v8681_v24 }
 0x586   : > { %2996 = vperm.xlu0 %5533, %v8318_v12   ;;  %v8705_v12 = vld [vmem:[#allocation2 + $0x84] sm:$0xff] }
 0x587   : > { %5514 = vset.pattern.permute.xlu2 %v10706_v61  ;;  %v8694_v50 = vpop.permute.xlu0 %4619 }
 0x588   : > { %10788 = vst [vmem:[#allocation35_spill] sm:$0xff] %v8694_v50  ;;  %v8696_v63 = vpop.permute.xlu2 %3614  ;;  %3835 = vperm.xlu2 %5514, %v8287_v4  }
 0x589   : > { %v8690_v18 = vpop.permute.xlu1 %3521  ;;  %5513 = vset.pattern.permute.xlu1 %v10706_v61  ;;  %10789 = vst [vmem:[#allocation36_spill] sm:$0xff] %v8696_v63 }
 0x58a   : > { %3830 = vperm.xlu1 %5513, %v8386_v23  }
 0x58e   : > { %3147 = vperm.xlu0 %5533, %v8368_v25  }
 0x58f   : > { %v8703_v40 = vpop.permute.xlu0 %4639 }
 0x590   : > { %10790 = vst [vmem:[#allocation175_spill] sm:$0xff] %v8703_v40  ;;  %v8707_v28 = vpop.permute.xlu2 %3624  ;;  %3845 = vperm.xlu2 %5514, %v8705_v12  }
 0x591   : > { %v8701_v31 = vpop.permute.xlu1 %3533 }
 0x592   : > { %3840 = vperm.xlu1 %5513, %v8342_v3  }
 0x596   : > { %3172 = vperm.xlu0 %5533, %v8386_v23  }
 0x597   : > { %v8714_v63 = vpop.permute.xlu0 %4651 }
 0x598   : > { %10791 = vst [vmem:[#allocation176_spill] sm:$0xff] %v8714_v63  ;;  %v8716_v25 = vpop.permute.xlu2 %3639  ;;  %3860 = vperm.xlu2 %5514, %v3814_v46  }
 0x599   : > { %v8712_v50 = vpop.permute.xlu1 %3545 }
 0x59a   : > { %3855 = vperm.xlu1 %5513, %v8397_v37  }
 0x59e   : > { %3187 = vperm.xlu0 %5533, %v8402_v15  }
 0x59f   : > { %v8720_v40 = vpop.permute.xlu0 %4663 }
 0x5a0   : > { %10792 = vst [vmem:[#allocation38_spill] sm:$0xff] %v8720_v40  ;;  %v8724_v54 = vpop.permute.xlu2 %3654  ;;  %3875 = vperm.xlu2 %5514, %v8425_v13  }
 0x5a2   : > { %v8722_v24 = vpop.permute.xlu1 %3609  ;;  %3870 = vperm.xlu1 %5513, %v8358_v21  }
 0x5a3   : > { %10793 = vst [vmem:[#allocation58_spill] sm:$0xff] %v8722_v24  ;;  %v8812_v24 = vld [vmem:[#allocation2 + $0xa8] sm:$0xff] }
 0x5a4   : > { %10817 = vst [vmem:[#allocation185_spill] sm:$0xff] %v8812_v24 }
 0x5a6   : > { %3202 = vperm.xlu0 %5533, %v8413_v42  }
 0x5a7   : > { %v8729_v23 = vpop.permute.xlu0 %4675 }
 0x5a8   : > { %10794 = vst [vmem:[#allocation177_spill] sm:$0xff] %v8729_v23  ;;  %3890 = vperm.xlu2 %5514, %v8565_v44   ;;  %v8735_v37 = vpop.permute.xlu2 %3669 }
 0x5a9   : > { %10796 = vst [vmem:[#allocation86_spill] sm:$0xff] %v8735_v37 }
 0x5aa   : > { %v8731_v63 = vpop.permute.xlu1 %3619  ;;  %3885 = vperm.xlu1 %5513, %v8420_v22  }
 0x5ab   : > { %10795 = vst [vmem:[#allocation179_spill] sm:$0xff] %v8731_v63  ;;  %v3818_v63 = vld [vmem:[#allocation2 + $0x174] sm:$0xff] }
 0x5ae   : > { %3217 = vperm.xlu0 %5533, %v8425_v13  }
 0x5af   : > { %v8738_v15 = vpop.permute.xlu0 %4841 }
 0x5b0   : > { %10797 = vst [vmem:[#allocation198_spill] sm:$0xff] %v8738_v15  ;;  %5515 = vset.pattern.permute.xlu2 %v10702_v35 }
 0x5b1   : > { %3937 = vperm.xlu2 %5515, %v8334_v32   ;;  %v8745_v21 = vpop.permute.xlu2 %3715 }
 0x5b2   : > { %v8740_v40 = vpop.permute.xlu1 %3634  ;;  %3900 = vperm.xlu1 %5513, %v8433_v34   ;;  %10799 = vst [vmem:[#allocation89_spill] sm:$0xff] %v8745_v21 }
 0x5b3   : > { %10798 = vst [vmem:[#allocation201_spill] sm:$0xff] %v8740_v40 }
 0x5b6   : > { %3383 = vperm.xlu0 %5533, %v8505_v11  }
 0x5b7   : > { %v8748_v42 = vpop.permute.xlu0 %4861 }
 0x5b8   : > { %10800 = vst [vmem:[#allocation40_spill] sm:$0xff] %v8748_v42 }
 0x5b9   : > { %3949 = vperm.xlu2 %5515, %v8342_v3   ;;  %v8755_v23 = vpop.permute.xlu2 %3727 }
 0x5ba   : > { %v8750_v22 = vpop.permute.xlu1 %3649  ;;  %5516 = vset.pattern.permute.xlu1 %v10702_v35  ;;  %10802 = vst [vmem:[#allocation52_spill] sm:$0xff] %v8755_v23 }
 0x5bb   : > { %10801 = vst [vmem:[#allocation55_spill] sm:$0xff] %v8750_v22  ;;  %3945 = vperm.xlu1 %5516, %v8287_v4   ;;  %v3815_v4 = vld [vmem:[#allocation2 + $0x144] sm:$0xff] }
 0x5be   : > { %3408 = vperm.xlu0 %5533, %v8531_v48  }
 0x5bf   : > { %v8758_v34 = vpop.permute.xlu0 %4873 }
 0x5c0   : > { %10803 = vst [vmem:[#allocation45_spill] sm:$0xff] %v8758_v34 }
 0x5c1   : > { %3957 = vperm.xlu2 %5515, %v8547_v52   ;;  %v8764_v11 = vpop.permute.xlu2 %3735 }
 0x5c2   : > { %v8760_v15 = vpop.permute.xlu1 %3664  ;;  %10805 = vst [vmem:[#allocation204_spill] sm:$0xff] %v8764_v11 }
 0x5c3   : > { %10804 = vst [vmem:[#allocation75_spill] sm:$0xff] %v8760_v15  ;;  %3953 = vperm.xlu1 %5516, %v8705_v12  }
 0x5c6   : > { %3423 = vperm.xlu0 %5533, %v8542_v16  }
 0x5c7   : > { %v8767_v42 = vpop.permute.xlu0 %4885 }
 0x5c8   : > { %10806 = vst [vmem:[#allocation47_spill] sm:$0xff] %v8767_v42  ;;  %v5588_v42 = vld [vmem:[#allocation2 + $0x50] sm:$0xff] }
 0x5c9   : > { %3969 = vperm.xlu2 %5515, %v3815_v4   ;;  %v8771_v23 = vpop.permute.xlu2 %3747 }
 0x5ca   : > { %10807 = vst [vmem:[#allocation53_spill] sm:$0xff] %v8771_v23 }
 0x5cb   : > { %v8769_v3 = vpop.permute.xlu1 %3711  ;;  %3965 = vperm.xlu1 %5516, %v3814_v46   ;;  %v3821_v46 = vld [vmem:[#allocation2 + $0x1a4] sm:$0xff] }
 0x5ce   : > { %3438 = vperm.xlu0 %5533, %v8554_v33  }
 0x5cf   : > { %v8774_v34 = vpop.permute.xlu0 %4897 }
 0x5d0   : > { %10808 = vst [vmem:[#allocation67_spill] sm:$0xff] %v8774_v34 }
 0x5d1   : > { %3981 = vperm.xlu2 %5515, %v3818_v63   ;;  %v8779_v16 = vpop.permute.xlu2 %3759 }
 0x5d2   : > { %10810 = vst [vmem:[#allocation49_spill] sm:$0xff] %v8779_v16 }
 0x5d3   : > { %v8776_v21 = vpop.permute.xlu1 %3723  ;;  %3977 = vperm.xlu1 %5516, %v8425_v13  }
 0x5d4   : > { %10809 = vst [vmem:[#allocation180_spill] sm:$0xff] %v8776_v21 }
 0x5d6   : > { %3604 = vperm.xlu0 %5533, %v5588_v42   ;;  %v4034_v42 = vld [vmem:[#allocation2 + $0x58] sm:$0xff] }
 0x5d8   : > { %v8781_v15 = vpop.permute.xlu0 %2926 }
 0x5d9   : > { %10811 = vst [vmem:[#allocation116_spill] sm:$0xff] %v8781_v15  ;;  %3993 = vperm.xlu2 %5515, %v3821_v46   ;;  %v8786_v40 = vpop.permute.xlu2 %3771 }
 0x5da   : > { %10812 = vst [vmem:[#allocation90_spill] sm:$0xff] %v8786_v40 }
 0x5db   : > { %v8783_v22 = vpop.permute.xlu1 %3731  ;;  %3989 = vperm.xlu1 %5516, %v8565_v44  }
 0x5de   : > { %3629 = vperm.xlu0 %5533, %v8495_v17  }
 0x5e0   : > { %v8789_v34 = vpop.permute.xlu0 %2951 }
 0x5e1   : > { %5518 = vset.pattern.permute.xlu2 %v10706_v61 }
 0x5e2   : > { %4056 = vperm.xlu2 %5518, %v4034_v42   ;;  %v8796_v21 = vpop.permute.xlu2 %3835 }
 0x5e3   : > { %v8791_v13 = vpop.permute.xlu1 %3743  ;;  %5517 = vset.pattern.permute.xlu1 %v10706_v61  ;;  %10813 = vst [vmem:[#allocation182_spill] sm:$0xff] %v8796_v21 }
 0x5e4   : > { %4051 = vperm.xlu1 %5517, %v8444_v57  }
 0x5e6   : > { %3644 = vperm.xlu0 %5533, %v8262_v49  }
 0x5e8   : > { %v8799_v44 = vpop.permute.xlu0 %2966 }
 0x5ea   : > { %4071 = vperm.xlu2 %5518, %v8597_v60   ;;  %v8805_v16 = vpop.permute.xlu2 %3845 }
 0x5eb   : > { %v8801_v40 = vpop.permute.xlu1 %3755  ;;  %10815 = vst [vmem:[#allocation56_spill] sm:$0xff] %v8805_v16 }
 0x5ec   : > { %10814 = vst [vmem:[#allocation76_spill] sm:$0xff] %v8801_v40  ;;  %4066 = vperm.xlu1 %5517, %v8531_v48  }
 0x5ee   : > { %3659 = vperm.xlu0 %5533, %v8670_v1  }
 0x5f0   : > { %v8808_v23 = vpop.permute.xlu0 %2981 }
 0x5f2   : > { %4081 = vperm.xlu2 %5518, %v8812_v24   ;;  %v8816_v49 = vpop.permute.xlu2 %3860 }
 0x5f3   : > { %v8810_v57 = vpop.permute.xlu1 %3767  ;;  %10818 = vst [vmem:[#allocation68_spill] sm:$0xff] %v8816_v49 }
 0x5f4   : > { %10816 = vst [vmem:[#allocation183_spill] sm:$0xff] %v8810_v57  ;;  %4076 = vperm.xlu1 %5517, %v8455_v43  }
 0x5f6   : > { %3674 = vperm.xlu0 %5533, %v8679_v19  }
 0x5f8   : > { %v8819_v21 = vpop.permute.xlu0 %2996 }
 0x5fa   : > { %4096 = vperm.xlu2 %5518, %v8554_v33   ;;  %v8825_v37 = vpop.permute.xlu2 %3875 }
 0x5fb   : > { %10820 = vst [vmem:[#allocation71_spill] sm:$0xff] %v8825_v37 }
 0x5fc   : > { %4091 = vperm.xlu1 %5517, %v8467_v8   ;;  %v8822_v16 = vpop.permute.xlu1 %3830 }
 0x5fd   : > { %10819 = vst [vmem:[#allocation81_spill] sm:$0xff] %v8822_v16 }
 0x5fe   : > { %3825 = vperm.xlu0 %5533, %v8334_v32  }
 0x600   : > { %v8828_v57 = vpop.permute.xlu0 %3147 }
 0x602   : > { %4111 = vperm.xlu2 %5518, %v8616_v58   ;;  %v8834_v49 = vpop.permute.xlu2 %3890 }
 0x603   : > { %10822 = vst [vmem:[#allocation210_spill] sm:$0xff] %v8834_v49 }
 0x604   : > { %4106 = vperm.xlu1 %5517, %v8475_v14   ;;  %v8831_v43 = vpop.permute.xlu1 %3840 }
 0x605   : > { %10821 = vst [vmem:[#allocation186_spill] sm:$0xff] %v8831_v43 }
 0x606   : > { %3850 = vperm.xlu0 %5533, %v8547_v52  }
 0x608   : > { %v8837_v8 = vpop.permute.xlu0 %3172 }
 0x60a   : > { %4126 = vperm.xlu2 %5518, %v8627_v39  }
 0x60b   : > { %v8843_v32 = vpop.permute.xlu2 %3937 }
 0x60c   : > { %4121 = vperm.xlu1 %5517, %v8486_v59   ;;  %v8840_v16 = vpop.permute.xlu1 %3855  ;;  %10824 = vst [vmem:[#allocation188_spill] sm:$0xff] %v8843_v32  ;;  %v2891_v32 = vld [vmem:[%s10029_s9 + $0x4] sm:$0x3] }
 0x60d   : > { %10823 = vst [vmem:[#allocation57_spill] sm:$0xff] %v8840_v16 }
 0x60e   : > { %3865 = vperm.xlu0 %5533, %v3815_v4  }
 0x610   : > { %v8845_v14 = vpop.permute.xlu0 %3187 }
 0x612   : > { %5520 = vset.pattern.permute.xlu2 %v10702_v35 }
 0x613   : > { %4171 = vperm.xlu2 %5520, %v8460_v9   ;;  %v8852_v52 = vpop.permute.xlu2 %3949 }
 0x614   : > { %5519 = vset.pattern.permute.xlu1 %v10702_v35  ;;  %v8848_v43 = vpop.permute.xlu1 %3870  ;;  %10826 = vst [vmem:[#allocation79_spill] sm:$0xff] %v8852_v52 }
 0x615   : > { %10825 = vst [vmem:[#allocation193_spill] sm:$0xff] %v8848_v43  ;;  %4167 = vperm.xlu1 %5519, %v4034_v42   ;;  %v4040_v42 = vld [vmem:[#allocation2 + $0xb8] sm:$0xff] }
 0x616   : > { %3880 = vperm.xlu0 %5533, %v3818_v63  }
 0x618   : > { %v8854_v59 = vpop.permute.xlu0 %3202 }
 0x61b   : > { %4179 = vperm.xlu2 %5520, %v8597_v60   ;;  %v8860_v4 = vpop.permute.xlu2 %3957 }
 0x61c   : > { %v8856_v49 = vpop.permute.xlu1 %3885  ;;  %10828 = vst [vmem:[#allocation213_spill] sm:$0xff] %v8860_v4  ;;  %v4046_v4 = vld [vmem:[#allocation2 + $0x198] sm:$0xff] }
 0x61d   : > { %10827 = vst [vmem:[#allocation190_spill] sm:$0xff] %v8856_v49  ;;  %4175 = vperm.xlu1 %5519, %v8531_v48   ;;  %v4043_v48 = vld [vmem:[#allocation2 + $0x168] sm:$0xff] }
 0x61e   : > { %3895 = vperm.xlu0 %5533, %v3821_v46  }
 0x620   : > { %v8862_v37 = vpop.permute.xlu0 %3217 }
 0x623   : > { %4191 = vperm.xlu2 %5520, %v4040_v42   ;;  %v8867_v63 = vpop.permute.xlu2 %3969 }
 0x624   : > { %v8864_v43 = vpop.permute.xlu1 %3900  ;;  %10830 = vst [vmem:[#allocation93_spill] sm:$0xff] %v8867_v63 }
 0x625   : > { %10829 = vst [vmem:[#allocation191_spill] sm:$0xff] %v8864_v43  ;;  %4187 = vperm.xlu1 %5519, %v8812_v24  }
 0x626   : > { %4061 = vperm.xlu0 %5533, %v8460_v9  }
 0x628   : > { %v8870_v52 = vpop.permute.xlu0 %3383 }
 0x62b   : > { %4203 = vperm.xlu2 %5520, %v4043_v48   ;;  %v8875_v46 = vpop.permute.xlu2 %3981 }
 0x62c   : > { %10832 = vst [vmem:[#allocation197_spill] sm:$0xff] %v8875_v46 }
 0x62d   : > { %4199 = vperm.xlu1 %5519, %v8554_v33   ;;  %v8873_v60 = vpop.permute.xlu1 %3945 }
 0x62e   : > { %10831 = vst [vmem:[#allocation59_spill] sm:$0xff] %v8873_v60  ;;  %4086 = vperm.xlu0 %5533, %v4040_v42   ;;  %v2889_v42 = vld [vmem:[%s10029_s9] sm:$0x3] }
 0x630   : > { %v8877_v43 = vpop.permute.xlu0 %3408 }
 0x631   : > { %10833 = vst [vmem:[#allocation194_spill] sm:$0xff] %v8877_v43 }
 0x633   : > { %4215 = vperm.xlu2 %5520, %v4046_v4   ;;  %v8882_v9 = vpop.permute.xlu2 %3993 }
 0x634   : > { %10835 = vst [vmem:[#allocation216_spill] sm:$0xff] %v8882_v9  ;;  %v8905_v9 = vld [vmem:[%s10030_s10] ss:$0 sm:$0xff] }
 0x635   : > { %4211 = vperm.xlu1 %5519, %v8616_v58   ;;  %v8880_v49 = vpop.permute.xlu1 %3953 }
 0x636   : > { %10834 = vst [vmem:[#allocation196_spill] sm:$0xff] %v8880_v49  ;;  %4101 = vperm.xlu0 %5533, %v4043_v48   ;;  %v8896_v49 = vperm.slane %v2889_v42, 0 }
 0x638   : > { %v8884_v63 = vpop.permute.xlu0 %3423 }
 0x639   : > { %10836 = vst [vmem:[#allocation82_spill] sm:$0xff] %v8884_v63  ;;  %v8939_v63 = vld [vmem:[#allocation2 + $0xe0] sm:$0xff] }
 0x63b   : > { %5521 = vset.pattern.permute.xlu2 %v10706_v61 }
 0x63c   : > { %4277 = vperm.xlu2 %5521, %v8587_v27   ;;  %v8894_v58 = vpop.permute.xlu2 %4056 }
 0x63d   : > { %4223 = vperm.xlu1 %5519, %v8627_v39   ;;  %v8887_v33 = vpop.permute.xlu1 %3965  ;;  %10838 = vst [vmem:[#allocation65_spill] sm:$0xff] %v8894_v58  ;;  %v3009_v39 = vmul.f32 %v8896_v49, %v8799_v44  ;;  %v8916_v58 = vperm.slane %v2889_v42, 1  ;;  %v3012_v42 = vmul.f32 %v8896_v49, %v8808_v23 }
 0x63e   : > { %10837 = vst [vmem:[#allocation60_spill] sm:$0xff] %v8887_v33  ;;  %4116 = vperm.xlu0 %5533, %v4046_v4   ;;  %v8910_v33 = vld [vmem:[#allocation2 + $0xb0] sm:$0xff] }
 0x63f   : > { %v3025_v44 = vadd.f32 %v8905_v9, %v3009_v39  ;;  %v8933_v39 = vld [vmem:[#allocation2 + $0xd0] sm:$0xff] }
 0x640   : > { %v8898_v48 = vpop.permute.xlu0 %3438 }
 0x641   : > { %10839 = vst [vmem:[#allocation34_spill] sm:$0xff] %v8898_v48  ;;  %v3106_v48 = vmul.f32 %v8916_v58, %v8404_v7 }
 0x643   : > { %v3122_v60 = vadd.f32 %v3106_v48, %v3025_v44  ;;  %v3028_v44 = vadd.f32 %v8905_v9, %v3012_v42 }
 0x644   : > { %4292 = vperm.xlu2 %5521, %v8910_v33   ;;  %v8914_v4 = vpop.permute.xlu2 %4071 }
 0x645   : > { %5522 = vset.pattern.permute.xlu1 %v10706_v61  ;;  %v8908_v46 = vpop.permute.xlu1 %3977  ;;  %10841 = vst [vmem:[#allocation208_spill] sm:$0xff] %v8914_v4  ;;  %v8931_v4 = vld [vmem:[#allocation2 + $0xc0] sm:$0xff] }
 0x646   : > { %10840 = vst [vmem:[#allocation199_spill] sm:$0xff] %v8908_v46  ;;  %4287 = vperm.xlu1 %5522, %v8495_v17   ;;  %4282 = vperm.xlu0 %5533, %v8589_v62   ;;  %v2890_v46 = vld [vmem:[%s10029_s9 + $0x2] sm:$0x3] }
 0x647   : > { %v8927_v17 = vperm.slane %v2890_v46, 0  ;;  %v8945_v48 = vperm.slane %v2890_v46, 1 }
 0x648   : > { %v8925_v61 = vpop.permute.xlu0 %3604 }
 0x649   : > { %10842 = vst [vmem:[#allocation88_spill] sm:$0xff] %v8925_v61  ;;  %v3235_v24 = vmul.f32 %v8927_v17, %v8510_v29  ;;  %v3332_v29 = vmul.f32 %v8945_v48, %v8411_v47  ;;  %v3238_v42 = vmul.f32 %v8927_v17, %v8519_v0  ;;  %v8977_v0 = vld [vmem:[#allocation2 + $0x190] sm:$0xff] }
 0x64b   : > { %v3251_v23 = vadd.f32 %v3235_v24, %v3122_v60  ;;  %v3015_v24 = vmul.f32 %v8896_v49, %v8819_v21 }
 0x64c   : > { %4302 = vperm.xlu2 %5521, %v8933_v39   ;;  %v8943_v61 = vpop.permute.xlu2 %4081 }
 0x64d   : > { %v8937_v7 = vpop.permute.xlu1 %3989  ;;  %10844 = vst [vmem:[#allocation202_spill] sm:$0xff] %v8943_v61  ;;  %v8958_v61 = vperm.slane %v2891_v32, 0  ;;  %v3348_v60 = vadd.f32 %v3332_v29, %v3251_v23  ;;  %v3031_v23 = vadd.f32 %v8905_v9, %v3015_v24 }
 0x64e   : > { %10843 = vst [vmem:[#allocation200_spill] sm:$0xff] %v8937_v7  ;;  %4297 = vperm.xlu1 %5522, %v8931_v4   ;;  %4307 = vperm.xlu0 %5533, %v8939_v63   ;;  %v3109_v7 = vmul.f32 %v8916_v58, %v8415_v53  ;;  %v3000_v53 = vmul.f32 %v8896_v49, %v8312_v38  ;;  %v8984_v38 = vld [vmem:[%s10029_s9 + $0x6] sm:$0x3] }
 0x64f   : > { %v3461_v47 = vmul.f32 %v8958_v61, %v8600_v55  ;;  %v3097_v55 = vmul.f32 %v8916_v58, %v8407_v20  ;;  %v3464_v40 = vmul.f32 %v8958_v61, %v8608_v56  ;;  %v3323_v56 = vmul.f32 %v8945_v48, %v8500_v6 }
 0x650   : > { %v8956_v16 = vpop.permute.xlu0 %3629  ;;  %v3125_v46 = vadd.f32 %v3109_v7, %v3028_v44  ;;  %v8974_v44 = vperm.slane %v2891_v32, 1  ;;  %v3112_v32 = vmul.f32 %v8916_v58, %v8428_v5  ;;  %v3016_v20 = vadd.f32 %v8905_v9, %v3000_v53 }
 0x651   : > { %v3477_v29 = vadd.f32 %v3461_v47, %v3348_v60  ;;  %v3226_v60 = vmul.f32 %v8927_v17, %v8828_v57  ;;  %v3241_v5 = vmul.f32 %v8927_v17, %v8533_v36  ;;  %v3005_v57 = vmul.f32 %v8896_v49, %v8332_v51  ;;  %v10849_v51 = vld [vmem:[#allocation144_spill] sm:$0xff] }
 0x652   : > { %v3254_v21 = vadd.f32 %v3238_v42, %v3125_v46  ;;  %v8992_v46 = vperm.slane %v8984_v38, 0  ;;  %v3558_v24 = vmul.f32 %v8974_v44, %v8690_v18  ;;  %v3128_v47 = vadd.f32 %v3112_v32, %v3031_v23  ;;  %v9006_v18 = vld [vmem:[#allocation2 + $0x1c0] sm:$0xff] }
 0x653   : > { %v3113_v11 = vadd.f32 %v3097_v55, %v3016_v20  ;;  %v3021_v55 = vadd.f32 %v8905_v9, %v3005_v57  ;;  %v9029_v20 = vld [vmem:[#allocation2 + $0x1e0] sm:$0xff]  ;;  %v9037_v57 = vld [vmem:[#allocation2 + $0x1f0] sm:$0xff] }
 0x654   : > { %4317 = vperm.xlu2 %5521, %v8670_v1   ;;  %v8972_v7 = vpop.permute.xlu2 %4096  ;;  %v3257_v36 = vadd.f32 %v3241_v5, %v3128_v47 }
 0x655   : > { %10846 = vst [vmem:[#allocation203_spill] sm:$0xff] %v8972_v7  ;;  %v3574_v7 = vadd.f32 %v3558_v24, %v3477_v29  ;;  %v3242_v53 = vadd.f32 %v3226_v60, %v3113_v11  ;;  %v3338_v11 = vmul.f32 %v8945_v48, %v10849_v51  ;;  %v10853_v51 = vld [vmem:[#allocation147_spill] sm:$0xff] }
 0x656   : > { %4312 = vperm.xlu1 %5522, %v8507_v10   ;;  %v8969_v43 = vpop.permute.xlu1 %4051  ;;  %4322 = vperm.xlu0 %5533, %v8977_v0   ;;  %v3335_v10 = vmul.f32 %v8945_v48, %v8423_v2 }
 0x657   : > { %10845 = vst [vmem:[#allocation115_spill] sm:$0xff] %v8969_v43  ;;  %v3354_v60 = vadd.f32 %v3338_v11, %v3257_v36  ;;  %v3549_v11 = vmul.f32 %v8974_v44, %v10853_v51  ;;  %v3678_v51 = vmul.f32 %v8992_v46, %v8687_v26 }
 0x658   : > { %v3645_v42 = vpop.permute.xlu0 %3644  ;;  %v3351_v2 = vadd.f32 %v3335_v10, %v3254_v21  ;;  %v3339_v10 = vadd.f32 %v3323_v56, %v3242_v53  ;;  %v10851_v53 = vld [vmem:[#allocation126_spill] sm:$0xff]  ;;  %v10852_v56 = vld [vmem:[#allocation168_spill] sm:$0xff] }
 0x659   : > { %v3687_v43 = vmul.f32 %v8992_v46, %v3645_v42  ;;  %v3452_v42 = vmul.f32 %v8958_v61, %v8603_v45 }
 0x65a   : > { %v3480_v29 = vadd.f32 %v3464_v40, %v3351_v2  ;;  %v3231_v40 = vmul.f32 %v8927_v17, %v8837_v8  ;;  %v10850_v2 = vld [vmem:[#allocation43_spill] sm:$0xff]  ;;  %v3008_v8 = vmul.f32 %v8896_v49, %v10851_v53  ;;  %v10856_v53 = vld [vmem:[#allocation128_spill] sm:$0xff] }
 0x65b   : > { %v9004_v15 = vadd.f32 %v3687_v43, %v3574_v7  ;;  %v10848_v43 = vld [vmem:[#allocation143_spill] sm:$0xff] }
 0x65c   : > { %4332 = vperm.xlu2 %5521, %v8679_v19   ;;  %v9014_v21 = vpop.permute.xlu2 %4111  ;;  %v3102_v7 = vmul.f32 %v8916_v58, %v10848_v43 }
 0x65e   : > { %4327 = vperm.xlu1 %5522, %v8524_v30   ;;  %v9011_v23 = vpop.permute.xlu1 %4066  ;;  %4337 = vperm.xlu0 %5533, %v9006_v18   ;;  %v3561_v30 = vmul.f32 %v8974_v44, %v8701_v31  ;;  %v3118_v47 = vadd.f32 %v3102_v7, %v3021_v55  ;;  %v3467_v31 = vmul.f32 %v8958_v61, %v10850_v2 }
 0x65f   : > { %10847 = vst [vmem:[#allocation110_spill] sm:$0xff] %v9011_v23 }
 0x660   : > { %v3660_v32 = vpop.permute.xlu0 %3659  ;;  %v3577_v24 = vadd.f32 %v3561_v30, %v3480_v29  ;;  %v3468_v29 = vadd.f32 %v3452_v42, %v3339_v10  ;;  %v3247_v45 = vadd.f32 %v3231_v40, %v3118_v47  ;;  %v3483_v7 = vadd.f32 %v3467_v31, %v3354_v60  ;;  %v10854_v30 = vld [vmem:[#allocation145_spill] sm:$0xff] }
 0x661   : > { %v3690_v6 = vmul.f32 %v8992_v46, %v3660_v32  ;;  %v3105_v55 = vmul.f32 %v8916_v58, %v10854_v30  ;;  %v10855_v32 = vld [vmem:[#allocation18_spill] sm:$0xff]  ;;  %v3234_v60 = vmul.f32 %v8927_v17, %v8845_v14  ;;  %v9071_v14 = vperm.slane %v8984_v38, 1 }
 0x662   : > { %v3328_v10 = vmul.f32 %v8945_v48, %v10855_v32  ;;  %v3565_v2 = vadd.f32 %v3549_v11, %v3468_v29  ;;  %v10857_v32 = vld [vmem:[#allocation31_spill] sm:$0xff] }
 0x663   : > { %v9035_v5 = vadd.f32 %v3690_v6, %v3577_v24  ;;  %v3564_v24 = vmul.f32 %v8974_v44, %v8712_v50  ;;  %v3024_v6 = vadd.f32 %v8905_v9, %v3008_v8  ;;  %v3457_v50 = vmul.f32 %v8958_v61, %v10857_v32  ;;  %v10858_v29 = vld [vmem:[#allocation127_spill] sm:$0xff] }
 0x664   : > { %4347 = vperm.xlu2 %5521, %v9029_v20   ;;  %v9045_v36 = vpop.permute.xlu2 %4126  ;;  %v3344_v40 = vadd.f32 %v3328_v10, %v3247_v45  ;;  %v3011_v45 = vmul.f32 %v8896_v49, %v10858_v29  ;;  %v3694_v26 = vadd.f32 %v3678_v51, %v3565_v2  ;;  %v3237_v32 = vmul.f32 %v8927_v17, %v8854_v59 }
 0x665   : > { %v3580_v47 = vadd.f32 %v3564_v24, %v3483_v7  ;;  %v3121_v30 = vadd.f32 %v3105_v55, %v3024_v6  ;;  %v3006_v7 = vmul.f32 %v8896_v49, %v8789_v34  ;;  %v9087_v34 = vld [vmem:[%s10029_s9 + $0x8] sm:$0x3]  ;;  %v3775_v6 = vmul.f32 %v9071_v14, %v8769_v3 }
 0x666   : > { %4342 = vperm.xlu1 %5522, %v10852_v56   ;;  %v9042_v43 = vpop.permute.xlu1 %4076  ;;  %4352 = vperm.xlu0 %5533, %v9037_v57   ;;  %v3002_v56 = vmul.f32 %v8896_v49, %v10856_v53  ;;  %v3473_v55 = vadd.f32 %v3457_v50, %v3344_v40  ;;  %v10862_v40 = vld [vmem:[#allocation23_spill] sm:$0xff] }
 0x667   : > { %v3250_v10 = vadd.f32 %v3234_v60, %v3121_v30  ;;  %v3331_v60 = vmul.f32 %v8945_v48, %v10862_v40  ;;  %v3022_v3 = vadd.f32 %v8905_v9, %v3006_v7  ;;  %v10865_v40 = vld [vmem:[#allocation141_spill] sm:$0xff]  ;;  %v3683_v7 = vmul.f32 %v8992_v46, %v8707_v28 }
 0x668   : > { %v3675_v42 = vpop.permute.xlu0 %3674  ;;  %v3018_v38 = vadd.f32 %v8905_v9, %v3002_v56  ;;  %v3027_v56 = vadd.f32 %v8905_v9, %v3011_v45  ;;  %v3103_v23 = vmul.f32 %v8916_v58, %v10865_v40 }
 0x669   : > { %v3693_v31 = vmul.f32 %v8992_v46, %v3675_v42  ;;  %v10860_v42 = vld [vmem:[#allocation148_spill] sm:$0xff]  ;;  %v3347_v30 = vadd.f32 %v3331_v60, %v3250_v10  ;;  %v9118_v10 = vld [vmem:[#allocation2 + $0xd4] sm:$0xff] }
 0x66a   : > { %v3108_v2 = vmul.f32 %v8916_v58, %v10860_v42  ;;  %v10864_v42 = vld [vmem:[#allocation129_spill] sm:$0xff]  ;;  %10867 = vst [vmem:[#allocation211_spill] sm:$0xff] %v9118_v10 }
 0x66b   : > { %v9066_v8 = vadd.f32 %v3693_v31, %v3580_v47  ;;  %v9099_v47 = vperm.slane %v9087_v34, 0  ;;  %v10863_v31 = vld [vmem:[#allocation136_spill] sm:$0xff] }
 0x66c   : > { %5524 = vset.pattern.permute.xlu2 %v10702_v35  ;;  %v3099_v53 = vmul.f32 %v8916_v58, %v10863_v31  ;;  %v3124_v31 = vadd.f32 %v3108_v2, %v3027_v56 }
 0x66d   : > { %4393 = vperm.xlu2 %5524, %v8589_v62   ;;  %v9081_v24 = vpop.permute.xlu2 %4171 }
 0x66e   : > { %5523 = vset.pattern.permute.xlu1 %v10702_v35  ;;  %v9076_v11 = vpop.permute.xlu1 %4091  ;;  %10859 = vst [vmem:[#allocation98_spill] sm:$0xff] %v9081_v24  ;;  %4503 = vperm.xlu0 %5533, %v8705_v12   ;;  %v3791_v12 = vadd.f32 %v3775_v6, %v3694_v26  ;;  %v10866_v35 = vld [vmem:[#allocation192_spill] sm:$0xff]  ;;  %v3115_v59 = vadd.f32 %v3099_v53, %v3018_v38  ;;  %v10868_v6 = vld [vmem:[#allocation138_spill] sm:$0xff]  ;;  %v10872_v53 = vld [vmem:[#allocation135_spill] sm:$0xff] }
 0x66f   : > { %4389 = vperm.xlu1 %5523, %v8587_v27   ;;  %v10861_v27 = vld [vmem:[#allocation150_spill] sm:$0xff]  ;;  %v3460_v45 = vmul.f32 %v8958_v61, %v10866_v35  ;;  %v3253_v56 = vadd.f32 %v3237_v32, %v3124_v31  ;;  %v3780_v31 = vmul.f32 %v9071_v14, %v8783_v22 }
 0x670   : > { %v3554_v62 = vmul.f32 %v8974_v44, %v10861_v27  ;;  %v3826_v51 = vpop.permute.xlu0 %3825  ;;  %v3014_v27 = vmul.f32 %v8896_v49, %v10864_v42 }
 0x671   : > { %v3904_v50 = vmul.f32 %v9099_v47, %v3826_v51  ;;  %v3119_v51 = vadd.f32 %v3103_v23, %v3022_v3  ;;  %v3476_v2 = vadd.f32 %v3460_v45, %v3347_v30  ;;  %v10874_v23 = vld [vmem:[#allocation165_spill] sm:$0xff]  ;;  %v10875_v30 = vld [vmem:[#allocation131_spill] sm:$0xff] }
 0x672   : > { %v3570_v29 = vadd.f32 %v3554_v62, %v3473_v55  ;;  %v3104_v55 = vmul.f32 %v8916_v58, %v10868_v6  ;;  %v10869_v62 = vld [vmem:[#allocation132_spill] sm:$0xff]  ;;  %v3030_v38 = vadd.f32 %v8905_v9, %v3014_v27  ;;  %v3232_v3 = vmul.f32 %v8927_v17, %v10874_v23 }
 0x673   : > { %v9116_v26 = vadd.f32 %v3904_v50, %v3791_v12  ;;  %v3007_v60 = vmul.f32 %v8896_v49, %v10869_v62  ;;  %v3010_v12 = vmul.f32 %v8896_v49, %v10872_v53  ;;  %v10873_v50 = vld [vmem:[#allocation152_spill] sm:$0xff]  ;;  %v3240_v53 = vmul.f32 %v8927_v17, %v8862_v37 }
 0x674   : > { %v3699_v28 = vadd.f32 %v3683_v7, %v3570_v29  ;;  %v3111_v40 = vmul.f32 %v8916_v58, %v10873_v50  ;;  %v10877_v29 = vld [vmem:[#allocation41_spill] sm:$0xff]  ;;  %v3248_v62 = vadd.f32 %v3232_v3, %v3119_v51  ;;  %v3463_v37 = vmul.f32 %v8958_v61, %v8640_v41 }
 0x675   : > { %4405 = vperm.xlu2 %5524, %v8931_v4   ;;  %v9128_v35 = vpop.permute.xlu2 %4179  ;;  %v10876_v4 = vld [vmem:[#allocation154_spill] sm:$0xff]  ;;  %v3334_v27 = vmul.f32 %v8945_v48, %v10877_v29  ;;  %v3023_v45 = vadd.f32 %v8905_v9, %v3007_v60  ;;  %v10878_v7 = vld [vmem:[#allocation133_spill] sm:$0xff]  ;;  %v3026_v29 = vadd.f32 %v8905_v9, %v3010_v12 }
 0x676   : > { %v9124_v42 = vpop.permute.xlu1 %4106  ;;  %10871 = vst [vmem:[#allocation87_spill] sm:$0xff] %v9128_v35  ;;  %4528 = vperm.xlu0 %5533, %v9118_v10   ;;  %v3557_v32 = vmul.f32 %v8974_v44, %v10876_v4  ;;  %v9149_v6 = vmul.f32 %v8916_v58, %v10878_v7  ;;  %v10879_v35 = vld [vmem:[#allocation140_spill] sm:$0xff]  ;;  %v10880_v60 = vld [vmem:[#allocation142_spill] sm:$0xff]  ;;  %v3127_v7 = vadd.f32 %v3111_v40, %v3030_v38  ;;  %v10884_v38 = vld [vmem:[#allocation139_spill] sm:$0xff] }
 0x677   : > { %10870 = vst [vmem:[#allocation119_spill] sm:$0xff] %v9124_v42  ;;  %4401 = vperm.xlu1 %5523, %v8910_v33   ;;  %v3107_v33 = vmul.f32 %v8916_v58, %v10875_v30  ;;  %v3350_v23 = vadd.f32 %v3334_v27, %v3253_v56  ;;  %v3796_v30 = vadd.f32 %v3780_v31, %v3699_v28  ;;  %v10881_v42 = vld [vmem:[#allocation146_spill] sm:$0xff] }
 0x678   : > { %v3851_v50 = vpop.permute.xlu0 %3850  ;;  %v3573_v10 = vadd.f32 %v3557_v32, %v3476_v2  ;;  %v3013_v22 = vmul.f32 %v8896_v49, %v10879_v35  ;;  %v3329_v24 = vmul.f32 %v8945_v48, %v10880_v60  ;;  %v3228_v51 = vmul.f32 %v8927_v17, %v10881_v42  ;;  %v10882_v2 = vld [vmem:[#allocation134_spill] sm:$0xff] }
 0x679   : > { %v3909_v4 = vmul.f32 %v9099_v47, %v3851_v50  ;;  %v3686_v56 = vmul.f32 %v8992_v46, %v8716_v25  ;;  %v3110_v12 = vmul.f32 %v8916_v58, %v10882_v2  ;;  %v3120_v3 = vadd.f32 %v3104_v55, %v3023_v45  ;;  %v9179_v25 = vld [vmem:[#allocation2 + $0x184] sm:$0xff] }
 0x67a   : > { %v3256_v35 = vadd.f32 %v3240_v53, %v3127_v7  ;;  %v3345_v32 = vadd.f32 %v3329_v24, %v3248_v62  ;;  %v9173_v40 = vmul.f32 %v8945_v48, %v10884_v38  ;;  %v3479_v42 = vadd.f32 %v3463_v37, %v3350_v23  ;;  %10885 = vst [vmem:[#allocation105_spill] sm:$0xff] %v9179_v25  ;;  %v10886_v24 = vld [vmem:[#allocation24_spill] sm:$0xff]  ;;  %v10887_v53 = vld [vmem:[#allocation169_spill] sm:$0xff] }
 0x67b   : > { %v9165_v28 = vadd.f32 %v3909_v4, %v3796_v30  ;;  %v3702_v31 = vadd.f32 %v3686_v56, %v3573_v10  ;;  %v3029_v55 = vadd.f32 %v8905_v9, %v3013_v22  ;;  %v3123_v45 = vadd.f32 %v3107_v33, %v3026_v29  ;;  %v10889_v30 = vld [vmem:[#allocation51_spill] sm:$0xff]  ;;  %v10890_v22 = vld [vmem:[#allocation153_spill] sm:$0xff] }
 0x67c   : > { %v3337_v62 = vmul.f32 %v8945_v48, %v10886_v24  ;;  %v3458_v50 = vmul.f32 %v8958_v61, %v10887_v53  ;;  %v3244_v23 = vadd.f32 %v3228_v51, %v3115_v59  ;;  %v3325_v4 = vmul.f32 %v8945_v48, %v10889_v30  ;;  %v10891_v29 = vld [vmem:[#allocation155_spill] sm:$0xff]  ;;  %v10892_v24 = vld [vmem:[#allocation178_spill] sm:$0xff]  ;;  %v10894_v30 = vld [vmem:[#allocation80_spill] sm:$0xff] }
 0x67d   : > { %4413 = vperm.xlu2 %5524, %v8939_v63   ;;  %v9177_v41 = vpop.permute.xlu2 %4191  ;;  %v3783_v10 = vmul.f32 %v9071_v14, %v8791_v13  ;;  %v3233_v33 = vmul.f32 %v8927_v17, %v10890_v22  ;;  %v3236_v60 = vmul.f32 %v8927_v17, %v10891_v29  ;;  %v3454_v59 = vmul.f32 %v8958_v61, %v8870_v52  ;;  %v10893_v13 = vld [vmem:[#allocation27_spill] sm:$0xff] }
 0x67e   : > { %v9169_v27 = vpop.permute.xlu1 %4121  ;;  %4543 = vperm.xlu0 %5533, %v9179_v25   ;;  %v3353_v7 = vadd.f32 %v3337_v62, %v3256_v35  ;;  %v3474_v37 = vadd.f32 %v3458_v50, %v3345_v32  ;;  %v3239_v53 = vmul.f32 %v8927_v17, %v10892_v24  ;;  %v3555_v22 = vmul.f32 %v8974_v44, %v10894_v30  ;;  %v10895_v50 = vld [vmem:[#allocation157_spill] sm:$0xff]  ;;  %v10904_v30 = vld [vmem:[#allocation204_spill] sm:$0xff] }
 0x67f   : > { %10883 = vst [vmem:[#allocation122_spill] sm:$0xff] %v9169_v27  ;;  %4409 = vperm.xlu1 %5523, %v8933_v39   ;;  %v10888_v39 = vld [vmem:[#allocation159_spill] sm:$0xff]  ;;  %v3799_v51 = vadd.f32 %v3783_v10, %v3702_v31  ;;  %v3684_v35 = vmul.f32 %v8992_v46, %v8956_v16  ;;  %v3126_v32 = vadd.f32 %v3110_v12, %v3029_v55  ;;  %v10897_v55 = vld [vmem:[#allocation161_spill] sm:$0xff] }
 0x680   : > { %v3560_v63 = vmul.f32 %v8974_v44, %v10888_v39  ;;  %v3866_v56 = vpop.permute.xlu0 %3865  ;;  %v3466_v39 = vmul.f32 %v8958_v61, %v10893_v13  ;;  %v3341_v62 = vadd.f32 %v3325_v4, %v3244_v23  ;;  %v3689_v52 = vmul.f32 %v8992_v46, %v8724_v54  ;;  %v9222_v54 = vld [vmem:[#allocation2 + $0x1b4] sm:$0xff]  ;;  %v10898_v4 = vld [vmem:[#allocation116_spill] sm:$0xff] }
 0x681   : > { %v3912_v2 = vmul.f32 %v9099_v47, %v3866_v56  ;;  %v3571_v29 = vadd.f32 %v3555_v22, %v3474_v37  ;;  %v3252_v56 = vadd.f32 %v3236_v60, %v3123_v45  ;;  %10896 = vst [vmem:[#allocation16_spill] sm:$0xff] %v9222_v54  ;;  %v3563_v23 = vmul.f32 %v8974_v44, %v10897_v55  ;;  %v10906_v55 = vld [vmem:[#allocation164_spill] sm:$0xff]  ;;  %v10922_v27 = vld [vmem:[#allocation115_spill] sm:$0xff] }
 0x682   : > { %v3576_v38 = vadd.f32 %v3560_v63, %v3479_v42  ;;  %v3249_v42 = vadd.f32 %v3233_v33, %v3120_v3  ;;  %v9214_v63 = vmul.f32 %v8927_v17, %v10895_v50  ;;  %v3482_v10 = vadd.f32 %v3466_v39, %v3353_v7  ;;  %v10900_v7 = vld [vmem:[#allocation33_spill] sm:$0xff] }
 0x683   : > { %v9210_v31 = vadd.f32 %v3912_v2, %v3799_v51  ;;  %v3470_v24 = vadd.f32 %v3454_v59, %v3341_v62  ;;  %v9224_v3 = vadd.f32 %v3239_v53, %v3126_v32  ;;  %v3001_v45 = vmul.f32 %v8896_v49, %v10898_v4  ;;  %v10901_v59 = vld [vmem:[#allocation76_spill] sm:$0xff]  ;;  %v10902_v2 = vld [vmem:[#allocation162_spill] sm:$0xff]  ;;  %v10903_v53 = vld [vmem:[#allocation163_spill] sm:$0xff] }
 0x684   : > { %v3705_v12 = vadd.f32 %v3689_v52, %v3576_v38  ;;  %v3700_v33 = vadd.f32 %v3684_v35, %v3571_v29  ;;  %v3551_v37 = vmul.f32 %v8974_v44, %v10900_v7  ;;  %v3786_v51 = vmul.f32 %v9071_v14, %v10901_v59  ;;  %v10905_v62 = vld [vmem:[#allocation194_spill] sm:$0xff] }
 0x685   : > { %4425 = vperm.xlu2 %5524, %v8977_v0   ;;  %v9220_v16 = vpop.permute.xlu2 %4203  ;;  %v10899_v0 = vld [vmem:[#allocation61_spill] sm:$0xff]  ;;  %v3777_v38 = vmul.f32 %v9071_v14, %v10902_v2  ;;  %v9244_v39 = vmul.f32 %v9071_v14, %v10903_v53  ;;  %v3579_v35 = vadd.f32 %v3563_v23, %v3482_v10  ;;  %v3459_v52 = vmul.f32 %v8958_v61, %v10905_v62  ;;  %v10907_v7 = vld [vmem:[#allocation86_spill] sm:$0xff]  ;;  %v10908_v23 = vld [vmem:[#allocation184_spill] sm:$0xff] }
 0x686   : > { %4558 = vperm.xlu0 %5533, %v9222_v54   ;;  %v3330_v60 = vmul.f32 %v8945_v48, %v10899_v0  ;;  %v3567_v32 = vadd.f32 %v3551_v37, %v3470_v24  ;;  %v3802_v50 = vadd.f32 %v3786_v51, %v3705_v12  ;;  %v9253_v4 = vmul.f32 %v9071_v14, %v10906_v55  ;;  %v2894_v0 = vld [vmem:[%s10029_s9 + $0xa] sm:$0x3]  ;;  %v10909_v51 = vld [vmem:[#allocation58_spill] sm:$0xff]  ;;  %v10912_v55 = vld [vmem:[#allocation84_spill] sm:$0xff] }
 0x687   : > { %4421 = vperm.xlu1 %5523, %v8670_v1   ;;  %v9217_v13 = vpop.permute.xlu1 %4167  ;;  %v9232_v1 = vperm.slane %v9087_v34, 1  ;;  %v3781_v34 = vmul.f32 %v9071_v14, %v10904_v30  ;;  %v3692_v59 = vmul.f32 %v8992_v46, %v10907_v7  ;;  %v3017_v10 = vadd.f32 %v8905_v9, %v3001_v45  ;;  %v9269_v30 = vld [vmem:[#allocation2 + $0x1e4] sm:$0xff] }
 0x688   : > { %v3881_v22 = vpop.permute.xlu0 %3880  ;;  %v9263_v37 = vmul.f32 %v9071_v14, %v10908_v23  ;;  %v3346_v12 = vadd.f32 %v3330_v60, %v3249_v42  ;;  %v3680_v2 = vmul.f32 %v8992_v46, %v10909_v51  ;;  %10910 = vst [vmem:[#allocation206_spill] sm:$0xff] %v9269_v30  ;;  %v3333_v7 = vmul.f32 %v8945_v48, %v10912_v55  ;;  %v10913_v45 = vld [vmem:[#allocation57_spill] sm:$0xff]  ;;  %v10914_v42 = vld [vmem:[#allocation188_spill] sm:$0xff] }
 0x689   : > { %v3915_v29 = vmul.f32 %v9099_v47, %v3881_v22  ;;  %v3797_v24 = vadd.f32 %v3781_v34, %v3700_v33  ;;  %v10911_v22 = vld [vmem:[#allocation30_spill] sm:$0xff]  ;;  %v3910_v33 = vmul.f32 %v9099_v47, %v10913_v45  ;;  %v3708_v34 = vadd.f32 %v3692_v59, %v3579_v35  ;;  %v10916_v55 = vld [vmem:[#allocation77_spill] sm:$0xff]  ;;  %v10917_v59 = vld [vmem:[#allocation183_spill] sm:$0xff] }
 0x68a   : > { %v4007_v62 = vmul.f32 %v9232_v1, %v10911_v22  ;;  %v9277_v23 = vperm.slane %v2894_v0, 1  ;;  %v4001_v60 = vmul.f32 %v9232_v1, %v10914_v42  ;;  %v3696_v51 = vadd.f32 %v3680_v2, %v3567_v32  ;;  %v10918_v32 = vld [vmem:[#allocation187_spill] sm:$0xff] }
 0x68b   : > { %v9267_v53 = vadd.f32 %v3915_v29, %v3802_v50  ;;  %v3475_v50 = vadd.f32 %v3459_v52, %v3346_v12  ;;  %v3453_v54 = vmul.f32 %v8958_v61, %v10916_v55  ;;  %v3114_v35 = vadd.f32 %v9149_v6, %v3017_v10  ;;  %v10919_v52 = vld [vmem:[#allocation173_spill] sm:$0xff]  ;;  %v10921_v10 = vld [vmem:[#allocation82_spill] sm:$0xff] }
 0x68c   : > { %v3789_v45 = vmul.f32 %v9071_v14, %v10917_v59  ;;  %v3926_v25 = vadd.f32 %v3910_v33, %v3797_v24  ;;  %v3556_v12 = vmul.f32 %v8974_v44, %v10919_v52  ;;  %v4017_v2 = vadd.f32 %v4001_v60, %v9116_v26  ;;  %v10920_v55 = vld [vmem:[#allocation53_spill] sm:$0xff] }
 0x68d   : > { %4437 = vperm.xlu2 %5524, %v9006_v18   ;;  %v9285_v22 = vpop.permute.xlu2 %4215  ;;  %v9297_v18 = vperm.slane %v2894_v0, 0  ;;  %v3349_v42 = vadd.f32 %v3333_v7, %v3252_v56  ;;  %v3784_v6 = vmul.f32 %v9071_v14, %v10920_v55  ;;  %v3462_v59 = vmul.f32 %v8958_v61, %v10921_v10  ;;  %v9310_v26 = vld [vmem:[%s10029_s9 + $0xc] sm:$0x3] }
 0x68e   : > { %4573 = vperm.xlu0 %5533, %v9269_v30   ;;  %v3805_v24 = vadd.f32 %v3789_v45, %v3708_v34  ;;  %v3793_v30 = vadd.f32 %v3777_v38, %v3696_v51  ;;  %v10923_v56 = vld [vmem:[#allocation201_spill] sm:$0xff]  ;;  %v3243_v7 = vadd.f32 %v9214_v63, %v3114_v35  ;;  %v4023_v60 = vadd.f32 %v4007_v62, %v3926_v25  ;;  %v10924_v38 = vld [vmem:[#allocation182_spill] sm:$0xff] }
 0x68f   : > { %4433 = vperm.xlu1 %5523, %v8679_v19   ;;  %v9282_v29 = vpop.permute.xlu1 %4175  ;;  %v4010_v19 = vmul.f32 %v9232_v1, %v10918_v32  ;;  %v4130_v32 = vmul.f32 %v9297_v18, %v10922_v27  ;;  %v3685_v0 = vmul.f32 %v8992_v46, %v10923_v56  ;;  %v3800_v34 = vadd.f32 %v3784_v6, %v9004_v15  ;;  %v10926_v10 = vld [vmem:[#allocation193_spill] sm:$0xff]  ;;  %v10927_v63 = vld [vmem:[#allocation202_spill] sm:$0xff] }
 0x690   : > { %10915 = vst [vmem:[#allocation219_spill] sm:$0xff] %v9282_v29  ;;  %v3896_v33 = vpop.permute.xlu0 %3895  ;;  %v3572_v29 = vadd.f32 %v3556_v12, %v3475_v50  ;;  %v3906_v51 = vmul.f32 %v9099_v47, %v10924_v38  ;;  %v9321_v27 = vperm.slane %v9310_v26, 0  ;;  %v10925_v12 = vld [vmem:[#allocation189_spill] sm:$0xff]  ;;  %v3478_v56 = vadd.f32 %v3462_v59, %v3349_v42  ;;  %v10928_v25 = vld [vmem:[#allocation170_spill] sm:$0xff] }
 0x691   : > { %v3918_v52 = vmul.f32 %v9099_v47, %v3896_v33  ;;  %v4146_v45 = vadd.f32 %v4130_v32, %v4017_v2  ;;  %v3336_v55 = vmul.f32 %v8945_v48, %v10925_v12  ;;  %v3913_v33 = vmul.f32 %v9099_v47, %v10926_v10  ;;  %v10929_v2 = vld [vmem:[#allocation25_spill] sm:$0xff]  ;;  %v10931_v10 = vld [vmem:[#allocation59_spill] sm:$0xff] }
 0x692   : > { %v4136_v15 = vmul.f32 %v9297_v18, %v10927_v63  ;;  %v4227_v62 = vmul.f32 %v9277_v23, %v10928_v25  ;;  %v3922_v35 = vadd.f32 %v3906_v51, %v3793_v30  ;;  %v3701_v6 = vadd.f32 %v3685_v0, %v3572_v29  ;;  %v10930_v12 = vld [vmem:[#allocation185_spill] sm:$0xff]  ;;  %v10933_v25 = vld [vmem:[#allocation34_spill] sm:$0xff] }
 0x693   : > { %v9318_v50 = vadd.f32 %v3918_v52, %v3805_v24  ;;  %v3559_v32 = vmul.f32 %v8974_v44, %v10929_v2  ;;  %v3929_v52 = vadd.f32 %v3913_v33, %v3800_v34  ;;  %v4003_v63 = vmul.f32 %v9232_v1, %v10931_v10  ;;  %v10932_v0 = vld [vmem:[#allocation49_spill] sm:$0xff] }
 0x694   : > { %v4152_v38 = vadd.f32 %v4136_v15, %v4023_v60  ;;  %v3340_v30 = vadd.f32 %v9173_v40, %v3243_v7  ;;  %v4243_v29 = vadd.f32 %v4227_v62, %v4146_v45  ;;  %v3465_v34 = vmul.f32 %v8958_v61, %v10933_v25  ;;  %v10934_v45 = vld [vmem:[#allocation55_spill] sm:$0xff]  ;;  %v9373_v25 = vld [vmem:[#allocation2 + $0xa4] sm:$0xff] }
 0x695   : > { %4449 = vperm.xlu2 %5524, %v9037_v57   ;;  %v3787_v57 = vmul.f32 %v9071_v14, %v10932_v0  ;;  %v3575_v51 = vadd.f32 %v3559_v32, %v3478_v56  ;;  %v4019_v15 = vadd.f32 %v4003_v63, %v3922_v35  ;;  %v3352_v7 = vadd.f32 %v3336_v55, %v9224_v3  ;;  %v10938_v55 = vld [vmem:[#allocation203_spill] sm:$0xff]  ;;  %v10940_v0 = vld [vmem:[#allocation60_spill] sm:$0xff] }
 0x696   : > { %v4278_v59 = vpop.permute.xlu2 %4277  ;;  %4739 = vperm.xlu0 %5533, %v10930_v12   ;;  %v3688_v62 = vmul.f32 %v8992_v46, %v10934_v45  ;;  %v4026_v32 = vadd.f32 %v4010_v19, %v3929_v52  ;;  %v3469_v12 = vadd.f32 %v3453_v54, %v3340_v30  ;;  %v10941_v54 = vmov 0   ;;  %v10943_v45 = vld [vmem:[#allocation63_spill] sm:$0xff] }
 0x697   : > { %4445 = vperm.xlu1 %5523, %v9029_v20   ;;  %v4188_v24 = vpop.permute.xlu1 %4187  ;;  %v4356_v20 = vmul.f32 %v9321_v27, %v4278_v59  ;;  %v3803_v56 = vadd.f32 %v3787_v57, %v9035_v5  ;;  %v10935_v59 = vld [vmem:[#allocation195_spill] sm:$0xff]  ;;  %v3481_v3 = vadd.f32 %v3465_v34, %v3352_v7  ;;  %v10939_v5 = vld [vmem:[#allocation213_spill] sm:$0xff]  ;;  %v4008_v57 = vmul.f32 %v9232_v1, %v10940_v0  ;;  %v10946_v0 = vld [vmem:[#allocation88_spill] sm:$0xff] }
 0x698   : > { %v4233_v42 = vmul.f32 %v9277_v23, %v4188_v24  ;;  %v4062_v33 = vpop.permute.xlu0 %4061  ;;  %v3798_v24 = vadd.f32 %v9244_v39, %v3701_v6  ;;  %v10937_v6 = vld [vmem:[#allocation190_spill] sm:$0xff]  ;;  %v3704_v63 = vadd.f32 %v3688_v62, %v3575_v51  ;;  %v4006_v19 = vmul.f32 %v9232_v1, %v10939_v5 }
 0x699   : > { %v9348_v2 = vadd.f32 %v4356_v20, %v4243_v29  ;;  %v4132_v40 = vmul.f32 %v9297_v18, %v4062_v33  ;;  %v3916_v10 = vmul.f32 %v9099_v47, %v10937_v6  ;;  %v4139_v29 = vmul.f32 %v9297_v18, %v10938_v55  ;;  %v9365_v20 = vld [vmem:[#allocation2 + $0xf8] sm:$0xff] }
 0x69a   : > { %v9345_v60 = vadd.f32 %v4233_v42, %v4152_v38  ;;  %v3562_v38 = vmul.f32 %v8974_v44, %v10935_v59  ;;  %v10936_v42 = vld [vmem:[#allocation68_spill] sm:$0xff]  ;;  %v3550_v62 = vmul.f32 %v8974_v44, %v10943_v45  ;;  %v10944_v59 = vld [vmem:[#allocation75_spill] sm:$0xff] }
 0x69b   : > { %v3911_v35 = vmul.f32 %v9099_v47, %v10936_v42  ;;  %v9359_v39 = vadd.f32 %v4132_v40, %v4019_v15  ;;  %v3932_v51 = vadd.f32 %v3916_v10, %v3803_v56  ;;  %v4155_v34 = vadd.f32 %v4139_v29, %v4026_v32  ;;  %v5589_v15 = vld [vmem:[#allocation2 + $0x94] sm:$0xff] }
 0x69c   : > { %v3691_v42 = vmul.f32 %v8992_v46, %v10944_v59  ;;  %v4022_v56 = vadd.f32 %v4006_v19, %v9165_v28  ;;  %v10945_v32 = vld [vmem:[#allocation90_spill] sm:$0xff]  ;;  %v3578_v6 = vadd.f32 %v3562_v38, %v3481_v3  ;;  %v3801_v10 = vadd.f32 %v9253_v4, %v3704_v63  ;;  %v10947_v19 = vld [vmem:[#allocation71_spill] sm:$0xff] }
 0x69d   : > { %v3927_v52 = vadd.f32 %v3911_v35, %v3798_v24  ;;  %5526 = vset.pattern.permute.xlu2 %v10941_v54  ;;  %v10942_v24 = vld [vmem:[#allocation28_spill] sm:$0xff]  ;;  %v3790_v35 = vmul.f32 %v9071_v14, %v10945_v32  ;;  %v3566_v45 = vadd.f32 %v3550_v62, %v3469_v12  ;;  %v10948_v4 = vld [vmem:[#allocation191_spill] sm:$0xff]  ;;  %v4142_v12 = vmul.f32 %v9297_v18, %v9014_v21 }
 0x69e   : > { %4513 = vperm.xlu2 %5526, %v9373_v25   ;;  %v9377_v40 = vpop.permute.xlu2 %4292  ;;  %v4013_v7 = vmul.f32 %v9232_v1, %v10942_v24  ;;  %4764 = vperm.xlu0 %5533, %v9365_v20   ;;  %v3914_v24 = vmul.f32 %v9099_v47, %v10947_v19  ;;  %v3919_v63 = vmul.f32 %v9099_v47, %v10948_v4  ;;  %v10949_v32 = vld [vmem:[#allocation199_spill] sm:$0xff] }
 0x69f   : > { %5525 = vset.pattern.permute.xlu1 %v10941_v54  ;;  %v4200_v30 = vpop.permute.xlu1 %4199  ;;  %v4024_v5 = vadd.f32 %v4008_v57, %v3927_v52  ;;  %v3806_v38 = vadd.f32 %v3790_v35, %v9066_v8  ;;  %v4234_v52 = vmul.f32 %v9277_v23, %v9177_v41  ;;  %v10950_v8 = vld [vmem:[#allocation95_spill] sm:$0xff] }
 0x6a0   : > { %v4236_v33 = vmul.f32 %v9277_v23, %v4200_v30  ;;  %4508 = vperm.xlu1 %5525, %v5589_v15   ;;  %v4087_v29 = vpop.permute.xlu0 %4086  ;;  %v3679_v30 = vmul.f32 %v8992_v46, %v10946_v0  ;;  %v4135_v15 = vmul.f32 %v9297_v18, %v9042_v43  ;;  %v4029_v3 = vadd.f32 %v4013_v7, %v3932_v51  ;;  %v10951_v7 = vld [vmem:[#allocation93_spill] sm:$0xff] }
 0x6a1   : > { %v4137_v28 = vmul.f32 %v9297_v18, %v4087_v29  ;;  %v3707_v43 = vadd.f32 %v3691_v42, %v3578_v6  ;;  %v3930_v59 = vadd.f32 %v3914_v24, %v3801_v10  ;;  %v4011_v29 = vmul.f32 %v9232_v1, %v10949_v32  ;;  %v9417_v6 = vld [vmem:[#allocation2 + $0xb4] sm:$0xff]  ;;  %v9421_v10 = vld [vmem:[#allocation2 + $0x1a8] sm:$0xff] }
 0x6a2   : > { %v9390_v55 = vadd.f32 %v4236_v33, %v4155_v34  ;;  %v9404_v34 = vld [vmem:[#allocation2 + $0xc4] sm:$0xff]  ;;  %v4151_v33 = vadd.f32 %v4135_v15, %v4022_v56  ;;  %v4232_v51 = vmul.f32 %v9277_v23, %v10950_v8  ;;  %v4009_v62 = vmul.f32 %v9232_v1, %v10951_v7  ;;  %v10955_v7 = vld [vmem:[#allocation210_spill] sm:$0xff] }
 0x6a3   : > { %v4153_v57 = vadd.f32 %v4137_v28, %v4024_v5  ;;  %v3695_v35 = vadd.f32 %v3679_v30, %v3566_v45  ;;  %v3935_v0 = vadd.f32 %v3919_v63, %v3806_v38  ;;  %v4158_v56 = vadd.f32 %v4142_v12, %v4029_v3  ;;  %v10952_v15 = vld [vmem:[#allocation89_spill] sm:$0xff]  ;;  %v10953_v45 = vld [vmem:[#allocation46_spill] sm:$0xff] }
 0x6a4   : > { %v3776_v28 = vmul.f32 %v9071_v14, %v10952_v15  ;;  %v4025_v30 = vadd.f32 %v4009_v62, %v9210_v31  ;;  %v4248_v19 = vadd.f32 %v4232_v51, %v4151_v33  ;;  %v4016_v38 = vmul.f32 %v9232_v1, %v10953_v45  ;;  %v10954_v33 = vld [vmem:[#allocation81_spill] sm:$0xff] }
 0x6a5   : > { %v9414_v5 = vadd.f32 %v4234_v52, %v4153_v57  ;;  %v4027_v3 = vadd.f32 %v4011_v29, %v3930_v59  ;;  %v3804_v4 = vadd.f32 %v9263_v37, %v3707_v43  ;;  %v4138_v32 = vmul.f32 %v9297_v18, %v9076_v11  ;;  %v9444_v29 = vld [vmem:[#allocation2 + $0xf4] sm:$0xff] }
 0x6a6   : > { %4523 = vperm.xlu2 %5526, %v9404_v34   ;;  %v4303_v21 = vpop.permute.xlu2 %4302  ;;  %4779 = vperm.xlu0 %5533, %v9421_v10   ;;  %v3792_v57 = vadd.f32 %v3776_v28, %v3695_v35  ;;  %v3905_v8 = vmul.f32 %v9099_v47, %v10954_v33  ;;  %v4032_v51 = vadd.f32 %v4016_v38, %v3935_v0  ;;  %v10956_v35 = vld [vmem:[#allocation17_spill] sm:$0xff]  ;;  %v9452_v0 = vld [vmem:[#allocation2 + $0x1d8] sm:$0xff]  ;;  %v10958_v28 = vld [vmem:[#allocation200_spill] sm:$0xff] }
 0x6a7   : > { %v4212_v41 = vpop.permute.xlu1 %4211  ;;  %v4361_v24 = vmul.f32 %v9321_v27, %v4303_v21  ;;  %v3917_v59 = vmul.f32 %v9099_v47, %v10955_v7  ;;  %v4237_v37 = vmul.f32 %v9277_v23, %v9220_v16  ;;  %v4154_v62 = vadd.f32 %v4138_v32, %v4025_v30 }
 0x6a8   : > { %v4239_v42 = vmul.f32 %v9277_v23, %v4212_v41  ;;  %4518 = vperm.xlu1 %5525, %v9417_v6   ;;  %v4102_v52 = vpop.permute.xlu0 %4101  ;;  %v4235_v11 = vmul.f32 %v9277_v23, %v10956_v35  ;;  %v10957_v41 = vld [vmem:[#allocation197_spill] sm:$0xff]  ;;  %v3921_v21 = vadd.f32 %v3905_v8, %v3792_v57  ;;  %v4014_v16 = vmul.f32 %v9232_v1, %v10958_v28 }
 0x6a9   : > { %v9435_v12 = vadd.f32 %v4361_v24, %v4248_v19  ;;  %v4140_v31 = vmul.f32 %v9297_v18, %v4102_v52  ;;  %v3933_v15 = vadd.f32 %v3917_v59, %v3804_v4  ;;  %v10959_v4 = vld [vmem:[#allocation166_spill] sm:$0xff]  ;;  %v10963_v28 = vld [vmem:[#allocation65_spill] sm:$0xff] }
 0x6aa   : > { %v9431_v63 = vadd.f32 %v4239_v42, %v4158_v56  ;;  %v4012_v56 = vmul.f32 %v9232_v1, %v10957_v41  ;;  %v4145_v42 = vmul.f32 %v9297_v18, %v9045_v36  ;;  %v4251_v52 = vadd.f32 %v4235_v11, %v4154_v62  ;;  %v10961_v11 = vld [vmem:[#allocation130_spill] sm:$0xff] }
 0x6ab   : > { %v4156_v43 = vadd.f32 %v4140_v31, %v4027_v3  ;;  %v5591_v3 = vld [vmem:[#allocation2 + $0xe4] sm:$0xff]  ;;  %v4002_v32 = vmul.f32 %v9232_v1, %v10959_v4  ;;  %v10960_v31 = vld [vmem:[#allocation119_spill] sm:$0xff]  ;;  %v4240_v62 = vmul.f32 %v9277_v23, %v9285_v22  ;;  %v3004_v41 = vmul.f32 %v8896_v49, %v10961_v11 }
 0x6ac   : > { %v4028_v30 = vadd.f32 %v4012_v56, %v9267_v53  ;;  %v4161_v45 = vadd.f32 %v4145_v42, %v4032_v51  ;;  %v4141_v33 = vmul.f32 %v9297_v18, %v10960_v31  ;;  %v4030_v51 = vadd.f32 %v4014_v16, %v3933_v15  ;;  %v10962_v56 = vld [vmem:[#allocation171_spill] sm:$0xff]  ;;  %v10964_v15 = vld [vmem:[#allocation216_spill] sm:$0xff] }
 0x6ad   : > { %v9456_v24 = vadd.f32 %v4237_v37, %v4156_v43  ;;  %v4018_v37 = vadd.f32 %v4002_v32, %v3921_v21  ;;  %v4238_v42 = vmul.f32 %v9277_v23, %v10962_v56  ;;  %v4015_v16 = vmul.f32 %v9232_v1, %v10964_v15  ;;  %v9490_v4 = vld [vmem:[#allocation2 + $0x1a4] sm:$0xff] }
 0x6ae   : > { %4538 = vperm.xlu2 %5526, %v9444_v29   ;;  %v4318_v36 = vpop.permute.xlu2 %4317  ;;  %4794 = vperm.xlu0 %5533, %v9452_v0   ;;  %v4157_v43 = vadd.f32 %v4141_v33, %v4028_v30  ;;  %v4228_v30 = vmul.f32 %v9277_v23, %v9217_v13 }
 0x6af   : > { %v4224_v19 = vpop.permute.xlu1 %4223  ;;  %v4364_v57 = vmul.f32 %v9321_v27, %v4318_v36  ;;  %v4031_v33 = vadd.f32 %v4015_v16, %v9318_v50 }
 0x6b0   : > { %v4242_v38 = vmul.f32 %v9277_v23, %v4224_v19  ;;  %4533 = vperm.xlu1 %5525, %v5591_v3   ;;  %v4117_v8 = vpop.permute.xlu0 %4116  ;;  %v4131_v19 = vmul.f32 %v9297_v18, %v10963_v28  ;;  %v4254_v31 = vadd.f32 %v4238_v42, %v4157_v43  ;;  %v10969_v42 = vld [vmem:[#allocation83_spill] sm:$0xff] }
 0x6b1   : > { %v9469_v7 = vadd.f32 %v4364_v57, %v4251_v52  ;;  %v4143_v59 = vmul.f32 %v9297_v18, %v4117_v8  ;;  %v5592_v52 = vld [vmem:[#allocation2 + $0x194] sm:$0xff]  ;;  %v3327_v15 = vmul.f32 %v8945_v48, %v10969_v42 }
 0x6b2   : > { %v9467_v53 = vadd.f32 %v4242_v38, %v4161_v45  ;;  %v10965_v45 = vld [vmem:[#allocation98_spill] sm:$0xff]  ;;  %v10966_v38 = vld [vmem:[#allocation137_spill] sm:$0xff]  ;;  %v4147_v36 = vadd.f32 %v4131_v19, %v4018_v37  ;;  %v10967_v37 = vld [vmem:[#allocation156_spill] sm:$0xff] }
 0x6b3   : > { %v4159_v35 = vadd.f32 %v4143_v59, %v4030_v51  ;;  %v4229_v21 = vmul.f32 %v9277_v23, %v10965_v45  ;;  %v3101_v3 = vmul.f32 %v8916_v58, %v10966_v38  ;;  %v3020_v59 = vadd.f32 %v8905_v9, %v3004_v41  ;;  %v9509_v9 = vld [vmem:[#allocation2 + $0x1d4] sm:$0xff] }
 0x6b4   : > { %v4244_v28 = vadd.f32 %v4228_v30, %v4147_v36 }
 0x6b5   : > { %v9486_v22 = vadd.f32 %v4240_v62, %v4159_v35  ;;  %v4245_v8 = vadd.f32 %v4229_v21, %v9359_v39  ;;  %v3230_v62 = vmul.f32 %v8927_v17, %v10967_v37  ;;  %v10968_v35 = vld [vmem:[#allocation122_spill] sm:$0xff]  ;;  %v3117_v39 = vadd.f32 %v3101_v3, %v3020_v59  ;;  %v10970_v21 = vld [vmem:[#allocation167_spill] sm:$0xff] }
 0x6b6   : > { %4553 = vperm.xlu2 %5526, %v9490_v4   ;;  %v4333_v32 = vpop.permute.xlu2 %4332  ;;  %v4144_v11 = vmul.f32 %v9297_v18, %v10968_v35  ;;  %v3456_v38 = vmul.f32 %v8958_v61, %v10970_v21  ;;  %v10973_v59 = vld [vmem:[#allocation179_spill] sm:$0xff] }
 0x6b7   : > { %v4367_v51 = vmul.f32 %v9321_v27, %v4333_v32  ;;  %v3246_v45 = vadd.f32 %v3230_v62, %v3117_v39  ;;  %v3682_v37 = vmul.f32 %v8992_v46, %v10973_v59 }
 0x6b8   : > { %4548 = vperm.xlu1 %5525, %v5592_v52   ;;  %v4288_v57 = vpop.permute.xlu1 %4287  ;;  %v4283_v56 = vpop.permute.xlu0 %4282  ;;  %v4160_v41 = vadd.f32 %v4144_v11, %v4031_v33  ;;  %v10971_v52 = vld [vmem:[#allocation37_spill] sm:$0xff] }
 0x6b9   : > { %v4358_v13 = vmul.f32 %v9321_v27, %v4288_v57  ;;  %v9504_v43 = vadd.f32 %v4367_v51, %v4254_v31  ;;  %v4357_v50 = vmul.f32 %v9321_v27, %v4283_v56  ;;  %v4241_v30 = vmul.f32 %v9277_v23, %v10971_v52  ;;  %v10972_v57 = vld [vmem:[#allocation172_spill] sm:$0xff] }
 0x6ba   : > { %v3343_v36 = vadd.f32 %v3327_v15, %v3246_v45  ;;  %v3553_v32 = vmul.f32 %v8974_v44, %v10972_v57  ;;  %v5594_v31 = vld [vmem:[#allocation2 + $0x1c4] sm:$0xff]  ;;  %v9532_v45 = vperm.slane %v9310_v26, 1  ;;  %v10977_v57 = vmov 1  }
 0x6bb   : > { %v9502_v19 = vadd.f32 %v4358_v13, %v4245_v8  ;;  %v4373_v16 = vadd.f32 %v4357_v50, %v4244_v28  ;;  %v4257_v13 = vadd.f32 %v4241_v30, %v4160_v41  ;;  %v10974_v28 = vld [vmem:[#allocation52_spill] sm:$0xff]  ;;  %v5595_v30 = vld [vmem:[#allocation2 + $0x1f4] sm:$0xff] }
 0x6bc   : > { %v3472_v51 = vadd.f32 %v3456_v38, %v3343_v36  ;;  %v3779_v50 = vmul.f32 %v9071_v14, %v10974_v28  ;;  %v10975_v15 = vld [vmem:[#allocation56_spill] sm:$0xff] }
 0x6bd   : > { %v3908_v41 = vmul.f32 %v9099_v47, %v10975_v15  ;;  %v10976_v38 = vld [vmem:[#allocation196_spill] sm:$0xff] }
 0x6be   : > { %4568 = vperm.xlu2 %5526, %v9509_v9   ;;  %v4348_v8 = vpop.permute.xlu2 %4347  ;;  %v3569_v56 = vadd.f32 %v3553_v32, %v3472_v51  ;;  %v4005_v52 = vmul.f32 %v9232_v1, %v10976_v38  ;;  %v10981_v38 = vld [vmem:[#allocation151_spill] sm:$0xff] }
 0x6bf   : > { %v4370_v33 = vmul.f32 %v9321_v27, %v4348_v8 }
 0x6c0   : > { %4563 = vperm.xlu1 %5525, %v5594_v31   ;;  %v4298_v3 = vpop.permute.xlu1 %4297  ;;  %v4308_v62 = vpop.permute.xlu0 %4307  ;;  %v3698_v42 = vadd.f32 %v3682_v37, %v3569_v56 }
 0x6c1   : > { %v9521_v35 = vadd.f32 %v4370_v33, %v4257_v13  ;;  %v4362_v11 = vmul.f32 %v9321_v27, %v4308_v62  ;;  %v10978_v13 = vld [vmem:[#allocation208_spill] sm:$0xff] }
 0x6c2   : > { %v3795_v21 = vadd.f32 %v3779_v50, %v3698_v42  ;;  %v4134_v33 = vmul.f32 %v9297_v18, %v10978_v13  ;;  %v10980_v42 = vld [vmem:[#allocation125_spill] sm:$0xff] }
 0x6c3   : > { %v9527_v39 = vadd.f32 %v4362_v11, %v9345_v60  ;;  %v5596_v60 = vld [vmem:[#allocation2 + $0x84] sm:$0xff]  ;;  %v10979_v11 = vld [vmem:[#allocation87_spill] sm:$0xff]  ;;  %v3003_v15 = vmul.f32 %v8896_v49, %v10980_v42 }
 0x6c4   : > { %v3924_v8 = vadd.f32 %v3908_v41, %v3795_v21  ;;  %v4231_v56 = vmul.f32 %v9277_v23, %v10979_v11  ;;  %v4360_v21 = vmul.f32 %v9321_v27, %v4298_v3  ;;  %v5597_v49 = vld [vmem:[%s10030_s10] ss:$0 sm:$0xff]  ;;  %v10982_v3 = vld [vmem:[#allocation22_spill] sm:$0xff] }
 0x6c6   : > { %5527 = vset.pattern.permute.xlu2 %v10977_v57  ;;  %v4021_v62 = vadd.f32 %v4005_v52, %v3924_v8 }
 0x6c7   : > { %4615 = vperm.xlu2 %5527, %v5596_v60   ;;  %v4394_v31 = vpop.permute.xlu2 %4393 }
 0x6c8   : > { %4578 = vperm.xlu1 %5525, %v5595_v30   ;;  %v4313_v36 = vpop.permute.xlu1 %4312  ;;  %v4454_v26 = vmul.f32 %v9532_v45, %v4394_v31  ;;  %v4323_v51 = vpop.permute.xlu0 %4322  ;;  %v4150_v41 = vadd.f32 %v4134_v33, %v4021_v62  ;;  %v10984_v62 = vld [vmem:[#allocation72_spill] sm:$0xff] }
 0x6c9   : > { %v4363_v32 = vmul.f32 %v9321_v27, %v4313_v36  ;;  %v4365_v37 = vmul.f32 %v9321_v27, %v4323_v51 }
 0x6ca   : > { %v9547_v28 = vadd.f32 %v4454_v26, %v4373_v16  ;;  %v4247_v30 = vadd.f32 %v4231_v56, %v4150_v41  ;;  %v3019_v16 = vadd.f32 %v5597_v49, %v3003_v15  ;;  %v10985_v56 = vld [vmem:[#allocation32_spill] sm:$0xff]  ;;  %v10986_v41 = vld [vmem:[#allocation211_spill] sm:$0xff] }
 0x6cb   : > { %v9542_v59 = vadd.f32 %v4363_v32, %v9414_v5  ;;  %v4381_v50 = vadd.f32 %v4365_v37, %v9390_v55  ;;  %v3100_v5 = vmul.f32 %v8916_v58, %v10981_v38  ;;  %v3229_v32 = vmul.f32 %v8927_v17, %v10982_v3  ;;  %v10987_v38 = vld [vmem:[#allocation36_spill] sm:$0xff]  ;;  %v10989_v3 = vld [vmem:[#allocation186_spill] sm:$0xff] }
 0x6cc   : > { %v4376_v58 = vadd.f32 %v4360_v21, %v4247_v30  ;;  %v3455_v17 = vmul.f32 %v8958_v61, %v10984_v62  ;;  %v3552_v42 = vmul.f32 %v8974_v44, %v10985_v56  ;;  %v10994_v56 = vld [vmem:[#allocation16_spill] sm:$0xff] }
 0x6cd   : > { %v3116_v13 = vadd.f32 %v3100_v5, %v3019_v16 }
 0x6cf   : > { %4627 = vperm.xlu2 %5527, %v9417_v6   ;;  %v4406_v55 = vpop.permute.xlu2 %4405  ;;  %v10983_v6 = vld [vmem:[#allocation181_spill] sm:$0xff]  ;;  %v3245_v37 = vadd.f32 %v3229_v32, %v3116_v13  ;;  %v10992_v13 = vld [vmem:[#allocation110_spill] sm:$0xff] }
 0x6d0   : > { %5528 = vset.pattern.permute.xlu1 %v10977_v57  ;;  %v4328_v52 = vpop.permute.xlu1 %4327  ;;  %v4457_v60 = vmul.f32 %v9532_v45, %v4406_v55  ;;  %v4338_v31 = vpop.permute.xlu0 %4337  ;;  %v3326_v33 = vmul.f32 %v8945_v48, %v10983_v6 }
 0x6d1   : > { %v4366_v36 = vmul.f32 %v9321_v27, %v4328_v52  ;;  %4623 = vperm.xlu1 %5528, %v9373_v25   ;;  %v4368_v25 = vmul.f32 %v9321_v27, %v4338_v31  ;;  %v10991_v31 = vld [vmem:[#allocation105_spill] sm:$0xff] }
 0x6d2   : > { %v9571_v26 = vadd.f32 %v4457_v60, %v4376_v58  ;;  %v3342_v11 = vadd.f32 %v3326_v33, %v3245_v37  ;;  %v10990_v58 = vld [vmem:[#allocation79_spill] sm:$0xff] }
 0x6d3   : > { %v9566_v8 = vadd.f32 %v4366_v36, %v9456_v24  ;;  %v4384_v51 = vadd.f32 %v4368_v25, %v9431_v63  ;;  %v3681_v63 = vmul.f32 %v8992_v46, %v10987_v38  ;;  %v10988_v36 = vld [vmem:[#allocation180_spill] sm:$0xff]  ;;  %v3907_v46 = vmul.f32 %v9099_v47, %v10989_v3  ;;  %v10993_v47 = vld [vmem:[#allocation219_spill] sm:$0xff] }
 0x6d4   : > { %v3471_v21 = vadd.f32 %v3455_v17, %v3342_v11  ;;  %v3778_v55 = vmul.f32 %v9071_v14, %v10988_v36  ;;  %v4230_v37 = vmul.f32 %v9277_v23, %v10993_v47  ;;  %v4359_v17 = vmul.f32 %v9321_v27, %v9377_v40 }
 0x6d6   : > { %v3568_v52 = vadd.f32 %v3552_v42, %v3471_v21 }
 0x6d7   : > { %4635 = vperm.xlu2 %5527, %v10986_v41   ;;  %v4414_v48 = vpop.permute.xlu2 %4413 }
 0x6d8   : > { %v4343_v24 = vpop.permute.xlu1 %4342  ;;  %v4459_v5 = vmul.f32 %v9532_v45, %v4414_v48  ;;  %v4353_v30 = vpop.permute.xlu0 %4352  ;;  %v3697_v16 = vadd.f32 %v3681_v63, %v3568_v52  ;;  %v10996_v63 = vld [vmem:[#allocation174_spill] sm:$0xff]  ;;  %v5598_v52 = vld [vmem:[#allocation2 + $0x88] sm:$0xff] }
 0x6d9   : > { %v4369_v15 = vmul.f32 %v9321_v27, %v4343_v24  ;;  %4631 = vperm.xlu1 %5528, %v9404_v34   ;;  %v4371_v44 = vmul.f32 %v9321_v27, %v4353_v30  ;;  %v10995_v27 = vld [vmem:[#allocation206_spill] sm:$0xff] }
 0x6da   : > { %v9591_v34 = vadd.f32 %v4459_v5, %v9527_v39  ;;  %v3794_v32 = vadd.f32 %v3778_v55, %v3697_v16  ;;  %v4133_v39 = vmul.f32 %v9297_v18, %v10992_v13 }
 0x6db   : > { %v9585_v61 = vadd.f32 %v4369_v15, %v9486_v22  ;;  %v4387_v49 = vadd.f32 %v4371_v44, %v9467_v53  ;;  %v4004_v22 = vmul.f32 %v9232_v1, %v10990_v58 }
 0x6dc   : > { %v3923_v14 = vadd.f32 %v3907_v46, %v3794_v32  ;;  %v9653_v46 = vld [vmem:[#allocation2 + $0xc8] sm:$0xff] }
 0x6de   : > { %v4020_v33 = vadd.f32 %v4004_v22, %v3923_v14  ;;  %v9656_v22 = vld [vmem:[#allocation2 + $0xb8] sm:$0xff]  ;;  %v10997_v14 = vld [vmem:[#allocation69_spill] sm:$0xff] }
 0x6df   : > { %4647 = vperm.xlu2 %5527, %v10991_v31   ;;  %v4426_v25 = vpop.permute.xlu2 %4425  ;;  %v4460_v13 = vmul.f32 %v9532_v45, %v10997_v14 }
 0x6e0   : > { %v4462_v6 = vmul.f32 %v9532_v45, %v4426_v25  ;;  %v4149_v62 = vadd.f32 %v4133_v39, %v4020_v33  ;;  %v9667_v25 = vld [vmem:[#allocation2 + $0xe8] sm:$0xff] }
 0x6e1   : > { %4643 = vperm.xlu1 %5528, %v9444_v29   ;;  %v4390_v60 = vpop.permute.xlu1 %4389  ;;  %v4476_v47 = vadd.f32 %v4460_v13, %v9542_v59 }
 0x6e2   : > { %v4453_v53 = vmul.f32 %v9532_v45, %v4390_v60  ;;  %v9609_v29 = vadd.f32 %v4462_v6, %v4381_v50  ;;  %v4246_v11 = vadd.f32 %v4230_v37, %v4149_v62  ;;  %v5600_v6 = vld [vmem:[#allocation2 + $0xd8] sm:$0xff] }
 0x6e3   : > { %v10998_v62 = vld [vmem:[#allocation207_spill] sm:$0xff] }
 0x6e4   : > { %v9607_v1 = vadd.f32 %v4453_v53, %v9348_v2  ;;  %v4375_v24 = vadd.f32 %v4359_v17, %v4246_v11  ;;  %v4463_v17 = vmul.f32 %v9532_v45, %v10998_v62  ;;  %v5601_v11 = vld [vmem:[#allocation2 + $0x188] sm:$0xff] }
 0x6e7   : > { %4659 = vperm.xlu2 %5527, %v10994_v56   ;;  %v4438_v42 = vpop.permute.xlu2 %4437  ;;  %v9682_v56 = vld [vmem:[#allocation2 + $0x198] sm:$0xff] }
 0x6e8   : > { %v4465_v23 = vmul.f32 %v9532_v45, %v4438_v42 }
 0x6e9   : > { %4655 = vperm.xlu1 %5528, %v9490_v4   ;;  %v4402_v18 = vpop.permute.xlu1 %4401 }
 0x6ea   : > { %v4456_v15 = vmul.f32 %v9532_v45, %v4402_v18  ;;  %v9619_v50 = vadd.f32 %v4465_v23, %v4384_v51  ;;  %v9633_v51 = vld [vmem:[%s10029_s9 + $0xe] sm:$0x3] }
 0x6eb   : > { %v9638_v5 = vperm.slane %v9633_v51, 0 }
 0x6ec   : > { %v9617_v2 = vadd.f32 %v4456_v15, %v4375_v24  ;;  %v4479_v24 = vadd.f32 %v4463_v17, %v9566_v8 }
 0x6ef   : > { %4671 = vperm.xlu2 %5527, %v10995_v27   ;;  %v4450_v40 = vpop.permute.xlu2 %4449  ;;  %v10999_v27 = vld [vmem:[#allocation66_spill] sm:$0xff] }
 0x6f0   : > { %v4468_v48 = vmul.f32 %v9532_v45, %v4450_v40  ;;  %v4466_v40 = vmul.f32 %v9532_v45, %v10999_v27 }
 0x6f1   : > { %4667 = vperm.xlu1 %5528, %v9509_v9   ;;  %v4410_v41 = vpop.permute.xlu1 %4409  ;;  %v4455_v9 = vmul.f32 %v9532_v45, %v10996_v63 }
 0x6f2   : > { %v4458_v4 = vmul.f32 %v9532_v45, %v4410_v41  ;;  %v9628_v38 = vadd.f32 %v4468_v48, %v4387_v49  ;;  %v9693_v41 = vld [vmem:[#allocation2 + $0x1c8] sm:$0xff] }
 0x6f3   : > { %v4471_v55 = vadd.f32 %v4455_v9, %v9502_v19  ;;  %v4482_v9 = vadd.f32 %v4466_v40, %v9585_v61 }
 0x6f4   : > { %v9626_v21 = vadd.f32 %v4458_v4, %v9435_v12  ;;  %v9642_v12 = vld [vmem:[#allocation2 + $0x98] sm:$0xff] }
 0x6f5   : > { %v5603_v4 = vld [vmem:[#allocation2 + $0x1b8] sm:$0xff] }
 0x6f7   : > { %5530 = vset.pattern.permute.xlu2 %v10941_v54 }
 0x6f8   : > { %4734 = vperm.xlu2 %5530, %v9642_v12   ;;  %v4514_v36 = vpop.permute.xlu2 %4513 }
 0x6f9   : > { %5529 = vset.pattern.permute.xlu1 %v10941_v54  ;;  %v4422_v30 = vpop.permute.xlu1 %4421  ;;  %v4584_v49 = vmul.f32 %v9638_v5, %v4514_v36  ;;  %v9704_v36 = vld [vmem:[#allocation2 + $0x1f8] sm:$0xff] }
 0x6fa   : > { %v4461_v44 = vmul.f32 %v9532_v45, %v4422_v30  ;;  %4729 = vperm.xlu1 %5529, %v5598_v52   ;;  %v4504_v30 = vpop.permute.xlu0 %4503 }
 0x6fb   : > { %v9651_v3 = vadd.f32 %v4584_v49, %v4471_v55  ;;  %v9708_v55 = vperm.slane %v9633_v51, 1  ;;  %v5604_v49 = vld [vmem:[#allocation2 + $0x1e8] sm:$0xff] }
 0x6fc   : > { %v9649_v16 = vadd.f32 %v4461_v44, %v9469_v7 }
 0x700   : > { %4749 = vperm.xlu2 %5530, %v9653_v46   ;;  %v4524_v60 = vpop.permute.xlu2 %4523 }
 0x701   : > { %v4434_v32 = vpop.permute.xlu1 %4433  ;;  %v4586_v19 = vmul.f32 %v9638_v5, %v4524_v60 }
 0x702   : > { %v4464_v58 = vmul.f32 %v9532_v45, %v4434_v32  ;;  %4744 = vperm.xlu1 %5529, %v9656_v22   ;;  %v4529_v13 = vpop.permute.xlu0 %4528 }
 0x703   : > { %v9665_v7 = vadd.f32 %v4586_v19, %v9571_v26 }
 0x704   : > { %v9662_v31 = vadd.f32 %v4464_v58, %v9504_v43 }
 0x708   : > { %4759 = vperm.xlu2 %5530, %v9667_v25   ;;  %v4539_v33 = vpop.permute.xlu2 %4538 }
 0x709   : > { %v4446_v39 = vpop.permute.xlu1 %4445  ;;  %v4589_v43 = vmul.f32 %v9638_v5, %v4539_v33 }
 0x70a   : > { %v4467_v53 = vmul.f32 %v9532_v45, %v4446_v39  ;;  %4754 = vperm.xlu1 %5529, %v5600_v6   ;;  %v4582_v45 = vmul.f32 %v9638_v5, %v4504_v30  ;;  %v4544_v62 = vpop.permute.xlu0 %4543 }
 0x70b   : > { %v9678_v37 = vadd.f32 %v4589_v43, %v4476_v47  ;;  %v4587_v47 = vmul.f32 %v9638_v5, %v4529_v13 }
 0x70c   : > { %v9676_v26 = vadd.f32 %v4467_v53, %v9521_v35  ;;  %v4598_v60 = vadd.f32 %v4582_v45, %v9607_v1  ;;  %v5605_v53 = vld [vmem:[#allocation2 + $0xa8] sm:$0xff] }
 0x70d   : > { %v4603_v17 = vadd.f32 %v4587_v47, %v9626_v21 }
 0x710   : > { %4774 = vperm.xlu2 %5530, %v9682_v56   ;;  %v4554_v42 = vpop.permute.xlu2 %4553 }
 0x711   : > { %v4592_v35 = vmul.f32 %v9638_v5, %v4554_v42  ;;  %v4590_v42 = vmul.f32 %v9638_v5, %v4544_v62 }
 0x712   : > { %4769 = vperm.xlu1 %5529, %v5601_v11   ;;  %v4509_v18 = vpop.permute.xlu1 %4508 }
 0x713   : > { %v4583_v59 = vmul.f32 %v9638_v5, %v4509_v18  ;;  %v9691_v23 = vadd.f32 %v4592_v35, %v4479_v24  ;;  %v4559_v35 = vpop.permute.xlu0 %4558 }
 0x714   : > { %v4593_v40 = vmul.f32 %v9638_v5, %v4559_v35  ;;  %v9819_v35 = vld [vmem:[%s10031_s11] ss:$0 sm:$0xff] }
 0x715   : > { %v9689_v15 = vadd.f32 %v4583_v59, %v9547_v28 }
 0x718   : > { %4789 = vperm.xlu2 %5530, %v9693_v41   ;;  %v4569_v63 = vpop.permute.xlu2 %4568 }
 0x719   : > { %v4595_v28 = vmul.f32 %v9638_v5, %v4569_v63 }
 0x71a   : > { %4784 = vperm.xlu1 %5529, %v5603_v4   ;;  %v4519_v48 = vpop.permute.xlu1 %4518 }
 0x71b   : > { %v4585_v8 = vmul.f32 %v9638_v5, %v4519_v48  ;;  %v9702_v52 = vadd.f32 %v4595_v28, %v4482_v9  ;;  %v4574_v63 = vpop.permute.xlu0 %4573 }
 0x71d   : > { %v4601_v44 = vadd.f32 %v4585_v8, %v9617_v2 }
 0x720   : > { %4804 = vperm.xlu2 %5530, %v9704_v36  }
 0x721   : > { %v4616_v58 = vpop.permute.xlu2 %4615 }
 0x722   : > { %4799 = vperm.xlu1 %5529, %v5604_v49   ;;  %v4534_v32 = vpop.permute.xlu1 %4533  ;;  %v4679_v2 = vmul.f32 %v9708_v55, %v4616_v58 }
 0x723   : > { %v4588_v61 = vmul.f32 %v9638_v5, %v4534_v32 }
 0x724   : > { %v9717_v14 = vadd.f32 %v4679_v2, %v4598_v60 }
 0x725   : > { %v9715_v19 = vadd.f32 %v4588_v61, %v9591_v34 }
 0x728   : > { %5532 = vset.pattern.permute.xlu2 %v10977_v57 }
 0x729   : > { %4849 = vperm.xlu2 %5532, %v5605_v53   ;;  %v4628_v1 = vpop.permute.xlu2 %4627 }
 0x72a   : > { %5531 = vset.pattern.permute.xlu1 %v10977_v57  ;;  %v4549_v51 = vpop.permute.xlu1 %4548  ;;  %v4682_v6 = vmul.f32 %v9708_v55, %v4628_v1 }
 0x72b   : > { %v4591_v39 = vmul.f32 %v9638_v5, %v4549_v51  ;;  %4845 = vperm.xlu1 %5531, %v9642_v12  }
 0x72c   : > { %v9727_v33 = vadd.f32 %v4682_v6, %v4601_v44  ;;  %v11000_v44 = vld [vmem:[#allocation35_spill] sm:$0xff] }
 0x72d   : > { %v9725_v34 = vadd.f32 %v4591_v39, %v9609_v29 }
 0x731   : > { %4857 = vperm.xlu2 %5532, %v9653_v46   ;;  %v4636_v12 = vpop.permute.xlu2 %4635 }
 0x732   : > { %v4564_v43 = vpop.permute.xlu1 %4563  ;;  %v4684_v11 = vmul.f32 %v9708_v55, %v4636_v12 }
 0x733   : > { %v4594_v57 = vmul.f32 %v9638_v5, %v4564_v43  ;;  %4853 = vperm.xlu1 %5531, %v9656_v22   ;;  %v4606_v22 = vadd.f32 %v4590_v42, %v9649_v16 }
 0x734   : > { %v9738_v18 = vadd.f32 %v4684_v11, %v4603_v17 }
 0x735   : > { %v9736_v29 = vadd.f32 %v4594_v57, %v9619_v50 }
 0x739   : > { %4869 = vperm.xlu2 %5532, %v9365_v20   ;;  %v4648_v46 = vpop.permute.xlu2 %4647 }
 0x73a   : > { %v4579_v59 = vpop.permute.xlu1 %4578  ;;  %v4687_v21 = vmul.f32 %v9708_v55, %v4648_v46 }
 0x73b   : > { %v4597_v24 = vmul.f32 %v9638_v5, %v4579_v59  ;;  %4865 = vperm.xlu1 %5531, %v9667_v25   ;;  %v4609_v25 = vadd.f32 %v4593_v40, %v9662_v31  ;;  %v11004_v40 = vld [vmem:[#allocation38_spill] sm:$0xff] }
 0x73c   : > { %v9749_v27 = vadd.f32 %v4687_v21, %v4606_v22 }
 0x73d   : > { %v9747_v50 = vadd.f32 %v4597_v24, %v9628_v38  ;;  %v4596_v38 = vmul.f32 %v9638_v5, %v4574_v63  ;;  %v2897_v5 = vld [vmem:[%s10029_s9 + $0x10] sm:$0x3] }
 0x73e   : > { %v9774_v45 = vperm.slane %v2897_v5, 0  ;;  %v9806_v12 = vperm.slane %v2897_v5, 1  ;;  %v11003_v24 = vld [vmem:[#allocation198_spill] sm:$0xff] }
 0x740   : > { %v4905_v46 = vmul.f32 %v9806_v12, %v11003_v24 }
 0x741   : > { %4881 = vperm.xlu2 %5532, %v9421_v10   ;;  %v4660_v20 = vpop.permute.xlu2 %4659  ;;  %v4612_v10 = vadd.f32 %v4596_v38, %v9676_v26 }
 0x742   : > { %v4690_v16 = vmul.f32 %v9708_v55, %v4660_v20  ;;  %v4691_v20 = vmul.f32 %v9708_v55, %v11004_v40 }
 0x743   : > { %4877 = vperm.xlu1 %5531, %v9682_v56   ;;  %v9753_v4 = vpop.permute.xlu1 %4623 }
 0x744   : > { %v9758_v48 = vadd.f32 %v4690_v16, %v4609_v25  ;;  %v4707_v63 = vadd.f32 %v4691_v20, %v9736_v29  ;;  %v4681_v29 = vmul.f32 %v9708_v55, %v9753_v4  ;;  %v11007_v20 = vld [vmem:[#allocation45_spill] sm:$0xff] }
 0x749   : > { %4893 = vperm.xlu2 %5532, %v9452_v0   ;;  %v4672_v56 = vpop.permute.xlu2 %4671 }
 0x74a   : > { %v4693_v28 = vmul.f32 %v9708_v55, %v4672_v56 }
 0x74b   : > { %4889 = vperm.xlu1 %5531, %v9693_v41   ;;  %v4632_v8 = vpop.permute.xlu1 %4631  ;;  %v4680_v41 = vmul.f32 %v9708_v55, %v11000_v44 }
 0x74c   : > { %v4683_v9 = vmul.f32 %v9708_v55, %v4632_v8  ;;  %v9767_v30 = vadd.f32 %v4693_v28, %v4612_v10 }
 0x74e   : > { %v4699_v31 = vadd.f32 %v4683_v9, %v9665_v7  ;;  %v4696_v7 = vadd.f32 %v4680_v41, %v9689_v15  ;;  %v11001_v15 = vld [vmem:[#allocation175_spill] sm:$0xff]  ;;  %v11005_v9 = vld [vmem:[#allocation177_spill] sm:$0xff] }
 0x74f   : > { %v4685_v53 = vmul.f32 %v9708_v55, %v11001_v15  ;;  %v4694_v10 = vmul.f32 %v9708_v55, %v11005_v9 }
 0x751   : > { %5534 = vset.pattern.permute.xlu2 %v10941_v54  ;;  %v4701_v47 = vadd.f32 %v4685_v53, %v9715_v19  ;;  %v4710_v5 = vadd.f32 %v4694_v10, %v9747_v50 }
 0x752   : > { %v4735_v49 = vpop.permute.xlu2 %4734 }
 0x753   : > { %4901 = vperm.xlu1 %5531, %v9704_v36   ;;  %v4644_v0 = vpop.permute.xlu1 %4643  ;;  %v4809_v32 = vmul.f32 %v9774_v45, %v4735_v49 }
 0x754   : > { %v4686_v26 = vmul.f32 %v9708_v55, %v4644_v0  ;;  %v4740_v0 = vpop.permute.xlu0 %4739 }
 0x755   : > { %v9784_v58 = vadd.f32 %v4809_v32, %v4696_v7  ;;  %v4810_v49 = vmul.f32 %v9774_v45, %v4740_v0 }
 0x756   : > { %v9782_v61 = vadd.f32 %v4686_v26, %v9678_v37  ;;  %v4697_v26 = vadd.f32 %v4681_v29, %v9651_v3 }
 0x75a   : > { %v4750_v2 = vpop.permute.xlu2 %4749 }
 0x75b   : > { %v4656_v60 = vpop.permute.xlu1 %4655  ;;  %5535 = vset.pattern.permute.xlu1 %v10941_v54  ;;  %v4812_v13 = vmul.f32 %v9774_v45, %v4750_v2 }
 0x75c   : > { %v4689_v36 = vmul.f32 %v9708_v55, %v4656_v60  ;;  %v4826_v60 = vadd.f32 %v4810_v49, %v4697_v26  ;;  %v11008_v26 = vld [vmem:[#allocation47_spill] sm:$0xff] }
 0x75d   : > { %v9792_v39 = vadd.f32 %v4812_v13, %v4699_v31  ;;  %v4916_v49 = vmul.f32 %v9806_v12, %v11008_v26 }
 0x75e   : > { %v9790_v51 = vadd.f32 %v4689_v36, %v9691_v23  ;;  %v11002_v23 = vld [vmem:[#allocation176_spill] sm:$0xff] }
 0x75f   : > { %v4688_v57 = vmul.f32 %v9708_v55, %v11002_v23 }
 0x761   : > { %v4704_v59 = vadd.f32 %v4688_v57, %v9725_v34 }
 0x762   : > { %v4760_v6 = vpop.permute.xlu2 %4759 }
 0x763   : > { %v4668_v37 = vpop.permute.xlu1 %4667  ;;  %v4814_v54 = vmul.f32 %v9774_v45, %v4760_v6 }
 0x764   : > { %v4692_v1 = vmul.f32 %v9708_v55, %v4668_v37 }
 0x765   : > { %v9802_v62 = vadd.f32 %v4814_v54, %v4701_v47  ;;  %v11006_v47 = vld [vmem:[#allocation40_spill] sm:$0xff] }
 0x766   : > { %v9800_v43 = vadd.f32 %v4692_v1, %v9702_v52  ;;  %v4910_v54 = vmul.f32 %v9806_v12, %v11006_v47 }
 0x76a   : > { %v4775_v11 = vpop.permute.xlu2 %4774 }
 0x76b   : > { %v4817_v19 = vmul.f32 %v9774_v45, %v4775_v11 }
 0x76c   : > { %v4730_v17 = vpop.permute.xlu1 %4729 }
 0x76d   : > { %v4808_v42 = vmul.f32 %v9774_v45, %v4730_v17  ;;  %v9814_v22 = vadd.f32 %v4817_v19, %v4704_v59 }
 0x76f   : > { %v4824_v52 = vadd.f32 %v4808_v42, %v9717_v14 }
 0x771   : > { %v4921_v21 = vadd.f32 %v4905_v46, %v4824_v52  ;;  %v4765_v46 = vpop.permute.xlu0 %4764 }
 0x772   : > { %v4790_v16 = vpop.permute.xlu2 %4789  ;;  %v4815_v9 = vmul.f32 %v9774_v45, %v4765_v46 }
 0x773   : > { %v4937_v25 = vmax.f32 %v4921_v21, 0.0  ;;  %v4820_v38 = vmul.f32 %v9774_v45, %v4790_v16 }
 0x774   : > { %v4745_v34 = vpop.permute.xlu1 %4744 }
 0x775   : > { %v4957_v14 = vmul.f32 %v9819_v35, %v4937_v25  ;;  %v9826_v8 = vadd.f32 %v4820_v38, %v4707_v63  ;;  %v4811_v57 = vmul.f32 %v9774_v45, %v4745_v34  ;;  %v4913_v25 = vmul.f32 %v9806_v12, %v11007_v20 }
 0x777   : > { %v4973_v56 = vsel %vm467_vm0, %v4957_v14, 0.0  ;;  %v4827_v19 = vadd.f32 %v4811_v57, %v9727_v33  ;;  %v11009_v57 = vld [vmem:[#allocation67_spill] sm:$0xff] }
 0x778   : > { %4974 = vadd.xlane.f32.xlu2 %v4973_v56 }
 0x77a   : > { %v4805_v31 = vpop.permute.xlu2 %4804 }
 0x77b   : > { %v4823_v44 = vmul.f32 %v9774_v45, %v4805_v31 }
 0x77c   : > { %v4755_v28 = vpop.permute.xlu1 %4754 }
 0x77d   : > { %v9835_v41 = vadd.f32 %v4823_v44, %v4710_v5  ;;  %v4813_v4 = vmul.f32 %v9774_v45, %v4755_v28 }
 0x77f   : > { %v4829_v1 = vadd.f32 %v4813_v4, %v9738_v18 }
 0x781   : > { %v4926_v11 = vadd.f32 %v4910_v54, %v4829_v1 }
 0x783   : > { %v4850_v32 = vpop.permute.xlu2 %4849  ;;  %v4942_v52 = vmax.f32 %v4926_v11, 0.0 }
 0x784   : > { %v4770_v7 = vpop.permute.xlu1 %4769  ;;  %v4907_v36 = vmul.f32 %v9806_v12, %v4850_v32  ;;  %v4780_v32 = vpop.permute.xlu0 %4779 }
 0x785   : > { %v4816_v17 = vmul.f32 %v9774_v45, %v4770_v7  ;;  %v4962_v14 = vmul.f32 %v9819_v35, %v4942_v52  ;;  %v4831_v7 = vadd.f32 %v4815_v9, %v9782_v61  ;;  %v4818_v4 = vmul.f32 %v9774_v45, %v4780_v32 }
 0x786   : > { %v4923_v2 = vadd.f32 %v4907_v36, %v4826_v60 }
 0x787   : > { %v4832_v24 = vadd.f32 %v4816_v17, %v9749_v27  ;;  %v4919_v17 = vmul.f32 %v9806_v12, %v11009_v57  ;;  %v4834_v11 = vadd.f32 %v4818_v4, %v9790_v51 }
 0x788   : > { %v4939_v13 = vmax.f32 %v4923_v2, 0.0 }
 0x789   : > { %v4929_v63 = vadd.f32 %v4913_v25, %v4832_v24 }
 0x78a   : > { %v4959_v15 = vmul.f32 %v9819_v35, %v4939_v13 }
 0x78b   : > { %v4858_v37 = vpop.permute.xlu2 %4857  ;;  %v4945_v10 = vmax.f32 %v4929_v63, 0.0 }
 0x78c   : > { %v4785_v50 = vpop.permute.xlu1 %4784  ;;  %v4979_v53 = vsel %vm467_vm0, %v4959_v15, 0.0  ;;  %v4909_v21 = vmul.f32 %v9806_v12, %v4858_v37  ;;  %v4795_v24 = vpop.permute.xlu0 %4794 }
 0x78d   : > { %4980 = vadd.xlane.f32.xlu1 %v4979_v53  ;;  %v4819_v33 = vmul.f32 %v9774_v45, %v4785_v50  ;;  %v4965_v50 = vmul.f32 %v9819_v35, %v4945_v10 }
 0x78e   : > { %v4925_v27 = vadd.f32 %v4909_v21, %v9792_v39  ;;  %v4988_v39 = vsel %vm467_vm0, %v4962_v14, 0.0 }
 0x78f   : > { %v4835_v28 = vadd.f32 %v4819_v33, %v9758_v48 }
 0x790   : > { %v4941_v44 = vmax.f32 %v4925_v27, 0.0 }
 0x791   : > { %v4932_v60 = vadd.f32 %v4916_v49, %v4835_v28 }
 0x792   : > { %v4961_v53 = vmul.f32 %v9819_v35, %v4941_v44 }
 0x793   : > { %v4870_v34 = vpop.permute.xlu2 %4869  ;;  %v4948_v61 = vmax.f32 %v4932_v60, 0.0 }
 0x794   : > { %v4800_v55 = vpop.permute.xlu1 %4799  ;;  %v4912_v31 = vmul.f32 %v9806_v12, %v4870_v34  ;;  %v4985_v54 = vsel %vm467_vm0, %v4961_v53, 0.0 }
 0x795   : > { %v4822_v36 = vmul.f32 %v9774_v45, %v4800_v55 }
 0x796   : > { %v4928_v2 = vadd.f32 %v4912_v31, %v4831_v7 }
 0x798   : > { %v4944_v1 = vmax.f32 %v4928_v2, 0.0 }
 0x79b   : > { %v4882_v13 = vpop.permute.xlu2 %4881 }
 0x79c   : > { %v4915_v55 = vmul.f32 %v9806_v12, %v4882_v13 }
 0x79d   : > { %v4846_v3 = vpop.permute.xlu1 %4845 }
 0x79e   : > { %v4906_v6 = vmul.f32 %v9806_v12, %v4846_v3  ;;  %v4838_v3 = vadd.f32 %v4822_v36, %v9767_v30 }
 0x7a0   : > { %v4922_v23 = vadd.f32 %v4906_v6, %v9784_v58 }
 0x7a2   : > { %v4938_v42 = vmax.f32 %v4922_v23, 0.0 }
 0x7a3   : > { %v4894_v52 = vpop.permute.xlu2 %4893 }
 0x7a4   : > { %v4958_v59 = vmul.f32 %v9819_v35, %v4938_v42  ;;  %v4935_v42 = vadd.f32 %v4919_v17, %v4838_v3  ;;  %v4918_v34 = vmul.f32 %v9806_v12, %v4894_v52 }
 0x7a5   : > { %v4854_v18 = vpop.permute.xlu1 %4853 }
 0x7a6   : > { %v4908_v40 = vmul.f32 %v9806_v12, %v4854_v18  ;;  %v4976_v58 = vsel %vm467_vm0, %v4958_v59, 0.0  ;;  %v4968_v59 = vmul.f32 %v9819_v35, %v4948_v61  ;;  %v4931_v18 = vadd.f32 %v4915_v55, %v4834_v11 }
 0x7a7   : > { %4977 = vadd.xlane.f32.xlu0 %v4976_v58  ;;  %v4951_v58 = vmax.f32 %v4935_v42, 0.0  ;;  %v5539_v42 = vld [vmem:[%s10024_s4] ss:$0 sm:$0xff] }
 0x7a8   : > { %v4924_v16 = vadd.f32 %v4908_v40, %v4827_v19  ;;  %v4964_v19 = vmul.f32 %v9819_v35, %v4944_v1  ;;  %v4821_v40 = vmul.f32 %v9774_v45, %v4795_v24  ;;  %v5006_v51 = vsel %vm467_vm0, %v4968_v59, 0.0 }
 0x7a9   : > { %v4947_v25 = vmax.f32 %v4931_v18, 0.0  ;;  %v4971_v45 = vmul.f32 %v9819_v35, %v4951_v58  ;;  %v11010_v18 = vld [vmem:[#allocation44_spill] sm:$0xff] }
 0x7aa   : > { %v4940_v38 = vmax.f32 %v4924_v16, 0.0  ;;  %v4837_v33 = vadd.f32 %v4821_v40, %v9800_v43 }
 0x7ab   : > { %v5015_v28 = vsel %vm467_vm0, %v4971_v45, 0.0 }
 0x7ac   : > { %v4960_v56 = vmul.f32 %v9819_v35, %v4940_v38  ;;  %v4934_v38 = vadd.f32 %v4918_v34, %v4837_v33 }
 0x7ad   : > { %v4866_v5 = vpop.permute.xlu1 %4865 }
 0x7ae   : > { %v4911_v29 = vmul.f32 %v9806_v12, %v4866_v5  ;;  %v4982_v0 = vsel %vm467_vm0, %v4960_v56, 0.0  ;;  %v4967_v56 = vmul.f32 %v9819_v35, %v4947_v25  ;;  %v4950_v31 = vmax.f32 %v4934_v38, 0.0 }
 0x7af   : > { %4983 = vadd.xlane.f32.xlu2 %v4982_v0  ;;  %4989 = vadd.xlane.f32.xlu0 %v4988_v39 }
 0x7b0   : > { %v4927_v48 = vadd.f32 %v4911_v29, %v9802_v62  ;;  %v4997_v62 = vsel %vm467_vm0, %v4965_v50, 0.0  ;;  %v5003_v43 = vsel %vm467_vm0, %v4967_v56, 0.0  ;;  %v4970_v0 = vmul.f32 %v9819_v35, %v4950_v31  ;;  %v5607_v31 = vld [vmem:[%s5893_s24 + $0x10] sm:$0xff] }
 0x7b2   : > { %v4943_v15 = vmax.f32 %v4927_v48, 0.0  ;;  %v5012_v49 = vsel %vm467_vm0, %v4970_v0, 0.0 }
 0x7b4   : > { %v4963_v37 = vmul.f32 %v9819_v35, %v4943_v15 }
 0x7b5   : > { %v4878_v6 = vpop.permute.xlu1 %4877 }
 0x7b6   : > { %v4914_v47 = vmul.f32 %v9806_v12, %v4878_v6  ;;  %v4991_v23 = vsel %vm467_vm0, %v4963_v37, 0.0 }
 0x7b7   : > { %4986 = vadd.xlane.f32.xlu2 %v4985_v54  ;;  %4998 = vadd.xlane.f32.xlu0 %v4997_v62 }
 0x7b8   : > { %v4930_v30 = vadd.f32 %v4914_v47, %v9814_v22  ;;  %4992 = vadd.xlane.f32.xlu1 %v4991_v23  ;;  %v4994_v22 = vsel %vm467_vm0, %v4964_v19, 0.0 }
 0x7ba   : > { %v4946_v46 = vmax.f32 %v4930_v30, 0.0 }
 0x7bc   : > { %v4966_v21 = vmul.f32 %v9819_v35, %v4946_v46  ;;  %v672_v46 = vadd.f32 %v5539_v42, %v11010_v18 }
 0x7bd   : > { %v4890_v20 = vpop.permute.xlu1 %4889 }
 0x7be   : > { %v4917_v16 = vmul.f32 %v9806_v12, %v4890_v20  ;;  %v5000_v63 = vsel %vm467_vm0, %v4966_v21, 0.0  ;;  %v9914_v21 = vperm.slane %v672_v46, 0 }
 0x7bf   : > { %5007 = vadd.xlane.f32.xlu0 %v5006_v51  ;;  %4995 = vadd.xlane.f32.xlu2 %v4994_v22 }
 0x7c0   : > { %v4933_v27 = vadd.f32 %v4917_v16, %v9826_v8  ;;  %5001 = vadd.xlane.f32.xlu1 %v5000_v63  ;;  %v5606_v16 = vld [vmem:[%s5893_s24] sm:$0xff] }
 0x7c2   : > { %v4949_v14 = vmax.f32 %v4933_v27, 0.0 }
 0x7c4   : > { %v4969_v9 = vmul.f32 %v9819_v35, %v4949_v14 }
 0x7c5   : > { %v4902_v10 = vpop.permute.xlu1 %4901 }
 0x7c6   : > { %v4920_v5 = vmul.f32 %v9806_v12, %v4902_v10  ;;  %v5009_v44 = vsel %vm467_vm0, %v4969_v9, 0.0  ;;  %v5542_v12 = vld [vmem:[#allocation3] ss:$0 sm:$0xff] }
 0x7c7   : > { %5016 = vadd.xlane.f32.xlu0 %v5015_v28  ;;  %5004 = vadd.xlane.f32.xlu2 %v5003_v43 }
 0x7c8   : > { %v4936_v8 = vadd.f32 %v4920_v5, %v9835_v41  ;;  %5010 = vadd.xlane.f32.xlu1 %v5009_v44 }
 0x7ca   : > { %v4952_v29 = vmax.f32 %v4936_v8, 0.0 }
 0x7cc   : > { %v4972_v39 = vmul.f32 %v9819_v35, %v4952_v29 }
 0x7ce   : > { %v5018_v26 = vsel %vm467_vm0, %v4972_v39, 0.0 }
 0x7cf   : > { %5013 = vadd.xlane.f32.xlu2 %v5012_v49 }
 0x7d0   : > { %5019 = vadd.xlane.f32.xlu1 %v5018_v26  ;;  %v5608_v26 = vld [vmem:[%s5893_s24 + $0x18] sm:$0xff] }
 0x7eb   : > { %v4975_v7 = vpop.xlane.xlu2 %4974 }
 0x7ec   : > { %v5025_v32 = vadd.f32 %v5542_v12, %v4975_v7 }
 0x7ee   : > { %5045 = vperm.xlu2 %5534, %v5025_v32  }
 0x800   : > { %v4981_v48 = vpop.xlane.xlu1 %4980 }
 0x801   : > { %v5027_v60 = vadd.f32 %v5542_v12, %v4981_v48 }
 0x803   : > { %5055 = vperm.xlu1 %5535, %v5027_v60  }
 0x81a   : > { %v4978_v41 = vpop.xlane.xlu0 %4977 }
 0x81b   : > { %v5026_v36 = vadd.f32 %v5542_v12, %v4978_v41  ;;  %v5042_v41 = vrot.slane %v672_v46, 1 }
 0x81d   : > { %5050 = vperm.xlu0 %5533, %v5026_v36  }
 0x822   : > { %v4984_v2 = vpop.xlane.xlu2 %4983  ;;  %v4990_v13 = vpop.xlane.xlu0 %4989 }
 0x823   : > { %v5028_v50 = vadd.f32 %v5542_v12, %v4984_v2  ;;  %v5030_v53 = vadd.f32 %v5542_v12, %v4990_v13 }
 0x825   : > { %5060 = vperm.xlu2 %5534, %v5028_v50  }
 0x82a   : > { %v4987_v35 = vpop.xlane.xlu2 %4986  ;;  %v4999_v15 = vpop.xlane.xlu0 %4998 }
 0x82b   : > { %v5029_v4 = vadd.f32 %v5542_v12, %v4987_v35  ;;  %v4993_v37 = vpop.xlane.xlu1 %4992  ;;  %v5033_v61 = vadd.f32 %v5542_v12, %v4999_v15  ;;  %v9935_v35 = vperm.slane %v5042_v41, 0  ;;  %v5609_v15 = vld [vmem:[%s5893_s24 + $0x28] sm:$0xff] }
 0x82c   : > { %v5031_v6 = vadd.f32 %v5542_v12, %v4993_v37 }
 0x82d   : > { %5065 = vperm.xlu1 %5535, %v5029_v4   ;;  %5070 = vperm.xlu2 %5534, %v5030_v53  }
 0x82e   : > { %5085 = vperm.xlu0 %5533, %v5033_v61  }
 0x832   : > { %v4996_v3 = vpop.xlane.xlu2 %4995  ;;  %v5008_v1 = vpop.xlane.xlu0 %5007 }
 0x833   : > { %v5032_v62 = vadd.f32 %v5542_v12, %v4996_v3  ;;  %v5036_v55 = vadd.f32 %v5542_v12, %v5008_v1  ;;  %v5002_v47 = vpop.xlane.xlu1 %5001 }
 0x834   : > { %v5034_v57 = vadd.f32 %v5542_v12, %v5002_v47 }
 0x835   : > { %5075 = vperm.xlu1 %5535, %v5031_v6   ;;  %5080 = vperm.xlu2 %5534, %v5032_v62  }
 0x836   : > { %5100 = vperm.xlu0 %5533, %v5036_v55  }
 0x83a   : > { %v5005_v54 = vpop.xlane.xlu2 %5004  ;;  %v5017_v23 = vpop.xlane.xlu0 %5016 }
 0x83b   : > { %v5035_v17 = vadd.f32 %v5542_v12, %v5005_v54  ;;  %v5039_v11 = vadd.f32 %v5542_v12, %v5017_v23  ;;  %v5011_v30 = vpop.xlane.xlu1 %5010  ;;  %v5610_v54 = vld [vmem:[%s5893_s24 + $0x38] sm:$0xff] }
 0x83c   : > { %v5037_v19 = vadd.f32 %v5542_v12, %v5011_v30 }
 0x83d   : > { %5090 = vperm.xlu1 %5535, %v5034_v57   ;;  %5095 = vperm.xlu2 %5534, %v5035_v17  }
 0x83e   : > { %5115 = vperm.xlu0 %5533, %v5039_v11   ;;  %v5611_v11 = vld [vmem:[%s5893_s24 + $0x8] sm:$0xff] }
 0x842   : > { %v5014_v59 = vpop.xlane.xlu2 %5013 }
 0x843   : > { %v5038_v24 = vadd.f32 %v5542_v12, %v5014_v59  ;;  %v5020_v52 = vpop.xlane.xlu1 %5019 }
 0x844   : > { %v5040_v58 = vadd.f32 %v5542_v12, %v5020_v52 }
 0x845   : > { %5105 = vperm.xlu1 %5535, %v5037_v19   ;;  %5110 = vperm.xlu2 %5534, %v5038_v24  }
 0x84a   : > { %v5046_v40 = vpop.permute.xlu2 %5045 }
 0x84b   : > { %v5127_v20 = vmul.f32 %v9914_v21, %v5046_v40 }
 0x84d   : > { %v5143_v51 = vmul.f32 0.5, %v5127_v20  ;;  %5120 = vperm.xlu1 %5535, %v5040_v58  }
 0x84f   : > { %5545 = vtanh.f32 %v5143_v51  ;;  %v5612_v51 = vld [vmem:[%s5893_s24 + $0x50] sm:$0xff] }
 0x855   : > { %v5546_v22 = vpop.eup %5545 }
 0x856   : > { %v5175_v25 = vmul.f32 0.5, %v5546_v22 }
 0x858   : > { %v5191_v34 = vadd.f32 1.5, %v5175_v25 }
 0x85a   : > { %v5207_v63 = vmul.f32 %v5606_v16, %v5191_v34 }
 0x85c   : > { %5223 = vst.msk [vmem:[%s9920_s27] sm:$0xff] %vm551_vm1, %v5207_v63 }
 0x875   : > { %v5056_v33 = vpop.permute.xlu1 %5055 }
 0x876   : > { %v5129_v27 = vmul.f32 %v9914_v21, %v5056_v33 }
 0x878   : > { %v5145_v45 = vmul.f32 0.5, %v5129_v27 }
 0x87a   : > { %5547 = vtanh.f32 %v5145_v45 }
 0x87f   : > { %v5061_v38 = vpop.permute.xlu2 %5060 }
 0x880   : > { %v5130_v14 = vmul.f32 %v9914_v21, %v5061_v38  ;;  %v5548_v56 = vpop.eup %5547 }
 0x881   : > { %v5177_v10 = vmul.f32 0.5, %v5548_v56 }
 0x882   : > { %v5146_v9 = vmul.f32 0.5, %v5130_v14 }
 0x883   : > { %v5193_v28 = vadd.f32 1.5, %v5177_v10 }
 0x884   : > { %5549 = vtanh.f32 %v5146_v9 }
 0x885   : > { %v5209_v5 = vmul.f32 %v5607_v31, %v5193_v28  ;;  %v5613_v31 = vld [vmem:[%s5893_s24 + $0x20] sm:$0xff] }
 0x887   : > { %v5071_v44 = vpop.permute.xlu2 %5070  ;;  %5225 = vst.msk [vmem:[%s9920_s27 + $0x10] sm:$0xff] %vm551_vm1, %v5209_v5 }
 0x888   : > { %v5132_v43 = vmul.f32 %v9914_v21, %v5071_v44 }
 0x88a   : > { %v5550_v8 = vpop.eup %5549  ;;  %v5148_v29 = vmul.f32 0.5, %v5132_v43 }
 0x88b   : > { %v5178_v0 = vmul.f32 0.5, %v5550_v8  ;;  %v5614_v8 = vld [vmem:[%s5893_s24 + $0x68] sm:$0xff] }
 0x88c   : > { %5551 = vtanh.f32 %v5148_v29 }
 0x88d   : > { %v5194_v39 = vadd.f32 1.5, %v5178_v0 }
 0x88f   : > { %v5210_v49 = vmul.f32 %v5608_v26, %v5194_v39  ;;  %v5081_v12 = vpop.permute.xlu2 %5080  ;;  %v5051_v7 = vpop.permute.xlu0 %5050  ;;  %v5615_v26 = vld [vmem:[%s5893_s24 + $0x40] sm:$0xff] }
 0x890   : > { %v5134_v32 = vmul.f32 %v9914_v21, %v5081_v12  ;;  %v5128_v48 = vmul.f32 %v9914_v21, %v5051_v7 }
 0x891   : > { %5226 = vst.msk [vmem:[%s9920_s27 + $0x18] sm:$0xff] %vm551_vm1, %v5210_v49 }
 0x892   : > { %v5552_v60 = vpop.eup %5551  ;;  %v5150_v36 = vmul.f32 0.5, %v5134_v32  ;;  %v5144_v2 = vmul.f32 0.5, %v5128_v48 }
 0x893   : > { %v5180_v13 = vmul.f32 0.5, %v5552_v60 }
 0x894   : > { %5553 = vtanh.f32 %v5150_v36 }
 0x895   : > { %v5196_v50 = vadd.f32 1.5, %v5180_v13  ;;  %5555 = vtanh.f32 %v5144_v2 }
 0x897   : > { %v5212_v53 = vmul.f32 %v5609_v15, %v5196_v50  ;;  %v5096_v4 = vpop.permute.xlu2 %5095  ;;  %v5616_v50 = vld [vmem:[%s5893_s24 + $0x30] sm:$0xff] }
 0x898   : > { %v5137_v37 = vmul.f32 %v9935_v35, %v5096_v4  ;;  %v5617_v4 = vld [vmem:[%s5893_s24 + $0x58] sm:$0xff] }
 0x899   : > { %5228 = vst.msk [vmem:[%s9920_s27 + $0x28] sm:$0xff] %vm551_vm1, %v5212_v53 }
 0x89a   : > { %v5554_v61 = vpop.eup %5553  ;;  %v5153_v3 = vmul.f32 0.5, %v5137_v37 }
 0x89b   : > { %v5556_v1 = vpop.eup %5555  ;;  %v5182_v6 = vmul.f32 0.5, %v5554_v61 }
 0x89c   : > { %v5176_v62 = vmul.f32 0.5, %v5556_v1  ;;  %5557 = vtanh.f32 %v5153_v3 }
 0x89d   : > { %v5198_v55 = vadd.f32 1.5, %v5182_v6 }
 0x89e   : > { %v5192_v47 = vadd.f32 1.5, %v5176_v62 }
 0x89f   : > { %v5214_v23 = vmul.f32 %v5610_v54, %v5198_v55  ;;  %v5066_v57 = vpop.permute.xlu1 %5065  ;;  %v5111_v17 = vpop.permute.xlu2 %5110 }
 0x8a0   : > { %v5208_v30 = vmul.f32 %v5611_v11, %v5192_v47  ;;  %v5131_v42 = vmul.f32 %v9914_v21, %v5066_v57  ;;  %v5140_v59 = vmul.f32 %v9935_v35, %v5111_v17  ;;  %v5086_v19 = vpop.permute.xlu0 %5085  ;;  %v5619_v11 = vld [vmem:[%s5893_s24 + $0x70] sm:$0xff] }
 0x8a1   : > { %5230 = vst.msk [vmem:[%s9920_s27 + $0x38] sm:$0xff] %vm551_vm1, %v5214_v23  ;;  %v5135_v24 = vmul.f32 %v9935_v35, %v5086_v19  ;;  %v5618_v23 = vld [vmem:[%s5893_s24 + $0x48] sm:$0xff] }
 0x8a2   : > { %v5558_v18 = vpop.eup %5557  ;;  %5224 = vst.msk [vmem:[%s9920_s27 + $0x8] sm:$0xff] %vm551_vm1, %v5208_v30  ;;  %v5147_v46 = vmul.f32 0.5, %v5131_v42  ;;  %v5156_v52 = vmul.f32 0.5, %v5140_v59 }
 0x8a3   : > { %v5185_v40 = vmul.f32 0.5, %v5558_v18  ;;  %v5151_v58 = vmul.f32 0.5, %v5135_v24 }
 0x8a4   : > { %5559 = vtanh.f32 %v5147_v46  ;;  %v5620_v46 = vld [vmem:[%s5893_s24 + $0x60] sm:$0xff] }
 0x8a5   : > { %v5201_v20 = vadd.f32 1.5, %v5185_v40  ;;  %5561 = vtanh.f32 %v5156_v52 }
 0x8a6   : > { %5563 = vtanh.f32 %v5151_v58 }
 0x8a7   : > { %v5217_v22 = vmul.f32 %v5612_v51, %v5201_v20  ;;  %v5076_v25 = vpop.permute.xlu1 %5075  ;;  %v5621_v20 = vld [vmem:[%s5893_s24 + $0x78] sm:$0xff] }
 0x8a8   : > { %v5133_v34 = vmul.f32 %v9914_v21, %v5076_v25  ;;  %v5101_v16 = vpop.permute.xlu0 %5100 }
 0x8a9   : > { %5233 = vst.msk [vmem:[%s9920_s27 + $0x50] sm:$0xff] %vm551_vm1, %v5217_v22  ;;  %v5138_v63 = vmul.f32 %v9935_v35, %v5101_v16 }
 0x8aa   : > { %v5560_v33 = vpop.eup %5559  ;;  %v5149_v27 = vmul.f32 0.5, %v5133_v34 }
 0x8ab   : > { %v5562_v45 = vpop.eup %5561  ;;  %v5179_v38 = vmul.f32 0.5, %v5560_v33  ;;  %v5154_v14 = vmul.f32 0.5, %v5138_v63 }
 0x8ac   : > { %v5564_v56 = vpop.eup %5563  ;;  %v5188_v9 = vmul.f32 0.5, %v5562_v45  ;;  %5565 = vtanh.f32 %v5149_v27 }
 0x8ad   : > { %v5195_v10 = vadd.f32 1.5, %v5179_v38  ;;  %v5183_v28 = vmul.f32 0.5, %v5564_v56  ;;  %5567 = vtanh.f32 %v5154_v14 }
 0x8ae   : > { %v5204_v21 = vadd.f32 1.5, %v5188_v9 }
 0x8af   : > { %v5211_v5 = vmul.f32 %v5613_v31, %v5195_v10  ;;  %v5199_v44 = vadd.f32 1.5, %v5183_v28  ;;  %v5091_v43 = vpop.permute.xlu1 %5090 }
 0x8b0   : > { %v5220_v29 = vmul.f32 %v5614_v8, %v5204_v21  ;;  %v5136_v0 = vmul.f32 %v9935_v35, %v5091_v43  ;;  %v5116_v39 = vpop.permute.xlu0 %5115 }
 0x8b1   : > { %5227 = vst.msk [vmem:[%s9920_s27 + $0x20] sm:$0xff] %vm551_vm1, %v5211_v5  ;;  %v5215_v49 = vmul.f32 %v5615_v26, %v5199_v44  ;;  %v5141_v12 = vmul.f32 %v9935_v35, %v5116_v39 }
 0x8b2   : > { %v5566_v7 = vpop.eup %5565  ;;  %5236 = vst.msk [vmem:[%s9920_s27 + $0x68] sm:$0xff] %vm551_vm1, %v5220_v29  ;;  %v5152_v32 = vmul.f32 0.5, %v5136_v0 }
 0x8b3   : > { %v5568_v48 = vpop.eup %5567  ;;  %5231 = vst.msk [vmem:[%s9920_s27 + $0x40] sm:$0xff] %vm551_vm1, %v5215_v49  ;;  %v5181_v60 = vmul.f32 0.5, %v5566_v7  ;;  %v5157_v41 = vmul.f32 0.5, %v5141_v12 }
 0x8b4   : > { %v5186_v36 = vmul.f32 0.5, %v5568_v48  ;;  %5569 = vtanh.f32 %v5152_v32 }
 0x8b5   : > { %v5197_v2 = vadd.f32 1.5, %v5181_v60  ;;  %5571 = vtanh.f32 %v5157_v41 }
 0x8b6   : > { %v5202_v13 = vadd.f32 1.5, %v5186_v36 }
 0x8b7   : > { %v5213_v15 = vmul.f32 %v5616_v50, %v5197_v2  ;;  %v5106_v53 = vpop.permute.xlu1 %5105 }
 0x8b8   : > { %v5218_v37 = vmul.f32 %v5617_v4, %v5202_v13  ;;  %v5139_v61 = vmul.f32 %v9935_v35, %v5106_v53 }
 0x8b9   : > { %5229 = vst.msk [vmem:[%s9920_s27 + $0x30] sm:$0xff] %vm551_vm1, %v5213_v15 }
 0x8ba   : > { %v5570_v3 = vpop.eup %5569  ;;  %5234 = vst.msk [vmem:[%s9920_s27 + $0x58] sm:$0xff] %vm551_vm1, %v5218_v37  ;;  %v5155_v1 = vmul.f32 0.5, %v5139_v61 }
 0x8bb   : > { %v5572_v6 = vpop.eup %5571  ;;  %v5184_v62 = vmul.f32 0.5, %v5570_v3 }
 0x8bc   : > { %v5189_v55 = vmul.f32 0.5, %v5572_v6  ;;  %5573 = vtanh.f32 %v5155_v1 }
 0x8bd   : > { %v5200_v47 = vadd.f32 1.5, %v5184_v62 }
 0x8be   : > { %v5205_v54 = vadd.f32 1.5, %v5189_v55 }
 0x8bf   : > { %v5216_v57 = vmul.f32 %v5618_v23, %v5200_v47  ;;  %v5121_v17 = vpop.permute.xlu1 %5120 }
 0x8c0   : > { %v5221_v30 = vmul.f32 %v5619_v11, %v5205_v54  ;;  %v5142_v42 = vmul.f32 %v9935_v35, %v5121_v17 }
 0x8c1   : > { %5232 = vst.msk [vmem:[%s9920_s27 + $0x48] sm:$0xff] %vm551_vm1, %v5216_v57 }
 0x8c2   : > { %v5574_v59 = vpop.eup %5573  ;;  %5237 = vst.msk [vmem:[%s9920_s27 + $0x70] sm:$0xff] %vm551_vm1, %v5221_v30  ;;  %v5158_v19 = vmul.f32 0.5, %v5142_v42 }
 0x8c3   : > { %v5187_v24 = vmul.f32 0.5, %v5574_v59 }
 0x8c4   : > { %5575 = vtanh.f32 %v5158_v19 }
 0x8c5   : > { %v5203_v18 = vadd.f32 1.5, %v5187_v24 }
 0x8c7   : > { %v5219_v52 = vmul.f32 %v5620_v46, %v5203_v18 }
 0x8c9   : > { %5235 = vst.msk [vmem:[%s9920_s27 + $0x60] sm:$0xff] %vm551_vm1, %v5219_v52 }
 0x8ca   : > { %v5576_v35 = vpop.eup %5575 }
 0x8cb   : > { %v5190_v40 = vmul.f32 0.5, %v5576_v35 }
 0x8cd   : > { %v5206_v58 = vadd.f32 1.5, %v5190_v40 }
 0x8cf   : > { %v5222_v51 = vmul.f32 %v5621_v20, %v5206_v58 }
 0x8d1   : > { %5238 = vst.msk [vmem:[%s9920_s27 + $0x78] sm:$0xff] %vm551_vm1, %v5222_v51 }
 0x8d2   : > { %5679 = shalt.err (!%p5676_p4)
}
 0x8d3   : > { %s5726_s14 = smov 128   ;;  %s5727_s24 = smov 8  }
 0x8d4   : > { %5385 = dma.vmem_to_hbm [thread:$0]  (%p5851_p11), %s5254_s25, 2048, %s5256_s19, %s5240_s12, %s5726_s14, %s5726_s14, %s5727_s24  }
 0x8d5 PF: > { %s11012_s27 = sld [smem:[#allocation10_spill]]  ;;  %p11014_p7 = scmp.ge.s32.totalorder %s5718_s30, 2 }
 0x8d7   : > { %p5392_p5 = pnand %p11014_p7, %p5855_p12 }
 0x8d9   : > { %p5393_p8 = pneg %p5392_p5 }
 0x8db   : > { %s5270_s18 = sand.u32 1, %s11012_s27  }
 0x8dc   : > { %s5271_s23 = scalar_lea.sflag [#allocation6], %s5270_s18 }
 0x8dd   : > { %5701 = dma.done.wait (%p5393_p8), %s5271_s23, 2048  }
 0x8de   : > { %5703 = vsyncadd (%p5393_p8), %s5271_s23, 4294965248  ;;  %s11015_s30 = sld [smem:[#allocation12_spill]]  ;;  %s11018_s27 = smov %s5710_s28 }
 0x8df   : > { %s11016_s26 = sld [smem:[#allocation11_spill]] }
 0x8e0   : > { %s11017_s29 = sld [smem:[#allocation13_spill]] }
 0x8e4   : > { %p28_p10 = scmp.ge.s32.totalorder %s11015_s30, 4  }
 0x8e5   : > { %s11019_s28 = smov %s11016_s26 }
 0x8e6   :  { %30 = sbr.rel (!%p28_p10) target bundleno = 8 (0x8), region = 120 }
 0x8eb   :  { %5277 = vsyncpa [#allocation5], 1 }
 0x8ec   :  { %5279 = vsyncpa [#allocation5 + $0x1], 1 }
 0x8ed   :  { %5280 = vsyncpa [#allocation6], 1 }
 0x8ee   :  { %5282 = vsyncpa [#allocation6 + $0x1], 1 }

</bundles_post_ra>
